<compile_context>
chip_gen: v6e
topology: v6e:2x2x1
jax: 0.10.0
libtpu: 0.0.40
codegen_flags: <defaults>
</compile_context>

<pallas_src>
import numpy as np
import jax
import jax.numpy as jnp
from jax.experimental import pallas as pl
from jax.experimental.pallas import tpu as pltpu

# ----------------- configuration (small, consistent with the module) ---------
INPUT_CH = 3
MULTIRES_X = 6                      # surface positional embedding
MULTIRES_VIEW = 4                   # view-dir positional embedding
W_S = 64                            # surface hidden width
D_S = 4                             # surface depth
SKIPS_S = (2,)                      # skip layer(s)
W_R = 64                            # radiance hidden width
D_R = 2                             # radiance depth (hidden layers)
W_GEO_FEAT = W_S                    # W_geo_feat = -1 -> use surface width
SOFTPLUS_BETA = 100.0
VARIANCE_INIT = 0.05
SPEED_FACTOR = 1.0

E_X = INPUT_CH + INPUT_CH * 2 * MULTIRES_X        # 39
E_V = INPUT_CH + INPUT_CH * 2 * MULTIRES_VIEW     # 27
RAD_SMALL = INPUT_CH + E_V + INPUT_CH             # 33 = [x | emb(view) | nablas]
RAD_IN = RAD_SMALL + W_GEO_FEAT                   # 97
INV_SQRT2 = float(1.0 / np.sqrt(2.0))
OUT_ROWS = 8                                      # [sdf | rad(3) | nab(3) | pad]


def _rup(n, m):
    return ((n + m - 1) // m) * m


# Packed bf16 weight slab, 64 lanes wide, 16-aligned row blocks.
# Forward blocks store W^T ([out, in], in zero-padded to 64 columns);
# backward blocks store W ([in, out]) for the reverse-mode nabla pass.
R_F0 = 0                      # W0^T           (cols 0:39 used)
R_F1 = R_F0 + W_S             # W1^T
R_F2A = R_F1 + W_S            # (W2[:64]/sqrt2)^T        skip: hidden part
R_F2B = R_F2A + W_S           # (W2[64:]/sqrt2)^T        skip: e_x part (cols 0:39)
R_F3 = R_F2B + W_S            # W3^T
R_FR0A = R_F3 + W_S           # Wr0[x|ev|nab]^T          (cols 0:33 used)
R_FR0B = R_FR0A + W_S         # Wr0[geo]^T
R_FR1 = R_FR0B + W_S          # Wr1^T
R_FRO = R_FR1 + W_S           # Wro^T  (16-row block, rows 0:3 used)
R_B3 = R_FRO + 16             # W3
R_B2A = R_B3 + W_S            # W2[:64]/sqrt2
R_B1 = R_B2A + W_S            # W1
R_B2B = R_B1 + W_S            # W2[64:]/sqrt2 (48-row block, rows 0:39 used)
R_B0 = R_B2B + 48             # W0            (48-row block, rows 0:39 used)
R_TOT = R_B0 + 48             # = 816 rows total


# ----------------------------- Pallas kernel ---------------------------------
def neus_kernel(xin_ref, w_ref, b_ref, out_ref):
    xv = xin_ref[...]                       # [6, T] f32 : rows 0:3 = x, 3:6 = view
    x, vd = xv[0:3], xv[3:6]                # [3, T]
    T = xv.shape[1]
    nx = 3 * MULTIRES_X                     # 18

    # --- NeRF positional embeddings: ONE sin + ONE cos over both inputs -----
    arg = jnp.concatenate(
        [x * float(2.0 ** i) for i in range(MULTIRES_X)]
        + [vd * float(2.0 ** i) for i in range(MULTIRES_VIEW)], axis=0)   # [30,T]
    s, c = jnp.sin(arg), jnp.cos(arg)
    sx, cx = s[0:nx], c[0:nx]               # [18, T] surface sin / cos
    sv, cv = s[nx:], c[nx:]                 # [12, T] view sin / cos

    # packed surface embedding, zero-padded to 64 feature rows (K = 64 matmuls)
    e_x = jnp.concatenate(
        [x, sx, cx, jnp.zeros((W_S - E_X, T), jnp.float32)], axis=0)      # [64,T]
    ex_bf = e_x.astype(jnp.bfloat16)        # cast once; reused by layer 0 + skip

    def mm(row, nrows, a_bf):               # bf16 MXU matmul, f32 accumulation
        return jnp.dot(w_ref[row:row + nrows, :], a_bf,
                       preferred_element_type=jnp.float32)

    def sp(z):                              # softplus(beta=100): value + deriv
        bz = SOFTPLUS_BETA * z
        t = jnp.exp(jnp.minimum(bz, 20.0))  # one shared exp
        big = bz > 20.0
        h = jnp.where(big, z, jnp.log(1.0 + t) * (1.0 / SOFTPLUS_BETA))
        d = jnp.where(big, 1.0, t / (1.0 + t))
        return h, d

    # ---------------- ImplicitSurface forward (feature-major [64, T]) -------
    h0, d0 = sp(mm(R_F0, W_S, ex_bf) + b_ref[:, 0:1])
    h1, d1 = sp(mm(R_F1, W_S, h0.astype(jnp.bfloat16)) + b_ref[:, 1:2])
    # skip layer: concat([h1, e_x]) / sqrt2  ==  W2a^T h1 + W2b^T e_x (folded)
    h2, d2 = sp(mm(R_F2A, W_S, h1.astype(jnp.bfloat16))
                + mm(R_F2B, W_S, ex_bf) + b_ref[:, 2:3])
    h3, d3 = sp(mm(R_F3, W_S, h2.astype(jnp.bfloat16)) + b_ref[:, 3:4])   # geo feat

    # sdf head off the MXU: VPU multiply + sublane reduce (w_sdf = bias col 4)
    wsdf = b_ref[:, 4:5]                                                   # [64,1]
    sdf = jnp.sum(h3 * wsdf, axis=0, keepdims=True) + b_ref[3:4, 7:8]      # [1,T]

    # ---------------- reverse-mode nablas: d sdf / d x ----------------------
    gz3 = wsdf * d3                                                        # [64,T]
    gz2 = mm(R_B3, W_S, gz3.astype(jnp.bfloat16)) * d2
    gz2_bf = gz2.astype(jnp.bfloat16)
    gz1 = mm(R_B2A, W_S, gz2_bf) * d1
    gz0 = mm(R_B1, W_S, gz1.astype(jnp.bfloat16)) * d0
    # gradient wrt the packed embedding (layer-0 path + skip path)
    g_ex = mm(R_B0, 48, gz0.astype(jnp.bfloat16)) + mm(R_B2B, 48, gz2_bf)  # [48,T]

    # contract with the analytic embedding Jacobian: d sin(fx)/dx = f cos(fx),
    # d cos(fx)/dx = -f sin(fx); identity rows pass straight through.
    gsc = g_ex[3:3 + nx] * cx - g_ex[3 + nx:3 + 2 * nx] * sx               # [18,T]
    nab = g_ex[0:3]
    for i in range(MULTIRES_X):
        nab = nab + float(2.0 ** i) * gsc[3 * i:3 * i + 3]                 # [3,T]

    # ---------------- RadianceNet: [x, emb(view), nablas, geo] --------------
    rin = jnp.concatenate(
        [x, vd, sv, cv, nab,
         jnp.zeros((W_S - RAD_SMALL, T), jnp.float32)], axis=0)            # [64,T]
    r0 = jnp.maximum(mm(R_FR0A, W_S, rin.astype(jnp.bfloat16))
                     + mm(R_FR0B, W_S, h3.astype(jnp.bfloat16))
                     + b_ref[:, 5:6], 0.0)
    r1 = jnp.maximum(mm(R_FR1, W_S, r0.astype(jnp.bfloat16))
                     + b_ref[:, 6:7], 0.0)
    zo = mm(R_FRO, 16, r1.astype(jnp.bfloat16))[0:3] + b_ref[0:3, 7:8]     # [3,T]
    rad = 1.0 / (1.0 + jnp.exp(jnp.minimum(-zo, 60.0)))                    # sigmoid

    # lane-dense fused output: rows = [sdf, rad0..2, nabla0..2, pad]
    out_ref[...] = jnp.concatenate(
        [sdf, rad, nab, jnp.zeros((1, T), jnp.float32)], axis=0)


# ----------------------------- wrapper ----------------------------------------
def neus_forward(x, view_dirs, w_slab, b_slab, tile=512):
    N = x.shape[0]
    tile = max(128, (int(tile) // 128) * 128)
    tile = min(tile, _rup(N, 128))
    n_pad = _rup(N, tile)

    # single pre-transposed (feature-major) input stream: rows 0:3 x, 3:6 view
    xin = jnp.concatenate([x, view_dirs], axis=1).T                        # [6, N]
    if n_pad != N:
        xin = jnp.pad(xin, ((0, 0), (0, n_pad - N)))
    grid = n_pad // tile

    out = pl.pallas_call(
        neus_kernel,
        grid=(grid,),
        in_specs=[pl.BlockSpec((6, tile), lambda i: (0, i)),
                  pl.BlockSpec((R_TOT, W_S), lambda i: (0, 0)),   # VMEM-resident slab
                  pl.BlockSpec((W_S, 8), lambda i: (0, 0))],      # biases + head vecs
        out_specs=pl.BlockSpec((OUT_ROWS, tile), lambda i: (0, i)),
        out_shape=jax.ShapeDtypeStruct((OUT_ROWS, n_pad), jnp.float32),
        compiler_params=pltpu.CompilerParams(
            dimension_semantics=("parallel",)),
    )(xin, w_slab, b_slab)
    # (sdf squeezed, radiances) like the module; padded tail rows sliced off
    return out[0, :N], out[1:4, :N].T


# ----------------------------- parameter packing ------------------------------
def _embed_perm(L):
    # packed layout [v, sin(f0..fL-1), cos(f0..fL-1)] -> original interleaved
    # layout [v, sin(f0), cos(f0), sin(f1), cos(f1), ...]
    perm = list(range(3))
    perm += [3 + 6 * i + k for i in range(L) for k in range(3)]        # sin block
    perm += [3 + 6 * i + 3 + k for i in range(L) for k in range(3)]    # cos block
    return np.asarray(perm, dtype=np.int32)


def build_slabs(params):
    (ws0, bs0, ws1, bs1, ws2, bs2, ws3, bs3, wsdf, bsdf,
     wr0, br0, wr1, br1, wro, bro) = [np.asarray(p, np.float32) for p in params]
    px = _embed_perm(MULTIRES_X)         # 39
    pv = _embed_perm(MULTIRES_VIEW)      # 27

    w0p = ws0[px]                                    # [39,64] packed e_x row order
    w2a = ws2[:W_S] * INV_SQRT2                      # [64,64] skip hidden part
    w2b = ws2[W_S:][px] * INV_SQRT2                  # [39,64] skip e_x part
    r_small = np.concatenate([wr0[0:3],              # x rows
                              wr0[3:3 + E_V][pv],    # emb(view) rows, packed order
                              wr0[3 + E_V:3 + E_V + 3]], axis=0)   # nabla rows
    r_geo = wr0[3 + E_V + 3:]                        # [64,64]

    W = np.zeros((R_TOT, W_S), np.float32)
    W[R_F0:R_F0 + W_S, :E_X] = w0p.T
    W[R_F1:R_F1 + W_S, :] = ws1.T
    W[R_F2A:R_F2A + W_S, :] = w2a.T
    W[R_F2B:R_F2B + W_S, :E_X] = w2b.T
    W[R_F3:R_F3 + W_S, :] = ws3.T
    W[R_FR0A:R_FR0A + W_S, :RAD_SMALL] = r_small.T
    W[R_FR0B:R_FR0B + W_S, :] = r_geo.T
    W[R_FR1:R_FR1 + W_S, :] = wr1.T
    W[R_FRO:R_FRO + 3, :] = wro.T
    W[R_B3:R_B3 + W_S, :] = ws3
    W[R_B2A:R_B2A + W_S, :] = w2a
    W[R_B1:R_B1 + W_S, :] = ws1
    W[R_B2B:R_B2B + E_X, :] = w2b
    W[R_B0:R_B0 + E_X, :] = w0p

    B = np.zeros((W_S, 8), np.float32)
    B[:, 0], B[:, 1], B[:, 2], B[:, 3] = bs0[0], bs1[0], bs2[0], bs3[0]
    B[:, 4] = wsdf[:, 0]                 # sdf head weight vector (VPU head)
    B[:, 5], B[:, 6] = br0[0], br1[0]
    B[0:3, 7] = bro[0]                   # radiance output bias
    B[3, 7] = bsdf[0, 0]                 # sdf head bias
    return jnp.asarray(W, jnp.bfloat16), jnp.asarray(B, jnp.float32)


def bf16_weights(params):
    # the kernel runs the MLP with bf16 weights; the reference uses the same
    # effective (bf16-rounded) weights in f32 math.
    out = []
    for i, p in enumerate(params):
        out.append(p.astype(jnp.bfloat16).astype(jnp.float32) if i % 2 == 0 else p)
    return out


# ----------------------------- deterministic params --------------------------
def init_params(key):
    dims = []
    in_d = E_X
    for i in range(D_S):
        if i in SKIPS_S:
            in_d = W_S + E_X
        dims.append((in_d, W_S))
        in_d = W_S
    dims.append((W_S, 1))                                   # sdf head
    dims.append((RAD_IN, W_R))                              # radiance layer 0
    dims += [(W_R, W_R)] * (D_R - 1)                        # radiance hidden
    dims.append((W_R, 3))                                   # radiance output
    params = []
    for (fi, fo) in dims:
        key, k1, k2 = jax.random.split(key, 3)
        W = jax.random.normal(k1, (fi, fo), jnp.float32) * (1.0 / np.sqrt(fi))
        b = 0.01 * jax.random.normal(k2, (1, fo), jnp.float32)
        params += [W, b]
    return params


# ----------------------------- pure-JAX reference ----------------------------
_HI = jax.lax.Precision.HIGHEST


def _mm(a, b):
    return jnp.dot(a, b, precision=_HI)


def _embed_full(v, L):
    outs = [v]
    for i in range(L):
        f = float(2.0 ** i)
        outs += [jnp.sin(f * v), jnp.cos(f * v)]
    return jnp.concatenate(outs, axis=-1)


def _softplus_b(z):
    bz = SOFTPLUS_BETA * z
    safe = jnp.where(bz > 20.0, 0.0, bz)
    return jnp.where(bz > 20.0, z, jnp.log(1.0 + jnp.exp(safe)) / SOFTPLUS_BETA)


def ref_surface(x, params):
    e = _embed_full(x, MULTIRES_X)
    h = e
    for i in range(D_S):
        if i in SKIPS_S:
            h = jnp.concatenate([h, e], axis=-1) * INV_SQRT2
        W, b = params[2 * i], params[2 * i + 1]
        h = _softplus_b(_mm(h, W) + b[0])
    sdf = _mm(h, params[2 * D_S]) + params[2 * D_S + 1][0]
    return sdf, h


def ref_forward(x, vd, params):
    sdf, geo = ref_surface(x, params)
    grad_fn = jax.grad(lambda xi: ref_surface(xi[None, :], params)[0][0, 0])
    nablas = jax.vmap(grad_fn)(x)                 # autograd reference for nablas
    ev = _embed_full(vd, MULTIRES_VIEW)
    r = jnp.concatenate([x, ev, nablas, geo], axis=-1)
    off = 2 * D_S + 2
    for i in range(D_R):
        W, b = params[off + 2 * i], params[off + 2 * i + 1]
        r = jnp.maximum(_mm(r, W) + b[0], 0.0)
    W, b = params[off + 2 * D_R], params[off + 2 * D_R + 1]
    rad = 1.0 / (1.0 + jnp.exp(-_mm(r, W) - b[0]))
    return sdf[:, 0], rad


# ----------------------------- main -------------------------------------------
if __name__ == "__main__":
    key = jax.random.PRNGKey(0)
    kx, kv, kp = jax.random.split(key, 3)
    N = 2000          # not a multiple of the tile: exercises padding; grid = 4
    x = jax.random.uniform(kx, (N, 3), jnp.float32, minval=-1.0, maxval=1.0)
    vd = jax.random.normal(kv, (N, 3), jnp.float32)
    vd = vd / jnp.linalg.norm(vd, axis=-1, keepdims=True)
    params = init_params(kp)
    w_slab, b_slab = build_slabs(params)

    # scalar s (forward_s): trivial glue, stays in plain JAX
    ln_s = jnp.asarray([-np.log(VARIANCE_INIT) / SPEED_FACTOR], jnp.float32)
    _ = jnp.exp(ln_s * SPEED_FACTOR)

    sdf, rad = neus_forward(x, vd, w_slab, b_slab, tile=512)
    jax.block_until_ready((sdf, rad))

    sdf_ref, rad_ref = ref_forward(x, vd, bf16_weights(params))
    np.testing.assert_allclose(np.asarray(sdf), np.asarray(sdf_ref),
                               rtol=2e-2, atol=2e-2)
    np.testing.assert_allclose(np.asarray(rad), np.asarray(rad_ref),
                               rtol=2e-2, atol=2e-2)
    print("KERNEL_OK")
</pallas_src>

<mosaic_0001>
module attributes {stable_mosaic.version = 11 : i64} {
  func.func @neus_kernel(%arg0: i32, %arg1: memref<6x512xf32, #tpu.memory_space<vmem>>, %arg2: memref<816x64xbf16, #tpu.memory_space<vmem>>, %arg3: memref<64x8xf32, #tpu.memory_space<vmem>>, %arg4: memref<8x512xf32, #tpu.memory_space<vmem>>) attributes {dimension_semantics = [#tpu.dimension_semantics<parallel>], iteration_bounds = array<i64: 4>, scalar_prefetch = 0 : i64, scratch_operands = 0 : i64, tpu.core_type = #tpu.core_type<tc>, window_params = [{transform_indices = @transform_0, window_bounds = array<i64: 6, 512>}, {pipeline_mode = #tpu.pipeline_mode<synchronous>, transform_indices = @transform_1, window_bounds = array<i64: 816, 64>}, {pipeline_mode = #tpu.pipeline_mode<synchronous>, transform_indices = @transform_2, window_bounds = array<i64: 64, 8>}, {transform_indices = @transform_3, window_bounds = array<i64: 8, 512>}]} {
    %c0 = arith.constant 0 : index
    %c0_0 = arith.constant 0 : index
    %0 = vector.load %arg1[%c0, %c0_0] : memref<6x512xf32, #tpu.memory_space<vmem>>, vector<6x512xf32>
    %1 = vector.extract_strided_slice %0 {offsets = [0, 0], sizes = [3, 512], strides = [1, 1]} : vector<6x512xf32> to vector<3x512xf32>
    %2 = vector.extract_strided_slice %0 {offsets = [3, 0], sizes = [3, 512], strides = [1, 1]} : vector<6x512xf32> to vector<3x512xf32>
    %cst = arith.constant 1.000000e+00 : f32
    %3 = vector.broadcast %cst : f32 to vector<3x512xf32>
    %4 = arith.mulf %1, %3 : vector<3x512xf32>
    %cst_1 = arith.constant 2.000000e+00 : f32
    %5 = vector.broadcast %cst_1 : f32 to vector<3x512xf32>
    %6 = arith.mulf %1, %5 : vector<3x512xf32>
    %cst_2 = arith.constant 4.000000e+00 : f32
    %7 = vector.broadcast %cst_2 : f32 to vector<3x512xf32>
    %8 = arith.mulf %1, %7 : vector<3x512xf32>
    %cst_3 = arith.constant 8.000000e+00 : f32
    %9 = vector.broadcast %cst_3 : f32 to vector<3x512xf32>
    %10 = arith.mulf %1, %9 : vector<3x512xf32>
    %cst_4 = arith.constant 1.600000e+01 : f32
    %11 = vector.broadcast %cst_4 : f32 to vector<3x512xf32>
    %12 = arith.mulf %1, %11 : vector<3x512xf32>
    %cst_5 = arith.constant 3.200000e+01 : f32
    %13 = vector.broadcast %cst_5 : f32 to vector<3x512xf32>
    %14 = arith.mulf %1, %13 : vector<3x512xf32>
    %cst_6 = arith.constant 1.000000e+00 : f32
    %15 = vector.broadcast %cst_6 : f32 to vector<3x512xf32>
    %16 = arith.mulf %2, %15 : vector<3x512xf32>
    %cst_7 = arith.constant 2.000000e+00 : f32
    %17 = vector.broadcast %cst_7 : f32 to vector<3x512xf32>
    %18 = arith.mulf %2, %17 : vector<3x512xf32>
    %cst_8 = arith.constant 4.000000e+00 : f32
    %19 = vector.broadcast %cst_8 : f32 to vector<3x512xf32>
    %20 = arith.mulf %2, %19 : vector<3x512xf32>
    %cst_9 = arith.constant 8.000000e+00 : f32
    %21 = vector.broadcast %cst_9 : f32 to vector<3x512xf32>
    %22 = arith.mulf %2, %21 : vector<3x512xf32>
    %23 = tpu.concatenate %4, %6, %8, %10, %12, %14, %16, %18, %20, %22 in 0 : vector<3x512xf32>, vector<3x512xf32>, vector<3x512xf32>, vector<3x512xf32>, vector<3x512xf32>, vector<3x512xf32>, vector<3x512xf32>, vector<3x512xf32>, vector<3x512xf32>, vector<3x512xf32> -> vector<30x512xf32>
    %24 = math.sin %23 : vector<30x512xf32>
    %25 = math.cos %23 : vector<30x512xf32>
    %26 = vector.extract_strided_slice %24 {offsets = [0, 0], sizes = [18, 512], strides = [1, 1]} : vector<30x512xf32> to vector<18x512xf32>
    %27 = vector.extract_strided_slice %25 {offsets = [0, 0], sizes = [18, 512], strides = [1, 1]} : vector<30x512xf32> to vector<18x512xf32>
    %28 = vector.extract_strided_slice %24 {offsets = [18, 0], sizes = [12, 512], strides = [1, 1]} : vector<30x512xf32> to vector<12x512xf32>
    %29 = vector.extract_strided_slice %25 {offsets = [18, 0], sizes = [12, 512], strides = [1, 1]} : vector<30x512xf32> to vector<12x512xf32>
    %cst_10 = arith.constant 0.000000e+00 : f32
    %30 = vector.broadcast %cst_10 : f32 to vector<25x512xf32>
    %31 = tpu.concatenate %1, %26, %27, %30 in 0 : vector<3x512xf32>, vector<18x512xf32>, vector<18x512xf32>, vector<25x512xf32> -> vector<64x512xf32>
    %32 = arith.truncf %31 : vector<64x512xf32> to vector<64x512xbf16>
    %c0_11 = arith.constant 0 : index
    %c0_12 = arith.constant 0 : index
    %33 = vector.load %arg2[%c0_11, %c0_12] : memref<816x64xbf16, #tpu.memory_space<vmem>>, vector<64x64xbf16>
    %cst_13 = arith.constant dense<0.000000e+00> : vector<64x512xf32>
    %34 = tpu.matmul %33, %32, %cst_13 {dimension_numbers = #tpu.dot_dimension_numbers<[1], [0], [0], [1], [0, 0, 1, 1], [], []>} : vector<64x64xbf16>, vector<64x512xbf16>, vector<64x512xf32> -> vector<64x512xf32>
    %c0_14 = arith.constant 0 : index
    %c0_15 = arith.constant 0 : index
    %35 = vector.load %arg3[%c0_14, %c0_15] : memref<64x8xf32, #tpu.memory_space<vmem>>, vector<64x1xf32>
    %36 = vector.broadcast %35 : vector<64x1xf32> to vector<64x512xf32>
    %37 = arith.addf %34, %36 : vector<64x512xf32>
    %cst_16 = arith.constant 1.000000e+02 : f32
    %38 = vector.broadcast %cst_16 : f32 to vector<64x512xf32>
    %39 = arith.mulf %38, %37 : vector<64x512xf32>
    %cst_17 = arith.constant 2.000000e+01 : f32
    %40 = vector.broadcast %cst_17 : f32 to vector<64x512xf32>
    %41 = arith.minimumf %39, %40 : vector<64x512xf32>
    %42 = math.exp %41 : vector<64x512xf32>
    %cst_18 = arith.constant 2.000000e+01 : f32
    %43 = vector.broadcast %cst_18 : f32 to vector<64x512xf32>
    %44 = arith.cmpf ogt, %39, %43 : vector<64x512xf32>
    %cst_19 = arith.constant 1.000000e+00 : f32
    %45 = vector.broadcast %cst_19 : f32 to vector<64x512xf32>
    %46 = arith.addf %45, %42 : vector<64x512xf32>
    %47 = math.log %46 : vector<64x512xf32>
    %cst_20 = arith.constant 0.00999999977 : f32
    %48 = vector.broadcast %cst_20 : f32 to vector<64x512xf32>
    %49 = arith.mulf %47, %48 : vector<64x512xf32>
    %50 = arith.select %44, %37, %49 : vector<64x512xi1>, vector<64x512xf32>
    %cst_21 = arith.constant 1.000000e+00 : f32
    %51 = vector.broadcast %cst_21 : f32 to vector<64x512xf32>
    %52 = arith.addf %51, %42 : vector<64x512xf32>
    %53 = arith.divf %42, %52 : vector<64x512xf32>
    %cst_22 = arith.constant 1.000000e+00 : f32
    %54 = vector.broadcast %cst_22 : f32 to vector<64x512xf32>
    %55 = arith.select %44, %54, %53 : vector<64x512xi1>, vector<64x512xf32>
    %56 = arith.truncf %50 : vector<64x512xf32> to vector<64x512xbf16>
    %c64 = arith.constant 64 : index
    %c0_23 = arith.constant 0 : index
    %57 = vector.load %arg2[%c64, %c0_23] : memref<816x64xbf16, #tpu.memory_space<vmem>>, vector<64x64xbf16>
    %cst_24 = arith.constant dense<0.000000e+00> : vector<64x512xf32>
    %58 = tpu.matmul %57, %56, %cst_24 {dimension_numbers = #tpu.dot_dimension_numbers<[1], [0], [0], [1], [0, 0, 1, 1], [], []>} : vector<64x64xbf16>, vector<64x512xbf16>, vector<64x512xf32> -> vector<64x512xf32>
    %c0_25 = arith.constant 0 : index
    %c1 = arith.constant 1 : index
    %59 = vector.load %arg3[%c0_25, %c1] : memref<64x8xf32, #tpu.memory_space<vmem>>, vector<64x1xf32>
    %60 = vector.broadcast %59 : vector<64x1xf32> to vector<64x512xf32>
    %61 = arith.addf %58, %60 : vector<64x512xf32>
    %cst_26 = arith.constant 1.000000e+02 : f32
    %62 = vector.broadcast %cst_26 : f32 to vector<64x512xf32>
    %63 = arith.mulf %62, %61 : vector<64x512xf32>
    %cst_27 = arith.constant 2.000000e+01 : f32
    %64 = vector.broadcast %cst_27 : f32 to vector<64x512xf32>
    %65 = arith.minimumf %63, %64 : vector<64x512xf32>
    %66 = math.exp %65 : vector<64x512xf32>
    %cst_28 = arith.constant 2.000000e+01 : f32
    %67 = vector.broadcast %cst_28 : f32 to vector<64x512xf32>
    %68 = arith.cmpf ogt, %63, %67 : vector<64x512xf32>
    %cst_29 = arith.constant 1.000000e+00 : f32
    %69 = vector.broadcast %cst_29 : f32 to vector<64x512xf32>
    %70 = arith.addf %69, %66 : vector<64x512xf32>
    %71 = math.log %70 : vector<64x512xf32>
    %cst_30 = arith.constant 0.00999999977 : f32
    %72 = vector.broadcast %cst_30 : f32 to vector<64x512xf32>
    %73 = arith.mulf %71, %72 : vector<64x512xf32>
    %74 = arith.select %68, %61, %73 : vector<64x512xi1>, vector<64x512xf32>
    %cst_31 = arith.constant 1.000000e+00 : f32
    %75 = vector.broadcast %cst_31 : f32 to vector<64x512xf32>
    %76 = arith.addf %75, %66 : vector<64x512xf32>
    %77 = arith.divf %66, %76 : vector<64x512xf32>
    %cst_32 = arith.constant 1.000000e+00 : f32
    %78 = vector.broadcast %cst_32 : f32 to vector<64x512xf32>
    %79 = arith.select %68, %78, %77 : vector<64x512xi1>, vector<64x512xf32>
    %80 = arith.truncf %74 : vector<64x512xf32> to vector<64x512xbf16>
    %c128 = arith.constant 128 : index
    %c0_33 = arith.constant 0 : index
    %81 = vector.load %arg2[%c128, %c0_33] : memref<816x64xbf16, #tpu.memory_space<vmem>>, vector<64x64xbf16>
    %cst_34 = arith.constant dense<0.000000e+00> : vector<64x512xf32>
    %82 = tpu.matmul %81, %80, %cst_34 {dimension_numbers = #tpu.dot_dimension_numbers<[1], [0], [0], [1], [0, 0, 1, 1], [], []>} : vector<64x64xbf16>, vector<64x512xbf16>, vector<64x512xf32> -> vector<64x512xf32>
    %c192 = arith.constant 192 : index
    %c0_35 = arith.constant 0 : index
    %83 = vector.load %arg2[%c192, %c0_35] : memref<816x64xbf16, #tpu.memory_space<vmem>>, vector<64x64xbf16>
    %cst_36 = arith.constant dense<0.000000e+00> : vector<64x512xf32>
    %84 = tpu.matmul %83, %32, %cst_36 {dimension_numbers = #tpu.dot_dimension_numbers<[1], [0], [0], [1], [0, 0, 1, 1], [], []>} : vector<64x64xbf16>, vector<64x512xbf16>, vector<64x512xf32> -> vector<64x512xf32>
    %85 = arith.addf %82, %84 : vector<64x512xf32>
    %c0_37 = arith.constant 0 : index
    %c2 = arith.constant 2 : index
    %86 = vector.load %arg3[%c0_37, %c2] : memref<64x8xf32, #tpu.memory_space<vmem>>, vector<64x1xf32>
    %87 = vector.broadcast %86 : vector<64x1xf32> to vector<64x512xf32>
    %88 = arith.addf %85, %87 : vector<64x512xf32>
    %cst_38 = arith.constant 1.000000e+02 : f32
    %89 = vector.broadcast %cst_38 : f32 to vector<64x512xf32>
    %90 = arith.mulf %89, %88 : vector<64x512xf32>
    %cst_39 = arith.constant 2.000000e+01 : f32
    %91 = vector.broadcast %cst_39 : f32 to vector<64x512xf32>
    %92 = arith.minimumf %90, %91 : vector<64x512xf32>
    %93 = math.exp %92 : vector<64x512xf32>
    %cst_40 = arith.constant 2.000000e+01 : f32
    %94 = vector.broadcast %cst_40 : f32 to vector<64x512xf32>
    %95 = arith.cmpf ogt, %90, %94 : vector<64x512xf32>
    %cst_41 = arith.constant 1.000000e+00 : f32
    %96 = vector.broadcast %cst_41 : f32 to vector<64x512xf32>
    %97 = arith.addf %96, %93 : vector<64x512xf32>
    %98 = math.log %97 : vector<64x512xf32>
    %cst_42 = arith.constant 0.00999999977 : f32
    %99 = vector.broadcast %cst_42 : f32 to vector<64x512xf32>
    %100 = arith.mulf %98, %99 : vector<64x512xf32>
    %101 = arith.select %95, %88, %100 : vector<64x512xi1>, vector<64x512xf32>
    %cst_43 = arith.constant 1.000000e+00 : f32
    %102 = vector.broadcast %cst_43 : f32 to vector<64x512xf32>
    %103 = arith.addf %102, %93 : vector<64x512xf32>
    %104 = arith.divf %93, %103 : vector<64x512xf32>
    %cst_44 = arith.constant 1.000000e+00 : f32
    %105 = vector.broadcast %cst_44 : f32 to vector<64x512xf32>
    %106 = arith.select %95, %105, %104 : vector<64x512xi1>, vector<64x512xf32>
    %107 = arith.truncf %101 : vector<64x512xf32> to vector<64x512xbf16>
    %c256 = arith.constant 256 : index
    %c0_45 = arith.constant 0 : index
    %108 = vector.load %arg2[%c256, %c0_45] : memref<816x64xbf16, #tpu.memory_space<vmem>>, vector<64x64xbf16>
    %cst_46 = arith.constant dense<0.000000e+00> : vector<64x512xf32>
    %109 = tpu.matmul %108, %107, %cst_46 {dimension_numbers = #tpu.dot_dimension_numbers<[1], [0], [0], [1], [0, 0, 1, 1], [], []>} : vector<64x64xbf16>, vector<64x512xbf16>, vector<64x512xf32> -> vector<64x512xf32>
    %c0_47 = arith.constant 0 : index
    %c3 = arith.constant 3 : index
    %110 = vector.load %arg3[%c0_47, %c3] : memref<64x8xf32, #tpu.memory_space<vmem>>, vector<64x1xf32>
    %111 = vector.broadcast %110 : vector<64x1xf32> to vector<64x512xf32>
    %112 = arith.addf %109, %111 : vector<64x512xf32>
    %cst_48 = arith.constant 1.000000e+02 : f32
    %113 = vector.broadcast %cst_48 : f32 to vector<64x512xf32>
    %114 = arith.mulf %113, %112 : vector<64x512xf32>
    %cst_49 = arith.constant 2.000000e+01 : f32
    %115 = vector.broadcast %cst_49 : f32 to vector<64x512xf32>
    %116 = arith.minimumf %114, %115 : vector<64x512xf32>
    %117 = math.exp %116 : vector<64x512xf32>
    %cst_50 = arith.constant 2.000000e+01 : f32
    %118 = vector.broadcast %cst_50 : f32 to vector<64x512xf32>
    %119 = arith.cmpf ogt, %114, %118 : vector<64x512xf32>
    %cst_51 = arith.constant 1.000000e+00 : f32
    %120 = vector.broadcast %cst_51 : f32 to vector<64x512xf32>
    %121 = arith.addf %120, %117 : vector<64x512xf32>
    %122 = math.log %121 : vector<64x512xf32>
    %cst_52 = arith.constant 0.00999999977 : f32
    %123 = vector.broadcast %cst_52 : f32 to vector<64x512xf32>
    %124 = arith.mulf %122, %123 : vector<64x512xf32>
    %125 = arith.select %119, %112, %124 : vector<64x512xi1>, vector<64x512xf32>
    %cst_53 = arith.constant 1.000000e+00 : f32
    %126 = vector.broadcast %cst_53 : f32 to vector<64x512xf32>
    %127 = arith.addf %126, %117 : vector<64x512xf32>
    %128 = arith.divf %117, %127 : vector<64x512xf32>
    %cst_54 = arith.constant 1.000000e+00 : f32
    %129 = vector.broadcast %cst_54 : f32 to vector<64x512xf32>
    %130 = arith.select %119, %129, %128 : vector<64x512xi1>, vector<64x512xf32>
    %c0_55 = arith.constant 0 : index
    %c4 = arith.constant 4 : index
    %131 = vector.load %arg3[%c0_55, %c4] : memref<64x8xf32, #tpu.memory_space<vmem>>, vector<64x1xf32>
    %132 = vector.broadcast %131 : vector<64x1xf32> to vector<64x512xf32>
    %133 = arith.mulf %125, %132 : vector<64x512xf32>
    %cst_56 = arith.constant dense<0.000000e+00> : vector<512xf32>
    %134 = vector.multi_reduction <add>, %133, %cst_56 [0] : vector<64x512xf32> to vector<512xf32>
    %135 = vector.shape_cast %134 : vector<512xf32> to vector<1x512xf32>
    %c3_57 = arith.constant 3 : index
    %c7 = arith.constant 7 : index
    %136 = vector.load %arg3[%c3_57, %c7] : memref<64x8xf32, #tpu.memory_space<vmem>>, vector<1x1xf32>
    %137 = vector.broadcast %136 : vector<1x1xf32> to vector<1x512xf32>
    %138 = arith.addf %135, %137 : vector<1x512xf32>
    %139 = vector.broadcast %131 : vector<64x1xf32> to vector<64x512xf32>
    %140 = arith.mulf %139, %130 : vector<64x512xf32>
    %141 = arith.truncf %140 : vector<64x512xf32> to vector<64x512xbf16>
    %c528 = arith.constant 528 : index
    %c0_58 = arith.constant 0 : index
    %142 = vector.load %arg2[%c528, %c0_58] : memref<816x64xbf16, #tpu.memory_space<vmem>>, vector<64x64xbf16>
    %cst_59 = arith.constant dense<0.000000e+00> : vector<64x512xf32>
    %143 = tpu.matmul %142, %141, %cst_59 {dimension_numbers = #tpu.dot_dimension_numbers<[1], [0], [0], [1], [0, 0, 1, 1], [], []>} : vector<64x64xbf16>, vector<64x512xbf16>, vector<64x512xf32> -> vector<64x512xf32>
    %144 = arith.mulf %143, %106 : vector<64x512xf32>
    %145 = arith.truncf %144 : vector<64x512xf32> to vector<64x512xbf16>
    %c592 = arith.constant 592 : index
    %c0_60 = arith.constant 0 : index
    %146 = vector.load %arg2[%c592, %c0_60] : memref<816x64xbf16, #tpu.memory_space<vmem>>, vector<64x64xbf16>
    %cst_61 = arith.constant dense<0.000000e+00> : vector<64x512xf32>
    %147 = tpu.matmul %146, %145, %cst_61 {dimension_numbers = #tpu.dot_dimension_numbers<[1], [0], [0], [1], [0, 0, 1, 1], [], []>} : vector<64x64xbf16>, vector<64x512xbf16>, vector<64x512xf32> -> vector<64x512xf32>
    %148 = arith.mulf %147, %79 : vector<64x512xf32>
    %149 = arith.truncf %148 : vector<64x512xf32> to vector<64x512xbf16>
    %c656 = arith.constant 656 : index
    %c0_62 = arith.constant 0 : index
    %150 = vector.load %arg2[%c656, %c0_62] : memref<816x64xbf16, #tpu.memory_space<vmem>>, vector<64x64xbf16>
    %cst_63 = arith.constant dense<0.000000e+00> : vector<64x512xf32>
    %151 = tpu.matmul %150, %149, %cst_63 {dimension_numbers = #tpu.dot_dimension_numbers<[1], [0], [0], [1], [0, 0, 1, 1], [], []>} : vector<64x64xbf16>, vector<64x512xbf16>, vector<64x512xf32> -> vector<64x512xf32>
    %152 = arith.mulf %151, %55 : vector<64x512xf32>
    %153 = arith.truncf %152 : vector<64x512xf32> to vector<64x512xbf16>
    %c768 = arith.constant 768 : index
    %c0_64 = arith.constant 0 : index
    %154 = vector.load %arg2[%c768, %c0_64] : memref<816x64xbf16, #tpu.memory_space<vmem>>, vector<48x64xbf16>
    %cst_65 = arith.constant dense<0.000000e+00> : vector<48x512xf32>
    %155 = tpu.matmul %154, %153, %cst_65 {dimension_numbers = #tpu.dot_dimension_numbers<[1], [0], [0], [1], [0, 0, 1, 1], [], []>} : vector<48x64xbf16>, vector<64x512xbf16>, vector<48x512xf32> -> vector<48x512xf32>
    %c720 = arith.constant 720 : index
    %c0_66 = arith.constant 0 : index
    %156 = vector.load %arg2[%c720, %c0_66] : memref<816x64xbf16, #tpu.memory_space<vmem>>, vector<48x64xbf16>
    %cst_67 = arith.constant dense<0.000000e+00> : vector<48x512xf32>
    %157 = tpu.matmul %156, %145, %cst_67 {dimension_numbers = #tpu.dot_dimension_numbers<[1], [0], [0], [1], [0, 0, 1, 1], [], []>} : vector<48x64xbf16>, vector<64x512xbf16>, vector<48x512xf32> -> vector<48x512xf32>
    %158 = arith.addf %155, %157 : vector<48x512xf32>
    %159 = vector.extract_strided_slice %158 {offsets = [3, 0], sizes = [18, 512], strides = [1, 1]} : vector<48x512xf32> to vector<18x512xf32>
    %160 = arith.mulf %159, %27 : vector<18x512xf32>
    %161 = vector.extract_strided_slice %158 {offsets = [21, 0], sizes = [18, 512], strides = [1, 1]} : vector<48x512xf32> to vector<18x512xf32>
    %162 = arith.mulf %161, %26 : vector<18x512xf32>
    %163 = arith.subf %160, %162 : vector<18x512xf32>
    %164 = vector.extract_strided_slice %158 {offsets = [0, 0], sizes = [3, 512], strides = [1, 1]} : vector<48x512xf32> to vector<3x512xf32>
    %165 = vector.extract_strided_slice %163 {offsets = [0, 0], sizes = [3, 512], strides = [1, 1]} : vector<18x512xf32> to vector<3x512xf32>
    %cst_68 = arith.constant 1.000000e+00 : f32
    %166 = vector.broadcast %cst_68 : f32 to vector<3x512xf32>
    %167 = arith.mulf %166, %165 : vector<3x512xf32>
    %168 = arith.addf %164, %167 : vector<3x512xf32>
    %169 = vector.extract_strided_slice %163 {offsets = [3, 0], sizes = [3, 512], strides = [1, 1]} : vector<18x512xf32> to vector<3x512xf32>
    %cst_69 = arith.constant 2.000000e+00 : f32
    %170 = vector.broadcast %cst_69 : f32 to vector<3x512xf32>
    %171 = arith.mulf %170, %169 : vector<3x512xf32>
    %172 = arith.addf %168, %171 : vector<3x512xf32>
    %173 = vector.extract_strided_slice %163 {offsets = [6, 0], sizes = [3, 512], strides = [1, 1]} : vector<18x512xf32> to vector<3x512xf32>
    %cst_70 = arith.constant 4.000000e+00 : f32
    %174 = vector.broadcast %cst_70 : f32 to vector<3x512xf32>
    %175 = arith.mulf %174, %173 : vector<3x512xf32>
    %176 = arith.addf %172, %175 : vector<3x512xf32>
    %177 = vector.extract_strided_slice %163 {offsets = [9, 0], sizes = [3, 512], strides = [1, 1]} : vector<18x512xf32> to vector<3x512xf32>
    %cst_71 = arith.constant 8.000000e+00 : f32
    %178 = vector.broadcast %cst_71 : f32 to vector<3x512xf32>
    %179 = arith.mulf %178, %177 : vector<3x512xf32>
    %180 = arith.addf %176, %179 : vector<3x512xf32>
    %181 = vector.extract_strided_slice %163 {offsets = [12, 0], sizes = [3, 512], strides = [1, 1]} : vector<18x512xf32> to vector<3x512xf32>
    %cst_72 = arith.constant 1.600000e+01 : f32
    %182 = vector.broadcast %cst_72 : f32 to vector<3x512xf32>
    %183 = arith.mulf %182, %181 : vector<3x512xf32>
    %184 = arith.addf %180, %183 : vector<3x512xf32>
    %185 = vector.extract_strided_slice %163 {offsets = [15, 0], sizes = [3, 512], strides = [1, 1]} : vector<18x512xf32> to vector<3x512xf32>
    %cst_73 = arith.constant 3.200000e+01 : f32
    %186 = vector.broadcast %cst_73 : f32 to vector<3x512xf32>
    %187 = arith.mulf %186, %185 : vector<3x512xf32>
    %188 = arith.addf %184, %187 : vector<3x512xf32>
    %cst_74 = arith.constant 0.000000e+00 : f32
    %189 = vector.broadcast %cst_74 : f32 to vector<31x512xf32>
    %190 = tpu.concatenate %1, %2, %28, %29, %188, %189 in 0 : vector<3x512xf32>, vector<3x512xf32>, vector<12x512xf32>, vector<12x512xf32>, vector<3x512xf32>, vector<31x512xf32> -> vector<64x512xf32>
    %191 = arith.truncf %190 : vector<64x512xf32> to vector<64x512xbf16>
    %c320 = arith.constant 320 : index
    %c0_75 = arith.constant 0 : index
    %192 = vector.load %arg2[%c320, %c0_75] : memref<816x64xbf16, #tpu.memory_space<vmem>>, vector<64x64xbf16>
    %cst_76 = arith.constant dense<0.000000e+00> : vector<64x512xf32>
    %193 = tpu.matmul %192, %191, %cst_76 {dimension_numbers = #tpu.dot_dimension_numbers<[1], [0], [0], [1], [0, 0, 1, 1], [], []>} : vector<64x64xbf16>, vector<64x512xbf16>, vector<64x512xf32> -> vector<64x512xf32>
    %194 = arith.truncf %125 : vector<64x512xf32> to vector<64x512xbf16>
    %c384 = arith.constant 384 : index
    %c0_77 = arith.constant 0 : index
    %195 = vector.load %arg2[%c384, %c0_77] : memref<816x64xbf16, #tpu.memory_space<vmem>>, vector<64x64xbf16>
    %cst_78 = arith.constant dense<0.000000e+00> : vector<64x512xf32>
    %196 = tpu.matmul %195, %194, %cst_78 {dimension_numbers = #tpu.dot_dimension_numbers<[1], [0], [0], [1], [0, 0, 1, 1], [], []>} : vector<64x64xbf16>, vector<64x512xbf16>, vector<64x512xf32> -> vector<64x512xf32>
    %197 = arith.addf %193, %196 : vector<64x512xf32>
    %c0_79 = arith.constant 0 : index
    %c5 = arith.constant 5 : index
    %198 = vector.load %arg3[%c0_79, %c5] : memref<64x8xf32, #tpu.memory_space<vmem>>, vector<64x1xf32>
    %199 = vector.broadcast %198 : vector<64x1xf32> to vector<64x512xf32>
    %200 = arith.addf %197, %199 : vector<64x512xf32>
    %cst_80 = arith.constant 0.000000e+00 : f32
    %201 = vector.broadcast %cst_80 : f32 to vector<64x512xf32>
    %202 = arith.maximumf %200, %201 : vector<64x512xf32>
    %203 = arith.truncf %202 : vector<64x512xf32> to vector<64x512xbf16>
    %c448 = arith.constant 448 : index
    %c0_81 = arith.constant 0 : index
    %204 = vector.load %arg2[%c448, %c0_81] : memref<816x64xbf16, #tpu.memory_space<vmem>>, vector<64x64xbf16>
    %cst_82 = arith.constant dense<0.000000e+00> : vector<64x512xf32>
    %205 = tpu.matmul %204, %203, %cst_82 {dimension_numbers = #tpu.dot_dimension_numbers<[1], [0], [0], [1], [0, 0, 1, 1], [], []>} : vector<64x64xbf16>, vector<64x512xbf16>, vector<64x512xf32> -> vector<64x512xf32>
    %c0_83 = arith.constant 0 : index
    %c6 = arith.constant 6 : index
    %206 = vector.load %arg3[%c0_83, %c6] : memref<64x8xf32, #tpu.memory_space<vmem>>, vector<64x1xf32>
    %207 = vector.broadcast %206 : vector<64x1xf32> to vector<64x512xf32>
    %208 = arith.addf %205, %207 : vector<64x512xf32>
    %cst_84 = arith.constant 0.000000e+00 : f32
    %209 = vector.broadcast %cst_84 : f32 to vector<64x512xf32>
    %210 = arith.maximumf %208, %209 : vector<64x512xf32>
    %211 = arith.truncf %210 : vector<64x512xf32> to vector<64x512xbf16>
    %c512 = arith.constant 512 : index
    %c0_85 = arith.constant 0 : index
    %212 = vector.load %arg2[%c512, %c0_85] : memref<816x64xbf16, #tpu.memory_space<vmem>>, vector<16x64xbf16>
    %cst_86 = arith.constant dense<0.000000e+00> : vector<16x512xf32>
    %213 = tpu.matmul %212, %211, %cst_86 {dimension_numbers = #tpu.dot_dimension_numbers<[1], [0], [0], [1], [0, 0, 1, 1], [], []>} : vector<16x64xbf16>, vector<64x512xbf16>, vector<16x512xf32> -> vector<16x512xf32>
    %214 = vector.extract_strided_slice %213 {offsets = [0, 0], sizes = [3, 512], strides = [1, 1]} : vector<16x512xf32> to vector<3x512xf32>
    %c0_87 = arith.constant 0 : index
    %c7_88 = arith.constant 7 : index
    %215 = vector.load %arg3[%c0_87, %c7_88] : memref<64x8xf32, #tpu.memory_space<vmem>>, vector<3x1xf32>
    %216 = vector.broadcast %215 : vector<3x1xf32> to vector<3x512xf32>
    %217 = arith.addf %214, %216 : vector<3x512xf32>
    %cst_89 = arith.constant 0.000000e+00 : f32
    %218 = vector.broadcast %cst_89 : f32 to vector<3x512xf32>
    %219 = arith.subf %218, %217 : vector<3x512xf32>
    %cst_90 = arith.constant 6.000000e+01 : f32
    %220 = vector.broadcast %cst_90 : f32 to vector<3x512xf32>
    %221 = arith.minimumf %219, %220 : vector<3x512xf32>
    %222 = math.exp %221 : vector<3x512xf32>
    %cst_91 = arith.constant 1.000000e+00 : f32
    %223 = vector.broadcast %cst_91 : f32 to vector<3x512xf32>
    %224 = arith.addf %223, %222 : vector<3x512xf32>
    %cst_92 = arith.constant 1.000000e+00 : f32
    %225 = vector.broadcast %cst_92 : f32 to vector<3x512xf32>
    %226 = arith.divf %225, %224 : vector<3x512xf32>
    %cst_93 = arith.constant 0.000000e+00 : f32
    %227 = vector.broadcast %cst_93 : f32 to vector<1x512xf32>
    %228 = tpu.concatenate %138, %226, %188, %227 in 0 : vector<1x512xf32>, vector<3x512xf32>, vector<3x512xf32>, vector<1x512xf32> -> vector<8x512xf32>
    %c0_94 = arith.constant 0 : index
    %c0_95 = arith.constant 0 : index
    %229 = vector.load %arg4[%c0_94, %c0_95] : memref<8x512xf32, #tpu.memory_space<vmem>>, vector<8x512xf32>
    tpu.vector_store %arg4[%c0_94, %c0_95], %228 {strides = array<i32>} : memref<8x512xf32, #tpu.memory_space<vmem>>, vector<8x512xf32>,
    return
  }
  func.func @transform_0(%arg0: i32) -> (i32, i32) {
    %c0_i32 = arith.constant 0 : i32
    %c0_i32_0 = arith.constant 0 : i32
    return %c0_i32, %arg0 : i32, i32
  }
  func.func @transform_1(%arg0: i32) -> (i32, i32) {
    %c0_i32 = arith.constant 0 : i32
    %c0_i32_0 = arith.constant 0 : i32
    %c0_i32_1 = arith.constant 0 : i32
    return %c0_i32, %c0_i32_0 : i32, i32
  }
  func.func @transform_2(%arg0: i32) -> (i32, i32) {
    %c0_i32 = arith.constant 0 : i32
    %c0_i32_0 = arith.constant 0 : i32
    %c0_i32_1 = arith.constant 0 : i32
    return %c0_i32, %c0_i32_0 : i32, i32
  }
  func.func @transform_3(%arg0: i32) -> (i32, i32) {
    %c0_i32 = arith.constant 0 : i32
    %c0_i32_0 = arith.constant 0 : i32
    return %c0_i32, %arg0 : i32, i32
  }
}

</mosaic_0001>

<bundles_post_ra>
// kernel: tpu_custom_call.1
= control target key start
LH: loop header
LB: loop body
LE: loop exit
PB: predicated region body
PF: predicated region fallthrough
CT: control target
= control target key end

     0   :  { %8 = vsyncpa [#allocation3], 0  ;;  %s17525_s0 = inlined_call_operand.vmem [shape: f32[6,2048], index: 0, kind: input, shape index: {}]   ;;  %s17526_s1 = inlined_call_operand.vmem [shape: bf16[816,64], index: 1, kind: input, shape index: {}]   ;;  %s17527_s2 = inlined_call_operand.vmem [shape: f32[64,8], index: 2, kind: input, shape index: {}]   ;;  %s17528_s3 = inlined_call_operand.hbm [shape: f32[8,2048], index: 3, kind: output, shape index: {}]  }
   0x1   :  { %10 = vsyncpa [#allocation3 + $0x1], 0  ;;  %s10603_s12 = smov 0   ;;  %s10605_s13 = smov 0  }
   0x2   :  { %s10607_s14 = smov 0   ;;  %s10609_s15 = smov 0  }
   0x3 LB: > { %s10624_s16 = sadd.s32 4294967295, %s10564_s15   ;;  %s9114_s17 = sadd.s32 4294967294, %s10564_s15   ;;  %s10564_s15 = sphi %s10609_s15, %s19617_s15   ;;  %s10560_s14 = sphi %s10607_s14, %s19616_s14   ;;  %s10556_s13 = sphi %s10605_s13, %s19615_s13   ;;  %s10552_s12 = sphi %s10603_s12, %s19614_s12  }
   0x4   : > { %s10628_s18 = sadd.s32 1, %s10564_s15   ;;  %s91_s19 = sadd.s32 1, %s10560_s14 }
   0x5   : > { %s88_s20 = ssub.s32 %s10564_s15, %s10628_s18  ;;  %p101_p0 = scmp.ne.s32.totalorder %s10560_s14, %s10556_s13 }
   0x6   : > { %p89_p1 = scmp.eq.s32.totalorder %s88_s20, 0  ;;  %p102_p2 = scmp.eq.s32.totalorder %s10624_s16, 3 }
   0x7   : > { %p107_p3 = scmp.ne.s32.totalorder %s10556_s13, %s10552_s12  ;;  %p108_p4 = scmp.eq.s32.totalorder %s9114_s17, 3 }
   0x8   : > { %s10639_s21 = scalar_select %p89_p1, %s10560_s14, %s91_s19  }
   0x9   : > { %p10641_p5 = por %p102_p2, %p101_p0  ;;  %p10645_p6 = por %p108_p4, %p107_p3 }
   0xa   : > { %p9117_p7 = scmp.ge.s32.totalorder %s10564_s15, 1  ;;  %p141_p8 = scmp.lt.s32.totalorder %s10564_s15, 5 }
   0xc   : > { %p142_p9 = pnand %p9117_p7, %p141_p8 }
   0xe   : > { %145 = sbr.rel (%p142_p9) target bundleno = 3433 (0xd69), region = 32 }
  0x13   : > { %s9119_s24 = sshll.u32 %s10624_s16, 2  ;;  %vm17533_vm0 = vcmask 1040384   ;;  %vm17532_vm1 = vcmask 1043456   ;;  %vm17530_vm2 = vcmask 1046528   ;;  %vm17531_vm3 = vcmask 1041408   ;;  %s162_s29 = sand.u32 1, %s10556_s13  }
  0x14   : > { %p166_p10 = scmp.lt.s32.totalorder %s9119_s24, 15  ;;  %vm17529_vm4 = vcmask 1044480   ;;  %v17549_v59 = vmov 683565275   ;;  %v17559_v61 = vmov 2475754826  }
  0x15   : > { %v17555_v63 = vmov 2131351028   ;;  %s9118_s30 = sshll.u32 %s162_s29, 5  ;;  %s9443_s5 = sshll.u32 %s10624_s16, 9 }
  0x16   : > { %s19619_s24 = smov (!%p166_p10, %s9119_s24), 15  ;;  %s164_s4 = scalar_lea.vmem [#allocation2], %s9118_s30 }
  0x17   : > { %s9120_s25 = sshll.u32 %s19619_s24, 3  ;;  %s17487_s8 = scalar_lea.hbm %s17528_s3, %s9443_s5 }
  0x18   : > { %s10655_s28 = scalar_lea.vmem %s17525_s0, %s9120_s25  ;;  %s9041_s16 = scalar_lea.sflag [#allocation3], %s162_s29 }
  0x19   : > { %v174_v0 = vld [vmem:[%s10655_s28 + $0x8] sm:$0x3f]  ;;  %v10659_v1 = vld [vmem:[%s10655_s28 + $0x18] sm:$0x3f]  ;;  %s10582_s10 = smov [#allocation2]  }
  0x1a   : > { %v10661_v2 = vmul.f32 2.0, %v174_v0  ;;  %v10663_v3 = vmul.f32 4.0, %v174_v0  ;;  %v10665_v4 = vmul.f32 8.0, %v174_v0  ;;  %v190_v5 = vmul.f32 16.0, %v174_v0  ;;  %s10508_s11 = sshll.u32 %s10582_s10, 4  ;;  %s10509_s11 = int_to_ptr.vmem [resolvable:$false] %s10508_s11 }
  0x1b   : > { %v194_v6 = vmul.f32 32.0, %v174_v0  ;;  %v262_v7 = vrot.slane %v174_v0, 1  ;;  %v10668_v8 = vmul.f32 4.0, %v10659_v1  ;;  %v10674_v14 = vmul.f32 8.0, %v10659_v1  ;;  %s10510_s17 = scalar_lea.vmem %s10509_s11, 1024 }
  0x1c   : > { %18126 = vst [vmem:[#allocation5_spill] sm:$0xff] %v10663_v3  ;;  %18127 = vst [vmem:[#allocation6_spill] sm:$0xff] %v10665_v4  ;;  %v17537_v9 = vrot.slane %v10663_v3, 2  ;;  %v226_v10 = vrot.slane %v10665_v4, 7  ;;  %v238_v11 = vrot.slane %v190_v5, 4  ;;  %v270_v12 = vrot.slane %v10661_v2, 6 }
  0x1d   : > { %18128 = vst [vmem:[#allocation7_spill] sm:$0xff] %v10668_v8  ;;  %v250_v13 = vrot.slane %v194_v6, 1  ;;  %18129 = vst [vmem:[#allocation8_spill] sm:$0xff] %v10674_v14  ;;  %v192_v15 = vmul.f32 16.0, %v10659_v1  ;;  %v10678_v16 = vmul.f32 32.0, %v10659_v1  ;;  %v17536_v20 = vrot.slane %v10668_v8, 2 }
  0x1e   : > { %v297_v17 = vsel %vm17533_vm0, %v17537_v9, %v226_v10  ;;  %v228_v21 = vrot.slane %v10674_v14, 7  ;;  %v10707_v37 = vmul.f32 2.0, %v10659_v1  ;;  %v264_v45 = vrot.slane %v10659_v1, 1  ;;  %v11724_v4 = vld [vmem:[%s10655_s28] sm:$0x3f] }
  0x1f   : > { %v302_v18 = vsel %vm17532_vm1, %v297_v17, %v238_v11  ;;  %v312_v19 = vsel %vm17531_vm3, %v250_v13, %v262_v7  ;;  %v240_v24 = vrot.slane %v192_v15, 4  ;;  %v252_v27 = vrot.slane %v10678_v16, 1 }
  0x20   : > { %v10688_v22 = vsel %vm17530_vm2, %v302_v18, %v250_v13  ;;  %v10691_v23 = vsel %vm17529_vm4, %v312_v19, %v270_v12  ;;  %v299_v32 = vsel %vm17533_vm0, %v17536_v20, %v228_v21  ;;  %v272_v46 = vrot.slane %v10707_v37, 6 }
  0x21   : > { %v844_v25 = vand.u32 2147483647, %v10688_v22  ;;  %v847_v26 = vand.u32 2139095040, %v10688_v22  ;;  %v1260_v28 = vand.u32 2147483647, %v10691_v23  ;;  %v1263_v29 = vand.u32 2139095040, %v10691_v23 }
  0x22   : > { %v304_v35 = vsel %vm17532_vm1, %v299_v32, %v240_v24  ;;  %v17557_v5 = vmov 2102212464   ;;  %v17561_v7 = vmov 920167782   ;;  %v17545_v18 = vmov 1326507024  }
  0x23   : > { %v848_v30 = vshrl.u32 %v847_v26, 23  ;;  %v851_v31 = vand.u32 8388607, %v844_v25  ;;  %v1264_v33 = vshrl.u32 %v1263_v29, 23  ;;  %v1267_v34 = vand.u32 8388607, %v1260_v28 }
  0x24   : > { %v10712_v38 = vsel %vm17530_vm2, %v304_v35, %v252_v27  ;;  %vm1352_vm0 = vweird.f32 %v10691_v23 }
  0x25   : > { %v9141_v36 = vadd.s32 4294967169, %v848_v30  ;;  %v9157_v39 = vadd.s32 4294967169, %v1264_v33  ;;  %v852_v40 = vor.u32 8388608, %v851_v31  ;;  %v1055_v42 = vand.u32 2139095040, %v10712_v38 }
  0x26   : > { %v1268_v43 = vor.u32 8388608, %v1267_v34  ;;  %v1052_v49 = vand.u32 2147483647, %v10712_v38 }
  0x27   : > { %v854_v41 = vadd.s32 1, %v9141_v36  ;;  %v1270_v44 = vadd.s32 1, %v9157_v39  ;;  %v1056_v47 = vshrl.u32 %v1055_v42, 23  ;;  %v10718_v52 = vshll.u32 %v852_v40, 8 }
  0x28   : > { %v10722_v56 = vshll.u32 %v1268_v43, 8 }
  0x29   : > { %vm855_vm5 = vcmp.gt.s32.totalorder %v854_v41, 0  ;;  %vm1271_vm6 = vcmp.gt.s32.totalorder %v1270_v44, 0  ;;  %v10724_v57 = vadd.s32 4294967169, %v1056_v47 }
  0x2a   : > { %v856_v48 = vsel %vm855_vm5, %v854_v41, 0  ;;  %v1272_v53 = vsel %vm1271_vm6, %v1270_v44, 0 }
  0x2b   : > { %v857_v50 = vshrl.u32 %v856_v48, 5  ;;  %v858_v51 = vand.u32 31, %v856_v48  ;;  %v10720_v54 = vshrl.u32 %v1272_v53, 5  ;;  %v1274_v55 = vand.u32 31, %v1272_v53 }
  0x2d   : > { %v859_v58 = vsub.s32 32, %v858_v51  ;;  %v861_v60 = vshll.u32 %v17549_v59, %v858_v51  ;;  %v864_v62 = vshll.u32 %v17559_v61, %v858_v51  ;;  %v867_v0 = vshll.u32 %v17555_v63, %v858_v51 }
  0x2e   : > { %v870_v6 = vshll.u32 %v17557_v5, %v858_v51  ;;  %v873_v10 = vshll.u32 %v17561_v7, %v858_v51  ;;  %vm876_vm7 = vcmp.lt.s32.totalorder %v857_v50, 1  ;;  %vm877_vm8 = vcmp.lt.s32.totalorder %v857_v50, 2 }
  0x2f   : > { %v860_v11 = vshrl.u32 %v17549_v59, %v859_v58  ;;  %v862_v12 = vshrl.u32 %v17559_v61, %v859_v58  ;;  %v865_v13 = vshrl.u32 %v17555_v63, %v859_v58  ;;  %v868_v15 = vshrl.u32 %v17557_v5, %v859_v58 }
  0x30   : > { %v871_v17 = vshrl.u32 %v17561_v7, %v859_v58  ;;  %v874_v19 = vshrl.u32 %v17545_v18, %v859_v58  ;;  %vm878_vm9 = vcmp.lt.s32.totalorder %v857_v50, 3  ;;  %vm879_vm10 = vcmp.lt.s32.totalorder %v857_v50, 4 }
  0x31   : > { %v863_v21 = vor.u32 %v862_v12, %v861_v60  ;;  %v866_v24 = vor.u32 %v865_v13, %v864_v62  ;;  %v869_v26 = vor.u32 %v868_v15, %v867_v0  ;;  %v1275_v29 = vsub.s32 32, %v1274_v55 }
  0x32   : > { %v872_v30 = vor.u32 %v871_v17, %v870_v6  ;;  %v875_v31 = vor.u32 %v874_v19, %v873_v10  ;;  %v1277_v32 = vshll.u32 %v17549_v59, %v1274_v55  ;;  %v1280_v42 = vshll.u32 %v17559_v61, %v1274_v55 }
  0x33   : > { %v880_v33 = vsel %vm876_vm7, %v860_v11, %v863_v21  ;;  %v881_v34 = vsel %vm879_vm10, %v869_v26, 2102212464  ;;  %v884_v35 = vsel %vm876_vm7, %v863_v21, %v866_v24  ;;  %v888_v36 = vsel %vm876_vm7, %v866_v24, %v869_v26 }
  0x34   : > { %v882_v39 = vsel %vm878_vm9, %v866_v24, %v881_v34  ;;  %v885_v40 = vsel %vm879_vm10, %v872_v30, 920167782  ;;  %v889_v41 = vsel %vm879_vm10, %v875_v31, 1326507024  ;;  %v1276_v47 = vshrl.u32 %v17549_v59, %v1275_v29 }
  0x35   : > { %v886_v43 = vsel %vm878_vm9, %v869_v26, %v885_v40  ;;  %v890_v44 = vsel %vm878_vm9, %v872_v30, %v889_v41  ;;  %v1278_v48 = vshrl.u32 %v17559_v61, %v1275_v29  ;;  %v883_v51 = vsel %vm877_vm8, %v880_v33, %v882_v39 }
  0x36   : > { %v887_v53 = vsel %vm877_vm8, %v884_v35, %v886_v43  ;;  %v891_v58 = vsel %vm877_vm8, %v888_v36, %v890_v44  ;;  %v1281_v60 = vshrl.u32 %v17555_v63, %v1275_v29  ;;  %v1283_v13 = vshll.u32 %v17555_v63, %v1274_v55 }
  0x37   : > { %v10752_v62 = vmul.u32.u64.low %v10718_v52, %v891_v58  ;;  %v10753_v0 = vmul.u32.u64.high %v10718_v52, %v891_v58, %v10752_v62  ;;  %v10756_v6 = vmul.u32.u64.low %v10718_v52, %v887_v53  ;;  %v10757_v10 = vmul.u32.u64.high %v10718_v52, %v887_v53, %v10756_v6 }
  0x38   : > { %v1279_v11 = vor.u32 %v1278_v48, %v1277_v32  ;;  %v1282_v12 = vor.u32 %v1281_v60, %v1280_v42  ;;  %v1284_v15 = vshrl.u32 %v17557_v5, %v1275_v29  ;;  %v1286_v50 = vshll.u32 %v17557_v5, %v1274_v55 }
  0x39   : > { %v1287_v17 = vshrl.u32 %v17561_v7, %v1275_v29  ;;  %v1289_v19 = vshll.u32 %v17561_v7, %v1274_v55  ;;  %v1290_v21 = vshrl.u32 %v17545_v18, %v1275_v29  ;;  %v899_v24 = vmul.u32 %v10718_v52, %v883_v51 }
  0x3a   : > { %v1285_v26 = vor.u32 %v1284_v15, %v1283_v13  ;;  %vm1292_vm11 = vcmp.lt.s32.totalorder %v10720_v54, 1  ;;  %vm1293_vm12 = vcmp.lt.s32.totalorder %v10720_v54, 2  ;;  %vm901_vm13 = vc.u32 %v10753_v0, %v10756_v6 }
  0x3b   : > { %v902_v30 = vadd.s32 1, %v10757_v10  ;;  %v1288_v31 = vor.u32 %v1287_v17, %v1286_v50  ;;  %vm1294_vm14 = vcmp.lt.s32.totalorder %v10720_v54, 3  ;;  %v1291_v32 = vor.u32 %v1290_v21, %v1289_v19 }
  0x3c   : > { %vm1295_vm15 = vcmp.lt.s32.totalorder %v10720_v54, 4  ;;  %v1296_v55 = vsel %vm1292_vm11, %v1276_v47, %v1279_v11  ;;  %v1300_v29 = vsel %vm1292_vm11, %v1279_v11, %v1282_v12  ;;  %v1304_v35 = vsel %vm1292_vm11, %v1282_v12, %v1285_v26 }
  0x3d   : > { %v903_v52 = vsel %vm901_vm13, %v902_v30, %v10757_v10  ;;  %v1297_v33 = vsel %vm1295_vm15, %v1285_v26, 2102212464  ;;  %v1301_v34 = vsel %vm1295_vm15, %v1288_v31, 920167782  ;;  %v1305_v41 = vsel %vm1295_vm15, %v1291_v32, 1326507024 }
  0x3e   : > { %v904_v36 = vadd.s32 %v903_v52, %v899_v24  ;;  %v1298_v39 = vsel %vm1294_vm14, %v1282_v12, %v1297_v33  ;;  %v1302_v40 = vsel %vm1294_vm14, %v1285_v26, %v1301_v34  ;;  %v1306_v44 = vsel %vm1294_vm14, %v1288_v31, %v1305_v41 }
  0x3f   : > { %v1299_v42 = vsel %vm1293_vm12, %v1296_v55, %v1298_v39  ;;  %v1303_v43 = vsel %vm1293_vm12, %v1300_v29, %v1302_v40  ;;  %v1062_v48 = vadd.s32 1, %v10724_v57  ;;  %v1307_v51 = vsel %vm1293_vm12, %v1304_v35, %v1306_v44 }
  0x40   : > { %v905_v47 = vadd.s32 536870912, %v904_v36  ;;  %v10783_v53 = vmul.u32.u64.low %v10722_v56, %v1303_v43  ;;  %v10784_v58 = vmul.u32.u64.high %v10722_v56, %v1303_v43, %v10783_v53  ;;  %v314_v10 = vsel %vm17531_vm3, %v252_v27, %v264_v45 }
  0x41   : > { %v10787_v60 = vmul.u32.u64.low %v10722_v56, %v1307_v51  ;;  %v10788_v62 = vmul.u32.u64.high %v10722_v56, %v1307_v51, %v10787_v60  ;;  %vm1063_vm5 = vcmp.gt.s32.totalorder %v1062_v48, 0  ;;  %v1315_v54 = vmul.u32 %v10722_v56, %v1299_v42 }
  0x42   : > { %v906_v57 = vshrl.u32 %v905_v47, 30  ;;  %v1064_v11 = vsel %vm1063_vm5, %v1062_v48, 0  ;;  %v1059_v12 = vand.u32 8388607, %v1052_v49  ;;  %v1318_v15 = vadd.s32 1, %v10784_v58 }
  0x43   : > { %v10802_v50 = vsel %vm17529_vm4, %v314_v10, %v272_v46  ;;  %v1066_v1 = vand.u32 31, %v1064_v11  ;;  %vm1317_vm6 = vc.u32 %v10788_v62, %v10783_v53  ;;  %vm846_vm7 = vcmp.lt.s32.totalorder %v10688_v22, 0 }
  0x44   : > { %v907_v13 = vshll.u32 %v906_v57, 30  ;;  %v1468_v16 = vand.u32 2147483647, %v10802_v50  ;;  %v1319_v45 = vsel %vm1317_vm6, %v1318_v15, %v10784_v58  ;;  %v930_v56 = vsub.s32 4, %v906_v57 }
  0x45   : > { %v1320_v17 = vadd.s32 %v1319_v45, %v1315_v54  ;;  %v1060_v19 = vor.u32 8388608, %v1059_v12  ;;  %v1067_v24 = vsub.s32 32, %v1066_v1  ;;  %v1471_v30 = vand.u32 2139095040, %v10802_v50 }
  0x46   : > { %v908_v27 = vsub.s32 %v904_v36, %v907_v13  ;;  %vm10811_vm8 = vcmp.le.f32.partialorder %v844_v25, 0.7853982  ;;  %v10817_v32 = vand.u32 8388607, %v1468_v16  ;;  %v900_v55 = vadd.s32 %v10756_v6, %v10753_v0 }
  0x47   : > { %v1321_v26 = vadd.s32 536870912, %v1320_v17  ;;  %v931_v29 = vsel %vm846_vm7, %v930_v56, %v906_v57  ;;  %vm1262_vm9 = vcmp.lt.s32.totalorder %v10691_v23, 0  ;;  %v10824_v33 = vshll.u32 %v1060_v19, 8 }
  0x48   : > { %v910_v21 = vsub.s32 0, %v908_v27  ;;  %v10826_v34 = vshrl.u32 %v1064_v11, 5  ;;  %v1069_v35 = vshll.u32 %v17549_v59, %v1066_v1  ;;  %v1070_v36 = vshrl.u32 %v17559_v61, %v1067_v24 }
  0x49   : > { %v1322_v52 = vshrl.u32 %v1321_v26, 30  ;;  %v10831_v39 = vadd.s32 %v10783_v53, %v10788_v62  ;;  %v1072_v0 = vshll.u32 %v17559_v61, %v1066_v1  ;;  %v1472_v6 = vshrl.u32 %v1471_v30, 23 }
  0x4a   : > { %v9142_v31 = vmin.u32 %v910_v21, %v908_v27  ;;  %v10836_v42 = vsel %vm10811_vm8, 0, %v931_v29  ;;  %vm10840_vm10 = vcmp.le.f32.partialorder %v1260_v28, 0.7853982  ;;  %v1073_v44 = vshrl.u32 %v17555_v63, %v1067_v24 }
  0x4b   : > { %v1323_v40 = vshll.u32 %v1322_v52, 30  ;;  %v1075_v48 = vshll.u32 %v17555_v63, %v1066_v1  ;;  %v1076_v51 = vshrl.u32 %v17557_v5, %v1067_v24  ;;  %v1078_v53 = vshll.u32 %v17557_v5, %v1066_v1 }
  0x4c   : > { %v912_v25 = vclz %v9142_v31  ;;  %v1079_v58 = vshrl.u32 %v17561_v7, %v1067_v24  ;;  %v1346_v60 = vsub.s32 4, %v1322_v52  ;;  %v1068_v62 = vshrl.u32 %v17549_v59, %v1067_v24 }
  0x4d   : > { %v10846_v47 = vsub.s32 %v1320_v17, %v1323_v40  ;;  %v1071_v28 = vor.u32 %v1070_v36, %v1069_v35  ;;  %v1081_v11 = vshll.u32 %v17561_v7, %v1066_v1  ;;  %v1082_v54 = vshrl.u32 %v17545_v18, %v1067_v24 }
  0x4e   : > { %v9143_v41 = vadd.s32 4294967294, %v912_v25  ;;  %v1074_v45 = vor.u32 %v1073_v44, %v1072_v0  ;;  %v1077_v17 = vor.u32 %v1076_v51, %v1075_v48  ;;  %v1080_v19 = vor.u32 %v1079_v58, %v1078_v53 }
  0x4f   : > { %v1326_v57 = vsub.s32 0, %v10846_v47  ;;  %vm1084_vm12 = vcmp.lt.s32.totalorder %v10826_v34, 1  ;;  %v1347_v30 = vsel %vm1262_vm9, %v1346_v60, %v1322_v52  ;;  %vm1087_vm13 = vcmp.lt.s32.totalorder %v10826_v34, 4 }
  0x50   : > { %vm9144_vm11 = vcmp.lt.s32.totalorder %v9143_v41, 0  ;;  %v1083_v31 = vor.u32 %v1082_v54, %v1081_v11  ;;  %vm1085_vm14 = vcmp.lt.s32.totalorder %v10826_v34, 2  ;;  %vm1086_vm15 = vcmp.lt.s32.totalorder %v10826_v34, 3 }
  0x51   : > { %v915_v10 = vsel %vm9144_vm11, 0, %v9143_v41  ;;  %v9158_v56 = vmin.u32 %v1326_v57, %v10846_v47  ;;  %v1089_v29 = vsel %vm1087_vm13, %v1077_v17, 2102212464  ;;  %v1349_v52 = vsel %vm10840_vm10, 0, %v1347_v30 }
  0x52   : > { %v916_v12 = vsub.s32 32, %v915_v10  ;;  %v917_v13 = vshll.u32 %v908_v27, %v915_v10  ;;  %v920_v15 = vsub.s32 4294967266, %v915_v10  ;;  %v1088_v35 = vsel %vm1084_vm12, %v1068_v62, %v1071_v28 }
  0x53   : > { %v1328_v1 = vclz %v9158_v56  ;;  %v1093_v36 = vsel %vm1087_vm13, %v1080_v19, 920167782  ;;  %v1096_v44 = vsel %vm1084_vm12, %v1074_v45, %v1077_v17  ;;  %v1090_v48 = vsel %vm1086_vm15, %v1074_v45, %v1089_v29 }
  0x54   : > { %v918_v21 = vshrl.u32 %v900_v55, %v916_v12  ;;  %v921_v26 = vadd.s32 127, %v920_v15  ;;  %v1092_v55 = vsel %vm1084_vm12, %v1071_v28, %v1074_v45  ;;  %v1094_v41 = vsel %vm1086_vm15, %v1077_v17, %v1093_v36 }
  0x55   : > { %v9159_v25 = vadd.s32 4294967294, %v1328_v1  ;;  %v1095_v51 = vsel %vm1085_vm14, %v1092_v55, %v1094_v41  ;;  %v1097_v53 = vsel %vm1087_vm13, %v1083_v31, 1326507024  ;;  %v9165_v28 = vadd.s32 4294967169, %v1472_v6 }
  0x56   : > { %v919_v27 = vor.u32 %v918_v21, %v917_v13  ;;  %v922_v24 = vshll.u32 %v921_v26, 23  ;;  %v1098_v62 = vsel %vm1086_vm15, %v1080_v19, %v1097_v53  ;;  %v1091_v13 = vsel %vm1085_vm14, %v1088_v35, %v1090_v48  ;;  %v10911_v35 = vld [vmem:[%s10655_s28] sm:$0x3f] }
  0x57   : > { %vm9160_vm5 = vcmp.lt.s32.totalorder %v9159_v25, 0  ;;  %v1099_v54 = vsel %vm1085_vm14, %v1096_v44, %v1098_v62  ;;  %v10895_v6 = vmul.u32.u64.low %v10824_v33, %v1095_v51  ;;  %v10896_v19 = vmul.u32.u64.high %v10824_v33, %v1095_v51, %v10895_v6 }
  0x58   : > { %v923_v40 = vor.u32 4788187, %v922_v24  ;;  %v926_v0 = vcvt.s32.f32 %v919_v27  ;;  %v1331_v60 = vsel %vm9160_vm5, 0, %v9159_v25  ;;  %v937_v21 = vadd.s32 3, %v10836_v42 }
  0x59   : > { %v1332_v10 = vsub.s32 32, %v1331_v60  ;;  %v1333_v57 = vshll.u32 %v10846_v47, %v1331_v60  ;;  %v1336_v11 = vsub.s32 4294967266, %v1331_v60  ;;  %v1478_v26 = vadd.s32 1, %v9165_v28 }
  0x5a   : > { %v924_v58 = vand.u32 2147483647, %v923_v40  ;;  %v10890_v15 = vmul.u32.u64.low %v10824_v33, %v1099_v54  ;;  %v10891_v45 = vmul.u32.u64.high %v10824_v33, %v1099_v54, %v10890_v15  ;;  %v1353_v1 = vadd.s32 3, %v1349_v52 }
  0x5b   : > { %v1334_v56 = vshrl.u32 %v10831_v39, %v1332_v10  ;;  %v1337_v17 = vadd.s32 127, %v1336_v11  ;;  %v1107_v31 = vmul.u32 %v10824_v33, %v1091_v13  ;;  %v1476_v39 = vor.u32 8388608, %v10817_v32 }
  0x5c   : > { %v927_v12 = vmul.f32 %v926_v0, %v924_v58  ;;  %vm1109_vm6 = vc.u32 %v10891_v45, %v10895_v6  ;;  %vm1479_vm11 = vcmp.gt.s32.totalorder %v1478_v26, 0  ;;  %v1110_v25 = vadd.s32 1, %v10896_v19 }
  0x5d   : > { %v1335_v30 = vor.u32 %v1334_v56, %v1333_v57  ;;  %v1338_v34 = vshll.u32 %v1337_v17, 23  ;;  %v10914_v33 = vand.u32 3, %v10836_v42  ;;  %v1480_v36 = vsel %vm1479_vm11, %v1478_v26, 0 }
  0x5e   : > { %v928_v47 = vxor.u32 2147483648, %v927_v12  ;;  %v10916_v40 = vand.u32 3, %v937_v21  ;;  %v1111_v0 = vsel %vm1109_vm6, %v1110_v25, %v10896_v19  ;;  %v1482_v46 = vand.u32 31, %v1480_v36 }
  0x5f   : > { %v1339_v29 = vor.u32 4788187, %v1338_v34  ;;  %v1342_v55 = vcvt.s32.f32 %v1335_v30  ;;  %v1112_v41 = vadd.s32 %v1111_v0, %v1107_v31  ;;  %v10920_v44 = vmul.f32 2.0, %v10911_v35 }
  0x60   : > { %v929_v27 = vsel %vm846_vm7, %v928_v47, %v927_v12  ;;  %v10923_v48 = vmul.f32 4.0, %v10911_v35  ;;  %v10925_v53 = vand.u32 3, %v1353_v1  ;;  %v10927_v42 = vand.u32 3, %v1349_v52 }
  0x61   : > { %v932_v24 = vsel %vm10811_vm8, %v10688_v22, %v929_v27  ;;  %v1340_v32 = vand.u32 2147483647, %v1339_v29  ;;  %v10929_v58 = vshll.u32 %v1476_v39, 8  ;;  %v1113_v60 = vadd.s32 536870912, %v1112_v41 }
  0x62   : > { %9630 = vcosq.f32 %v932_v24  ;;  %18134 = vst [vmem:[#allocation9_spill] sm:$0xff] %v10923_v48  ;;  %v10931_v62 = vshrl.u32 %v1480_v36, 5  ;;  %v1483_v28 = vsub.s32 32, %v1482_v46  ;;  %v1485_v10 = vshll.u32 %v17549_v59, %v1482_v46 }
  0x63   : > { %9632 = vsinq.f32 %v932_v24  ;;  %v1343_v51 = vmul.f32 %v1342_v55, %v1340_v32  ;;  %vm943_vm7 = vcmp.eq.s32.totalorder %v10916_v40, 2  ;;  %vm2601_vm8 = vcmp.eq.s32.totalorder %v10914_v33, 2 }
  0x64   : > { %v1488_v11 = vshll.u32 %v17559_v61, %v1482_v46  ;;  %v1491_v54 = vshll.u32 %v17555_v63, %v1482_v46  ;;  %v1494_v52 = vshll.u32 %v17557_v5, %v1482_v46  ;;  %vm940_vm12 = vcmp.eq.s32.totalorder %v10916_v40, 0 }
  0x65   : > { %v1344_v57 = vxor.u32 2147483648, %v1343_v51  ;;  %vm2598_vm13 = vcmp.eq.s32.totalorder %v10914_v33, 0  ;;  %v10941_v12 = vshrl.u32 %v1113_v60, 30  ;;  %v1486_v13 = vshrl.u32 %v17559_v61, %v1483_v28 }
  0x66   : > { %v1489_v15 = vshrl.u32 %v17555_v63, %v1483_v28  ;;  %v1497_v56 = vshll.u32 %v17561_v7, %v1482_v46  ;;  %vm939_vm14 = vcmp.lt.s32.totalorder %v10916_v40, 2  ;;  %vm2597_vm15 = vcmp.lt.s32.totalorder %v10914_v33, 2 }
  0x67   : > { %v1345_v17 = vsel %vm1262_vm9, %v1344_v57, %v1343_v51  ;;  %v1492_v19 = vshrl.u32 %v17557_v5, %v1483_v28  ;;  %v1495_v47 = vshrl.u32 %v17561_v7, %v1483_v28  ;;  %v1498_v21 = vshrl.u32 %v17545_v18, %v1483_v28 }
  0x68   : > { %v1348_v26 = vsel %vm10840_vm10, %v10691_v23, %v1345_v17  ;;  %v1115_v30 = vshll.u32 %v10941_v12, 30  ;;  %vm1500_vm5 = vcmp.lt.s32.totalorder %v10931_v62, 1  ;;  %v10959_v34 = vmul.f32 8.0, %v10911_v35 }
  0x69   : > { %vm936_vm9 = vweird.f32 %v10688_v22  ;;  %9634 = vcosq.f32 %v1348_v26  ;;  %v1487_v1 = vor.u32 %v1486_v13, %v1485_v10  ;;  %v1490_v31 = vor.u32 %v1489_v15, %v1488_v11 }
  0x6a   : > { %18135 = vst [vmem:[#allocation10_spill] sm:$0xff] %v10959_v34  ;;  %v1496_v27 = vor.u32 %v1495_v47, %v1494_v52  ;;  %9636 = vsinq.f32 %v1348_v26  ;;  %v10962_v39 = vsub.s32 %v1112_v41, %v1115_v30  ;;  %v1493_v24 = vor.u32 %v1492_v19, %v1491_v54 }
  0x6b   : > { %v1499_v29 = vor.u32 %v1498_v21, %v1497_v56  ;;  %vm1502_vm10 = vcmp.lt.s32.totalorder %v10931_v62, 3  ;;  %vm1503_vm6 = vcmp.lt.s32.totalorder %v10931_v62, 4  ;;  %v10967_v43 = vmul.f32 16.0, %v10911_v35 }
  0x6c   : > { %v10970_v55 = vmul.f32 32.0, %v10911_v35  ;;  %v1108_v25 = vadd.s32 %v10895_v6, %v10891_v45  ;;  %v1118_v36 = vsub.s32 0, %v10962_v39  ;;  %v1484_v32 = vshrl.u32 %v17549_v59, %v1483_v28 }
  0x6d   : > { %v1509_v0 = vsel %vm1503_vm6, %v1496_v27, 920167782  ;;  %vm1054_vm11 = vcmp.lt.s32.totalorder %v10712_v38, 0  ;;  %vm1501_vm4 = vcmp.lt.s32.totalorder %v10931_v62, 2  ;;  %v1508_v46 = vsel %vm1500_vm5, %v1487_v1, %v1490_v31 }
  0x6e   : > { %v1513_v51 = vsel %vm1503_vm6, %v1499_v29, 1326507024  ;;  %v17535_v45 = vrot.slane %v10923_v48, 2  ;;  %vm1359_vm2 = vcmp.eq.s32.totalorder %v10925_v53, 2  ;;  %vm3013_vm3 = vcmp.eq.s32.totalorder %v10927_v42, 2 }
  0x6f   : > { %v9631_v41 = vpop.eup %9630  ;;  %v9150_v28 = vmin.u32 %v1118_v36, %v10962_v39  ;;  %v1505_v10 = vsel %vm1503_vm6, %v1493_v24, 2102212464  ;;  %v1510_v57 = vsel %vm1502_vm10, %v1493_v24, %v1509_v0  ;;  %v1138_v54 = vsub.s32 4, %v10941_v12 }
  0x70   : > { %v9633_v6 = vpop.eup %9632  ;;  %v944_v60 = vxor.u32 2147483648, %v9631_v41  ;;  %v1512_v52 = vsel %vm1500_vm5, %v1490_v31, %v1493_v24  ;;  %v1514_v13 = vsel %vm1502_vm10, %v1496_v27, %v1513_v51  ;;  %vm1355_vm6 = vcmp.lt.s32.totalorder %v10925_v53, 2 }
  0x71   : > { %v941_v11 = vxor.u32 2147483648, %v9633_v6  ;;  %vm3009_vm1 = vcmp.lt.s32.totalorder %v10927_v42, 2  ;;  %v1120_v17 = vclz %v9150_v28  ;;  %v1504_v19 = vsel %vm1500_vm5, %v1484_v32, %v1487_v1 }
  0x72   : > { %v945_v15 = vsel %vm943_vm7, %v944_v60, %v9633_v6  ;;  %v2603_v56 = vsel %vm2601_vm8, %v944_v60, %v9633_v6  ;;  %v1506_v26 = vsel %vm1502_vm10, %v1490_v31, %v1505_v10  ;;  %v1511_v30 = vsel %vm1501_vm4, %v1508_v46, %v1510_v57 }
  0x73   : > { %v942_v47 = vsel %vm940_vm12, %v9631_v41, %v941_v11  ;;  %v2600_v21 = vsel %vm2598_vm13, %v9631_v41, %v941_v11  ;;  %v9151_v24 = vadd.s32 4294967294, %v1120_v17  ;;  %v1515_v29 = vsel %vm1501_vm4, %v1512_v52, %v1514_v13 }
  0x74   : > { %v946_v27 = vsel %vm939_vm14, %v942_v47, %v945_v15  ;;  %v2604_v1 = vsel %vm2597_vm15, %v2600_v21, %v2603_v56  ;;  %v11027_v32 = vmul.u32.u64.low %v10929_v58, %v1515_v29  ;;  %v11028_v31 = vmul.u32.u64.high %v10929_v58, %v1515_v29, %v11027_v32 }
  0x75   : > { %v11024_v36 = vsel %vm936_vm9, nan, %v946_v27  ;;  %v225_v0 = vrot.slane %v10959_v34, 7  ;;  %v11033_v40 = vsel %vm936_vm9, nan, %v2604_v1  ;;  %vm9152_vm7 = vcmp.lt.s32.totalorder %v9151_v24, 0 }
  0x76   : > { %18136 = vst [vmem:[#allocation11_spill] sm:$0xff] %v11024_v36  ;;  %18137 = vst [vmem:[#allocation12_spill] sm:$0xff] %v11033_v40  ;;  %v1507_v33 = vsel %vm1501_vm4, %v1504_v19, %v1506_v26  ;;  %v237_v41 = vrot.slane %v10967_v43, 4  ;;  %v1123_v46 = vsel %vm9152_vm7, 0, %v9151_v24  ;;  %v249_v60 = vrot.slane %v10970_v55, 1  ;;  %v9635_v28 = vpop.eup %9634 }
  0x77   : > { %v11039_v51 = vmul.u32.u64.low %v10929_v58, %v1511_v30  ;;  %v11040_v6 = vmul.u32.u64.high %v10929_v58, %v1511_v30, %v11039_v51  ;;  %v1124_v10 = vsub.s32 32, %v1123_v46  ;;  %v1125_v22 = vshll.u32 %v10962_v39, %v1123_v46  ;;  %v9637_v11 = vpop.eup %9636 }
  0x78   : > { %v1128_v57 = vsub.s32 4294967266, %v1123_v46  ;;  %v1139_v62 = vsel %vm1054_vm11, %v1138_v54, %v10941_v12  ;;  %v1360_v52 = vxor.u32 2147483648, %v9635_v28  ;;  %v17534_v43 = vrot.slane %v11033_v40, 3 }
  0x79   : > { %v1523_v13 = vmul.u32 %v10929_v58, %v1507_v33  ;;  %v261_v15 = vrot.slane %v10911_v35, 1  ;;  %v1357_v56 = vxor.u32 2147483648, %v9637_v11  ;;  %v1126_v17 = vshrl.u32 %v1108_v25, %v1124_v10 }
  0x7a   : > { %v1129_v55 = vadd.s32 127, %v1128_v57  ;;  %vm1525_vm4 = vc.u32 %v11028_v31, %v11039_v51  ;;  %v1361_v39 = vsel %vm1359_vm2, %v1360_v52, %v9637_v11  ;;  %v3015_v12 = vsel %vm3013_vm3, %v1360_v52, %v9637_v11 }
  0x7b   : > { %v1526_v54 = vadd.s32 1, %v11040_v6  ;;  %v269_v19 = vrot.slane %v10920_v44, 6  ;;  %vm18138_vm8 = vcmp.eq.s32.totalorder %v10925_v53, 0  ;;  %vm18139_vm12 = vcmp.eq.s32.totalorder %v10927_v42, 0 }
  0x7c   : > { %v1358_v58 = vsel %vm18138_vm8, %v9635_v28, %v1357_v56  ;;  %v3012_v35 = vsel %vm18139_vm12, %v9635_v28, %v1357_v56  ;;  %v1127_v25 = vor.u32 %v1126_v17, %v1125_v22  ;;  %v1130_v47 = vshll.u32 %v1129_v55, 23 }
  0x7d   : > { %v1362_v21 = vsel %vm1355_vm6, %v1358_v58, %v1361_v39  ;;  %v3016_v26 = vsel %vm3009_vm1, %v3012_v35, %v3015_v12  ;;  %v1527_v30 = vsel %vm1525_vm4, %v1526_v54, %v11040_v6  ;;  %vm18140_vm2 = vcmask 1040384  }
  0x7e   : > { %v296_v27 = vsel %vm18140_vm2, %v17535_v45, %v225_v0  ;;  %v11073_v1 = vsel %vm1352_vm0, nan, %v1362_v21  ;;  %v11077_v24 = vsel %vm1352_vm0, nan, %v3016_v26  ;;  %v1131_v29 = vor.u32 4788187, %v1130_v47 }
  0x7f   : > { %18141 = vst [vmem:[#allocation13_spill] sm:$0xff] %v11073_v1  ;;  %18142 = vst [vmem:[#allocation14_spill] sm:$0xff] %v11077_v24  ;;  %v1134_v53 = vcvt.s32.f32 %v1127_v25  ;;  %v3706_v32 = vrot.slane %v11077_v24, 3  ;;  %v1528_v42 = vadd.s32 %v1527_v30, %v1523_v13  ;;  %vm18143_vm1 = vcmask 1043456  }
  0x80   : > { %v301_v33 = vsel %vm18143_vm1, %v296_v27, %v237_v41  ;;  %vm18144_vm3 = vcmask 1041408   ;;  %vm11084_vm13 = vcmp.le.f32.partialorder %v1052_v49, 0.7853982  ;;  %v1132_v6 = vand.u32 2147483647, %v1131_v29 }
  0x81   : > { %v311_v46 = vsel %vm18144_vm3, %v249_v60, %v261_v15  ;;  %vm18147_vm14 = vcmask 1046528   ;;  %vm18148_vm0 = vcmask 1044480   ;;  %vm17732_vm15 = vmmov 1  }
  0x82   : > { %v11089_v23 = vsel %vm18147_vm14, %v301_v33, %v249_v60  ;;  %v3707_v28 = vsel %vm18148_vm0, %v17534_v43, %v3706_v32  ;;  %vm18149_vm5 = vmmov %vm18147_vm14  ;;  %v18150_v41 = vmov 0  ;;  %v1141_v49 = vsel %vm11084_vm13, 0, %v1139_v62 }
  0x83   : > { %vm11096_vm9 = vmpackc.low %vm17732_vm15, %vm18149_vm5  ;;  %v1529_v10 = vadd.s32 536870912, %v1528_v42  ;;  %v17540_v60 = vmov 0.0   ;;  %v1135_v11 = vmul.f32 %v1134_v53, %v1132_v6  ;;  %v17539_v52 = vand.u32 2147483647, %v11089_v23 }
  0x84   : > { %v18151_v41 = vsel %vm11096_vm9, 4294967295, %v18150_v41  ;;  %vm18153_vm10 = vmmov %vm18148_vm0  ;;  %v11106_v57 = vpack.c.bf16 %v17540_v60, %v3707_v28  ;;  %v743_v13 = vand.u32 2139095040, %v11089_v23  ;;  %vm1470_vm6 = vcmp.lt.s32.totalorder %v10802_v50, 0 }
  0x85   : > { %18152 = vst [vmem:[#allocation15_spill] sm:$0xff] %v18151_v41  ;;  %v11103_v22 = vsel %vm18153_vm10, %v311_v46, %v269_v19  ;;  %v1530_v15 = vshrl.u32 %v1529_v10, 30  ;;  %v1136_v56 = vxor.u32 2147483648, %v1135_v11  ;;  %v1145_v55 = vadd.s32 3, %v1141_v49  ;;  %v11144_v10 = vld [vmem:[%s10655_s28 + $0x10] sm:$0x3f] }
  0x86   : > { %18154 = vst [vmem:[#allocation16_spill] sm:$0xff] %v11106_v57  ;;  %9255 = vmatprep.subr.msk.bf16.mxu0 %vm11096_vm9, %v11106_v57  ;;  %v744_v62 = vshrl.u32 %v743_v13, 23  ;;  %v1159_v17 = vand.u32 2139095040, %v11103_v22  ;;  %vm11117_vm7 = vcmp.le.f32.partialorder %v1468_v16, 0.7853982  ;;  %v1524_v13 = vadd.s32 %v11039_v51, %v11028_v31 }
  0x87   : > { %v1531_v12 = vshll.u32 %v1530_v15, 30  ;;  %v1554_v54 = vsub.s32 4, %v1530_v15  ;;  %v1137_v19 = vsel %vm1054_vm11, %v1136_v56, %v1135_v11  ;;  %v747_v35 = vand.u32 8388607, %v17539_v52 }
  0x88   : > { %v9137_v58 = vadd.s32 4294967169, %v744_v62  ;;  %v1160_v25 = vshrl.u32 %v1159_v17, 23  ;;  %v1140_v47 = vsel %vm11084_vm13, %v10712_v38, %v1137_v19  ;;  %v17538_v26 = vand.u32 2147483647, %v11103_v22 }
  0x89   : > { %v11128_v21 = vsub.s32 %v1528_v42, %v1531_v12  ;;  %v1555_v16 = vsel %vm1470_vm6, %v1554_v54, %v1530_v15  ;;  %9638 = vcosq.f32 %v1140_v47  ;;  %v11135_v53 = vand.u32 3, %v1145_v55 }
  0x8a   : > { %v1557_v30 = vsel %vm11117_vm7, 0, %v1555_v16  ;;  %v750_v27 = vadd.s32 1, %v9137_v58  ;;  %v9153_v29 = vadd.s32 4294967169, %v1160_v25  ;;  %9640 = vsinq.f32 %v1140_v47 }
  0x8b   : > { %v1534_v32 = vsub.s32 0, %v11128_v21  ;;  %v748_v33 = vor.u32 8388608, %v747_v35  ;;  %v1561_v0 = vadd.s32 3, %v1557_v30  ;;  %v11141_v28 = vand.u32 8388607, %v17538_v26 }
  0x8c   : > { %vm751_vm11 = vcmp.gt.s32.totalorder %v750_v27, 0  ;;  %v1166_v42 = vadd.s32 1, %v9153_v29  ;;  %vm1151_vm4 = vcmp.eq.s32.totalorder %v11135_v53, 2  ;;  %vm1148_vm12 = vcmp.eq.s32.totalorder %v11135_v53, 0 }
  0x8d   : > { %v9166_v46 = vmin.u32 %v1534_v32, %v11128_v21  ;;  %v752_v6 = vsel %vm751_vm11, %v750_v27, 0  ;;  %v11150_v15 = vand.u32 3, %v1141_v49  ;;  %v11152_v62 = vshll.u32 %v748_v33, 8 }
  0x8e   : > { %vm1167_vm8 = vcmp.gt.s32.totalorder %v1166_v42, 0  ;;  %v754_v56 = vand.u32 31, %v752_v6  ;;  %vm1147_vm2 = vcmp.lt.s32.totalorder %v11135_v53, 2  ;;  %v11155_v55 = vand.u32 3, %v1561_v0 }
  0x8f   : > { %v1536_v11 = vclz %v9166_v46  ;;  %v11157_v12 = vand.u32 3, %v1557_v30  ;;  %v11160_v54 = vmul.f32 4.0, %v11144_v10  ;;  %v11162_v19 = vshrl.u32 %v752_v6, 5 }
  0x90   : > { %v755_v58 = vsub.s32 32, %v754_v56  ;;  %v1164_v31 = vor.u32 8388608, %v11141_v28  ;;  %v1168_v51 = vsel %vm1167_vm8, %v1166_v42, 0  ;;  %v757_v49 = vshll.u32 %v17549_v59, %v754_v56 }
  0x91   : > { %v9167_v17 = vadd.s32 4294967294, %v1536_v11  ;;  %18157 = vst [vmem:[#allocation17_spill] sm:$0xff] %v11160_v54  ;;  %v760_v35 = vshll.u32 %v17559_v61, %v754_v56  ;;  %v763_v25 = vshll.u32 %v17555_v63, %v754_v56  ;;  %vm1144_vm3 = vweird.f32 %v10712_v38 }
  0x92   : > { %v758_v16 = vshrl.u32 %v17559_v61, %v755_v58  ;;  %v761_v30 = vshrl.u32 %v17555_v63, %v755_v58  ;;  %v766_v27 = vshll.u32 %v17557_v5, %v754_v56  ;;  %v764_v42 = vshrl.u32 %v17557_v5, %v755_v58 }
  0x93   : > { %vm9168_vm1 = vcmp.lt.s32.totalorder %v9167_v17, 0  ;;  %v756_v46 = vshrl.u32 %v17549_v59, %v755_v58  ;;  %v767_v0 = vshrl.u32 %v17561_v7, %v755_v58  ;;  %v769_v6 = vshll.u32 %v17561_v7, %v754_v56 }
  0x94   : > { %v1539_v47 = vsel %vm9168_vm1, 0, %v9167_v17  ;;  %v770_v28 = vshrl.u32 %v17545_v18, %v755_v58  ;;  %v759_v45 = vor.u32 %v758_v16, %v757_v49  ;;  %vm772_vm13 = vcmp.lt.s32.totalorder %v11162_v19, 1 }
  0x95   : > { %v1540_v29 = vsub.s32 32, %v1539_v47  ;;  %v1541_v32 = vshll.u32 %v11128_v21, %v1539_v47  ;;  %v1544_v33 = vsub.s32 4294967266, %v1539_v47  ;;  %v762_v47 = vor.u32 %v761_v30, %v760_v35 }
  0x96   : > { %v11178_v11 = vpop.eup %9638  ;;  %v765_v9 = vor.u32 %v764_v42, %v763_v25  ;;  %v768_v26 = vor.u32 %v767_v0, %v766_v27  ;;  %vm775_vm14 = vcmp.lt.s32.totalorder %v11162_v19, 4  ;;  %v771_v58 = vor.u32 %v770_v28, %v769_v6 }
  0x97   : > { %v1542_v17 = vshrl.u32 %v1524_v13, %v1540_v29  ;;  %v1545_v43 = vadd.s32 127, %v1544_v33  ;;  %v11181_v20 = vpop.eup %9640  ;;  %v1152_v21 = vxor.u32 2147483648, %v11178_v11  ;;  %v776_v49 = vsel %vm772_vm13, %v756_v46, %v759_v45 }
  0x98   : > { %v1149_v52 = vxor.u32 2147483648, %v11181_v20  ;;  %v777_v35 = vsel %vm775_vm14, %v765_v9, 2102212464  ;;  %vm774_vm0 = vcmp.lt.s32.totalorder %v11162_v19, 3  ;;  %vm773_vm5 = vcmp.lt.s32.totalorder %v11162_v19, 2 }
  0x99   : > { %v1543_v60 = vor.u32 %v1542_v17, %v1541_v32  ;;  %v1546_v56 = vshll.u32 %v1545_v43, 23  ;;  %v1153_v13 = vsel %vm1151_vm4, %v1152_v21, %v11181_v20  ;;  %v778_v27 = vsel %vm774_vm0, %v762_v47, %v777_v35 }
  0x9a   : > { %v1150_v43 = vsel %vm1148_vm12, %v11178_v11, %v1149_v52  ;;  %v1170_v29 = vand.u32 31, %v1168_v51  ;;  %v779_v42 = vsel %vm773_vm5, %v776_v49, %v778_v27  ;;  %v781_v53 = vsel %vm775_vm14, %v768_v26, 920167782 }
  0x9b   : > { %v1547_v25 = vor.u32 4788187, %v1546_v56  ;;  %v1550_v16 = vcvt.s32.f32 %v1543_v60  ;;  %v1154_v30 = vsel %vm1147_vm2, %v1150_v43, %v1153_v13  ;;  %v780_v60 = vsel %vm772_vm13, %v759_v45, %v762_v47 }
  0x9c   : > { %v11208_v32 = vsel %vm1144_vm3, nan, %v1154_v30  ;;  %v784_v46 = vsel %vm772_vm13, %v762_v47, %v765_v9  ;;  %v11218_v0 = vshrl.u32 %v1168_v51, 5  ;;  %v11220_v6 = vshll.u32 %v1164_v31, 8 }
  0x9d   : > { %18158 = vst [vmem:[#allocation18_spill] sm:$0xff] %v11208_v32  ;;  %v1548_v33 = vand.u32 2147483647, %v1547_v25  ;;  %v782_v17 = vsel %vm774_vm0, %v765_v9, %v781_v53  ;;  %v785_v56 = vsel %vm775_vm14, %v771_v58, 1326507024  ;;  %v795_v13 = vmul.u32 %v11152_v62, %v779_v42 }
  0x9e   : > { %vm2807_vm10 = vcmp.eq.s32.totalorder %v11150_v15, 2  ;;  %v783_v45 = vsel %vm773_vm5, %v780_v60, %v782_v17  ;;  %v786_v51 = vsel %vm774_vm0, %v768_v26, %v785_v56  ;;  %v1171_v47 = vsub.s32 32, %v1170_v29 }
  0x9f   : > { %v1551_v28 = vmul.f32 %v1550_v16, %v1548_v33  ;;  %v1173_v31 = vshll.u32 %v17549_v59, %v1170_v29  ;;  %vm2804_vm11 = vcmp.eq.s32.totalorder %v11150_v15, 0  ;;  %v787_v9 = vsel %vm773_vm5, %v784_v46, %v786_v51 }
  0xa0   : > { %v11237_v58 = vmul.u32.u64.low %v11152_v62, %v783_v45  ;;  %v11238_v35 = vmul.u32.u64.high %v11152_v62, %v783_v45, %v11237_v58  ;;  %v11242_v43 = vmul.u32.u64.low %v11152_v62, %v787_v9  ;;  %v11243_v25 = vmul.u32.u64.high %v11152_v62, %v787_v9, %v11242_v43 }
  0xa1   : > { %v1552_v49 = vxor.u32 2147483648, %v1551_v28  ;;  %v1172_v26 = vshrl.u32 %v17549_v59, %v1171_v47  ;;  %v1174_v16 = vshrl.u32 %v17559_v61, %v1171_v47  ;;  %v1176_v27 = vshll.u32 %v17559_v61, %v1170_v29 }
  0xa2   : > { %v1177_v19 = vshrl.u32 %v17555_v63, %v1171_v47  ;;  %v1179_v33 = vshll.u32 %v17555_v63, %v1170_v29  ;;  %v1180_v62 = vshrl.u32 %v17557_v5, %v1171_v47  ;;  %v1182_v53 = vshll.u32 %v17557_v5, %v1170_v29 }
  0xa3   : > { %v1553_v30 = vsel %vm1470_vm6, %v1552_v49, %v1551_v28  ;;  %v1175_v60 = vor.u32 %v1174_v16, %v1173_v31  ;;  %v798_v46 = vadd.s32 1, %v11238_v35  ;;  %v1183_v28 = vshrl.u32 %v17561_v7, %v1171_v47 }
  0xa4   : > { %v1556_v42 = vsel %vm11117_vm7, %v10802_v50, %v1553_v30  ;;  %v1178_v17 = vor.u32 %v1177_v19, %v1176_v27  ;;  %vm2803_vm6 = vcmp.lt.s32.totalorder %v11150_v15, 2  ;;  %vm797_vm4 = vc.u32 %v11243_v25, %v11237_v58 }
  0xa5   : > { %9642 = vcosq.f32 %v1556_v42  ;;  %v1181_v56 = vor.u32 %v1180_v62, %v1179_v33  ;;  %v11263_v39 = vmul.f32 8.0, %v11144_v10  ;;  %v799_v45 = vsel %vm797_vm4, %v798_v46, %v11238_v35 }
  0xa6   : > { %9644 = vsinq.f32 %v1556_v42  ;;  %v1184_v51 = vor.u32 %v1183_v28, %v1182_v53  ;;  %v1185_v31 = vshll.u32 %v17561_v7, %v1170_v29  ;;  %v1186_v49 = vshrl.u32 %v17545_v18, %v1171_v47 }
  0xa7   : > { %18159 = vst [vmem:[#allocation19_spill] sm:$0xff] %v11263_v39  ;;  %v800_v9 = vadd.s32 %v799_v45, %v795_v13  ;;  %vm1188_vm7 = vcmp.lt.s32.totalorder %v11218_v0, 1  ;;  %vm1189_vm8 = vcmp.lt.s32.totalorder %v11218_v0, 2  ;;  %vm1190_vm12 = vcmp.lt.s32.totalorder %v11218_v0, 3 }
  0xa8   : > { %v1187_v43 = vor.u32 %v1186_v49, %v1185_v31  ;;  %vm1191_vm2 = vcmp.lt.s32.totalorder %v11218_v0, 4  ;;  %v1192_v16 = vsel %vm1188_vm7, %v1172_v26, %v1175_v60  ;;  %v1196_v30 = vsel %vm1188_vm7, %v1175_v60, %v1178_v17 }
  0xa9   : > { %v801_v27 = vadd.s32 536870912, %v800_v9  ;;  %v1193_v19 = vsel %vm1191_vm2, %v1181_v56, 2102212464  ;;  %v1197_v35 = vsel %vm1191_vm2, %v1184_v51, 920167782  ;;  %v1200_v33 = vsel %vm1188_vm7, %v1178_v17, %v1181_v56 }
  0xaa   : > { %v2809_v29 = vsel %vm2807_vm10, %v1152_v21, %v11181_v20  ;;  %v1194_v13 = vsel %vm1190_vm12, %v1178_v17, %v1193_v19  ;;  %v1198_v47 = vsel %vm1190_vm12, %v1181_v56, %v1197_v35  ;;  %v1201_v42 = vsel %vm1191_vm2, %v1187_v43, 1326507024 }
  0xab   : > { %v2806_v26 = vsel %vm2804_vm11, %v11178_v11, %v1149_v52  ;;  %v802_v60 = vshrl.u32 %v801_v27, 30  ;;  %v1199_v62 = vsel %vm1189_vm8, %v1196_v30, %v1198_v47  ;;  %v1202_v21 = vsel %vm1190_vm12, %v1184_v51, %v1201_v42 }
  0xac   : > { %v1195_v53 = vsel %vm1189_vm8, %v1192_v16, %v1194_v13  ;;  %v1203_v46 = vsel %vm1189_vm8, %v1200_v33, %v1202_v21  ;;  %v11295_v17 = vmul.u32.u64.low %v11220_v6, %v1199_v62  ;;  %v11296_v20 = vmul.u32.u64.high %v11220_v6, %v1199_v62, %v11295_v17 }
  0xad   : > { %v803_v28 = vshll.u32 %v802_v60, 30  ;;  %v11300_v52 = vmul.u32.u64.low %v11220_v6, %v1203_v46  ;;  %v11301_v11 = vmul.u32.u64.high %v11220_v6, %v1203_v46, %v11300_v52  ;;  %v191_v56 = vmul.f32 16.0, %v11144_v10 }
  0xae   : > { %vm1560_vm1 = vweird.f32 %v10802_v50  ;;  %vm3215_vm13 = vcmp.lt.s32.totalorder %v11157_v12, 2  ;;  %v17543_v45 = vrot.slane %v11160_v54, 2  ;;  %v227_v0 = vrot.slane %v11263_v39, 7 }
  0xaf   : > { %vm3216_vm14 = vcmp.eq.s32.totalorder %v11157_v12, 0  ;;  %vm3219_vm0 = vcmp.eq.s32.totalorder %v11157_v12, 2  ;;  %v11310_v51 = vsub.s32 %v800_v9, %v803_v28  ;;  %v1211_v31 = vmul.u32 %v11220_v6, %v1195_v53 }
  0xb0   : > { %vm1563_vm5 = vcmp.lt.s32.totalorder %v11155_v55, 2  ;;  %v2810_v49 = vsel %vm2803_vm6, %v2806_v26, %v2809_v29  ;;  %v1214_v43 = vadd.s32 1, %v11296_v20  ;;  %v195_v16 = vmul.f32 32.0, %v11144_v10 }
  0xb1   : > { %vm1567_vm10 = vcmp.eq.s32.totalorder %v11155_v55, 2  ;;  %v806_v27 = vsub.s32 0, %v11310_v51  ;;  %vm1213_vm11 = vc.u32 %v11301_v11, %v11295_v17  ;;  %v239_v9 = vrot.slane %v191_v56, 4 }
  0xb2   : > { %v9643_v30 = vpop.eup %9642  ;;  %vm1564_vm4 = vcmp.eq.s32.totalorder %v11155_v55, 0  ;;  %v1215_v15 = vsel %vm1213_vm11, %v1214_v43, %v11296_v20  ;;  %vm18160_vm6 = vcmask 1040384   ;;  %v11329_v29 = vsel %vm1144_vm3, nan, %v2810_v49 }
  0xb3   : > { %v9645_v19 = vpop.eup %9644  ;;  %v1568_v6 = vxor.u32 2147483648, %v9643_v30  ;;  %v298_v35 = vsel %vm18160_vm6, %v17543_v45, %v227_v0  ;;  %18161 = vst [vmem:[#allocation20_spill] sm:$0xff] %v11329_v29  ;;  %v9138_v13 = vmin.u32 %v806_v27, %v11310_v51  ;;  %v1216_v47 = vadd.s32 %v1215_v15, %v1211_v31 }
  0xb4   : > { %v1565_v33 = vxor.u32 2147483648, %v9645_v19  ;;  %v826_v62 = vsub.s32 4, %v802_v60  ;;  %v251_v21 = vrot.slane %v195_v16, 1  ;;  %vm18162_vm7 = vcmask 1043456  }
  0xb5   : > { %v1569_v42 = vsel %vm1567_vm10, %v1568_v6, %v9645_v19  ;;  %v3221_v26 = vsel %vm3219_vm0, %v1568_v6, %v9645_v19  ;;  %v808_v20 = vclz %v9138_v13  ;;  %v303_v28 = vsel %vm18162_vm7, %v298_v35, %v239_v9 }
  0xb6   : > { %v1566_v53 = vsel %vm1564_vm4, %v9643_v30, %v1565_v33  ;;  %v3218_v46 = vsel %vm3216_vm14, %v9643_v30, %v1565_v33  ;;  %v17542_v56 = vrot.slane %v11329_v29, 3  ;;  %v11343_v0 = vmul.f32 2.0, %v11144_v10 }
  0xb7   : > { %v1570_v38 = vsel %vm1563_vm5, %v1566_v53, %v1569_v42  ;;  %v3222_v52 = vsel %vm3215_vm13, %v3218_v46, %v3221_v26  ;;  %v9139_v43 = vadd.s32 4294967294, %v808_v20  ;;  %v1217_v16 = vadd.s32 536870912, %v1216_v47 }
  0xb8   : > { %v11347_v31 = vsel %vm1560_vm1, nan, %v1570_v38  ;;  %v11351_v49 = vsel %vm1560_vm1, nan, %v3222_v52  ;;  %vm742_vm3 = vcmp.lt.s32.totalorder %v11089_v23, 0  ;;  %v796_v12 = vadd.s32 %v11237_v58, %v11243_v25 }
  0xb9   : > { %18163 = vst [vmem:[#allocation21_spill] sm:$0xff] %v11347_v31  ;;  %18164 = vst [vmem:[#allocation22_spill] sm:$0xff] %v11351_v49  ;;  %v3710_v55 = vrot.slane %v11351_v49, 3  ;;  %vm18165_vm8 = vcmask 1046528   ;;  %vm9140_vm12 = vcmp.lt.s32.totalorder %v9139_v43, 0  ;;  %v827_v27 = vsel %vm742_vm3, %v826_v62, %v802_v60 }
  0xba   : > { %v11358_v30 = vsel %vm18165_vm8, %v303_v28, %v251_v21  ;;  %v1218_v9 = vshrl.u32 %v1217_v16, 30  ;;  %v263_v50 = vrot.slane %v11144_v10, 1  ;;  %vm18166_vm2 = vcmask 1044480  }
  0xbb   : > { %v3711_v19 = vsel %vm18166_vm2, %v17542_v56, %v3710_v55  ;;  %v811_v6 = vsel %vm9140_vm12, 0, %v9139_v43  ;;  %v17544_v15 = vand.u32 2147483647, %v11358_v30  ;;  %v951_v35 = vand.u32 2139095040, %v11358_v30  ;;  %vm18173_vm14 = vmmov %vm18166_vm2 }
  0xbc   : > { %v18167_v58 = vmov 0.0   ;;  %v812_v33 = vsub.s32 32, %v811_v6  ;;  %v813_v13 = vshll.u32 %v11310_v51, %v811_v6  ;;  %v816_v42 = vsub.s32 4294967266, %v811_v6 }
  0xbd   : > { %v11369_v25 = vpack.c.bf16 %v18167_v58, %v3711_v19  ;;  %v1219_v60 = vshll.u32 %v1218_v9, 30  ;;  %v952_v26 = vshrl.u32 %v951_v35, 23  ;;  %v18169_v10 = vand.u32 2147483647, %v11089_v23 }
  0xbe   : > { %v814_v53 = vshrl.u32 %v796_v12, %v812_v33  ;;  %v817_v46 = vadd.s32 127, %v816_v42  ;;  %v271_v51 = vrot.slane %v11343_v0, 6  ;;  %vm18172_vm13 = vcmask 1041408  }
  0xbf   : > { %18168 = vst [vmem:[#allocation23_spill] sm:$0xff] %v11369_v25  ;;  %9265 = vmatprep.subr.msk.bf16.mxu1 %vm11096_vm9, %v11369_v25  ;;  %vm11377_vm1 = vcmp.le.f32.partialorder %v18169_v10, 0.7853982  ;;  %v1220_v28 = vsub.s32 %v1216_v47, %v1219_v60  ;;  %v9145_v38 = vadd.s32 4294967169, %v952_v26  ;;  %v313_v16 = vsel %vm18172_vm13, %v251_v21, %v263_v50 }
  0xc0   : > { %v829_v20 = vsel %vm11377_vm1, 0, %v827_v27  ;;  %v815_v52 = vor.u32 %v814_v53, %v813_v13  ;;  %v818_v43 = vshll.u32 %v817_v46, 23  ;;  %v955_v55 = vand.u32 8388607, %v17544_v15 }
  0xc1   : > { %v1222_v19 = vsub.s32 0, %v1220_v28  ;;  %v958_v6 = vadd.s32 1, %v9145_v38  ;;  %v833_v12 = vadd.s32 3, %v829_v20  ;;  %v1242_v42 = vsub.s32 4, %v1218_v9 }
  0xc2   : > { %v819_v35 = vor.u32 4788187, %v818_v43  ;;  %v822_v10 = vcvt.s32.f32 %v815_v52  ;;  %v11388_v27 = vsel %vm18173_vm14, %v313_v16, %v271_v51  ;;  %v956_v60 = vor.u32 8388608, %v955_v55 }
  0xc3   : > { %v9154_v33 = vmin.u32 %v1222_v19, %v1220_v28  ;;  %vm959_vm0 = vcmp.gt.s32.totalorder %v958_v6, 0  ;;  %vm1158_vm5 = vcmp.lt.s32.totalorder %v11103_v22, 0  ;;  %v1212_v21 = vadd.s32 %v11295_v17, %v11301_v11 }
  0xc4   : > { %v820_v47 = vand.u32 2147483647, %v819_v35  ;;  %v11393_v13 = vand.u32 3, %v829_v20  ;;  %v11395_v53 = vand.u32 3, %v833_v12  ;;  %v960_v46 = vsel %vm959_vm0, %v958_v6, 0 }
  0xc5   : > { %v1224_v50 = vclz %v9154_v33  ;;  %v1367_v38 = vand.u32 2139095040, %v11388_v27  ;;  %v1243_v51 = vsel %vm1158_vm5, %v1242_v42, %v1218_v9  ;;  %v962_v43 = vand.u32 31, %v960_v46 }
  0xc6   : > { %v823_v26 = vmul.f32 %v822_v10, %v820_v47  ;;  %v961_v19 = vshrl.u32 %v960_v46, 5  ;;  %v11401_v35 = vshll.u32 %v956_v60, 8  ;;  %v18174_v47 = vand.u32 2147483647, %v11103_v22 }
  0xc7   : > { %v9155_v52 = vadd.s32 4294967294, %v1224_v50  ;;  %v1368_v17 = vshrl.u32 %v1367_v38, 23  ;;  %v963_v11 = vsub.s32 32, %v962_v43  ;;  %v965_v20 = vshll.u32 %v17549_v59, %v962_v43 }
  0xc8   : > { %v824_v55 = vxor.u32 2147483648, %v823_v26  ;;  %v968_v6 = vshll.u32 %v17559_v61, %v962_v43  ;;  %v971_v9 = vshll.u32 %v17555_v63, %v962_v43  ;;  %v974_v33 = vshll.u32 %v17557_v5, %v962_v43 }
  0xc9   : > { %vm9156_vm10 = vcmp.lt.s32.totalorder %v9155_v52, 0  ;;  %vm11414_vm11 = vcmp.le.f32.partialorder %v18174_v47, 0.7853982  ;;  %v975_v15 = vshrl.u32 %v17561_v7, %v963_v11  ;;  %v977_v16 = vshll.u32 %v17561_v7, %v962_v43 }
  0xca   : > { %v825_v10 = vsel %vm742_vm3, %v824_v55, %v823_v26  ;;  %v1227_v12 = vsel %vm9156_vm10, 0, %v9155_v52  ;;  %v964_v26 = vshrl.u32 %v17549_v59, %v963_v11  ;;  %v966_v52 = vshrl.u32 %v17559_v61, %v963_v11 }
  0xcb   : > { %v828_v42 = vsel %vm11377_vm1, %v11089_v23, %v825_v10  ;;  %v1228_v50 = vsub.s32 32, %v1227_v12  ;;  %v1229_v46 = vshll.u32 %v1220_v28, %v1227_v12  ;;  %v1232_v38 = vsub.s32 4294967266, %v1227_v12 }
  0xcc   : > { %9646 = vcosq.f32 %v828_v42  ;;  %v969_v55 = vshrl.u32 %v17555_v63, %v963_v11  ;;  %v972_v10 = vshrl.u32 %v17557_v5, %v963_v11  ;;  %v967_v45 = vor.u32 %v966_v52, %v965_v20 }
  0xcd   : > { %9648 = vsinq.f32 %v828_v42  ;;  %v1230_v56 = vshrl.u32 %v1212_v21, %v1228_v50  ;;  %v1233_v62 = vadd.s32 127, %v1232_v38  ;;  %v18177_v49 = vmov 1326507024  }
  0xce   : > { %v970_v47 = vor.u32 %v969_v55, %v968_v6  ;;  %v973_v18 = vor.u32 %v972_v10, %v971_v9  ;;  %v978_v59 = vshrl.u32 %v18177_v49, %v963_v11  ;;  %v976_v24 = vor.u32 %v975_v15, %v974_v33 }
  0xcf   : > { %v1231_v28 = vor.u32 %v1230_v56, %v1229_v46  ;;  %v1234_v12 = vshll.u32 %v1233_v62, 23  ;;  %vm980_vm4 = vcmp.lt.s32.totalorder %v961_v19, 1  ;;  %vm981_vm6 = vcmp.lt.s32.totalorder %v961_v19, 2 }
  0xd0   : > { %vm982_vm7 = vcmp.lt.s32.totalorder %v961_v19, 3  ;;  %v979_v50 = vor.u32 %v978_v59, %v977_v16  ;;  %vm983_vm3 = vcmp.lt.s32.totalorder %v961_v19, 4  ;;  %v984_v38 = vsel %vm980_vm4, %v964_v26, %v967_v45 }
  0xd1   : > { %v1235_v42 = vor.u32 4788187, %v1234_v12  ;;  %v1238_v21 = vcvt.s32.f32 %v1231_v28  ;;  %v985_v20 = vsel %vm983_vm3, %v973_v18, 2102212464  ;;  %v988_v6 = vsel %vm980_vm4, %v967_v45, %v970_v47 }
  0xd2   : > { %v989_v52 = vsel %vm983_vm3, %v976_v24, 920167782  ;;  %v986_v43 = vsel %vm982_vm7, %v970_v47, %v985_v20  ;;  %v992_v9 = vsel %vm980_vm4, %v970_v47, %v973_v18  ;;  %v1245_v15 = vsel %vm11414_vm11, 0, %v1243_v51 }
  0xd3   : > { %v1236_v55 = vand.u32 2147483647, %v1235_v42  ;;  %v990_v56 = vsel %vm982_vm7, %v973_v18, %v989_v52  ;;  %v993_v33 = vsel %vm983_vm3, %v979_v50, 1326507024  ;;  %v9161_v46 = vadd.s32 4294967169, %v1368_v17 }
  0xd4   : > { %v991_v11 = vsel %vm981_vm6, %v988_v6, %v990_v56  ;;  %vm2495_vm8 = vcmp.eq.s32.totalorder %v11393_v13, 0  ;;  %v994_v59 = vsel %vm982_vm7, %v976_v24, %v993_v33  ;;  %vm832_vm12 = vweird.f32 %v11089_v23 }
  0xd5   : > { %v1239_v62 = vmul.f32 %v1238_v21, %v1236_v55  ;;  %v11433_v45 = vmul.u32.u64.low %v11401_v35, %v991_v11  ;;  %v11434_v16 = vmul.u32.u64.high %v11401_v35, %v991_v11, %v11433_v45  ;;  %vm835_vm2 = vcmp.lt.s32.totalorder %v11395_v53, 2 }
  0xd6   : > { %v987_v18 = vsel %vm981_vm6, %v984_v38, %v986_v43  ;;  %v995_v51 = vsel %vm981_vm6, %v992_v9, %v994_v59  ;;  %v1374_v26 = vadd.s32 1, %v9161_v46  ;;  %vm836_vm1 = vcmp.eq.s32.totalorder %v11395_v53, 0 }
  0xd7   : > { %v1240_v17 = vxor.u32 2147483648, %v1239_v62  ;;  %v11443_v10 = vmul.u32.u64.low %v11401_v35, %v995_v51  ;;  %v11444_v24 = vmul.u32.u64.high %v11401_v35, %v995_v51, %v11443_v10  ;;  %vm839_vm13 = vcmp.eq.s32.totalorder %v11395_v53, 2 }
  0xd8   : > { %v1249_v47 = vadd.s32 3, %v1245_v15  ;;  %v18178_v28 = vand.u32 2147483647, %v11388_v27  ;;  %vm1375_vm14 = vcmp.gt.s32.totalorder %v1374_v26, 0  ;;  %vm2494_vm0 = vcmp.lt.s32.totalorder %v11393_v13, 2 }
  0xd9   : > { %v9647_v42 = vpop.eup %9646  ;;  %v1241_v19 = vsel %vm1158_vm5, %v1240_v17, %v1239_v62  ;;  %v1003_v21 = vmul.u32 %v11401_v35, %v987_v18  ;;  %v1006_v50 = vadd.s32 1, %v11434_v16  ;;  %v1376_v38 = vsel %vm1375_vm14, %v1374_v26, 0 }
  0xda   : > { %v11449_v12 = vand.u32 8388607, %v18178_v28  ;;  %v9649_v20 = vpop.eup %9648  ;;  %v840_v6 = vxor.u32 2147483648, %v9647_v42  ;;  %v1244_v52 = vsel %vm11414_vm11, %v11103_v22, %v1241_v19  ;;  %vm2498_vm10 = vcmp.eq.s32.totalorder %v11393_v13, 2  ;;  %v10478_v13 = vld [vmem:[%s10655_s28 + $0x8] sm:$0x3f] }
  0xdb   : > { %v1378_v55 = vand.u32 31, %v1376_v38  ;;  %v837_v43 = vxor.u32 2147483648, %v9649_v20  ;;  %9650 = vcosq.f32 %v1244_v52  ;;  %v11460_v56 = vand.u32 3, %v1245_v15 }
  0xdc   : > { %vm1005_vm5 = vc.u32 %v11444_v24, %v11433_v45  ;;  %v841_v35 = vsel %vm839_vm13, %v840_v6, %v9649_v20  ;;  %9652 = vsinq.f32 %v1244_v52  ;;  %v11466_v9 = vand.u32 3, %v1249_v47 }
  0xdd   : > { %v1007_v11 = vsel %vm1005_vm5, %v1006_v50, %v11434_v16  ;;  %v838_v60 = vsel %vm836_vm1, %v9647_v42, %v837_v43  ;;  %v1372_v46 = vor.u32 8388608, %v11449_v12  ;;  %v1379_v62 = vsub.s32 32, %v1378_v55 }
  0xde   : > { %v1008_v33 = vadd.s32 %v1007_v11, %v1003_v21  ;;  %v842_v15 = vsel %vm835_vm2, %v838_v60, %v841_v35  ;;  %v18179_v59 = vmov 683565275   ;;  %v1384_v51 = vshll.u32 %v17559_v61, %v1378_v55 }
  0xdf   : > { %v1381_v18 = vshll.u32 %v18179_v59, %v1378_v55  ;;  %v202_v26 = vrot.slane %v10661_v2, 5  ;;  %v11479_v17 = vsel %vm832_vm12, nan, %v842_v15  ;;  %v2500_v16 = vsel %vm2498_vm10, %v840_v6, %v9649_v20 }
  0xe0   : > { %18180 = vst [vmem:[#allocation24_spill] sm:$0xff] %v11479_v17  ;;  %v1009_v10 = vadd.s32 536870912, %v1008_v33  ;;  %v11483_v47 = vshrl.u32 %v1376_v38, 5  ;;  %vm1255_vm11 = vcmp.eq.s32.totalorder %v11466_v9, 2  ;;  %v2497_v53 = vsel %vm2495_vm8, %v9647_v42, %v837_v43 }
  0xe1   : > { %vm2910_vm4 = vcmp.eq.s32.totalorder %v11460_v56, 2  ;;  %v1382_v28 = vshrl.u32 %v17559_v61, %v1379_v62  ;;  %v1385_v2 = vshrl.u32 %v17555_v63, %v1379_v62  ;;  %v1387_v12 = vshll.u32 %v17555_v63, %v1378_v55 }
  0xe2   : > { %vm1252_vm6 = vcmp.eq.s32.totalorder %v11466_v9, 0  ;;  %vm2907_vm7 = vcmp.eq.s32.totalorder %v11460_v56, 0  ;;  %v11494_v19 = vshrl.u32 %v1009_v10, 30  ;;  %v1388_v21 = vshrl.u32 %v17557_v5, %v1379_v62 }
  0xe3   : > { %v1390_v50 = vshll.u32 %v17557_v5, %v1378_v55  ;;  %v1391_v42 = vshrl.u32 %v17561_v7, %v1379_v62  ;;  %vm1251_vm3 = vcmp.lt.s32.totalorder %v11466_v9, 2  ;;  %vm2906_vm8 = vcmp.lt.s32.totalorder %v11460_v56, 2 }
  0xe4   : > { %v1383_v38 = vor.u32 %v1382_v28, %v1381_v18  ;;  %v1386_v20 = vor.u32 %v1385_v2, %v1384_v51  ;;  %v1393_v6 = vshll.u32 %v17561_v7, %v1378_v55  ;;  %v1394_v52 = vshrl.u32 %v18177_v49, %v1379_v62 }
  0xe5   : > { %vm1248_vm2 = vweird.f32 %v11103_v22  ;;  %v1011_v43 = vshll.u32 %v11494_v19, 30  ;;  %v1389_v35 = vor.u32 %v1388_v21, %v1387_v12  ;;  %v1392_v11 = vor.u32 %v1391_v42, %v1390_v50 }
  0xe6   : > { %vm17736_vm1 = vcmask 1042432   ;;  %v2501_v60 = vsel %vm2494_vm0, %v2497_v53, %v2500_v16  ;;  %v1395_v15 = vor.u32 %v1394_v52, %v1393_v6  ;;  %vm1396_vm13 = vcmp.lt.s32.totalorder %v11483_v47, 1 }
  0xe7   : > { %vm1398_vm14 = vcmp.lt.s32.totalorder %v11483_v47, 3  ;;  %v11509_v18 = vsub.s32 %v1008_v33, %v1011_v43  ;;  %v1380_v55 = vshrl.u32 %v18179_v59, %v1379_v62  ;;  %vm1397_vm10 = vcmp.lt.s32.totalorder %v11483_v47, 2 }
  0xe8   : > { %vm1399_vm5 = vcmp.lt.s32.totalorder %v11483_v47, 4  ;;  %v1404_v51 = vsel %vm1396_vm13, %v1383_v38, %v1386_v20  ;;  %v1412_v28 = vshll.u32 %v1372_v46, 8  ;;  %v287_v16 = vsel %vm17736_vm1, %v10478_v13, %v202_v26  ;;  %v9651_v62 = vpop.eup %9650 }
  0xe9   : > { %v1405_v10 = vsel %vm1399_vm5, %v1392_v11, 920167782  ;;  %v1014_v53 = vsub.s32 0, %v11509_v18  ;;  %v1401_v2 = vsel %vm1399_vm5, %v1389_v35, 2102212464  ;;  %vm17733_vm0 = vcmask 1045504   ;;  %v9653_v26 = vpop.eup %9652 }
  0xea   : > { %v1406_v33 = vsel %vm1398_vm14, %v1389_v35, %v1405_v10  ;;  %v11523_v12 = vsel %vm832_vm12, nan, %v2501_v60  ;;  %v1408_v46 = vsel %vm1396_vm13, %v1386_v20, %v1389_v35  ;;  %v1409_v50 = vsel %vm1399_vm5, %v1395_v15, 1326507024 }
  0xeb   : > { %18181 = vst [vmem:[#allocation25_spill] sm:$0xff] %v11523_v12  ;;  %v1407_v21 = vsel %vm1397_vm10, %v1404_v51, %v1406_v33  ;;  %v1256_v42 = vxor.u32 2147483648, %v9651_v62  ;;  %v9146_v6 = vmin.u32 %v1014_v53, %v11509_v18  ;;  %v1400_v52 = vsel %vm1396_vm13, %v1380_v55, %v1383_v38 }
  0xec   : > { %v1410_v43 = vsel %vm1398_vm14, %v1392_v11, %v1409_v50  ;;  %v1253_v23 = vxor.u32 2147483648, %v9653_v26  ;;  %v1402_v60 = vsel %vm1398_vm14, %v1386_v20, %v1401_v2  ;;  %v17553_v55 = vrot.slane %v11523_v12, 3 }
  0xed   : > { %v11536_v10 = vmul.u32.u64.low %v1412_v28, %v1407_v21  ;;  %v11537_v51 = vmul.u32.u64.high %v1412_v28, %v1407_v21, %v11536_v10  ;;  %v1257_v35 = vsel %vm1255_vm11, %v1256_v42, %v9653_v26  ;;  %v2912_v15 = vsel %vm2910_vm4, %v1256_v42, %v9653_v26 }
  0xee   : > { %v1016_v13 = vclz %v9146_v6  ;;  %v1411_v38 = vsel %vm1397_vm10, %v1408_v46, %v1410_v43  ;;  %v1254_v11 = vsel %vm1252_vm6, %v9651_v62, %v1253_v23  ;;  %v2909_v20 = vsel %vm2907_vm7, %v9651_v62, %v1253_v23 }
  0xef   : > { %v18182_v53 = vrot.slane %v10663_v3, 2  ;;  %v1258_v33 = vsel %vm1251_vm3, %v1254_v11, %v1257_v35  ;;  %v2913_v21 = vsel %vm2906_vm8, %v2909_v20, %v2912_v15  ;;  %v1403_v50 = vsel %vm1397_vm10, %v1400_v52, %v1402_v60 }
  0xf0   : > { %v9147_v46 = vadd.s32 4294967294, %v1016_v13  ;;  %v11564_v62 = vsel %vm1248_vm2, nan, %v1258_v33  ;;  %v11568_v26 = vsel %vm1248_vm2, nan, %v2913_v21  ;;  %v1004_v56 = vadd.s32 %v11433_v45, %v11444_v24 }
  0xf1   : > { %v11554_v2 = vsel %vm17733_vm0, %v287_v16, %v18182_v53  ;;  %18183 = vst [vmem:[#allocation26_spill] sm:$0xff] %v11564_v62  ;;  %18184 = vst [vmem:[#allocation27_spill] sm:$0xff] %v11568_v26  ;;  %v11570_v16 = vmul.u32.u64.low %v1412_v28, %v1411_v38  ;;  %v11571_v42 = vmul.u32.u64.high %v1412_v28, %v1411_v38, %v11570_v16  ;;  %v3704_v9 = vrot.slane %v11568_v26, 3 }
  0xf2   : > { %vm9148_vm12 = vcmp.lt.s32.totalorder %v9147_v46, 0  ;;  %v1422_v47 = vadd.s32 1, %v11537_v51  ;;  %v1034_v52 = vsub.s32 4, %v11494_v19  ;;  %v1419_v43 = vmul.u32 %v1412_v28, %v1403_v50 }
  0xf3   : > { %v1019_v6 = vsel %vm9148_vm12, 0, %v9147_v46  ;;  %v431_v23 = vand.u32 2139095040, %v11554_v2  ;;  %vm18185_vm11 = vcmask 1044480   ;;  %vm1421_vm4 = vc.u32 %v11571_v42, %v11536_v10 }
  0xf4   : > { %v3705_v22 = vsel %vm18185_vm11, %v17553_v55, %v3704_v9  ;;  %v1020_v60 = vsub.s32 32, %v1019_v6  ;;  %v1021_v35 = vshll.u32 %v11509_v18, %v1019_v6  ;;  %v1024_v15 = vsub.s32 4294967266, %v1019_v6 }
  0xf5   : > { %v11584_v13 = vpack.c.bf16 %v18167_v58, %v3705_v22  ;;  %vm950_vm6 = vcmp.lt.s32.totalorder %v11358_v30, 0  ;;  %v1423_v28 = vsel %vm1421_vm4, %v1422_v47, %v11537_v51  ;;  %v17554_v11 = vand.u32 2147483647, %v11554_v2 }
  0xf6   : > { %v1022_v45 = vshrl.u32 %v1004_v56, %v1020_v60  ;;  %v1025_v24 = vadd.s32 127, %v1024_v15  ;;  %v1035_v18 = vsel %vm950_vm6, %v1034_v52, %v11494_v19  ;;  %v1424_v38 = vadd.s32 %v1423_v28, %v1419_v43  ;;  %v10479_v43 = vld [vmem:[%s10655_s28 + $0x18] sm:$0x3f] }
  0xf7   : > { %18186 = vst [vmem:[#allocation28_spill] sm:$0xff] %v11584_v13  ;;  %9258 = vmatpush1.bf16.msk.msra.mxu0 %vm11096_vm9, %v11584_v13  ;;  %v432_v20 = vshrl.u32 %v431_v23, 23  ;;  %v18187_v21 = vand.u32 2147483647, %v11358_v30  ;;  %v204_v16 = vrot.slane %v10707_v37, 5  ;;  %v18190_v37 = vrot.slane %v10668_v8, 2 }
  0xf8   : > { %v1023_v53 = vor.u32 %v1022_v45, %v1021_v35  ;;  %v1026_v33 = vshll.u32 %v1025_v24, 23  ;;  %v1425_v51 = vadd.s32 536870912, %v1424_v38  ;;  %v435_v6 = vand.u32 8388607, %v17554_v11 }
  0xf9   : > { %vm11599_vm7 = vcmp.le.f32.partialorder %v18187_v21, 0.7853982  ;;  %v9125_v50 = vadd.s32 4294967169, %v432_v20  ;;  %v289_v23 = vsel %vm17736_vm1, %v10479_v43, %v204_v16  ;;  %vm1366_vm8 = vcmp.lt.s32.totalorder %v11388_v27, 0 }
  0xfa   : > { %v1027_v9 = vor.u32 4788187, %v1026_v33  ;;  %v1030_v56 = vcvt.s32.f32 %v1023_v53  ;;  %v1037_v19 = vsel %vm11599_vm7, 0, %v1035_v18  ;;  %v1426_v47 = vshrl.u32 %v1425_v51, 30 }
  0xfb   : > { %v438_v52 = vadd.s32 1, %v9125_v50  ;;  %v1041_v60 = vadd.s32 3, %v1037_v19  ;;  %v11613_v24 = vsel %vm17733_vm0, %v289_v23, %v18190_v37  ;;  %v436_v20 = vor.u32 8388608, %v435_v6 }
  0xfc   : > { %v1028_v22 = vand.u32 2147483647, %v1027_v9  ;;  %v1427_v35 = vshll.u32 %v1426_v47, 30  ;;  %v1450_v18 = vsub.s32 4, %v1426_v47  ;;  %v639_v16 = vand.u32 2139095040, %v11613_v24 }
  0xfd   : > { %vm439_vm3 = vcmp.gt.s32.totalorder %v438_v52, 0  ;;  %v11618_v51 = vand.u32 3, %v1041_v60  ;;  %v18191_v46 = vand.u32 2147483647, %v11388_v27  ;;  %vm1040_vm4 = vweird.f32 %v11358_v30 }
  0xfe   : > { %v1031_v15 = vmul.f32 %v1030_v56, %v1028_v22  ;;  %v440_v45 = vsel %vm439_vm3, %v438_v52, 0  ;;  %v11615_v28 = vsub.s32 %v1424_v38, %v1427_v35  ;;  %v1420_v38 = vadd.s32 %v11536_v10, %v11571_v42 }
  0xff   : > { %v442_v53 = vand.u32 31, %v440_v45  ;;  %v11627_v56 = vand.u32 3, %v1037_v19  ;;  %v1451_v23 = vsel %vm1366_vm8, %v1450_v18, %v1426_v47  ;;  %v11635_v22 = vshll.u32 %v436_v20, 8 }
 0x100   : > { %v1032_v21 = vxor.u32 2147483648, %v1031_v15  ;;  %v1430_v50 = vsub.s32 0, %v11615_v28  ;;  %v441_v19 = vshrl.u32 %v440_v45, 5  ;;  %vm11642_vm2 = vcmp.le.f32.partialorder %v18191_v46, 0.7853982 }
 0x101   : > { %v443_v6 = vsub.s32 32, %v442_v53  ;;  %v445_v60 = vshll.u32 %v18179_v59, %v442_v53  ;;  %v448_v35 = vshll.u32 %v17559_v61, %v442_v53  ;;  %v451_v10 = vshll.u32 %v17555_v63, %v442_v53 }
 0x102   : > { %v1033_v9 = vsel %vm950_vm6, %v1032_v21, %v1031_v15  ;;  %v9162_v43 = vmin.u32 %v1430_v50, %v11615_v28  ;;  %v640_v15 = vshrl.u32 %v639_v16, 23  ;;  %v457_v16 = vshll.u32 %v17561_v7, %v442_v53 }
 0x103   : > { %v1036_v52 = vsel %vm11599_vm7, %v11358_v30, %v1033_v9  ;;  %v444_v47 = vshrl.u32 %v18179_v59, %v443_v6  ;;  %v446_v18 = vshrl.u32 %v17559_v61, %v443_v6  ;;  %v449_v20 = vshrl.u32 %v17555_v63, %v443_v6 }
 0x104   : > { %9654 = vcosq.f32 %v1036_v52  ;;  %v1432_v42 = vclz %v9162_v43  ;;  %v452_v21 = vshrl.u32 %v17557_v5, %v443_v6  ;;  %v454_v9 = vshll.u32 %v17557_v5, %v442_v53 }
 0x105   : > { %9656 = vsinq.f32 %v1036_v52  ;;  %v455_v45 = vshrl.u32 %v17561_v7, %v443_v6  ;;  %v447_v52 = vor.u32 %v446_v18, %v445_v60  ;;  %v450_v43 = vor.u32 %v449_v20, %v448_v35 }
 0x106   : > { %v9163_v50 = vadd.s32 4294967294, %v1432_v42  ;;  %v453_v46 = vor.u32 %v452_v21, %v451_v10  ;;  %v458_v55 = vshrl.u32 %v18177_v49, %v443_v6  ;;  %vm1047_vm13 = vcmp.eq.s32.totalorder %v11618_v51, 2 }
 0x107   : > { %v456_v33 = vor.u32 %v455_v45, %v454_v9  ;;  %vm460_vm10 = vcmp.lt.s32.totalorder %v441_v19, 1  ;;  %vm461_vm5 = vcmp.lt.s32.totalorder %v441_v19, 2  ;;  %vm462_vm12 = vcmp.lt.s32.totalorder %v441_v19, 3 }
 0x108   : > { %vm9164_vm14 = vcmp.lt.s32.totalorder %v9163_v50, 0  ;;  %v459_v63 = vor.u32 %v458_v55, %v457_v16  ;;  %vm463_vm11 = vcmp.lt.s32.totalorder %v441_v19, 4  ;;  %v464_v53 = vsel %vm460_vm10, %v444_v47, %v447_v52 }
 0x109   : > { %v1435_v11 = vsel %vm9164_vm14, 0, %v9163_v50  ;;  %v465_v60 = vsel %vm463_vm11, %v453_v46, 2102212464  ;;  %v468_v35 = vsel %vm460_vm10, %v447_v52, %v450_v43  ;;  %v469_v10 = vsel %vm463_vm11, %v456_v33, 920167782 }
 0x10a   : > { %v1436_v42 = vsub.s32 32, %v1435_v11  ;;  %v1437_v5 = vshll.u32 %v11615_v28, %v1435_v11  ;;  %v1440_v61 = vsub.s32 4294967266, %v1435_v11  ;;  %v472_v18 = vsel %vm460_vm10, %v450_v43, %v453_v46 }
 0x10b   : > { %v466_v21 = vsel %vm462_vm12, %v450_v43, %v465_v60  ;;  %v470_v9 = vsel %vm462_vm12, %v453_v46, %v469_v10  ;;  %v473_v55 = vsel %vm463_vm11, %v459_v63, 1326507024  ;;  %v17563_v45 = vand.u32 2147483647, %v11613_v24 }
 0x10c   : > { %v1438_v6 = vshrl.u32 %v1420_v38, %v1436_v42  ;;  %v1441_v20 = vadd.s32 127, %v1440_v61  ;;  %v471_v50 = vsel %vm461_vm5, %v468_v35, %v470_v9  ;;  %v9133_v16 = vadd.s32 4294967169, %v640_v15 }
 0x10d   : > { %v1453_v11 = vsel %vm11642_vm2, 0, %v1451_v23  ;;  %v474_v47 = vsel %vm462_vm12, %v456_v33, %v473_v55  ;;  %v467_v38 = vsel %vm461_vm5, %v464_v53, %v466_v21  ;;  %vm1044_vm6 = vcmp.eq.s32.totalorder %v11618_v51, 0 }
 0x10e   : > { %v1439_v7 = vor.u32 %v1438_v6, %v1437_v5  ;;  %v1442_v28 = vshll.u32 %v1441_v20, 23  ;;  %v475_v61 = vsel %vm461_vm5, %v472_v18, %v474_v47  ;;  %v646_v23 = vadd.s32 1, %v9133_v16 }
 0x10f   : > { %v11666_v52 = vmul.u32.u64.low %v11635_v22, %v471_v50  ;;  %v11667_v43 = vmul.u32.u64.high %v11635_v22, %v471_v50, %v11666_v52  ;;  %v11671_v5 = vmul.u32.u64.low %v11635_v22, %v475_v61  ;;  %v11672_v15 = vmul.u32.u64.high %v11635_v22, %v475_v61, %v11671_v5 }
 0x110   : > { %v1443_v46 = vor.u32 4788187, %v1442_v28  ;;  %v1446_v42 = vcvt.s32.f32 %v1439_v7  ;;  %vm1043_vm7 = vcmp.lt.s32.totalorder %v11618_v51, 2  ;;  %v1457_v35 = vadd.s32 3, %v1453_v11 }
 0x111   : > { %v9655_v63 = vpop.eup %9654  ;;  %v483_v7 = vmul.u32 %v11635_v22, %v467_v38  ;;  %v486_v18 = vadd.s32 1, %v11667_v43  ;;  %vm647_vm3 = vcmp.gt.s32.totalorder %v646_v23, 0  ;;  %vm2700_vm14 = vcmp.lt.s32.totalorder %v11627_v56, 2 }
 0x112   : > { %v9657_v60 = vpop.eup %9656  ;;  %v1048_v33 = vxor.u32 2147483648, %v9655_v63  ;;  %v1444_v53 = vand.u32 2147483647, %v1443_v46  ;;  %vm2701_vm10 = vcmp.eq.s32.totalorder %v11627_v56, 0  ;;  %v643_v21 = vand.u32 8388607, %v17563_v45 }
 0x113   : > { %v1045_v19 = vxor.u32 2147483648, %v9657_v60  ;;  %vm2704_vm5 = vcmp.eq.s32.totalorder %v11627_v56, 2  ;;  %v648_v51 = vsel %vm647_vm3, %v646_v23, 0  ;;  %v201_v16 = vrot.slane %v10920_v44, 5 }
 0x114   : > { %v1049_v10 = vsel %vm1047_vm13, %v1048_v33, %v9657_v60  ;;  %v1447_v20 = vmul.f32 %v1446_v42, %v1444_v53  ;;  %vm485_vm13 = vc.u32 %v11672_v15, %v11666_v52  ;;  %v11694_v28 = vand.u32 3, %v1457_v35 }
 0x115   : > { %v1046_v6 = vsel %vm1044_vm6, %v9655_v63, %v1045_v19  ;;  %v487_v55 = vsel %vm485_vm13, %v486_v18, %v11667_v43  ;;  %v11696_v47 = vand.u32 3, %v1453_v11  ;;  %v650_v61 = vand.u32 31, %v648_v51 }
 0x116   : > { %v1050_v9 = vsel %vm1043_vm7, %v1046_v6, %v1049_v10  ;;  %v1448_v50 = vxor.u32 2147483648, %v1447_v20  ;;  %v488_v38 = vadd.s32 %v487_v55, %v483_v7  ;;  %v2706_v42 = vsel %vm2704_vm5, %v1048_v33, %v9657_v60 }
 0x117   : > { %v11690_v22 = vsel %vm1040_vm4, nan, %v1050_v9  ;;  %v644_v5 = vor.u32 8388608, %v643_v21  ;;  %v649_v23 = vshrl.u32 %v648_v51, 5  ;;  %v651_v43 = vsub.s32 32, %v650_v61 }
 0x118   : > { %18194 = vst [vmem:[#allocation29_spill] sm:$0xff] %v11690_v22  ;;  %v1449_v46 = vsel %vm1366_vm8, %v1448_v50, %v1447_v20  ;;  %v489_v10 = vadd.s32 536870912, %v488_v38  ;;  %v653_v44 = vshll.u32 %v18179_v59, %v650_v61  ;;  %v18195_v35 = vmov 2475754826  }
 0x119   : > { %v1452_v53 = vsel %vm11642_vm2, %v11388_v27, %v1449_v46  ;;  %v656_v11 = vshll.u32 %v18195_v35, %v650_v61  ;;  %v18196_v18 = vmov 2131351028   ;;  %v18197_v6 = vmov 2102212464  }
 0x11a   : > { %9658 = vcosq.f32 %v1452_v53  ;;  %v659_v7 = vshll.u32 %v18196_v18, %v650_v61  ;;  %v662_v9 = vshll.u32 %v18197_v6, %v650_v61  ;;  %v2703_v60 = vsel %vm2701_vm10, %v9655_v63, %v1045_v19 }
 0x11b   : > { %9660 = vsinq.f32 %v1452_v53  ;;  %v11709_v33 = vshrl.u32 %v489_v10, 30  ;;  %v654_v37 = vshrl.u32 %v18195_v35, %v651_v43  ;;  %v657_v20 = vshrl.u32 %v18196_v18, %v651_v43 }
 0x11c   : > { %v660_v21 = vshrl.u32 %v18197_v6, %v651_v43  ;;  %v18198_v51 = vmov 920167782   ;;  %v652_v53 = vshrl.u32 %v18179_v59, %v651_v43  ;;  %v666_v63 = vshrl.u32 %v18177_v49, %v651_v43 }
 0x11d   : > { %v663_v50 = vshrl.u32 %v18198_v51, %v651_v43  ;;  %v665_v55 = vshll.u32 %v18198_v51, %v650_v61  ;;  %v491_v46 = vshll.u32 %v11709_v33, 30  ;;  %v655_v45 = vor.u32 %v654_v37, %v653_v44 }
 0x11e   : > { %v658_v19 = vor.u32 %v657_v20, %v656_v11  ;;  %v661_v10 = vor.u32 %v660_v21, %v659_v7  ;;  %vm668_vm8 = vcmp.lt.s32.totalorder %v649_v23, 1  ;;  %v2707_v39 = vsel %vm2700_vm14, %v2703_v60, %v2706_v42 }
 0x11f   : > { %v664_v26 = vor.u32 %v663_v50, %v662_v9  ;;  %v11721_v34 = vsub.s32 %v488_v38, %v491_v46  ;;  %v667_v14 = vor.u32 %v666_v63, %v665_v55  ;;  %v286_v61 = vsel %vm17736_vm1, %v11724_v4, %v201_v16 }
 0x120   : > { %vm3113_vm2 = vcmp.eq.s32.totalorder %v11696_v47, 0  ;;  %vm669_vm12 = vcmp.lt.s32.totalorder %v649_v23, 2  ;;  %vm670_vm11 = vcmp.lt.s32.totalorder %v649_v23, 3  ;;  %vm671_vm6 = vcmp.lt.s32.totalorder %v649_v23, 4 }
 0x121   : > { %v11729_v43 = vshll.u32 %v644_v5, 8  ;;  %vm3112_vm7 = vcmp.lt.s32.totalorder %v11696_v47, 2  ;;  %v494_v56 = vsub.s32 0, %v11721_v34  ;;  %v672_v38 = vsel %vm668_vm8, %v652_v53, %v655_v45 }
 0x122   : > { %v673_v42 = vsel %vm671_vm6, %v661_v10, 2102212464  ;;  %v676_v44 = vsel %vm668_vm8, %v655_v45, %v658_v19  ;;  %vm1456_vm3 = vweird.f32 %v11388_v27  ;;  %v677_v11 = vsel %vm671_vm6, %v664_v26, 920167782 }
 0x123   : > { %v674_v16 = vsel %vm670_vm11, %v658_v19, %v673_v42  ;;  %v680_v7 = vsel %vm668_vm8, %v658_v19, %v661_v10  ;;  %v681_v9 = vsel %vm671_vm6, %v667_v14, 1326507024  ;;  %vm1459_vm14 = vcmp.lt.s32.totalorder %v11694_v28, 2 }
 0x124   : > { %vm1460_vm10 = vcmp.eq.s32.totalorder %v11694_v28, 0  ;;  %vm3116_vm5 = vcmp.eq.s32.totalorder %v11696_v47, 2  ;;  %v9126_v5 = vmin.u32 %v494_v56, %v11721_v34  ;;  %v11744_v60 = vsel %vm1040_vm4, nan, %v2707_v39 }
 0x125   : > { %18199 = vst [vmem:[#allocation30_spill] sm:$0xff] %v11744_v60  ;;  %v678_v45 = vsel %vm670_vm11, %v661_v10, %v677_v11  ;;  %v682_v37 = vsel %vm670_vm11, %v664_v26, %v681_v9  ;;  %v18200_v20 = vrot.slane %v10923_v48, 2  ;;  %vm430_vm13 = vcmp.lt.s32.totalorder %v11554_v2, 0 }
 0x126   : > { %v496_v21 = vclz %v9126_v5  ;;  %v675_v50 = vsel %vm669_vm12, %v672_v38, %v674_v16  ;;  %v679_v55 = vsel %vm669_vm12, %v676_v44, %v678_v45  ;;  %v683_v30 = vsel %vm669_vm12, %v680_v7, %v682_v37 }
 0x127   : > { %v11751_v14 = vsel %vm17733_vm0, %v286_v61, %v18200_v20  ;;  %v11758_v39 = vmul.u32.u64.low %v11729_v43, %v683_v30  ;;  %v11759_v46 = vmul.u32.u64.high %v11729_v43, %v683_v30, %v11758_v39  ;;  %v9659_v63 = vpop.eup %9658  ;;  %vm1463_vm4 = vcmp.eq.s32.totalorder %v11694_v28, 2 }
 0x128   : > { %v11762_v26 = vmul.u32.u64.low %v11729_v43, %v679_v55  ;;  %v11763_v53 = vmul.u32.u64.high %v11729_v43, %v679_v55, %v11762_v26  ;;  %v484_v19 = vadd.s32 %v11666_v52, %v11672_v15  ;;  %v9127_v10 = vadd.s32 4294967294, %v496_v21  ;;  %v9661_v23 = vpop.eup %9660 }
 0x129   : > { %v327_v61 = vand.u32 2139095040, %v11751_v14  ;;  %v1464_v56 = vxor.u32 2147483648, %v9659_v63  ;;  %v17570_v38 = vrot.slane %v11744_v60, 3  ;;  %v514_v42 = vsub.s32 4, %v11709_v33 }
 0x12a   : > { %v17571_v44 = vand.u32 2147483647, %v11751_v14  ;;  %v1461_v16 = vxor.u32 2147483648, %v9661_v23  ;;  %vm9128_vm8 = vcmp.lt.s32.totalorder %v9127_v10, 0  ;;  %v691_v11 = vmul.u32 %v11729_v43, %v675_v50 }
 0x12b   : > { %v328_v7 = vshrl.u32 %v327_v61, 23  ;;  %v1465_v9 = vsel %vm1463_vm4, %v1464_v56, %v9661_v23  ;;  %v3118_v52 = vsel %vm3116_vm5, %v1464_v56, %v9661_v23  ;;  %v499_v15 = vsel %vm9128_vm8, 0, %v9127_v10 }
 0x12c   : > { %v203_v5 = vrot.slane %v11343_v0, 5  ;;  %v1462_v45 = vsel %vm1460_vm10, %v9659_v63, %v1461_v16  ;;  %v3115_v37 = vsel %vm3113_vm2, %v9659_v63, %v1461_v16  ;;  %v500_v20 = vsub.s32 32, %v499_v15 }
 0x12d   : > { %v501_v21 = vshll.u32 %v11721_v34, %v499_v15  ;;  %v1466_v43 = vsel %vm1459_vm14, %v1462_v45, %v1465_v9  ;;  %v3119_v50 = vsel %vm3112_vm7, %v3115_v37, %v3118_v52  ;;  %v504_v55 = vsub.s32 4294967266, %v499_v15 }
 0x12e   : > { %vm693_vm12 = vc.u32 %v11759_v46, %v11762_v26  ;;  %v11790_v0 = vsel %vm1456_vm3, nan, %v1466_v43  ;;  %v11794_v30 = vsel %vm1456_vm3, nan, %v3119_v50  ;;  %v502_v39 = vshrl.u32 %v484_v19, %v500_v20 }
 0x12f   : > { %18201 = vst [vmem:[#allocation31_spill] sm:$0xff] %v11790_v0  ;;  %18202 = vst [vmem:[#allocation32_spill] sm:$0xff] %v11794_v30  ;;  %v694_v34 = vadd.s32 1, %v11763_v53  ;;  %v3708_v28 = vrot.slane %v11794_v30, 3  ;;  %v505_v47 = vadd.s32 127, %v504_v55  ;;  %v515_v63 = vsel %vm430_vm13, %v514_v42, %v11709_v33 }
 0x130   : > { %v9121_v10 = vadd.s32 4294967169, %v328_v7  ;;  %v18203_v61 = vand.u32 2147483647, %v11554_v2  ;;  %v503_v27 = vor.u32 %v502_v39, %v501_v21  ;;  %v331_v56 = vand.u32 8388607, %v17571_v44 }
 0x131   : > { %v695_v19 = vsel %vm693_vm12, %v694_v34, %v11763_v53  ;;  %vm18206_vm11 = vcmask 1044480   ;;  %v506_v9 = vshll.u32 %v505_v47, 23  ;;  %v3662_v15 = vrot.slane %v11073_v1, 5  ;;  %v11822_v53 = vld [vmem:[%s10655_s28 + $0x10] sm:$0x3f] }
 0x132   : > { %vm11803_vm2 = vcmp.le.f32.partialorder %v18203_v61, 0.7853982  ;;  %v3709_v16 = vsel %vm18206_vm11, %v17570_v38, %v3708_v28  ;;  %v696_v52 = vadd.s32 %v695_v19, %v691_v11  ;;  %v334_v33 = vadd.s32 1, %v9121_v10 }
 0x133   : > { %v11814_v42 = vpack.c.bf16 %v18167_v58, %v3709_v16  ;;  %v11818_v7 = vsel %vm11803_vm2, 0, %v515_v63  ;;  %v288_v45 = vsel %vm17736_vm1, %v11822_v53, %v203_v5  ;;  %v507_v37 = vor.u32 4788187, %v506_v9 }
 0x134   : > { %v510_v20 = vcvt.s32.f32 %v503_v27  ;;  %v697_v21 = vadd.s32 536870912, %v696_v52  ;;  %vm335_vm6 = vcmp.gt.s32.totalorder %v334_v33, 0  ;;  %v332_v11 = vor.u32 8388608, %v331_v56 }
 0x135   : > { %18207 = vst [vmem:[#allocation33_spill] sm:$0xff] %v11814_v42  ;;  %9268 = vmatpush1.bf16.msk.msra.mxu1 %vm11096_vm9, %v11814_v42  ;;  %v336_v43 = vsel %vm335_vm6, %v334_v33, 0  ;;  %v508_v50 = vand.u32 2147483647, %v507_v37  ;;  %v11833_v28 = vand.u32 3, %v11818_v7  ;;  %v18208_v5 = vrot.slane %v11024_v36, 5 }
 0x136   : > { %v11829_v55 = vshrl.u32 %v697_v21, 30  ;;  %v338_v39 = vand.u32 31, %v336_v43  ;;  %v18209_v63 = vrot.slane %v11160_v54, 2  ;;  %v11847_v27 = vadd.s32 %v11762_v26, %v11759_v46 }
 0x137   : > { %v11838_v47 = vsel %vm17736_vm1, %v18208_v5, %v3662_v15  ;;  %v511_v61 = vmul.f32 %v510_v20, %v508_v50  ;;  %v11852_v33 = vshll.u32 %v332_v11, 8  ;;  %v337_v38 = vshrl.u32 %v336_v43, 5 }
 0x138   : > { %v11843_v10 = vsel %vm17733_vm0, %v288_v45, %v18209_v63  ;;  %v699_v19 = vshll.u32 %v11829_v55, 30  ;;  %v339_v56 = vsub.s32 32, %v338_v39  ;;  %v341_v16 = vshll.u32 %v18179_v59, %v338_v39 }
 0x139   : > { %v344_v9 = vshll.u32 %v18195_v35, %v338_v39  ;;  %v512_v37 = vxor.u32 2147483648, %v511_v61  ;;  %v347_v45 = vshll.u32 %v18196_v18, %v338_v39  ;;  %v535_v20 = vand.u32 2139095040, %v11843_v10 }
 0x13a   : > { %v11855_v21 = vsub.s32 %v696_v52, %v699_v19  ;;  %v342_v46 = vshrl.u32 %v18195_v35, %v339_v56  ;;  %v345_v26 = vshrl.u32 %v18196_v18, %v339_v56  ;;  %v348_v50 = vshrl.u32 %v18197_v6, %v339_v56 }
 0x13b   : > { %v350_v5 = vshll.u32 %v18197_v6, %v338_v39  ;;  %v513_v11 = vsel %vm430_vm13, %v512_v37, %v511_v61  ;;  %v351_v52 = vshrl.u32 %v18198_v51, %v339_v56  ;;  %v340_v44 = vshrl.u32 %v18179_v59, %v339_v56 }
 0x13c   : > { %v702_v63 = vsub.s32 0, %v11855_v21  ;;  %v516_v19 = vsel %vm11803_vm2, %v11554_v2, %v513_v11  ;;  %v343_v34 = vor.u32 %v342_v46, %v341_v16  ;;  %v346_v15 = vor.u32 %v345_v26, %v344_v9 }
 0x13d   : > { %9662 = vcosq.f32 %v516_v19  ;;  %v722_v1 = vsub.s32 4, %v11829_v55  ;;  %v536_v30 = vshrl.u32 %v535_v20, 23  ;;  %vm638_vm7 = vcmp.lt.s32.totalorder %v11613_v24, 0 }
 0x13e   : > { %v9134_v58 = vmin.u32 %v702_v63, %v11855_v21  ;;  %9664 = vsinq.f32 %v516_v19  ;;  %v349_v43 = vor.u32 %v348_v50, %v347_v45  ;;  %v352_v61 = vor.u32 %v351_v52, %v350_v5 }
 0x13f   : > { %v353_v37 = vshll.u32 %v18198_v51, %v338_v39  ;;  %v354_v23 = vshrl.u32 %v18177_v49, %v339_v56  ;;  %vm356_vm3 = vcmp.lt.s32.totalorder %v337_v38, 1  ;;  %vm357_vm14 = vcmp.lt.s32.totalorder %v337_v38, 2 }
 0x140   : > { %v704_v54 = vclz %v9134_v58  ;;  %vm358_vm10 = vcmp.lt.s32.totalorder %v337_v38, 3  ;;  %vm359_vm5 = vcmp.lt.s32.totalorder %v337_v38, 4  ;;  %v360_v16 = vsel %vm356_vm3, %v340_v44, %v343_v34 }
 0x141   : > { %v364_v9 = vsel %vm356_vm3, %v343_v34, %v346_v15  ;;  %v355_v26 = vor.u32 %v354_v23, %v353_v37  ;;  %v361_v11 = vsel %vm359_vm5, %v349_v43, 2102212464  ;;  %v365_v20 = vsel %vm359_vm5, %v352_v61, 920167782 }
 0x142   : > { %v9135_v46 = vadd.s32 4294967294, %v704_v54  ;;  %v362_v63 = vsel %vm358_vm10, %v346_v15, %v361_v11  ;;  %v366_v45 = vsel %vm358_vm10, %v349_v43, %v365_v20  ;;  %v368_v50 = vsel %vm356_vm3, %v346_v15, %v349_v43 }
 0x143   : > { %v9129_v5 = vadd.s32 4294967169, %v536_v30  ;;  %v363_v58 = vsel %vm357_vm14, %v360_v16, %v362_v63  ;;  %v367_v39 = vsel %vm357_vm14, %v364_v9, %v366_v45  ;;  %v369_v56 = vsel %vm359_vm5, %v355_v26, 1326507024 }
 0x144   : > { %vm9136_vm13 = vcmp.lt.s32.totalorder %v9135_v46, 0  ;;  %v370_v44 = vsel %vm358_vm10, %v352_v61, %v369_v56  ;;  %v11882_v54 = vmul.u32.u64.low %v11852_v33, %v367_v39  ;;  %v11883_v34 = vmul.u32.u64.high %v11852_v33, %v367_v39, %v11882_v54 }
 0x145   : > { %v707_v52 = vsel %vm9136_vm13, 0, %v9135_v46  ;;  %vm520_vm4 = vweird.f32 %v11554_v2  ;;  %v371_v43 = vsel %vm357_vm14, %v368_v50, %v370_v44  ;;  %v18210_v37 = vand.u32 2147483647, %v11613_v24 }
 0x146   : > { %v708_v19 = vsub.s32 32, %v707_v52  ;;  %v709_v15 = vshll.u32 %v11855_v21, %v707_v52  ;;  %v712_v30 = vsub.s32 4294967266, %v707_v52  ;;  %v18213_v9 = vand.u32 2147483647, %v11843_v10 }
 0x147   : > { %vm11891_vm8 = vcmp.le.f32.partialorder %v18210_v37, 0.7853982  ;;  %v11896_v61 = vmul.u32.u64.low %v11852_v33, %v371_v43  ;;  %v11897_v16 = vmul.u32.u64.high %v11852_v33, %v371_v43, %v11896_v61  ;;  %v723_v38 = vsel %vm638_vm7, %v722_v1, %v11829_v55  ;;  %v11917_v1 = vld [vmem:[%s17527_s2 + $0x20] sm:$0xff] }
 0x148   : > { %v539_v46 = vand.u32 8388607, %v18213_v9  ;;  %v710_v26 = vshrl.u32 %v11847_v27, %v708_v19  ;;  %v713_v11 = vadd.s32 127, %v712_v30  ;;  %v542_v21 = vadd.s32 1, %v9129_v5  ;;  %v11912_v27 = vld [vmem:[%s17527_s2 + $0x30] sm:$0xff] }
 0x149   : > { %vm2186_vm12 = vcmp.eq.s32.totalorder %v11833_v28, 0  ;;  %vm2189_vm2 = vcmp.eq.s32.totalorder %v11833_v28, 2  ;;  %v379_v20 = vmul.u32 %v11852_v33, %v363_v58  ;;  %v382_v63 = vadd.s32 1, %v11883_v34 }
 0x14a   : > { %v711_v45 = vor.u32 %v710_v26, %v709_v15  ;;  %v714_v50 = vshll.u32 %v713_v11, 23  ;;  %vm543_vm11 = vcmp.gt.s32.totalorder %v542_v21, 0  ;;  %v11919_v55 = vpop.eup %9662  ;;  %v725_v33 = vsel %vm11891_vm8, 0, %v723_v38  ;;  %v11948_v26 = vld [vmem:[%s17527_s2 + $0x38] sm:$0xff]  ;;  %v11953_v11 = vld [vmem:[%s17527_s2 + $0x28] sm:$0xff] }
 0x14b   : > { %vm381_vm6 = vc.u32 %v11897_v16, %v11882_v54  ;;  %v540_v5 = vor.u32 8388608, %v539_v46  ;;  %v544_v58 = vsel %vm543_vm11, %v542_v21, 0  ;;  %v17578_v39 = vmov 0   ;;  %v11927_v56 = vpop.eup %9664 }
 0x14c   : > { %3870 = vmatprep.mubr.bf16.mxu0 %v17578_v39  ;;  %3943 = vmatprep.mubr.bf16.mxu1 %v17578_v39  ;;  %v17580_v52 = vxor.u32 2147483648, %v11919_v55  ;;  %v715_v44 = vor.u32 4788187, %v714_v50  ;;  %v718_v19 = vcvt.s32.f32 %v711_v45  ;;  %v383_v15 = vsel %vm381_vm6, %v382_v63, %v11883_v34 }
 0x14d   : > { %9563 = vset.pattern.permute.xlu0 %v17578_v39  ;;  %9564 = vset.pattern.permute.xlu1 %v17578_v39  ;;  %v17581_v30 = vxor.u32 2147483648, %v11927_v56  ;;  %vm2185_vm3 = vcmp.lt.s32.totalorder %v11833_v28, 2  ;;  %v384_v43 = vadd.s32 %v383_v15, %v379_v20  ;;  %v546_v37 = vand.u32 31, %v544_v58 }
 0x14e   : > { %3797 = vperm.xlu0 %9563, %v11912_v27   ;;  %3787 = vperm.xlu1 %9564, %v11917_v1   ;;  %v2191_v34 = vsel %vm2189_vm2, %v17580_v52, %v11927_v56  ;;  %v716_v61 = vand.u32 2147483647, %v715_v44  ;;  %v11942_v9 = vand.u32 3, %v725_v33  ;;  %v11960_v63 = vshll.u32 %v540_v5, 8 }
 0x14f   : > { %v2188_v38 = vsel %vm2186_vm12, %v11919_v55, %v17581_v30  ;;  %v385_v21 = vadd.s32 536870912, %v384_v43  ;;  %v547_v20 = vsub.s32 32, %v546_v37  ;;  %v521_v44 = vadd.s32 3, %v11818_v7 }
 0x150   : > { %v2192_v45 = vsel %vm2185_vm3, %v2188_v38, %v2191_v34  ;;  %v719_v50 = vmul.f32 %v718_v19, %v716_v61  ;;  %v11963_v15 = vadd.s32 3, %v725_v33  ;;  %v11971_v52 = vshrl.u32 %v544_v58, 5  ;;  %v11982_v34 = vld [vmem:[%s17527_s2 + $0x10] sm:$0xff] }
 0x151   : > { %v11967_v39 = vsel %vm520_vm4, nan, %v2192_v45  ;;  %v11969_v46 = vshrl.u32 %v385_v21, 30  ;;  %v549_v28 = vshll.u32 %v18179_v59, %v546_v37  ;;  %v550_v7 = vshrl.u32 %v18195_v35, %v547_v20  ;;  %v11991_v45 = vld [vmem:[%s17527_s2 + $0x18] sm:$0xff] }
 0x152   : > { %18214 = vst [vmem:[#allocation34_spill] sm:$0xff] %v11967_v39  ;;  %3802 = vperm.xlu0 %9563, %v11948_v26   ;;  %3792 = vperm.xlu1 %9564, %v11953_v11   ;;  %v3693_v5 = vrot.slane %v11967_v39, 3  ;;  %v720_v19 = vxor.u32 2147483648, %v719_v50  ;;  %v552_v33 = vshll.u32 %v18195_v35, %v546_v37  ;;  %v553_v61 = vshrl.u32 %v18196_v18, %v547_v20 }
 0x153   : > { %v387_v58 = vshll.u32 %v11969_v46, 30  ;;  %v555_v38 = vshll.u32 %v18196_v18, %v546_v37  ;;  %v556_v21 = vshrl.u32 %v18197_v6, %v547_v20  ;;  %v18215_v30 = vrot.slane %v11033_v40, 3 }
 0x154   : > { %vm18216_vm14 = vcmask 1044480   ;;  %v721_v48 = vsel %vm638_vm7, %v720_v19, %v719_v50  ;;  %v558_v8 = vshll.u32 %v18197_v6, %v546_v37  ;;  %v522_v25 = vand.u32 3, %v521_v44 }
 0x155   : > { %v3699_v39 = vsel %vm18216_vm14, %v3693_v5, %v18215_v30  ;;  %vm18217_vm10 = vmmov %vm18216_vm14  ;;  %v724_v3 = vsel %vm11891_vm8, %v11613_v24, %v721_v48  ;;  %v12006_v42 = vsub.s32 %v384_v43, %v387_v58  ;;  %v548_v30 = vshrl.u32 %v18179_v59, %v547_v20  ;;  %v12023_v43 = vld [vmem:[%s17527_s2 + $0x8] sm:$0xff] }
 0x156   : > { %v3729_v35 = vsel %vm18217_vm10, %v11838_v47, %v3693_v5  ;;  %3777 = vperm.xlu0 %9563, %v11982_v34   ;;  %9666 = vcosq.f32 %v724_v3  ;;  %v551_v47 = vor.u32 %v550_v7, %v549_v28  ;;  %v559_v5 = vshrl.u32 %v18198_v51, %v547_v20  ;;  %3782 = vperm.xlu1 %9564, %v11991_v45  }
 0x157   : > { %v12001_v18 = vpack.c.bf16 %v3699_v39, %v3729_v35  ;;  %v12015_v35 = vld [vmem:[%s17527_s2] sm:$0xff]  ;;  %9668 = vsinq.f32 %v724_v3  ;;  %v390_v48 = vsub.s32 0, %v12006_v42  ;;  %v554_v23 = vor.u32 %v553_v61, %v552_v33 }
 0x158   : > { %v561_v39 = vshll.u32 %v18198_v51, %v546_v37  ;;  %v557_v50 = vor.u32 %v556_v21, %v555_v38  ;;  %v560_v44 = vor.u32 %v559_v5, %v558_v8  ;;  %v562_v28 = vshrl.u32 %v18177_v49, %v547_v20 }
 0x159   : > { %18218 = vst [vmem:[#allocation35_spill] sm:$0xff] %v12001_v18  ;;  %3850 = vmatprep.subr.bf16.mxu0 %v12001_v18  ;;  %vm564_vm7 = vcmp.lt.s32.totalorder %v11971_v52, 1  ;;  %v380_v19 = vadd.s32 %v11882_v54, %v11897_v16  ;;  %v9122_v3 = vmin.u32 %v390_v48, %v12006_v42  ;;  %vm565_vm5 = vcmp.lt.s32.totalorder %v11971_v52, 2 }
 0x15a   : > { %vm524_vm13 = vcmp.eq.s32.totalorder %v522_v25, 0  ;;  %3767 = vperm.xlu0 %9563, %v12015_v35   ;;  %v563_v37 = vor.u32 %v562_v28, %v561_v39  ;;  %vm566_vm8 = vcmp.lt.s32.totalorder %v11971_v52, 3  ;;  %vm567_vm12 = vcmp.lt.s32.totalorder %v11971_v52, 4  ;;  %3772 = vperm.xlu1 %9564, %v12023_v43  }
 0x15b   : > { %v568_v8 = vsel %vm564_vm7, %v548_v30, %v551_v47  ;;  %v392_v20 = vclz %v9122_v3  ;;  %v569_v7 = vsel %vm567_vm12, %v557_v50, 2102212464  ;;  %v572_v54 = vsel %vm564_vm7, %v551_v47, %v554_v23 }
 0x15c   : > { %v573_v16 = vsel %vm567_vm12, %v560_v44, 920167782  ;;  %v570_v33 = vsel %vm566_vm8, %v554_v23, %v569_v7  ;;  %v576_v61 = vsel %vm564_vm7, %v554_v23, %v557_v50  ;;  %v577_v38 = vsel %vm567_vm12, %v563_v37, 1326507024 }
 0x15d   : > { %v574_v58 = vsel %vm566_vm8, %v557_v50, %v573_v16  ;;  %v9123_v21 = vadd.s32 4294967294, %v392_v20  ;;  %v571_v5 = vsel %vm565_vm5, %v568_v8, %v570_v33  ;;  %v578_v48 = vsel %vm566_vm8, %v560_v44, %v577_v38 }
 0x15e   : > { %v575_v30 = vsel %vm565_vm5, %v572_v54, %v574_v58  ;;  %v579_v39 = vsel %vm565_vm5, %v576_v61, %v578_v48  ;;  %vm523_vm2 = vcmp.lt.s32.totalorder %v522_v25, 2  ;;  %v18219_v3 = vxor.u32 2147483648, %v11927_v56 }
 0x15f   : > { %v12048_v47 = vmul.u32.u64.low %v11960_v63, %v575_v30  ;;  %v12049_v28 = vmul.u32.u64.high %v11960_v63, %v575_v30, %v12048_v47  ;;  %vm9124_vm11 = vcmp.lt.s32.totalorder %v9123_v21, 0  ;;  %v587_v52 = vmul.u32 %v11960_v63, %v571_v5 }
 0x160   : > { %v12053_v23 = vmul.u32.u64.low %v11960_v63, %v579_v39  ;;  %v12054_v50 = vmul.u32.u64.high %v11960_v63, %v579_v39, %v12053_v23  ;;  %v526_v37 = vsel %vm524_vm13, %v11919_v55, %v18219_v3  ;;  %v395_v44 = vsel %vm9124_vm11, 0, %v9123_v21 }
 0x161   : > { %vm527_vm6 = vcmp.eq.s32.totalorder %v522_v25, 2  ;;  %v730_v8 = vand.u32 3, %v11963_v15  ;;  %v396_v20 = vsub.s32 32, %v395_v44  ;;  %v397_v7 = vshll.u32 %v12006_v42, %v395_v44 }
 0x162   : > { %v400_v54 = vsub.s32 4294967266, %v395_v44  ;;  %v18220_v16 = vxor.u32 2147483648, %v11919_v55  ;;  %vm2391_vm3 = vcmp.lt.s32.totalorder %v11942_v9, 2  ;;  %vm2392_vm14 = vcmp.eq.s32.totalorder %v11942_v9, 0 }
 0x163   : > { %v590_v58 = vadd.s32 1, %v12049_v28  ;;  %v9667_v63 = vpop.eup %9666  ;;  %vm2395_vm10 = vcmp.eq.s32.totalorder %v11942_v9, 2  ;;  %v398_v15 = vshrl.u32 %v380_v19, %v396_v20  ;;  %vm589_vm7 = vc.u32 %v12054_v50, %v12048_v47 }
 0x164   : > { %v529_v33 = vsel %vm527_vm6, %v18220_v16, %v11927_v56  ;;  %v401_v38 = vadd.s32 127, %v400_v54  ;;  %v9669_v42 = vpop.eup %9668  ;;  %v736_v55 = vxor.u32 2147483648, %v9667_v63  ;;  %vm732_vm5 = vcmp.eq.s32.totalorder %v730_v8, 0 }
 0x165   : > { %v12070_v61 = vsel %vm523_vm2, %v526_v37, %v529_v33  ;;  %v591_v56 = vsel %vm589_vm7, %v590_v58, %v12049_v28  ;;  %vm735_vm13 = vcmp.eq.s32.totalorder %v730_v8, 2  ;;  %v733_v21 = vxor.u32 2147483648, %v9669_v42 }
 0x166   : > { %v399_v5 = vor.u32 %v398_v15, %v397_v7  ;;  %v402_v30 = vshll.u32 %v401_v38, 23  ;;  %v592_v25 = vadd.s32 %v591_v56, %v587_v52  ;;  %vm728_vm8 = vweird.f32 %v11613_v24 }
 0x167   : > { %v2397_v48 = vsel %vm2395_vm10, %v736_v55, %v9669_v42  ;;  %vm731_vm12 = vcmp.lt.s32.totalorder %v730_v8, 2  ;;  %v737_v39 = vsel %vm735_vm13, %v736_v55, %v9669_v42  ;;  %v2394_v19 = vsel %vm2392_vm14, %v9667_v63, %v733_v21 }
 0x168   : > { %v403_v23 = vor.u32 4788187, %v402_v30  ;;  %v406_v3 = vcvt.s32.f32 %v399_v5  ;;  %v593_v37 = vadd.s32 536870912, %v592_v25  ;;  %v2398_v28 = vsel %vm2391_vm3, %v2394_v19, %v2397_v48 }
 0x169   : > { %v734_v44 = vsel %vm732_vm5, %v9667_v63, %v733_v21  ;;  %v12083_v20 = vsel %vm728_vm8, nan, %v2398_v28  ;;  %v18222_v52 = vrot.slane %v11347_v31, 5  ;;  %v18223_v7 = vrot.slane %v11208_v32, 5 }
 0x16a   : > { %18221 = vst [vmem:[#allocation36_spill] sm:$0xff] %v12083_v20  ;;  %v404_v54 = vand.u32 2147483647, %v403_v23  ;;  %v12090_v16 = vshrl.u32 %v593_v37, 30  ;;  %v3695_v33 = vrot.slane %v12083_v20, 3  ;;  %v12093_v58 = vsel %vm731_vm12, %v734_v44, %v737_v39 }
 0x16b   : > { %v3667_v8 = vsel %vm17736_vm1, %v18223_v7, %v18222_v52  ;;  %v18224_v15 = vrot.slane %v11329_v29, 3  ;;  %vm18225_vm2 = vcmask 1044480   ;;  %vm326_vm6 = vcmp.lt.s32.totalorder %v11751_v14, 0 }
 0x16c   : > { %v407_v9 = vmul.f32 %v406_v3, %v404_v54  ;;  %v595_v63 = vshll.u32 %v12090_v16, 30  ;;  %vm18226_vm11 = vmmov %vm18225_vm2  ;;  %v18228_v56 = vand.u32 2147483647, %v11751_v14  ;;  %v410_v30 = vsub.s32 4, %v11969_v46 }
 0x16d   : > { %v3703_v38 = vsel %vm18225_vm2, %v3695_v33, %v18224_v15  ;;  %v3731_v42 = vsel %vm18226_vm11, %v3667_v8, %v3695_v33  ;;  %v3660_v2 = vrot.slane %v11564_v62, 5  ;;  %vm416_vm2 = vweird.f32 %v11751_v14 }
 0x16e   : > { %v12101_v55 = vpack.c.bf16 %v3703_v38, %v3731_v42  ;;  %vm325_vm3 = vcmp.le.f32.partialorder %v18228_v56, 0.7853982  ;;  %v408_v21 = vxor.u32 2147483648, %v407_v9  ;;  %v596_v5 = vsub.s32 %v592_v25, %v595_v63 }
 0x16f   : > { %v411_v3 = vsel %vm326_vm6, %v410_v30, %v11969_v46  ;;  %v588_v25 = vadd.s32 %v12048_v47, %v12054_v50  ;;  %v12114_v46 = vsel %vm520_vm4, nan, %v12070_v61  ;;  %v3652_v42 = vrot.slane %v11479_v17, 5 }
 0x170   : > { %18227 = vst [vmem:[#allocation37_spill] sm:$0xff] %v12101_v55  ;;  %3923 = vmatprep.subr.bf16.mxu1 %v12101_v55  ;;  %v409_v48 = vsel %vm326_vm6, %v408_v21, %v407_v9  ;;  %v598_v39 = vsub.s32 0, %v596_v5  ;;  %v413_v28 = vsel %vm325_vm3, 0, %v411_v3  ;;  %18229 = vst [vmem:[#allocation38_spill] sm:$0xff] %v12114_v46  ;;  %v3649_v47 = vrot.slane %v12114_v46, 5 }
 0x171   : > { %v412_v19 = vsel %vm325_vm3, %v11751_v14, %v409_v48  ;;  %v417_v52 = vadd.s32 3, %v413_v28  ;;  %v2081_v9 = vand.u32 3, %v413_v28  ;;  %v18230_v28 = vrot.slane %v11024_v36, 5 }
 0x172   : > { %9670 = vcosq.f32 %v412_v19  ;;  %v9130_v23 = vmin.u32 %v598_v39, %v596_v5  ;;  %v3661_v14 = vsel %vm17736_vm1, %v3652_v42, %v3660_v2  ;;  %vm534_vm11 = vcmp.lt.s32.totalorder %v11843_v10, 0 }
 0x173   : > { %9672 = vsinq.f32 %v412_v19  ;;  %v418_v63 = vand.u32 3, %v417_v52  ;;  %vm2083_vm10 = vcmp.eq.s32.totalorder %v2081_v9, 0  ;;  %vm2086_vm7 = vcmp.eq.s32.totalorder %v2081_v9, 2 }
 0x174   : > { %v600_v37 = vclz %v9130_v23  ;;  %vm2082_vm12 = vcmp.lt.s32.totalorder %v2081_v9, 2  ;;  %vm18238_vm3 = vcmask 1044480   ;;  %v3664_v24 = vrot.slane %v11790_v0, 5 }
 0x175   : > { %vm423_vm5 = vcmp.eq.s32.totalorder %v418_v63, 2  ;;  %vm420_vm13 = vcmp.eq.s32.totalorder %v418_v63, 0  ;;  %vm419_vm4 = vcmp.lt.s32.totalorder %v418_v63, 2  ;;  %v10575_v51 = vmov 1  }
 0x176   : > { %v9131_v44 = vadd.s32 4294967294, %v600_v37  ;;  %9566 = vset.pattern.permute.xlu1 %v10575_v51  ;;  %9565 = vset.pattern.permute.xlu0 %v10575_v51 }
 0x177   : > { %4453 = vperm.xlu1 %9566, %v11948_v26   ;;  %4449 = vperm.xlu0 %9565, %v11912_v27  }
 0x178   : > { %vm9132_vm14 = vcmp.lt.s32.totalorder %v9131_v44, 0 }
 0x179   : > { %v603_v7 = vsel %vm9132_vm14, 0, %v9131_v44  ;;  %v3655_v44 = vsel %vm17736_vm1, %v3649_v47, %v18230_v28  ;;  %vm18239_vm14 = vmmov %vm18238_vm3 }
 0x17a   : > { %v604_v8 = vsub.s32 32, %v603_v7  ;;  %v605_v54 = vshll.u32 %v596_v5, %v603_v7  ;;  %v608_v33 = vsub.s32 4294967266, %v603_v7 }
 0x17b   : > { %4441 = vperm.xlu1 %9566, %v11917_v1   ;;  %4445 = vperm.xlu0 %9565, %v11953_v11  }
 0x17c   : > { %v606_v15 = vshrl.u32 %v588_v25, %v604_v8  ;;  %v609_v38 = vadd.s32 127, %v608_v33  ;;  %v10482_v8 = vld [vmem:[%s10655_s28 + $0x8] sm:$0x3f] }
 0x17e   : > { %v607_v56 = vor.u32 %v606_v15, %v605_v54  ;;  %v610_v21 = vshll.u32 %v609_v38, 23  ;;  %v3725_v54 = vsel %vm17736_vm1, %v10482_v8, %v3649_v47  ;;  %v18233_v38 = vand.u32 2147483647, %v11843_v10  ;;  %v9580_v8 = vld [vmem:[%s17526_s1 + $0x8] sm:$0xff]  }
 0x17f   : > { %v9671_v30 = vpop.eup %9670  ;;  %v618_v47 = vsub.s32 4, %v12090_v16  ;;  %4433 = vperm.xlu1 %9566, %v11982_v34   ;;  %4437 = vperm.xlu0 %9565, %v11991_v45  }
 0x180   : > { %v9673_v50 = vpop.eup %9672  ;;  %v424_v5 = vxor.u32 2147483648, %v9671_v30  ;;  %v611_v48 = vor.u32 4788187, %v610_v21  ;;  %v614_v39 = vcvt.s32.f32 %v607_v56  ;;  %vm12135_vm6 = vcmp.le.f32.partialorder %v18233_v38, 0.7853982 }
 0x181   : > { %v421_v19 = vxor.u32 2147483648, %v9673_v50 }
 0x182   : > { %v2088_v61 = vsel %vm2086_vm7, %v424_v5, %v9673_v50  ;;  %v612_v23 = vand.u32 2147483647, %v611_v48  ;;  %v425_v3 = vsel %vm423_vm5, %v424_v5, %v9673_v50  ;;  %v12141_v50 = vpack.c.bf16 %v3655_v44, %v3725_v54  ;;  %v9579_v44 = vld [vmem:[%s17526_s1] sm:$0xff]  }
 0x183   : > { %v2085_v37 = vsel %vm2083_vm10, %v9671_v30, %v421_v19  ;;  %v422_v52 = vsel %vm420_vm13, %v9671_v30, %v421_v19  ;;  %v18237_v5 = vrot.slane %v11523_v12, 3  ;;  %vm17749_vm10 = vcmask 523264   ;;  %4425 = vperm.xlu1 %9566, %v12015_v35   ;;  %4429 = vperm.xlu0 %9565, %v12023_v43  }
 0x184   : > { %v2089_v25 = vsel %vm2082_vm12, %v2085_v37, %v2088_v61  ;;  %v615_v7 = vmul.f32 %v614_v39, %v612_v23  ;;  %v426_v33 = vsel %vm419_vm4, %v422_v52, %v425_v3  ;;  %18236 = vst [vmem:[#allocation41_spill] sm:$0xff] %v12141_v50  ;;  %v619_v37 = vsel %vm534_vm11, %v618_v47, %v12090_v16 }
 0x185   : > { %v12126_v15 = vsel %vm416_vm2, nan, %v2089_v25  ;;  %v12130_v63 = vsel %vm416_vm2, nan, %v426_v33  ;;  %v18242_v25 = vmov 0   ;;  %v3656_v33 = vrot.slane %v11690_v22, 5 }
 0x186   : > { %18231 = vst [vmem:[#allocation39_spill] sm:$0xff] %v12126_v15  ;;  %18232 = vst [vmem:[#allocation40_spill] sm:$0xff] %v12130_v63  ;;  %v3692_v9 = vrot.slane %v12126_v15, 3  ;;  %v616_v21 = vxor.u32 2147483648, %v615_v7  ;;  %v3648_v30 = vrot.slane %v12130_v63, 5  ;;  %vm624_vm2 = vweird.f32 %v11843_v10 }
 0x188   : > { %v3697_v48 = vsel %vm18238_vm3, %v3692_v9, %v18237_v5  ;;  %v3728_v39 = vsel %vm18239_vm14, %v3661_v14, %v3692_v9  ;;  %v617_v19 = vsel %vm534_vm11, %v616_v21, %v615_v7  ;;  %v3653_v2 = vsel %vm17736_vm1, %v3648_v30, %v3652_v42  ;;  %vm18249_vm11 = vmmov %vm18238_vm3 }
 0x189   : > { %v12150_v61 = vpack.c.bf16 %v3697_v48, %v3728_v39  ;;  %v620_v23 = vsel %vm12135_vm6, %v11843_v10, %v617_v19  ;;  %v3724_v3 = vsel %vm17736_vm1, %v11724_v4, %v3648_v30  ;;  %v621_v42 = vsel %vm12135_vm6, 0, %v619_v37  ;;  %v10483_v19 = vld [vmem:[%s10655_s28 + $0x18] sm:$0x3f]  ;;  %vm18250_vm6 = vmmov %vm18238_vm3 }
 0x18a   : > { %9674 = vcosq.f32 %v620_v23  ;;  %v12161_v28 = vpack.c.bf16 %v3653_v2, %v3724_v3  ;;  %v625_v4 = vadd.s32 3, %v621_v42  ;;  %v2287_v52 = vand.u32 3, %v621_v42 }
 0x18b   : > { %18240 = vst [vmem:[#allocation42_spill] sm:$0xff] %v12150_v61  ;;  %3851 = vmatpush1.bf16.msra.mxu0 %v12150_v61  ;;  %9676 = vsinq.f32 %v620_v23  ;;  %v12175_v7 = vsel %vm728_vm8, nan, %v12093_v58  ;;  %v18244_v48 = vrot.slane %v11208_v32, 5  ;;  %v3665_v10 = vsel %vm17736_vm1, %v3656_v33, %v3664_v24 }
 0x18c   : > { %18241 = vst [vmem:[#allocation43_spill] sm:$0xff] %v12161_v28  ;;  %3852 = vmatprep.subr.bf16.mxu0 %v12141_v50  ;;  %v626_v16 = vand.u32 3, %v625_v4  ;;  %18243 = vst [vmem:[#allocation44_spill] sm:$0xff] %v12175_v7  ;;  %vm2292_vm7 = vcmp.eq.s32.totalorder %v2287_v52, 2  ;;  %vm2289_vm13 = vcmp.eq.s32.totalorder %v2287_v52, 0  ;;  %v3651_v38 = vrot.slane %v12175_v7, 5 }
 0x18d   : > { %vm2288_vm4 = vcmp.lt.s32.totalorder %v2287_v52, 2  ;;  %v9581_v52 = vld [vmem:[%s17526_s1 + $0x10] sm:$0xff]  }
 0x18e   : > { %vm631_vm5 = vcmp.eq.s32.totalorder %v626_v16, 2  ;;  %vm628_vm12 = vcmp.eq.s32.totalorder %v626_v16, 0  ;;  %vm627_vm8 = vcmp.lt.s32.totalorder %v626_v16, 2  ;;  %v3659_v39 = vsel %vm17736_vm1, %v3651_v38, %v18244_v48 }
 0x18f   : > { %3853 = vmatpush1.bf16.msra.mxu0 %v12161_v28  ;;  %v3727_v2 = vsel %vm17736_vm1, %v10483_v19, %v3651_v38 }
 0x190   : > { %v12201_v16 = vpack.c.bf16 %v3659_v39, %v3727_v2 }
 0x192   : > { %9259 = vmatmul.mubr.msk.bf16.vlgmr.msra.gmra.mxu0 %vm17749_vm10, %v9579_v44  ;;  %18247 = vst [vmem:[#allocation47_spill] sm:$0xff] %v12201_v16 }
 0x193   : > { %3880 = vmatprep.mubr.bf16.mxu0 %v18242_v25 }
 0x197   : > { %v9675_v54 = vpop.eup %9674 }
 0x198   : > { %v9677_v14 = vpop.eup %9676  ;;  %v632_v9 = vxor.u32 2147483648, %v9675_v54 }
 0x199   : > { %v629_v56 = vxor.u32 2147483648, %v9677_v14 }
 0x19a   : > { %v2294_v58 = vsel %vm2292_vm7, %v632_v9, %v9677_v14  ;;  %v633_v21 = vsel %vm631_vm5, %v632_v9, %v9677_v14  ;;  %9260 = vmatmul.mubr.msk.bf16.gmra.mxu0 %vm17749_vm10, %v9580_v8 }
 0x19b   : > { %v2291_v30 = vsel %vm2289_vm13, %v9675_v54, %v629_v56  ;;  %v630_v47 = vsel %vm628_vm12, %v9675_v54, %v629_v56  ;;  %3890 = vmatprep.mubr.bf16.mxu0 %v18242_v25  ;;  %v18248_v54 = vrot.slane %v11744_v60, 3 }
 0x19c   : > { %v2295_v5 = vsel %vm2288_vm4, %v2291_v30, %v2294_v58  ;;  %v634_v23 = vsel %vm627_vm8, %v630_v47, %v633_v21  ;;  %v9582_v21 = vld [vmem:[%s17526_s1 + $0x18] sm:$0xff]  }
 0x19d   : > { %v12191_v3 = vsel %vm624_vm2, nan, %v2295_v5  ;;  %v12194_v37 = vsel %vm624_vm2, nan, %v634_v23 }
 0x19e   : > { %18245 = vst [vmem:[#allocation45_spill] sm:$0xff] %v12191_v3  ;;  %18246 = vst [vmem:[#allocation46_spill] sm:$0xff] %v12194_v37  ;;  %v3694_v42 = vrot.slane %v12191_v3, 3  ;;  %v3650_v4 = vrot.slane %v12194_v37, 5 }
 0x1a0   : > { %v3701_v14 = vsel %vm18249_vm11, %v3694_v42, %v18248_v54  ;;  %v3730_v9 = vsel %vm18250_vm6, %v3665_v10, %v3694_v42  ;;  %v3657_v38 = vsel %vm17736_vm1, %v3650_v4, %v3656_v33  ;;  %v3726_v56 = vsel %vm17736_vm1, %v11822_v53, %v3650_v4 }
 0x1a1   : > { %v12210_v24 = vpack.c.bf16 %v3701_v14, %v3730_v9  ;;  %v12214_v58 = vpack.c.bf16 %v3657_v38, %v3726_v56 }
 0x1a2   : > { %9261 = vmatmul.mubr.msk.bf16.gmra.mxu0 %vm17749_vm10, %v9581_v52 }
 0x1a3   : > { %18251 = vst [vmem:[#allocation48_spill] sm:$0xff] %v12210_v24  ;;  %3924 = vmatpush1.bf16.msra.mxu1 %v12210_v24  ;;  %18252 = vst [vmem:[#allocation49_spill] sm:$0xff] %v12214_v58  ;;  %3900 = vmatprep.mubr.bf16.mxu0 %v18242_v25 }
 0x1a4   : > { %3925 = vmatprep.subr.bf16.mxu1 %v12201_v16 }
 0x1a7   : > { %3926 = vmatpush1.bf16.msra.mxu1 %v12214_v58 }
 0x1aa   : > { %9269 = vmatmul.mubr.msk.bf16.vlgmr.msra.gmra.mxu1 %vm17749_vm10, %v9579_v44  ;;  %9262 = vmatmul.mubr.msk.bf16.gmra.mxu0 %vm17749_vm10, %v9582_v21 }
 0x1ab   : > { %3953 = vmatprep.mubr.bf16.mxu1 %v18242_v25  ;;  %4520 = vmatprep.mubr.bf16.mxu0 %v18242_v25 }
 0x1b2   : > { %9270 = vmatmul.mubr.msk.bf16.gmra.mxu1 %vm17749_vm10, %v9580_v8 }
 0x1b3   : > { %3963 = vmatprep.mubr.bf16.mxu1 %v18242_v25 }
 0x1ba   : > { %9271 = vmatmul.mubr.msk.bf16.gmra.mxu1 %vm17749_vm10, %v9581_v52 }
 0x1bb   : > { %3973 = vmatprep.mubr.bf16.mxu1 %v18242_v25 }
 0x1c2   : > { %9272 = vmatmul.mubr.msk.bf16.gmra.mxu1 %vm17749_vm10, %v9582_v21 }
 0x1c3   : > { %4593 = vmatprep.mubr.bf16.mxu1 %v18242_v25 }
 0x1c9   : > { %v12232_v53 = vpop.permute.xlu0 %3797  ;;  %v12234_v44 = vpop.permute.xlu1 %3787 }
 0x1cd   : > { %v12236_v33 = vpop.permute.xlu0 %3802  ;;  %v12238_v30 = vpop.permute.xlu1 %3792 }
 0x1d1   : > { %v12240_v47 = vpop.permute.xlu0 %3777  ;;  %v12242_v8 = vpop.permute.xlu1 %3782 }
 0x1d5   : > { %v12244_v5 = vpop.permute.xlu0 %3767  ;;  %v12249_v2 = vpop.permute.xlu1 %3772 }
 0x252   : > { %v3872_v48 = vpop.f32.mrf.mxu0 }
 0x253   : > { %v12247_v39 = vadd.f32 %v3872_v48, %v12244_v5 }
 0x254   : > { %v3874_v19 = vpop.f32.mrf.mxu0 }
 0x255   : > { %v12252_v10 = vmul.f32 100.0, %v12247_v39  ;;  %v12265_v56 = vadd.f32 %v3874_v19, %v12244_v5 }
 0x256   : > { %v3876_v23 = vpop.f32.mrf.mxu0 }
 0x257   : > { %18253 = vst [vmem:[#allocation50_spill] sm:$0xff] %v12252_v10  ;;  %v12255_v42 = vadd.f32 %v3876_v23, %v12249_v2  ;;  %v4016_v54 = vmin.f32 %v12252_v10, 20.0  ;;  %18255 = vst [vmem:[#allocation52_spill] sm:$0xff] %v12265_v56  ;;  %vm17737_vm3 = vcmp.gt.f32.partialorder %v12252_v10, 20.0 }
 0x258   : > { %v3878_v4 = vpop.f32.mrf.mxu0 }
 0x259   : > { %v12259_v14 = vmul.f32 100.0, %v12255_v42  ;;  %v4048_v23 = vmul.f32 1.442695, %v4016_v54  ;;  %v12272_v0 = vadd.f32 %v3878_v4, %v12249_v2 }
 0x25a   : > { %v3882_v52 = vpop.f32.mrf.mxu0 }
 0x25b   : > { %18254 = vst [vmem:[#allocation51_spill] sm:$0xff] %v12259_v14  ;;  %v12262_v9 = vadd.f32 %v3882_v52, %v12240_v47  ;;  %v4020_v31 = vmin.f32 %v12259_v14, 20.0  ;;  %18257 = vst [vmem:[#allocation54_spill] sm:$0xff] %v12272_v0  ;;  %v12278_v52 = vmul.f32 100.0, %v12265_v56  ;;  %9678 = vpow2.f32 %v4048_v23 }
 0x25c   : > { %v3884_v38 = vpop.f32.mrf.mxu0  ;;  %v12288_v4 = vmul.f32 100.0, %v12272_v0  ;;  %vm17738_vm14 = vcmp.gt.f32.partialorder %v12259_v14, 20.0 }
 0x25d   : > { %v12268_v21 = vmul.f32 100.0, %v12262_v9  ;;  %v12282_v36 = vadd.f32 %v3884_v38, %v12240_v47  ;;  %v4056_v7 = vmul.f32 1.442695, %v4020_v31  ;;  %v4017_v17 = vmin.f32 %v12278_v52, 20.0 }
 0x25e   : > { %v3886_v48 = vpop.f32.mrf.mxu0 }
 0x25f   : > { %18256 = vst [vmem:[#allocation53_spill] sm:$0xff] %v12268_v21  ;;  %v12275_v32 = vadd.f32 %v3886_v48, %v12242_v8  ;;  %v4024_v19 = vmin.f32 %v12268_v21, 20.0  ;;  %18258 = vst [vmem:[#allocation55_spill] sm:$0xff] %v12282_v36  ;;  %v12298_v63 = vmul.f32 100.0, %v12282_v36  ;;  %9680 = vpow2.f32 %v4056_v7 }
 0x260   : > { %v3888_v62 = vpop.f32.mrf.mxu0  ;;  %v4050_v60 = vmul.f32 1.442695, %v4017_v17  ;;  %vm17739_vm7 = vcmp.gt.f32.partialorder %v12268_v21, 20.0 }
 0x261   : > { %v12285_v54 = vadd.f32 %v3888_v62, %v12242_v8  ;;  %v12294_v37 = vmul.f32 100.0, %v12275_v32  ;;  %v4064_v38 = vmul.f32 1.442695, %v4024_v19  ;;  %v4025_v3 = vmin.f32 %v12298_v63, 20.0 }
 0x262   : > { %v3892_v22 = vpop.f32.mrf.mxu0 }
 0x263   : > { %18259 = vst [vmem:[#allocation56_spill] sm:$0xff] %v12285_v54  ;;  %v12291_v48 = vadd.f32 %v3892_v22, %v12234_v44  ;;  %18260 = vst [vmem:[#allocation57_spill] sm:$0xff] %v12294_v37  ;;  %v12301_v23 = vmul.f32 100.0, %v12285_v54  ;;  %v4021_v22 = vmin.f32 %v12288_v4, 20.0  ;;  %v4028_v40 = vmin.f32 %v12294_v37, 20.0 }
 0x264   : > { %v3894_v46 = vpop.f32.mrf.mxu0  ;;  %9682 = vpow2.f32 %v4064_v38  ;;  %v4066_v16 = vmul.f32 1.442695, %v4025_v3  ;;  %vm17740_vm5 = vcmp.gt.f32.partialorder %v12294_v37, 20.0 }
 0x265   : > { %v12308_v29 = vmul.f32 100.0, %v12291_v48  ;;  %v12317_v7 = vadd.f32 %v3894_v46, %v12234_v44  ;;  %v4058_v17 = vmul.f32 1.442695, %v4021_v22  ;;  %v4072_v59 = vmul.f32 1.442695, %v4028_v40 }
 0x266   : > { %v3896_v62 = vpop.f32.mrf.mxu0  ;;  %9684 = vpow2.f32 %v4050_v60  ;;  %vm4125_vm0 = vcmp.gt.f32.partialorder %v12301_v23, 20.0 }
 0x267   : > { %v12304_v31 = vadd.f32 %v3896_v62, %v12238_v30  ;;  %18261 = vst [vmem:[#allocation58_spill] sm:$0xff] %v12308_v29  ;;  %v4029_v62 = vmin.f32 %v12301_v23, 20.0  ;;  %v4032_v38 = vmin.f32 %v12308_v29, 20.0  ;;  %v12336_v26 = vmul.f32 100.0, %v12317_v7 }
 0x268   : > { %v3898_v20 = vpop.f32.mrf.mxu0  ;;  %9686 = vpow2.f32 %v4058_v17  ;;  %v12344_v60 = vpop.eup %9678  ;;  %vm17741_vm13 = vcmp.gt.f32.partialorder %v12308_v29, 20.0 }
 0x269   : > { %v12320_v49 = vmul.f32 100.0, %v12304_v31  ;;  %v12329_v46 = vadd.f32 %v3898_v20, %v12238_v30  ;;  %v4074_v24 = vmul.f32 1.442695, %v4029_v62  ;;  %v4080_v20 = vmul.f32 1.442695, %v4032_v38  ;;  %18265 = vst [vmem:[#allocation62_spill] sm:$0xff] %v12344_v60 }
 0x26a   : > { %v3945_v19 = vpop.f32.mrf.mxu1  ;;  %v3902_v15 = vpop.f32.mrf.mxu0  ;;  %9688 = vpow2.f32 %v4072_v59  ;;  %v4033_v59 = vmin.f32 %v12336_v26, 20.0  ;;  %vm17747_vm2 = vcmp.gt.f32.partialorder %v12336_v26, 20.0 }
 0x26b   : > { %v12313_v12 = vadd.f32 %v3945_v19, %v12244_v5  ;;  %18263 = vst [vmem:[#allocation60_spill] sm:$0xff] %v12320_v49  ;;  %v12332_v58 = vadd.f32 %v3902_v15, %v12232_v53  ;;  %v4036_v27 = vmin.f32 %v12320_v49, 20.0  ;;  %v12350_v3 = vmul.f32 100.0, %v12329_v46 }
 0x26c   : > { %v3947_v6 = vpop.f32.mrf.mxu1  ;;  %9690 = vpow2.f32 %v4066_v16  ;;  %v4082_v61 = vmul.f32 1.442695, %v4033_v59  ;;  %vm17744_vm12 = vcmp.gt.f32.partialorder %v12320_v49, 20.0 }
 0x26d   : > { %18262 = vst [vmem:[#allocation59_spill] sm:$0xff] %v12313_v12  ;;  %v12326_v19 = vmul.f32 100.0, %v12313_v12  ;;  %v12347_v15 = vadd.f32 %v3947_v6, %v12244_v5  ;;  %18267 = vst [vmem:[#allocation64_spill] sm:$0xff] %v12350_v3  ;;  %v12353_v62 = vmul.f32 100.0, %v12332_v58  ;;  %9692 = vpow2.f32 %v4074_v24 }
 0x26e   : > { %v3949_v51 = vpop.f32.mrf.mxu1  ;;  %v4088_v6 = vmul.f32 1.442695, %v4036_v27  ;;  %v12366_v5 = vadd.f32 1.0, %v12344_v60  ;;  %9694 = vpow2.f32 %v4080_v20  ;;  %v4037_v27 = vmin.f32 %v12350_v3, 20.0 }
 0x26f   : > { %v4018_v22 = vmin.f32 %v12326_v19, 20.0  ;;  %v12340_v28 = vadd.f32 %v3949_v51, %v12249_v2  ;;  %18266 = vst [vmem:[#allocation63_spill] sm:$0xff] %v12347_v15  ;;  %18268 = vst [vmem:[#allocation65_spill] sm:$0xff] %v12353_v62  ;;  %v12374_v16 = vmul.f32 100.0, %v12347_v15  ;;  %vm17745_vm4 = vcmp.gt.f32.partialorder %v12353_v62, 20.0 }
 0x270   : > { %v3951_v40 = vpop.f32.mrf.mxu1  ;;  %18272 = vst [vmem:[#allocation69_spill] sm:$0xff] %v12366_v5  ;;  %vm17746_vm8 = vcmp.gt.f32.partialorder %v12350_v3, 20.0  ;;  %v18357_v3 = vld [vmem:[#allocation56_spill] sm:$0xff] }
 0x271   : > { %18264 = vst [vmem:[#allocation61_spill] sm:$0xff] %v12340_v28  ;;  %v4052_v51 = vmul.f32 1.442695, %v4018_v22  ;;  %v12356_v17 = vmul.f32 100.0, %v12340_v28  ;;  %v12359_v1 = vadd.f32 %v3951_v40, %v12249_v2  ;;  %v12371_v2 = vpop.eup %9680  ;;  %18274 = vst [vmem:[#allocation71_spill] sm:$0xff] %v12374_v16  ;;  %v4040_v40 = vmin.f32 %v12353_v62, 20.0 }
 0x272   : > { %v3955_v11 = vpop.f32.mrf.mxu1  ;;  %18273 = vst [vmem:[#allocation70_spill] sm:$0xff] %v12371_v2  ;;  %v12387_v60 = vpop.eup %9682  ;;  %v12394_v18 = vadd.f32 1.0, %v12371_v2 }
 0x273   : > { %18269 = vst [vmem:[#allocation66_spill] sm:$0xff] %v12356_v17  ;;  %18270 = vst [vmem:[#allocation67_spill] sm:$0xff] %v12359_v1  ;;  %v12362_v38 = vadd.f32 %v3955_v11, %v12240_v47  ;;  %v4022_v22 = vmin.f32 %v12356_v17, 20.0  ;;  %9696 = vpow2.f32 %v4052_v51  ;;  %v12382_v20 = vmul.f32 100.0, %v12359_v1  ;;  %v12410_v35 = vpop.eup %9684 }
 0x274   : > { %v3957_v55 = vpop.f32.mrf.mxu1  ;;  %18278 = vst [vmem:[#allocation75_spill] sm:$0xff] %v12387_v60  ;;  %9698 = vpow2.f32 %v4088_v6  ;;  %18280 = vst [vmem:[#allocation77_spill] sm:$0xff] %v12394_v18  ;;  %v4096_v59 = vmul.f32 1.442695, %v4040_v40  ;;  %v12413_v43 = vadd.f32 1.0, %v12387_v60  ;;  %v3904_v60 = vpop.f32.mrf.mxu0 }
 0x275   : > { %18271 = vst [vmem:[#allocation68_spill] sm:$0xff] %v12362_v38  ;;  %v12377_v24 = vmul.f32 100.0, %v12362_v38  ;;  %v4060_v11 = vmul.f32 1.442695, %v4022_v22  ;;  %18276 = vst [vmem:[#allocation73_spill] sm:$0xff] %v12382_v20  ;;  %v12385_v34 = vadd.f32 %v3957_v55, %v12240_v47  ;;  %9700 = vlog2.f32 %v12366_v5  ;;  %v12420_v12 = vpop.eup %9686 }
 0x276   : > { %v3959_v45 = vpop.f32.mrf.mxu1  ;;  %v4019_v55 = vmin.f32 %v12374_v16, 20.0  ;;  %v4023_v6 = vmin.f32 %v12382_v20, 20.0  ;;  %18284 = vst [vmem:[#allocation81_spill] sm:$0xff] %v12413_v43  ;;  %18286 = vst [vmem:[#allocation83_spill] sm:$0xff] %v12420_v12 }
 0x277   : > { %18275 = vst [vmem:[#allocation72_spill] sm:$0xff] %v12377_v24  ;;  %18277 = vst [vmem:[#allocation74_spill] sm:$0xff] %v12385_v34  ;;  %v12390_v50 = vadd.f32 %v3959_v45, %v12242_v8  ;;  %v4026_v51 = vmin.f32 %v12377_v24, 20.0  ;;  %v4090_v45 = vmul.f32 1.442695, %v4037_v27  ;;  %9702 = vpow2.f32 %v4060_v11  ;;  %v12428_v41 = vpop.eup %9688 }
 0x278   : > { %v3961_v22 = vpop.f32.mrf.mxu1  ;;  %v12405_v2 = vmul.f32 100.0, %v12385_v34  ;;  %9704 = vpow2.f32 %v4082_v61  ;;  %18289 = vst [vmem:[#allocation86_spill] sm:$0xff] %v12428_v41  ;;  %v4062_v61 = vmul.f32 1.442695, %v4023_v6  ;;  %v12446_v38 = vadd.f32 1.0, %v12428_v41 }
 0x279   : > { %18279 = vst [vmem:[#allocation76_spill] sm:$0xff] %v12390_v50  ;;  %v12401_v47 = vmul.f32 100.0, %v12390_v50  ;;  %v12408_v5 = vadd.f32 %v3961_v22, %v12242_v8  ;;  %9706 = vlog2.f32 %v12394_v18  ;;  %v4068_v27 = vmul.f32 1.442695, %v4026_v51  ;;  %v12434_v57 = vpop.eup %9690 }
 0x27a   : > { %18282 = vst [vmem:[#allocation79_spill] sm:$0xff] %v12405_v2  ;;  %v3965_v13 = vpop.f32.mrf.mxu1  ;;  %v4054_v8 = vmul.f32 1.442695, %v4019_v55  ;;  %9708 = vpow2.f32 %v4096_v59  ;;  %v4027_v51 = vmin.f32 %v12405_v2, 20.0  ;;  %18291 = vst [vmem:[#allocation88_spill] sm:$0xff] %v12434_v57  ;;  %v12440_v59 = vpop.eup %9692 }
 0x27b   : > { %18281 = vst [vmem:[#allocation78_spill] sm:$0xff] %v12401_v47  ;;  %18283 = vst [vmem:[#allocation80_spill] sm:$0xff] %v12408_v5  ;;  %v4030_v25 = vmin.f32 %v12401_v47, 20.0  ;;  %v12418_v40 = vadd.f32 %v3965_v13, %v12234_v44  ;;  %v12423_v22 = vmul.f32 100.0, %v12408_v5  ;;  %9710 = vpow2.f32 %v4090_v45  ;;  %v12443_v15 = vpop.eup %9694 }
 0x27c   : > { %v3967_v11 = vpop.f32.mrf.mxu1  ;;  %9712 = vlog2.f32 %v12413_v43  ;;  %18292 = vst [vmem:[#allocation89_spill] sm:$0xff] %v12440_v59  ;;  %18293 = vst [vmem:[#allocation90_spill] sm:$0xff] %v12443_v15  ;;  %v4070_v1 = vmul.f32 1.442695, %v4027_v51 }
 0x27d   : > { %18285 = vst [vmem:[#allocation82_spill] sm:$0xff] %v12418_v40  ;;  %18287 = vst [vmem:[#allocation84_spill] sm:$0xff] %v12423_v22  ;;  %v12426_v28 = vadd.f32 %v3967_v11, %v12234_v44  ;;  %v12432_v13 = vmul.f32 100.0, %v12418_v40  ;;  %v4076_v55 = vmul.f32 1.442695, %v4030_v25  ;;  %9714 = vpow2.f32 %v4068_v27  ;;  %v3906_v25 = vpop.f32.mrf.mxu0 }
 0x27e   : > { %v3969_v18 = vpop.f32.mrf.mxu1  ;;  %9716 = vpow2.f32 %v4054_v8  ;;  %18294 = vst [vmem:[#allocation91_spill] sm:$0xff] %v12446_v38  ;;  %v4031_v45 = vmin.f32 %v12423_v22, 20.0  ;;  %v12451_v27 = vadd.f32 %v3904_v60, %v12232_v53 }
 0x27f   : > { %18288 = vst [vmem:[#allocation85_spill] sm:$0xff] %v12426_v28  ;;  %18290 = vst [vmem:[#allocation87_spill] sm:$0xff] %v12432_v13  ;;  %v12438_v44 = vmul.f32 100.0, %v12426_v28  ;;  %v4034_v6 = vmin.f32 %v12432_v13, 20.0  ;;  %9718 = vpow2.f32 %v4062_v61  ;;  %v12456_v8 = vadd.f32 %v3969_v18, %v12238_v30 }
 0x280   : > { %v3971_v11 = vpop.f32.mrf.mxu1  ;;  %18295 = vst [vmem:[#allocation92_spill] sm:$0xff] %v12451_v27  ;;  %v12453_v34 = vpop.eup %9696  ;;  %9720 = vpow2.f32 %v4076_v55  ;;  %v12464_v61 = vadd.f32 1.0, %v12443_v15  ;;  %v4078_v18 = vmul.f32 1.442695, %v4031_v45 }
 0x281   : > { %v4035_v43 = vmin.f32 %v12438_v44, 20.0  ;;  %v4084_v24 = vmul.f32 1.442695, %v4034_v6  ;;  %18296 = vst [vmem:[#allocation93_spill] sm:$0xff] %v12453_v34  ;;  %18297 = vst [vmem:[#allocation94_spill] sm:$0xff] %v12456_v8  ;;  %v12459_v41 = vadd.f32 %v3971_v11, %v12238_v30  ;;  %v12461_v56 = vpop.eup %9698  ;;  %v12470_v6 = vadd.f32 %v3906_v25, %v12236_v33 }
 0x282   : > { %v3975_v50 = vpop.f32.mrf.mxu1  ;;  %18299 = vst [vmem:[#allocation96_spill] sm:$0xff] %v12461_v56  ;;  %18300 = vst [vmem:[#allocation97_spill] sm:$0xff] %v12464_v61  ;;  %v12476_v30 = vmul.f32 100.0, %v12456_v8  ;;  %v12488_v11 = vmul.f32 100.0, %v12451_v27  ;;  %v12493_v45 = vadd.f32 1.0, %v12461_v56  ;;  %vm4131_vm1 = vcmp.gt.f32.partialorder %v12438_v44, 20.0 }
 0x283   : > { %v4086_v40 = vmul.f32 1.442695, %v4035_v43  ;;  %18298 = vst [vmem:[#allocation95_spill] sm:$0xff] %v12459_v41  ;;  %9722 = vpow2.f32 %v4084_v24  ;;  %v12467_v51 = vadd.f32 %v3975_v50, %v12232_v53  ;;  %v12472_v43 = vpop.eup %9700  ;;  %v12479_v55 = vmul.f32 100.0, %v12459_v41 }
 0x284   : > { %v3977_v60 = vpop.f32.mrf.mxu1  ;;  %9724 = vlog2.f32 %v12446_v38  ;;  %18302 = vst [vmem:[#allocation99_spill] sm:$0xff] %v12476_v30  ;;  %v12482_v24 = vadd.f32 1.0, %v12453_v34  ;;  %18305 = vst [vmem:[#allocation102_spill] sm:$0xff] %v12488_v11  ;;  %v12490_v25 = vpop.eup %9702  ;;  %v4038_v15 = vmin.f32 %v12476_v30, 20.0  ;;  %v4041_v36 = vmin.f32 %v12488_v11, 20.0 }
 0x285   : > { %18301 = vst [vmem:[#allocation98_spill] sm:$0xff] %v12467_v51  ;;  %18303 = vst [vmem:[#allocation100_spill] sm:$0xff] %v12479_v55  ;;  %9726 = vpow2.f32 %v4070_v1  ;;  %v12485_v50 = vmul.f32 100.0, %v12467_v51  ;;  %v4039_v38 = vmin.f32 %v12479_v55, 20.0  ;;  %v12497_v5 = vpop.eup %9704  ;;  %v12507_v56 = vadd.f32 1.0, %v12490_v25 }
 0x286   : > { %18306 = vst [vmem:[#allocation103_spill] sm:$0xff] %v12490_v25  ;;  %9728 = vpow2.f32 %v4086_v40  ;;  %18307 = vst [vmem:[#allocation104_spill] sm:$0xff] %v12493_v45  ;;  %v3979_v8 = vpop.f32.mrf.mxu1  ;;  %v12501_v0 = vpop.eup %9706  ;;  %v4092_v34 = vmul.f32 1.442695, %v4038_v15  ;;  %v12514_v41 = vadd.f32 %v3977_v60, %v12232_v53  ;;  %v12517_v15 = vmul.f32 100.0, %v12470_v6 }
 0x287   : > { %18304 = vst [vmem:[#allocation101_spill] sm:$0xff] %v12485_v50  ;;  %18308 = vst [vmem:[#allocation105_spill] sm:$0xff] %v12497_v5  ;;  %9730 = vlog2.f32 %v12464_v61  ;;  %v4042_v1 = vmin.f32 %v12485_v50, 20.0  ;;  %v4094_v20 = vmul.f32 1.442695, %v4039_v38  ;;  %v3908_v40 = vpop.f32.mrf.mxu0  ;;  %v12503_v47 = vpop.eup %9708  ;;  %v12520_v38 = vadd.f32 %v3979_v8, %v12236_v33 }
 0x288   : > { %9732 = vpow2.f32 %v4078_v18  ;;  %18309 = vst [vmem:[#allocation106_spill] sm:$0xff] %v12503_v47  ;;  %v12510_v61 = vpop.eup %9710  ;;  %18311 = vst [vmem:[#allocation108_spill] sm:$0xff] %v12514_v41  ;;  %v4098_v25 = vmul.f32 1.442695, %v4041_v36  ;;  %v12533_v53 = vmul.f32 100.0, %v12514_v41  ;;  %v4044_v8 = vmin.f32 %v12517_v15, 20.0  ;;  %v3981_v54 = vpop.f32.mrf.mxu1 }
 0x289   : > { %9734 = vlog2.f32 %v12482_v24  ;;  %v4100_v17 = vmul.f32 1.442695, %v4042_v1  ;;  %18310 = vst [vmem:[#allocation107_spill] sm:$0xff] %v12510_v61  ;;  %18312 = vst [vmem:[#allocation109_spill] sm:$0xff] %v12517_v15  ;;  %v12522_v18 = vpop.eup %9712  ;;  %v12525_v1 = vadd.f32 %v3908_v40, %v12236_v33  ;;  %v12570_v22 = vadd.f32 %v3981_v54, %v12236_v33 }
 0x28a   : > { %9736 = vlog2.f32 %v12493_v45  ;;  %18313 = vst [vmem:[#allocation110_spill] sm:$0xff] %v12520_v38  ;;  %v12527_v2 = vpop.eup %9714  ;;  %v12530_v45 = vadd.f32 1.0, %v12503_v47  ;;  %18317 = vst [vmem:[#allocation114_spill] sm:$0xff] %v12533_v53  ;;  %v4043_v36 = vmin.f32 %v12533_v53, 20.0  ;;  %v4104_v47 = vmul.f32 1.442695, %v4044_v8 }
 0x28b   : > { %9738 = vpow2.f32 %v4092_v34  ;;  %18314 = vst [vmem:[#allocation111_spill] sm:$0xff] %v12525_v1  ;;  %18315 = vst [vmem:[#allocation112_spill] sm:$0xff] %v12527_v2  ;;  %v12535_v60 = vpop.eup %9716  ;;  %v12543_v34 = vmul.f32 100.0, %v12520_v38  ;;  %v12548_v40 = vadd.f32 1.0, %v12527_v2  ;;  %vm17748_vm11 = vcmp.gt.f32.partialorder %v12517_v15, 20.0  ;;  %v18356_v15 = vld [vmem:[#allocation71_spill] sm:$0xff] }
 0x28c   : > { %9740 = vpow2.f32 %v4094_v20  ;;  %18316 = vst [vmem:[#allocation113_spill] sm:$0xff] %v12530_v45  ;;  %v12538_v28 = vpop.eup %9718  ;;  %v4102_v51 = vmul.f32 1.442695, %v4043_v36  ;;  %18328 = vst [vmem:[#allocation125_spill] sm:$0xff] %v12570_v22  ;;  %vm17754_vm6 = vcmp.gt.f32.partialorder %v12488_v11, 20.0 }
 0x28d   : > { %9742 = vpow2.f32 %v4100_v17  ;;  %18318 = vst [vmem:[#allocation115_spill] sm:$0xff] %v12538_v28  ;;  %18319 = vst [vmem:[#allocation116_spill] sm:$0xff] %v12543_v34  ;;  %v12545_v20 = vpop.eup %9720  ;;  %v12551_v17 = vmul.f32 100.0, %v12525_v1  ;;  %v4046_v13 = vmin.f32 %v12543_v34, 20.0  ;;  %v12573_v1 = vadd.f32 1.0, %v12497_v5 }
 0x28e   : > { %9744 = vlog2.f32 %v12507_v56  ;;  %18320 = vst [vmem:[#allocation117_spill] sm:$0xff] %v12545_v20  ;;  %18321 = vst [vmem:[#allocation118_spill] sm:$0xff] %v12548_v40 }
 0x28f   : > { %9746 = vpow2.f32 %v4098_v25  ;;  %18322 = vst [vmem:[#allocation119_spill] sm:$0xff] %v12551_v17  ;;  %v4045_v16 = vmin.f32 %v12551_v17, 20.0  ;;  %v12561_v25 = vadd.f32 1.0, %v12545_v20  ;;  %v4108_v8 = vmul.f32 1.442695, %v4046_v13  ;;  %18329 = vst [vmem:[#allocation126_spill] sm:$0xff] %v12573_v1 }
 0x290   : > { %v12553_v41 = vpop.eup %9722  ;;  %9748 = vlog2.f32 %v12530_v45  ;;  %v12578_v13 = vmul.f32 100.0, %v12570_v22  ;;  %vm17753_vm15 = vcmp.gt.f32.partialorder %v12551_v17, 20.0 }
 0x291   : > { %18323 = vst [vmem:[#allocation120_spill] sm:$0xff] %v12553_v41  ;;  %v9725_v38 = vpop.eup %9724  ;;  %9750 = vpow2.f32 %v4104_v47  ;;  %18325 = vst [vmem:[#allocation122_spill] sm:$0xff] %v12561_v25  ;;  %v12567_v36 = vadd.f32 1.0, %v12553_v41  ;;  %v4106_v45 = vmul.f32 1.442695, %v4045_v16 }
 0x292   : > { %v12558_v30 = vpop.eup %9726  ;;  %9752 = vpow2.f32 %v4102_v51  ;;  %v12581_v51 = vadd.f32 1.0, %v12510_v61  ;;  %v4047_v16 = vmin.f32 %v12578_v13, 20.0 }
 0x293   : > { %18324 = vst [vmem:[#allocation121_spill] sm:$0xff] %v12558_v30  ;;  %v12563_v2 = vpop.eup %9728  ;;  %9754 = vlog2.f32 %v12548_v40  ;;  %18327 = vst [vmem:[#allocation124_spill] sm:$0xff] %v12567_v36  ;;  %v18370_v11 = vld [vmem:[#allocation125_spill] sm:$0xff] }
 0x294   : > { %18326 = vst [vmem:[#allocation123_spill] sm:$0xff] %v12563_v2  ;;  %v9731_v47 = vpop.eup %9730  ;;  %9756 = vpow2.f32 %v4108_v8  ;;  %18331 = vst [vmem:[#allocation128_spill] sm:$0xff] %v12581_v51  ;;  %v12587_v33 = vadd.f32 1.0, %v12563_v2  ;;  %v4110_v5 = vmul.f32 1.442695, %v4047_v16  ;;  %v12615_v16 = vadd.f32 1.0, %v12434_v57 }
 0x295   : > { %v12575_v20 = vpop.eup %9732  ;;  %9758 = vpow2.f32 %v4106_v45 }
 0x296   : > { %18330 = vst [vmem:[#allocation127_spill] sm:$0xff] %v12575_v20  ;;  %v12583_v41 = vpop.eup %9734  ;;  %9760 = vlog2.f32 %v12561_v25  ;;  %18332 = vst [vmem:[#allocation129_spill] sm:$0xff] %v12587_v33 }
 0x297   : > { %v9737_v54 = vpop.eup %9736  ;;  %9762 = vlog2.f32 %v12567_v36  ;;  %18340 = vst [vmem:[#allocation137_spill] sm:$0xff] %v12615_v16  ;;  %v12721_v21 = vmul.f32 0.6931472, %v12583_v41 }
 0x298   : > { %v12591_v8 = vpop.eup %9738  ;;  %9764 = vlog2.f32 %v12573_v1  ;;  %v4217_v22 = vmul.f32 0.6931472, %v9737_v54  ;;  %v12669_v54 = vadd.f32 1.0, %v12420_v12 }
 0x299   : > { %18333 = vst [vmem:[#allocation130_spill] sm:$0xff] %v12591_v8  ;;  %v12594_v45 = vpop.eup %9740  ;;  %v12597_v61 = vadd.f32 1.0, %v12591_v8  ;;  %9766 = vlog2.f32 %v12581_v51  ;;  %v4185_v51 = vmul.f32 0.6931472, %v12501_v0 }
 0x29a   : > { %18334 = vst [vmem:[#allocation131_spill] sm:$0xff] %v12594_v45  ;;  %v12600_v25 = vpop.eup %9742  ;;  %v12603_v2 = vadd.f32 1.0, %v12594_v45  ;;  %9768 = vlog2.f32 %v12587_v33 }
 0x29b   : > { %18335 = vst [vmem:[#allocation132_spill] sm:$0xff] %v12597_v61  ;;  %18336 = vst [vmem:[#allocation133_spill] sm:$0xff] %v12600_v25  ;;  %v12606_v36 = vpop.eup %9744  ;;  %9770 = vlog2.f32 %v12597_v61  ;;  %v12610_v1 = vadd.f32 1.0, %v12600_v25 }
 0x29c   : > { %18337 = vst [vmem:[#allocation134_spill] sm:$0xff] %v12603_v2  ;;  %v12612_v40 = vpop.eup %9746  ;;  %9772 = vpow2.f32 %v4110_v5  ;;  %v12632_v5 = vadd.f32 1.0, %v12440_v59  ;;  %v4193_v59 = vmul.f32 0.6931472, %v12522_v18  ;;  %v12731_v49 = vmul.f32 0.6931472, %v12606_v36 }
 0x29d   : > { %18338 = vst [vmem:[#allocation135_spill] sm:$0xff] %v12610_v1  ;;  %18339 = vst [vmem:[#allocation136_spill] sm:$0xff] %v12612_v40  ;;  %v9749_v8 = vpop.eup %9748  ;;  %9774 = vlog2.f32 %v12610_v1  ;;  %v12620_v45 = vadd.f32 1.0, %v12612_v40  ;;  %v4201_v1 = vmul.f32 0.6931472, %v9725_v38 }
 0x29e   : > { %v12622_v33 = vpop.eup %9750  ;;  %9776 = vlog2.f32 %v12603_v2  ;;  %v4244_v2 = vmul.f32 0.01, %v4185_v51  ;;  %v4225_v14 = vmul.f32 0.6931472, %v9749_v8 }
 0x29f   : > { %18341 = vst [vmem:[#allocation138_spill] sm:$0xff] %v12620_v45  ;;  %18342 = vst [vmem:[#allocation139_spill] sm:$0xff] %v12622_v33  ;;  %v12625_v25 = vpop.eup %9752  ;;  %v12628_v61 = vadd.f32 1.0, %v12622_v33  ;;  %9778 = vlog2.f32 %v12620_v45  ;;  %v4177_v33 = vmul.f32 0.6931472, %v12472_v43  ;;  %v12660_v43 = vadd.f32 1.0, %v12575_v20 }
 0x2a0   : > { %18343 = vst [vmem:[#allocation140_spill] sm:$0xff] %v12625_v25  ;;  %v12634_v0 = vpop.eup %9754  ;;  %v12637_v40 = vadd.f32 1.0, %v12625_v25  ;;  %9780 = vlog2.f32 %v12615_v16  ;;  %v12653_v25 = vadd.f32 1.0, %v12558_v30  ;;  %v4252_v18 = vmul.f32 0.01, %v4201_v1 }
 0x2a1   : > { %18344 = vst [vmem:[#allocation141_spill] sm:$0xff] %v12628_v61  ;;  %v12640_v57 = vpop.eup %9756  ;;  %9782 = vlog2.f32 %v12628_v61  ;;  %v4209_v61 = vmul.f32 0.6931472, %v9731_v47  ;;  %v4240_v30 = vmul.f32 0.01, %v4177_v33 }
 0x2a2   : > { %18345 = vst [vmem:[#allocation142_spill] sm:$0xff] %v12637_v40  ;;  %18346 = vst [vmem:[#allocation143_spill] sm:$0xff] %v12640_v57  ;;  %v12645_v45 = vpop.eup %9758  ;;  %v12649_v38 = vadd.f32 1.0, %v12640_v57  ;;  %9784 = vlog2.f32 %v12637_v40  ;;  %v12664_v57 = vadd.f32 1.0, %v12410_v35  ;;  %v4248_v20 = vmul.f32 0.01, %v4193_v59 }
 0x2a3   : > { %18347 = vst [vmem:[#allocation144_spill] sm:$0xff] %v12645_v45  ;;  %v9761_v16 = vpop.eup %9760  ;;  %v12656_v27 = vadd.f32 1.0, %v12645_v45  ;;  %9786 = vlog2.f32 %v12632_v5  ;;  %v4260_v47 = vmul.f32 0.01, %v4217_v22  ;;  %v12685_v59 = vsel %vm17740_vm5, %v12275_v32, %v4252_v18 }
 0x2a4   : > { %18348 = vst [vmem:[#allocation145_spill] sm:$0xff] %v12649_v38  ;;  %v9763_v51 = vpop.eup %9762  ;;  %9788 = vlog2.f32 %v12649_v38  ;;  %v4256_v38 = vmul.f32 0.01, %v4209_v61  ;;  %v12694_v22 = vsel %vm17737_vm3, %v12247_v39, %v4240_v30  ;;  %v12701_v32 = vsel %vm17739_vm7, %v12262_v9, %v4248_v20 }
 0x2a5   : > { %18349 = vst [vmem:[#allocation146_spill] sm:$0xff] %v12656_v27  ;;  %v9765_v40 = vpop.eup %9764  ;;  %9790 = vlog2.f32 %v12656_v27  ;;  %v12680_v27 = vsel %vm17738_vm14, %v12255_v42, %v4244_v2  ;;  %v4147_v42 = vadd.f32 1.0, %v12535_v60  ;;  %v4205_v61 = vmul.f32 0.6931472, %v9761_v16 }
 0x2a6   : > { %v9767_v45 = vpop.eup %9766  ;;  %9792 = vlog2.f32 %v12653_v25  ;;  %v12708_v39 = vadd.f32 1.0, %v12538_v28  ;;  %v12718_v9 = vsel %vm17744_vm12, %v12304_v31, %v4260_v47  ;;  %v12726_v37 = vsel %vm17741_vm13, %v12291_v48, %v4256_v38 }
 0x2a7   : > { %v9769_v1 = vpop.eup %9768  ;;  %9794 = vlog2.f32 %v12660_v43  ;;  %v4219_v20 = vmul.f32 0.6931472, %v9767_v45  ;;  %v4211_v8 = vmul.f32 0.6931472, %v9765_v40  ;;  %v4213_v31 = vmul.f32 0.6931472, %v9763_v51 }
 0x2a8   : > { %v9771_v33 = vpop.eup %9770  ;;  %9796 = vlog2.f32 %v12664_v57  ;;  %v4264_v45 = vmul.f32 0.01, %v4225_v14  ;;  %v12734_v41 = vmul.f32 0.6931472, %v12634_v0  ;;  %v4215_v29 = vmul.f32 0.6931472, %v9769_v1 }
 0x2a9   : > { %v12689_v12 = vpop.eup %9772  ;;  %9798 = vlog2.f32 %v12669_v54  ;;  %v4261_v14 = vmul.f32 0.01, %v4219_v20  ;;  %v4221_v0 = vmul.f32 0.6931472, %v9771_v33  ;;  %vm17756_vm3 = vcmp.gt.f32.partialorder %v12485_v50, 20.0 }
 0x2aa   : > { %18350 = vst [vmem:[#allocation147_spill] sm:$0xff] %v12689_v12  ;;  %v9775_v2 = vpop.eup %9774  ;;  %v12705_v18 = vadd.f32 1.0, %v12689_v12  ;;  %v12736_v12 = vmul.f32 0.01, %v4205_v61  ;;  %v4257_v61 = vmul.f32 0.01, %v4211_v8 }
 0x2ab   : > { %v9777_v30 = vpop.eup %9776  ;;  %vm17755_vm14 = vcmp.gt.f32.partialorder %v12543_v34, 20.0  ;;  %vm4121_vm7 = vcmp.gt.f32.partialorder %v12298_v63, 20.0  ;;  %vm17757_vm5 = vcmp.gt.f32.partialorder %v12479_v55, 20.0  ;;  %vm17764_vm13 = vcmp.gt.f32.partialorder %v12533_v53, 20.0  ;;  %v18371_v53 = vld [vmem:[#allocation118_spill] sm:$0xff]  ;;  %v18427_v63 = vld [vmem:[#allocation89_spill] sm:$0xff] }
 0x2ac   : > { %18351 = vst [vmem:[#allocation148_spill] sm:$0xff] %v12705_v18  ;;  %v9779_v16 = vpop.eup %9778  ;;  %9800 = vlog2.f32 %v12705_v18  ;;  %v12746_v18 = vmul.f32 0.01, %v4213_v31  ;;  %v4223_v8 = vmul.f32 0.6931472, %v9777_v30  ;;  %vm17763_vm12 = vcmp.gt.f32.partialorder %v12578_v13, 20.0 }
 0x2ad   : > { %v9781_v10 = vpop.eup %9780  ;;  %9802 = vlog2.f32 %v4147_v42  ;;  %v4227_v38 = vmul.f32 0.6931472, %v9779_v16  ;;  %v4296_v16 = vsel %vm17745_vm4, %v12332_v58, %v4264_v45  ;;  %v4293_v45 = vsel %vm17746_vm8, %v12329_v46, %v4261_v14  ;;  %v18352_v14 = vld [vmem:[#allocation92_spill] sm:$0xff] }
 0x2ae   : > { %v9783_v47 = vpop.eup %9782  ;;  %9804 = vlog2.f32 %v12708_v39  ;;  %v12760_v62 = vmul.f32 0.01, %v4221_v0  ;;  %v4259_v30 = vmul.f32 0.01, %v4215_v29  ;;  %vm4114_vm4 = vcmp.gt.f32.partialorder %v12326_v19, 20.0  ;;  %v18353_v0 = vld [vmem:[#allocation111_spill] sm:$0xff] }
 0x2af   : > { %v9785_v40 = vpop.eup %9784  ;;  %v4233_v36 = vmul.f32 0.6931472, %v9783_v47  ;;  %9806 = vrcp.f32 %v12482_v24  ;;  %v4265_v58 = vmul.f32 0.01, %v4227_v38  ;;  %vm4117_vm8 = vcmp.gt.f32.partialorder %v12288_v4, 20.0 }
 0x2b0   : > { %v9787_v51 = vpop.eup %9786  ;;  %9808 = vrcp.f32 %v12664_v57  ;;  %v4229_v57 = vmul.f32 0.6931472, %v9775_v2  ;;  %v4231_v28 = vmul.f32 0.6931472, %v9785_v40  ;;  %v4289_v2 = vsel %vm17747_vm2, %v12317_v7, %v4257_v61 }
 0x2b1   : > { %v9789_v48 = vpop.eup %9788  ;;  %v4268_v24 = vmul.f32 0.01, %v4233_v36  ;;  %v4203_v20 = vmul.f32 0.6931472, %v9787_v51  ;;  %9810 = vrcp.f32 %v4147_v42  ;;  %v4195_v36 = vmul.f32 0.6931472, %v9781_v10 }
 0x2b2   : > { %v9791_v33 = vpop.eup %9790  ;;  %v4237_v1 = vmul.f32 0.6931472, %v9789_v48  ;;  %9812 = vrcp.f32 %v12507_v56  ;;  %v4266_v46 = vmul.f32 0.01, %v4229_v57  ;;  %v4409_v7 = vpack.c.bf16 %v4293_v45, %v4289_v2 }
 0x2b3   : > { %v9793_v31 = vpop.eup %9792  ;;  %v4235_v47 = vmul.f32 0.6931472, %v9791_v33  ;;  %v4300_v48 = vsel %vm17748_vm11, %v12470_v6, %v4268_v24  ;;  %v4253_v33 = vmul.f32 0.01, %v4203_v20  ;;  %v4263_v29 = vmul.f32 0.01, %v4223_v8 }
 0x2b4   : > { %v9795_v51 = vpop.eup %9794  ;;  %v4270_v40 = vmul.f32 0.01, %v4237_v1  ;;  %v4297_v6 = vsel %vm17754_vm6, %v18352_v14, %v4265_v58  ;;  %v4249_v56 = vmul.f32 0.01, %v4195_v36  ;;  %v18354_v20 = vld [vmem:[#allocation84_spill] sm:$0xff]  ;;  %v4412_v57 = vpack.c.bf16 %v4300_v48, %v4296_v16 }
 0x2b5   : > { %v9797_v42 = vpop.eup %9796  ;;  %v4269_v38 = vmul.f32 0.01, %v4235_v47  ;;  %vm4127_vm11 = vcmp.gt.f32.partialorder %v18354_v20, 20.0  ;;  %v18355_v47 = vld [vmem:[#allocation99_spill] sm:$0xff]  ;;  %v4267_v45 = vmul.f32 0.01, %v4231_v28  ;;  %v4285_v58 = vsel %vm4125_vm0, %v18357_v3, %v4253_v33 }
 0x2b6   : > { %v9799_v10 = vpop.eup %9798  ;;  %vm4134_vm10 = vcmp.gt.f32.partialorder %v18355_v47, 20.0  ;;  %v4199_v8 = vmul.f32 0.6931472, %v9793_v31  ;;  %vm4115_vm2 = vcmp.gt.f32.partialorder %v18356_v15, 20.0  ;;  %v4207_v14 = vmul.f32 0.6931472, %v9795_v51 }
 0x2b7   : > { %v4301_v61 = vsel %vm17753_vm15, %v18353_v0, %v4269_v38  ;;  %v4187_v24 = vmul.f32 0.6931472, %v9799_v10  ;;  %v4179_v17 = vmul.f32 0.6931472, %v9797_v42  ;;  %9814 = vrcp.f32 %v12669_v54  ;;  %v18358_v38 = vld [vmem:[#allocation87_spill] sm:$0xff]  ;;  %v18359_v10 = vld [vmem:[#allocation98_spill] sm:$0xff] }
 0x2b8   : > { %v4413_v1 = vpack.c.bf16 %v4301_v61, %v4297_v6  ;;  %vm4130_vm15 = vcmp.gt.f32.partialorder %v18358_v38, 20.0  ;;  %v4298_v16 = vsel %vm17756_vm3, %v18359_v10, %v4266_v46  ;;  %v18360_v28 = vld [vmem:[#allocation110_spill] sm:$0xff]  ;;  %v18361_v6 = vld [vmem:[#allocation85_spill] sm:$0xff]  ;;  %v18362_v42 = vld [vmem:[#allocation79_spill] sm:$0xff]  ;;  %9816 = vrcp.f32 %v12708_v39 }
 0x2b9   : > { %v9801_v2 = vpop.eup %9800  ;;  %v4302_v31 = vsel %vm17755_vm14, %v18360_v28, %v4270_v40  ;;  %v4291_v3 = vsel %vm4131_vm1, %v18361_v6, %v4259_v30  ;;  %vm4123_vm6 = vcmp.gt.f32.partialorder %v18362_v42, 20.0  ;;  %v18363_v54 = vld [vmem:[#allocation95_spill] sm:$0xff]  ;;  %v4245_v61 = vmul.f32 0.01, %v4187_v24  ;;  %v18367_v10 = vld [vmem:[#allocation108_spill] sm:$0xff]  ;;  %v18369_v39 = vld [vmem:[#allocation93_spill] sm:$0xff] }
 0x2ba   : > { %v9803_v36 = vpop.eup %9802  ;;  %4496 = vmatprep.subr.bf16.mxu0 %v4413_v1  ;;  %v4239_v48 = vmul.f32 0.6931472, %v9801_v2  ;;  %v4295_v33 = vsel %vm17757_vm5, %v18363_v54, %v4263_v29  ;;  %v18364_v0 = vld [vmem:[#allocation55_spill] sm:$0xff]  ;;  %v18365_v1 = vld [vmem:[#allocation66_spill] sm:$0xff]  ;;  %v4251_v29 = vmul.f32 0.01, %v4199_v8  ;;  %9818 = vrcp.f32 %v18371_v53 }
 0x2bb   : > { %v9805_v51 = vpop.eup %9804  ;;  %4497 = vmatpush1.bf16.msra.mxu0 %v4412_v57  ;;  %v4281_v46 = vsel %vm4121_vm7, %v18364_v0, %v4249_v56  ;;  %vm4118_vm14 = vcmp.gt.f32.partialorder %v18365_v1, 20.0  ;;  %v18366_v2 = vld [vmem:[#allocation78_spill] sm:$0xff]  ;;  %v4299_v57 = vsel %vm17764_vm13, %v18367_v10, %v4267_v45  ;;  %v18368_v54 = vld [vmem:[#allocation73_spill] sm:$0xff]  ;;  %v4414_v56 = vpack.c.bf16 %v4302_v31, %v4298_v16  ;;  %v18379_v16 = vld [vmem:[#allocation80_spill] sm:$0xff] }
 0x2bc   : > { %v9807_v40 = vpop.eup %9806  ;;  %vm4126_vm3 = vcmp.gt.f32.partialorder %v18366_v2, 20.0  ;;  %v4271_v30 = vmul.f32 0.01, %v4239_v48  ;;  %4498 = vmatprep.subr.bf16.mxu0 %v4409_v7  ;;  %v4405_v28 = vpack.c.bf16 %v4285_v58, %v4281_v46  ;;  %vm4119_vm5 = vcmp.gt.f32.partialorder %v18368_v54, 20.0  ;;  %v18373_v58 = vld [vmem:[#allocation54_spill] sm:$0xff]  ;;  %v18405_v15 = vld [vmem:[#allocation132_spill] sm:$0xff] }
 0x2bd   : > { %v9809_v6 = vpop.eup %9808  ;;  %v4255_v24 = vmul.f32 0.01, %v4207_v14  ;;  %v4241_v0 = vmul.f32 0.01, %v4179_v17  ;;  %v4309_v34 = vmul.f32 %v9807_v40, %v18369_v39  ;;  %v4191_v48 = vmul.f32 0.6931472, %v9805_v51 }
 0x2be   : > { %v4303_v50 = vsel %vm17763_vm12, %v18370_v11, %v4271_v30  ;;  %v4307_v55 = vmul.f32 %v9809_v6, %v12410_v35  ;;  %v9811_v7 = vpop.eup %9810  ;;  %v18372_v8 = vpack.c.bf16 %v12718_v9, %v12726_v37  ;;  %v4277_v17 = vsel %vm4117_vm8, %v18373_v58, %v4245_v61  ;;  %v18375_v11 = vld [vmem:[#allocation137_spill] sm:$0xff]  ;;  %v18378_v37 = vld [vmem:[#allocation94_spill] sm:$0xff]  ;;  %v18386_v40 = vld [vmem:[#allocation103_spill] sm:$0xff] }
 0x2bf   : > { %v4415_v45 = vpack.c.bf16 %v4303_v50, %v4299_v57  ;;  %v12824_v14 = vsel %vm4114_vm4, 1.0, %v4309_v34  ;;  %9820 = vrcp.f32 %v18375_v11  ;;  %v4183_v35 = vmul.f32 0.6931472, %v9803_v36  ;;  %v18380_v36 = vld [vmem:[#allocation52_spill] sm:$0xff]  ;;  %v9813_v51 = vpop.eup %9812  ;;  %v18383_v61 = vld [vmem:[#allocation122_spill] sm:$0xff] }
 0x2c0   : > { %4499 = vmatpush1.bf16.msra.mxu0 %v18372_v8  ;;  %18374 = vst [vmem:[#allocation92_spill] sm:$0xff] %v12824_v14  ;;  %vm18376_vm12 = vcmp.gt.f32.partialorder %v12278_v52, 20.0  ;;  %v4311_v50 = vmul.f32 %v9811_v7, %v12535_v60  ;;  %9822 = vrcp.f32 %v12653_v25  ;;  %v4294_v9 = vsel %vm4134_vm10, %v18378_v37, %v12760_v62  ;;  %v18387_v57 = vld [vmem:[#allocation74_spill] sm:$0xff]  ;;  %v18388_v6 = vld [vmem:[#allocation76_spill] sm:$0xff] }
 0x2c1   : > { %4500 = vmatprep.subr.bf16.mxu0 %v4405_v28  ;;  %v12829_v53 = vsel %vm18376_vm12, 1.0, %v4307_v55  ;;  %4569 = vmatprep.subr.bf16.mxu1 %v4415_v45  ;;  %v4411_v34 = vpack.c.bf16 %v4295_v33, %v4291_v3  ;;  %v4287_v31 = vsel %vm4127_vm11, %v18379_v16, %v4255_v24  ;;  %vm18381_vm13 = vmmov %vm18376_vm12  ;;  %v4247_v46 = vmul.f32 0.01, %v4191_v48  ;;  %v18384_v3 = vld [vmem:[#allocation82_spill] sm:$0xff]  ;;  %v18390_v24 = vld [vmem:[#allocation72_spill] sm:$0xff] }
 0x2c2   : > { %18377 = vst [vmem:[#allocation111_spill] sm:$0xff] %v12829_v53  ;;  %v4273_v55 = vsel %vm18381_vm13, %v18380_v36, %v4241_v0  ;;  %4570 = vmatpush1.bf16.msra.mxu1 %v4414_v56  ;;  %v12845_v25 = vsel %vm4115_vm2, 1.0, %v4311_v50  ;;  %9824 = vrcp.f32 %v18383_v61  ;;  %v4250_v62 = vmul.f32 0.01, %v12734_v41  ;;  %v18392_v0 = vld [vmem:[#allocation124_spill] sm:$0xff]  ;;  %v18395_v45 = vld [vmem:[#allocation83_spill] sm:$0xff] }
 0x2c3   : > { %v4401_v60 = vpack.c.bf16 %v4277_v17, %v4273_v55  ;;  %18382 = vst [vmem:[#allocation84_spill] sm:$0xff] %v12845_v25  ;;  %v4290_v33 = vsel %vm4130_vm15, %v18384_v3, %v12746_v18  ;;  %4571 = vmatprep.subr.bf16.mxu1 %v4411_v34  ;;  %v18385_v52 = vpack.c.bf16 %v12685_v59, %v12701_v32  ;;  %9826 = vrcp.f32 %v12632_v5  ;;  %v18393_v39 = vld [vmem:[#allocation68_spill] sm:$0xff]  ;;  %v18396_v58 = vld [vmem:[#allocation126_spill] sm:$0xff]  ;;  %v18401_v34 = vld [vmem:[#allocation61_spill] sm:$0xff] }
 0x2c4   : > { %v4317_v30 = vmul.f32 %v9813_v51, %v18386_v40  ;;  %v4410_v10 = vpack.c.bf16 %v4294_v9, %v4290_v33  ;;  %v4283_v28 = vsel %vm4123_vm6, %v18387_v57, %v4251_v29  ;;  %v4243_v41 = vmul.f32 0.01, %v4183_v35  ;;  %v9815_v56 = vpop.eup %9814  ;;  %v18391_v29 = vld [vmem:[#allocation67_spill] sm:$0xff]  ;;  %v18400_v9 = vld [vmem:[#allocation129_spill] sm:$0xff]  ;;  %v18410_v3 = vld [vmem:[#allocation28_spill] sm:$0xff] }
 0x2c5   : > { %4501 = vmatpush1.bf16.msra.mxu0 %v18385_v52  ;;  %9828 = vrcp.f32 %v12660_v43  ;;  %v4246_v18 = vmul.f32 0.01, %v12731_v49  ;;  %v4286_v59 = vsel %vm4126_vm3, %v18388_v6, %v12736_v12  ;;  %v4407_v32 = vpack.c.bf16 %v4287_v31, %v4283_v28  ;;  %v9583_v49 = vld [vmem:[%s17526_s1 + $0x20] sm:$0xff]   ;;  %v9817_v17 = vpop.eup %9816  ;;  %v18397_v35 = vld [vmem:[#allocation63_spill] sm:$0xff]  ;;  %v18411_v33 = vld [vmem:[#allocation112_spill] sm:$0xff] }
 0x2c6   : > { %4502 = vmatprep.subr.bf16.mxu0 %v4401_v60  ;;  %v12869_v5 = vsel %vm4118_vm14, 1.0, %v4317_v30  ;;  %vm4122_vm13 = vcmp.gt.f32.partialorder %v18390_v24, 20.0  ;;  %4572 = vmatpush1.bf16.msra.mxu1 %v4410_v10  ;;  %v4279_v43 = vsel %vm4119_vm5, %v18391_v29, %v4247_v46  ;;  %9830 = vrcp.f32 %v18392_v0  ;;  %v18403_v31 = vld [vmem:[#allocation115_spill] sm:$0xff]  ;;  %v18409_v46 = vld [vmem:[#allocation128_spill] sm:$0xff]  ;;  %v18412_v40 = vld [vmem:[#allocation134_spill] sm:$0xff] }
 0x2c7   : > { %18389 = vst [vmem:[#allocation99_spill] sm:$0xff] %v12869_v5  ;;  %v4242_v12 = vmul.f32 0.01, %v12721_v21  ;;  %v4282_v48 = vsel %vm4122_vm13, %v18393_v39, %v4250_v62  ;;  %4573 = vmatprep.subr.bf16.mxu1 %v4407_v32  ;;  %v18394_v7 = vpack.c.bf16 %v12680_v27, %v12694_v22  ;;  %v4315_v8 = vmul.f32 %v9815_v56, %v18395_v45  ;;  %v18398_v21 = vld [vmem:[#allocation16_spill] sm:$0xff]  ;;  %v9819_v55 = vpop.eup %9818  ;;  %v18406_v51 = vld [vmem:[#allocation59_spill] sm:$0xff]  ;;  %v9584_v54 = vld [vmem:[%s17526_s1 + $0x28] sm:$0xff]  }
 0x2c8   : > { %9832 = vrcp.f32 %v18396_v58  ;;  %v4406_v11 = vpack.c.bf16 %v4286_v59, %v4282_v48  ;;  %v4275_v50 = vsel %vm4115_vm2, %v18397_v35, %v4243_v41  ;;  %v4278_v27 = vsel %vm4118_vm14, %v18401_v34, %v4246_v18  ;;  %v18413_v30 = vld [vmem:[#allocation35_spill] sm:$0xff]  ;;  %v18414_v10 = vld [vmem:[#allocation88_spill] sm:$0xff]  ;;  %v18416_v41 = vld [vmem:[#allocation121_spill] sm:$0xff] }
 0x2c9   : > { %4503 = vmatpush1.bf16.msra.mxu0 %v18394_v7  ;;  %9834 = vrcp.f32 %v18400_v9  ;;  %v4403_v22 = vpack.c.bf16 %v4279_v43, %v4275_v50  ;;  %v12900_v16 = vsel %vm4117_vm8, 1.0, %v4315_v8  ;;  %v4319_v36 = vmul.f32 %v9817_v17, %v18403_v31  ;;  %v18417_v6 = vld [vmem:[#allocation135_spill] sm:$0xff]  ;;  %v18420_v29 = vld [vmem:[#allocation138_spill] sm:$0xff]  ;;  %v18426_v45 = vld [vmem:[#allocation41_spill] sm:$0xff] }
 0x2ca   : > { %9291 = vmatprep.subr.msk.bf16.mxu0 %vm11096_vm9, %v18398_v21  ;;  %18402 = vst [vmem:[#allocation71_spill] sm:$0xff] %v12900_v16  ;;  %4574 = vmatpush1.bf16.msra.mxu1 %v4406_v11  ;;  %vm18404_vm12 = vcmask 523264   ;;  %9836 = vrcp.f32 %v18405_v15  ;;  %v4274_v60 = vsel %vm4114_vm4, %v18406_v51, %v4242_v12  ;;  %v18407_v1 = vmov 0   ;;  %v18418_v32 = vld [vmem:[#allocation23_spill] sm:$0xff]  ;;  %v18421_v0 = vld [vmem:[#allocation42_spill] sm:$0xff]  ;;  %v18423_v12 = vld [vmem:[#allocation117_spill] sm:$0xff] }
 0x2cb   : > { %4575 = vmatprep.subr.bf16.mxu1 %v4403_v22  ;;  %v12911_v4 = vsel %vm4119_vm5, 1.0, %v4319_v36  ;;  %9838 = vrcp.f32 %v18409_v46  ;;  %v4402_v62 = vpack.c.bf16 %v4278_v27, %v4274_v60  ;;  %v4325_v52 = vmul.f32 %v9819_v55, %v18411_v33  ;;  %v18424_v48 = vld [vmem:[#allocation142_spill] sm:$0xff]  ;;  %vm18425_vm14 = vmmov %vm18404_vm12  ;;  %v18428_v58 = vld [vmem:[#allocation141_spill] sm:$0xff] }
 0x2cc   : > { %9277 = vmatmul.mubr.msk.bf16.vlgmr.msra.gmra.mxu0 %vm18404_vm12, %v9583_v49  ;;  %18408 = vst [vmem:[#allocation56_spill] sm:$0xff] %v12911_v4  ;;  %v9821_v61 = vpop.eup %9820  ;;  %9840 = vrcp.f32 %v18412_v40  ;;  %v18431_v17 = vld [vmem:[#allocation127_spill] sm:$0xff]  ;;  %v18432_v35 = vld [vmem:[#allocation145_spill] sm:$0xff]  ;;  %v18435_v9 = vld [vmem:[#allocation146_spill] sm:$0xff] }
 0x2cd   : > { %4530 = vmatprep.mubr.bf16.mxu0 %v18407_v1  ;;  %9294 = vmatpush1.bf16.msk.msra.mxu0 %vm11096_vm9, %v18410_v3  ;;  %v9823_v19 = vpop.eup %9822  ;;  %v4323_v57 = vmul.f32 %v9821_v61, %v18414_v10  ;;  %v12926_v28 = vsel %vm4122_vm13, 1.0, %v4325_v52  ;;  %9842 = vrcp.f32 %v18417_v6  ;;  %v18436_v34 = vld [vmem:[#allocation37_spill] sm:$0xff]  ;;  %v18437_v27 = vld [vmem:[#allocation43_spill] sm:$0xff]  ;;  %v18439_v31 = vld [vmem:[#allocation120_spill] sm:$0xff] }
 0x2ce   : > { %5126 = vmatprep.subr.bf16.mxu0 %v18413_v30  ;;  %4576 = vmatpush1.bf16.msra.mxu1 %v4402_v62  ;;  %18415 = vst [vmem:[#allocation87_spill] sm:$0xff] %v12926_v28  ;;  %v4327_v18 = vmul.f32 %v9823_v19, %v18416_v41  ;;  %9844 = vrcp.f32 %v18420_v29  ;;  %v18440_v15 = vld [vmem:[#allocation148_spill] sm:$0xff]  ;;  %v18441_v55 = vld [vmem:[#allocation105_spill] sm:$0xff]  ;;  %v9585_v51 = vld [vmem:[%s17526_s1 + $0x30] sm:$0xff]  }
 0x2cf   : > { %v9825_v59 = vpop.eup %9824  ;;  %9301 = vmatprep.subr.msk.bf16.mxu1 %vm11096_vm9, %v18418_v32  ;;  %v12935_v56 = vsel %vm4121_vm7, 1.0, %v4323_v57  ;;  %9846 = vrcp.f32 %v18424_v48  ;;  %vm18429_vm7 = vmmov %vm18404_vm12  ;;  %v18443_v46 = vld [vmem:[#allocation123_spill] sm:$0xff]  ;;  %v18444_v62 = vld [vmem:[#allocation48_spill] sm:$0xff]  ;;  %vm18489_vm12 = vcmp.gt.f32.partialorder %v12578_v13, 20.0 }
 0x2d0   : > { %18419 = vst [vmem:[#allocation98_spill] sm:$0xff] %v12935_v56  ;;  %v9827_v43 = vpop.eup %9826  ;;  %v12941_v24 = vsel %vm4123_vm6, 1.0, %v4327_v18  ;;  %v4333_v39 = vmul.f32 %v9825_v59, %v18423_v12  ;;  %9848 = vrcp.f32 %v18428_v58  ;;  %v18447_v52 = vld [vmem:[#allocation47_spill] sm:$0xff]  ;;  %v18449_v19 = vld [vmem:[#allocation130_spill] sm:$0xff]  ;;  %v18455_v6 = vld [vmem:[#allocation49_spill] sm:$0xff] }
 0x2d1   : > { %5127 = vmatpush1.bf16.msra.mxu0 %v18421_v0  ;;  %18422 = vst [vmem:[#allocation110_spill] sm:$0xff] %v12941_v24  ;;  %9281 = vmatmul.mubr.msk.bf16.vlgmr.msra.gmra.mxu1 %vm18425_vm14, %v9583_v49  ;;  %v4331_v8 = vmul.f32 %v9827_v43, %v18427_v63  ;;  %9850 = vrcp.f32 %v18432_v35  ;;  %v18433_v49 = vld [vmem:[#allocation33_spill] sm:$0xff]  ;;  %v18451_v10 = vld [vmem:[#allocation107_spill] sm:$0xff]  ;;  %v18456_v59 = vld [vmem:[#allocation64_spill] sm:$0xff] }
 0x2d2   : > { %v9829_v7 = vpop.eup %9828  ;;  %5128 = vmatprep.subr.bf16.mxu0 %v18426_v45  ;;  %4603 = vmatprep.mubr.bf16.mxu1 %v18407_v1  ;;  %v12953_v42 = vsel %vm4126_vm3, 1.0, %v4333_v39  ;;  %9852 = vrcp.f32 %v18435_v9  ;;  %v18454_v41 = vld [vmem:[#allocation131_spill] sm:$0xff]  ;;  %v18459_v29 = vld [vmem:[#allocation100_spill] sm:$0xff]  ;;  %v18462_v0 = vld [vmem:[#allocation133_spill] sm:$0xff] }
 0x2d3   : > { %18430 = vst [vmem:[#allocation85_spill] sm:$0xff] %v12953_v42  ;;  %v4335_v11 = vmul.f32 %v9829_v7, %v18431_v17  ;;  %v9831_v50 = vpop.eup %9830  ;;  %9304 = vmatpush1.bf16.msk.msra.mxu1 %vm11096_vm9, %v18433_v49  ;;  %v12963_v21 = vsel %vm4125_vm0, 1.0, %v4331_v8  ;;  %9854 = vrcp.f32 %v18440_v15  ;;  %vm18445_vm9 = vcmp.gt.f32.partialorder %v12336_v26, 20.0  ;;  %vm18452_vm0 = vmmov %vm18429_vm7  ;;  %v18463_v39 = vld [vmem:[#allocation136_spill] sm:$0xff]  ;;  %v18464_v63 = vld [vmem:[#allocation101_spill] sm:$0xff] }
 0x2d4   : > { %9278 = vmatmul.mubr.msk.bf16.gmra.mxu0 %vm18429_vm7, %v9584_v54  ;;  %18434 = vst [vmem:[#allocation79_spill] sm:$0xff] %v12963_v21  ;;  %5199 = vmatprep.subr.bf16.mxu1 %v18436_v34  ;;  %v4341_v36 = vmul.f32 %v9831_v50, %v18439_v31  ;;  %vm18460_vm3 = vcmp.gt.f32.partialorder %v18459_v29, 20.0  ;;  %v9586_v45 = vld [vmem:[%s17526_s1 + $0x38] sm:$0xff]   ;;  %v18468_v35 = vld [vmem:[#allocation102_spill] sm:$0xff]  ;;  %v18471_v49 = vld [vmem:[#allocation139_spill] sm:$0xff] }
 0x2d5   : > { %4540 = vmatprep.mubr.bf16.mxu0 %v18407_v1  ;;  %v9833_v2 = vpop.eup %9832  ;;  %5129 = vmatpush1.bf16.msra.mxu0 %v18437_v27  ;;  %v12970_v22 = vsel %vm4127_vm11, 1.0, %v4335_v11  ;;  %v18467_v58 = vld [vmem:[#allocation140_spill] sm:$0xff]  ;;  %vm18469_vm5 = vcmp.gt.f32.partialorder %v18468_v35, 20.0  ;;  %v18472_v34 = vld [vmem:[#allocation114_spill] sm:$0xff]  ;;  %v18475_v31 = vld [vmem:[#allocation143_spill] sm:$0xff] }
 0x2d6   : > { %18438 = vst [vmem:[#allocation95_spill] sm:$0xff] %v12970_v22  ;;  %v9835_v37 = vpop.eup %9834  ;;  %v4339_v23 = vmul.f32 %v9833_v2, %v18441_v55  ;;  %v12980_v60 = vsel %vm4130_vm15, 1.0, %v4341_v36  ;;  %vm18450_vm15 = vmmov %vm18429_vm7  ;;  %vm18473_vm4 = vcmp.gt.f32.partialorder %v18472_v34, 20.0  ;;  %v9588_v13 = vld [vmem:[%s17526_s1 + $0x68] sm:$0xff]  }
 0x2d7   : > { %18442 = vst [vmem:[#allocation55_spill] sm:$0xff] %v12980_v60  ;;  %v4343_v61 = vmul.f32 %v9835_v37, %v18443_v46  ;;  %v9837_v20 = vpop.eup %9836  ;;  %5200 = vmatpush1.bf16.msra.mxu1 %v18444_v62  ;;  %vm18476_vm8 = vmmov %vm18452_vm0  ;;  %v18477_v37 = vld [vmem:[#allocation109_spill] sm:$0xff]  ;;  %v18485_v62 = vld [vmem:[#allocation147_spill] sm:$0xff] }
 0x2d8   : > { %v12986_v3 = vsel %vm18445_vm9, 1.0, %v4339_v23  ;;  %v9839_v33 = vpop.eup %9838  ;;  %5201 = vmatprep.subr.bf16.mxu1 %v18447_v52  ;;  %v4349_v38 = vmul.f32 %v9837_v20, %v18449_v19  ;;  %vm18478_vm2 = vcmp.gt.f32.partialorder %v18477_v37, 20.0  ;;  %v18480_v23 = vld [vmem:[#allocation144_spill] sm:$0xff]  ;;  %vm18481_vm11 = vmmov %vm18452_vm0  ;;  %v18486_v52 = vld [vmem:[#allocation119_spill] sm:$0xff] }
 0x2d9   : > { %18446 = vst [vmem:[#allocation66_spill] sm:$0xff] %v12986_v3  ;;  %v12991_v40 = vsel %vm4131_vm1, 1.0, %v4343_v61  ;;  %v9841_v30 = vpop.eup %9840  ;;  %9282 = vmatmul.mubr.msk.bf16.gmra.mxu1 %vm18450_vm15, %v9584_v54  ;;  %v4347_v57 = vmul.f32 %v9839_v33, %v18451_v10  ;;  %vm18457_vm1 = vcmp.gt.f32.partialorder %v18456_v59, 20.0  ;;  %v18482_v61 = vld [vmem:[#allocation116_spill] sm:$0xff]  ;;  %vm18487_vm13 = vcmp.gt.f32.partialorder %v18486_v52, 20.0  ;;  %vm18491_vm14 = vmmov %vm18452_vm0  ;;  %v13078_v10 = vpop.permute.xlu1 %4453 }
 0x2da   : > { %18448 = vst [vmem:[#allocation78_spill] sm:$0xff] %v12991_v40  ;;  %4613 = vmatprep.mubr.bf16.mxu1 %v18407_v1  ;;  %v13000_v26 = vsel %vm4134_vm10, 1.0, %v4349_v38  ;;  %v4351_v18 = vmul.f32 %v9841_v30, %v18454_v41  ;;  %v9843_v44 = vpop.eup %9842  ;;  %vm18465_vm10 = vcmp.gt.f32.partialorder %v18464_v63, 20.0  ;;  %vm18483_vm6 = vcmp.gt.f32.partialorder %v18482_v61, 20.0  ;;  %v9587_v38 = vld [vmem:[%s17526_s1 + $0x60] sm:$0xff]   ;;  %vm18492_vm7 = vmmov %vm18452_vm0  ;;  %v9589_v30 = vld [vmem:[%s17526_s1 + $0x70] sm:$0xff]   ;;  %v13085_v41 = vpop.permute.xlu0 %4449 }
 0x2db   : > { %18453 = vst [vmem:[#allocation108_spill] sm:$0xff] %v13000_v26  ;;  %5202 = vmatpush1.bf16.msra.mxu1 %v18455_v6  ;;  %v13007_v54 = vsel %vm18457_vm1, 1.0, %v4347_v57  ;;  %v9845_v32 = vpop.eup %9844  ;;  %v4357_v47 = vmul.f32 %v9843_v44, %v18462_v0  ;;  %vm18493_vm9 = vmmov %vm18452_vm0  ;;  %v9590_v57 = vld [vmem:[%s17526_s1 + $0x78] sm:$0xff]  }
 0x2dc   : > { %9279 = vmatmul.mubr.msk.bf16.gmra.mxu0 %vm18452_vm0, %v9585_v51  ;;  %18458 = vst [vmem:[#allocation73_spill] sm:$0xff] %v13007_v54  ;;  %v13011_v43 = vsel %vm18460_vm3, 1.0, %v4351_v18  ;;  %v9847_v12 = vpop.eup %9846  ;;  %v4355_v48 = vmul.f32 %v9845_v32, %v18463_v39  ;;  %vm18494_vm15 = vmmov %vm18452_vm0 }
 0x2dd   : > { %4550 = vmatprep.mubr.bf16.mxu0 %v18407_v1  ;;  %18461 = vst [vmem:[#allocation93_spill] sm:$0xff] %v13011_v43  ;;  %v9849_v7 = vpop.eup %9848  ;;  %v13020_v8 = vsel %vm18465_vm10, 1.0, %v4357_v47  ;;  %v4359_v17 = vmul.f32 %v9847_v12, %v18467_v58  ;;  %vm18495_vm1 = vmmov %vm18452_vm0  ;;  %v13089_v18 = vpop.permute.xlu1 %4441 }
 0x2de   : > { %18466 = vst [vmem:[#allocation125_spill] sm:$0xff] %v13020_v8  ;;  %v9851_v11 = vpop.eup %9850  ;;  %v13025_v50 = vsel %vm18469_vm5, 1.0, %v4355_v48  ;;  %v4361_v9 = vmul.f32 %v9849_v7, %v18471_v49  ;;  %vm18496_vm3 = vmmov %vm18452_vm0  ;;  %v13091_v44 = vpop.permute.xlu0 %4445 }
 0x2df   : > { %18470 = vst [vmem:[#allocation118_spill] sm:$0xff] %v13025_v50  ;;  %v9853_v2 = vpop.eup %9852  ;;  %v13030_v27 = vsel %vm18473_vm4, 1.0, %v4359_v17  ;;  %v4365_v36 = vmul.f32 %v9851_v11, %v18475_v31  ;;  %vm18497_vm10 = vmmov %vm18452_vm0 }
 0x2e0   : > { %18474 = vst [vmem:[#allocation54_spill] sm:$0xff] %v13030_v27  ;;  %v9855_v15 = vpop.eup %9854  ;;  %v13036_v55 = vsel %vm18478_vm2, 1.0, %v4361_v9  ;;  %v4363_v46 = vmul.f32 %v9853_v2, %v18480_v23  ;;  %vm18498_vm5 = vmmov %vm18452_vm0 }
 0x2e1   : > { %9283 = vmatmul.mubr.msk.bf16.gmra.mxu1 %vm18476_vm8, %v9585_v51  ;;  %18479 = vst [vmem:[#allocation137_spill] sm:$0xff] %v13036_v55  ;;  %v13043_v20 = vsel %vm18483_vm6, 1.0, %v4365_v36  ;;  %v4367_v33 = vmul.f32 %v9855_v15, %v18485_v62  ;;  %v4434_v6 = vpop.permute.xlu1 %4433 }
 0x2e2   : > { %4623 = vmatprep.mubr.bf16.mxu1 %v18407_v1  ;;  %18484 = vst [vmem:[#allocation94_spill] sm:$0xff] %v13043_v20  ;;  %v13049_v51 = vsel %vm18487_vm13, 1.0, %v4363_v46  ;;  %v13093_v59 = vpop.permute.xlu0 %4437 }
 0x2e3   : > { %18488 = vst [vmem:[#allocation80_spill] sm:$0xff] %v13049_v51  ;;  %v13053_v19 = vsel %vm18489_vm12, 1.0, %v4367_v33 }
 0x2e4   : > { %9280 = vmatmul.mubr.msk.bf16.gmra.mxu0 %vm18481_vm11, %v9586_v45  ;;  %18490 = vst [vmem:[#allocation52_spill] sm:$0xff] %v13053_v19 }
 0x2e5   : > { %5146 = vmatprep.mubr.bf16.mxu0 %v18407_v1  ;;  %v4426_v32 = vpop.permute.xlu1 %4425 }
 0x2e6   : > { %v4430_v12 = vpop.permute.xlu0 %4429 }
 0x2e9   : > { %9284 = vmatmul.mubr.msk.bf16.gmra.mxu1 %vm18491_vm14, %v9586_v45 }
 0x2ea   : > { %5219 = vmatprep.mubr.bf16.mxu1 %v18407_v1 }
 0x2ec   : > { %9295 = vmatmul.mubr.msk.bf16.vlgmr.msra.gmra.mxu0 %vm18492_vm7, %v9587_v38 }
 0x2ed   : > { %5156 = vmatprep.mubr.bf16.mxu0 %v18407_v1 }
 0x2f1   : > { %9305 = vmatmul.mubr.msk.bf16.vlgmr.msra.gmra.mxu1 %vm18493_vm9, %v9587_v38 }
 0x2f2   : > { %5229 = vmatprep.mubr.bf16.mxu1 %v18407_v1 }
 0x2f4   : > { %9296 = vmatmul.mubr.msk.bf16.gmra.mxu0 %vm18494_vm15, %v9588_v13 }
 0x2f5   : > { %5166 = vmatprep.mubr.bf16.mxu0 %v18407_v1 }
 0x2f9   : > { %9306 = vmatmul.mubr.msk.bf16.gmra.mxu1 %vm18452_vm0, %v9588_v13 }
 0x2fa   : > { %5239 = vmatprep.mubr.bf16.mxu1 %v18407_v1 }
 0x2fc   : > { %9297 = vmatmul.mubr.msk.bf16.gmra.mxu0 %vm18495_vm1, %v9589_v30 }
 0x2fd   : > { %5176 = vmatprep.mubr.bf16.mxu0 %v18407_v1 }
 0x301   : > { %9307 = vmatmul.mubr.msk.bf16.gmra.mxu1 %vm18496_vm3, %v9589_v30 }
 0x302   : > { %5249 = vmatprep.mubr.bf16.mxu1 %v18407_v1 }
 0x304   : > { %9298 = vmatmul.mubr.msk.bf16.gmra.mxu0 %vm18497_vm10, %v9590_v57 }
 0x305   : > { %5324 = vmatprep.mubr.bf16.mxu0 %v18407_v1 }
 0x309   : > { %9308 = vmatmul.mubr.msk.bf16.gmra.mxu1 %vm18498_vm5, %v9590_v57 }
 0x30a   : > { %5397 = vmatprep.mubr.bf16.mxu1 %v18407_v1 }
 0x38c   : > { %v4522_v29 = vpop.f32.mrf.mxu0 }
 0x38d   : > { %v13095_v0 = vadd.f32 %v4522_v29, %v4426_v32 }
 0x38e   : > { %v4524_v47 = vpop.f32.mrf.mxu0 }
 0x38f   : > { %18499 = vst [vmem:[#allocation122_spill] sm:$0xff] %v13095_v0  ;;  %v13098_v39 = vmul.f32 100.0, %v13095_v0  ;;  %v13108_v49 = vadd.f32 %v4524_v47, %v4426_v32 }
 0x390   : > { %v4526_v48 = vpop.f32.mrf.mxu0 }
 0x391   : > { %18500 = vst [vmem:[#allocation82_spill] sm:$0xff] %v13098_v39  ;;  %v4666_v7 = vmin.f32 %v13098_v39, 20.0  ;;  %v13101_v45 = vadd.f32 %v4526_v48, %v4430_v12  ;;  %v4595_v17 = vpop.f32.mrf.mxu1  ;;  %18502 = vst [vmem:[#allocation74_spill] sm:$0xff] %v13108_v49  ;;  %v13120_v61 = vmul.f32 100.0, %v13108_v49 }
 0x392   : > { %v4528_v63 = vpop.f32.mrf.mxu0  ;;  %v13106_v35 = vadd.f32 %v4595_v17, %v4426_v32 }
 0x393   : > { %v4698_v58 = vmul.f32 1.442695, %v4666_v7  ;;  %v13104_v11 = vmul.f32 100.0, %v13101_v45  ;;  %v4597_v2 = vpop.f32.mrf.mxu1  ;;  %v13114_v36 = vadd.f32 %v4528_v63, %v4430_v12  ;;  %18505 = vst [vmem:[#allocation67_spill] sm:$0xff] %v13120_v61  ;;  %v4667_v63 = vmin.f32 %v13120_v61, 20.0 }
 0x394   : > { %18501 = vst [vmem:[#allocation103_spill] sm:$0xff] %v13106_v35  ;;  %v4532_v9 = vpop.f32.mrf.mxu0  ;;  %v13111_v34 = vmul.f32 100.0, %v13106_v35  ;;  %v13122_v62 = vadd.f32 %v4597_v2, %v4426_v32 }
 0x395   : > { %v4670_v31 = vmin.f32 %v13104_v11, 20.0  ;;  %18504 = vst [vmem:[#allocation72_spill] sm:$0xff] %v13114_v36  ;;  %v13116_v15 = vadd.f32 %v4532_v9, %v4434_v6  ;;  %9856 = vpow2.f32 %v4698_v58  ;;  %v4599_v37 = vpop.f32.mrf.mxu1  ;;  %v13130_v30 = vmul.f32 100.0, %v13114_v36 }
 0x396   : > { %18503 = vst [vmem:[#allocation76_spill] sm:$0xff] %v13111_v34  ;;  %v4534_v23 = vpop.f32.mrf.mxu0  ;;  %v4668_v46 = vmin.f32 %v13111_v34, 20.0  ;;  %18506 = vst [vmem:[#allocation124_spill] sm:$0xff] %v13122_v62  ;;  %v13124_v33 = vadd.f32 %v4599_v37, %v4430_v12  ;;  %v13141_v58 = vmul.f32 100.0, %v13122_v62  ;;  %v4700_v27 = vmul.f32 1.442695, %v4667_v63 }
 0x397   : > { %v4601_v52 = vpop.f32.mrf.mxu1  ;;  %v13127_v38 = vmul.f32 100.0, %v13116_v15  ;;  %v4706_v13 = vmul.f32 1.442695, %v4670_v31  ;;  %18509 = vst [vmem:[#allocation126_spill] sm:$0xff] %v13130_v30  ;;  %v13132_v57 = vadd.f32 %v4534_v23, %v4434_v6  ;;  %vm4766_vm4 = vcmp.gt.f32.partialorder %v13104_v11, 20.0 }
 0x398   : > { %18507 = vst [vmem:[#allocation68_spill] sm:$0xff] %v13124_v33  ;;  %v13135_v29 = vmul.f32 100.0, %v13124_v33  ;;  %v13137_v47 = vadd.f32 %v4601_v52, %v4430_v12  ;;  %v4536_v32 = vpop.f32.mrf.mxu0  ;;  %v4702_v7 = vmul.f32 1.442695, %v4668_v46  ;;  %18513 = vst [vmem:[#allocation129_spill] sm:$0xff] %v13141_v58  ;;  %v4671_v12 = vmin.f32 %v13130_v30, 20.0 }
 0x399   : > { %18508 = vst [vmem:[#allocation83_spill] sm:$0xff] %v13127_v38  ;;  %18510 = vst [vmem:[#allocation63_spill] sm:$0xff] %v13132_v57  ;;  %v4605_v48 = vpop.f32.mrf.mxu1  ;;  %v4674_v9 = vmin.f32 %v13127_v38, 20.0  ;;  %9858 = vpow2.f32 %v4706_v13  ;;  %v13151_v37 = vmul.f32 100.0, %v13132_v57  ;;  %v4669_v51 = vmin.f32 %v13141_v58, 20.0 }
 0x39a   : > { %18511 = vst [vmem:[#allocation16_spill] sm:$0xff] %v13135_v29  ;;  %18512 = vst [vmem:[#allocation15_spill] sm:$0xff] %v13137_v47  ;;  %v13144_v17 = vmul.f32 100.0, %v13137_v47  ;;  %v13147_v2 = vadd.f32 %v4605_v48, %v4434_v6  ;;  %v4672_v46 = vmin.f32 %v13135_v29, 20.0  ;;  %v4538_v19 = vpop.f32.mrf.mxu0  ;;  %9860 = vpow2.f32 %v4702_v7 }
 0x39b   : > { %v4607_v31 = vpop.f32.mrf.mxu1  ;;  %v4714_v20 = vmul.f32 1.442695, %v4674_v9  ;;  %v4708_v8 = vmul.f32 1.442695, %v4671_v12  ;;  %v4675_v55 = vmin.f32 %v13151_v37, 20.0  ;;  %9862 = vpow2.f32 %v4700_v27 }
 0x39c   : > { %18514 = vst [vmem:[#allocation61_spill] sm:$0xff] %v13144_v17  ;;  %18515 = vst [vmem:[#allocation115_spill] sm:$0xff] %v13147_v2  ;;  %v13153_v23 = vadd.f32 %v4607_v31, %v4434_v6  ;;  %v13158_v48 = vmul.f32 100.0, %v13147_v2  ;;  %v4673_v13 = vmin.f32 %v13144_v17, 20.0  ;;  %v13165_v6 = vadd.f32 %v4536_v32, %v13093_v59  ;;  %v4542_v40 = vpop.f32.mrf.mxu0 }
 0x39d   : > { %v4609_v52 = vpop.f32.mrf.mxu1  ;;  %v4710_v63 = vmul.f32 1.442695, %v4672_v46  ;;  %v4704_v9 = vmul.f32 1.442695, %v4669_v51  ;;  %9864 = vpow2.f32 %v4714_v20  ;;  %v4716_v46 = vmul.f32 1.442695, %v4675_v55 }
 0x39e   : > { %18516 = vst [vmem:[#allocation132_spill] sm:$0xff] %v13153_v23  ;;  %18517 = vst [vmem:[#allocation59_spill] sm:$0xff] %v13158_v48  ;;  %v13162_v50 = vmul.f32 100.0, %v13153_v23  ;;  %v13169_v7 = vadd.f32 %v4609_v52, %v13093_v59  ;;  %v13172_v43 = vmul.f32 100.0, %v13165_v6  ;;  %v4676_v26 = vmin.f32 %v13158_v48, 20.0  ;;  %v4544_v24 = vpop.f32.mrf.mxu0 }
 0x39f   : > { %v4611_v31 = vpop.f32.mrf.mxu1  ;;  %v4712_v12 = vmul.f32 1.442695, %v4673_v13  ;;  %9866 = vpow2.f32 %v4708_v8  ;;  %v13183_v22 = vadd.f32 %v4538_v19, %v13093_v59  ;;  %v13193_v8 = vadd.f32 %v4542_v40, %v13089_v18 }
 0x3a0   : > { %18518 = vst [vmem:[#allocation128_spill] sm:$0xff] %v13162_v50  ;;  %18519 = vst [vmem:[#allocation28_spill] sm:$0xff] %v13172_v43  ;;  %v13178_v32 = vmul.f32 100.0, %v13169_v7  ;;  %v4677_v3 = vmin.f32 %v13162_v50, 20.0  ;;  %v4678_v60 = vmin.f32 %v13172_v43, 20.0  ;;  %9868 = vpow2.f32 %v4710_v63 }
 0x3a1   : > { %v4615_v52 = vpop.f32.mrf.mxu1  ;;  %18521 = vst [vmem:[#allocation134_spill] sm:$0xff] %v13183_v22  ;;  %9870 = vpow2.f32 %v4704_v9  ;;  %v4718_v13 = vmul.f32 1.442695, %v4676_v26  ;;  %v13190_v20 = vadd.f32 %v4611_v31, %v13093_v59  ;;  %v13199_v63 = vmul.f32 100.0, %v13183_v22 }
 0x3a2   : > { %v13174_v54 = vpop.eup %9856  ;;  %v4680_v51 = vmin.f32 %v13178_v32, 20.0  ;;  %9872 = vpow2.f32 %v4712_v12  ;;  %v4720_v55 = vmul.f32 1.442695, %v4677_v3  ;;  %v13196_v19 = vadd.f32 %v4615_v52, %v13089_v18  ;;  %v4546_v3 = vpop.f32.mrf.mxu0 }
 0x3a3   : > { %18520 = vst [vmem:[#allocation112_spill] sm:$0xff] %v13174_v54  ;;  %v13186_v27 = vadd.f32 1.0, %v13174_v54  ;;  %18522 = vst [vmem:[#allocation35_spill] sm:$0xff] %v13190_v20  ;;  %v4617_v21 = vpop.f32.mrf.mxu1  ;;  %9874 = vpow2.f32 %v4716_v46  ;;  %v4722_v42 = vmul.f32 1.442695, %v4678_v60  ;;  %v13202_v9 = vmul.f32 100.0, %v13193_v8 }
 0x3a4   : > { %18523 = vst [vmem:[#allocation88_spill] sm:$0xff] %v13199_v63  ;;  %v4726_v40 = vmul.f32 1.442695, %v4680_v51  ;;  %v13208_v59 = vmul.f32 100.0, %v13196_v19  ;;  %v13211_v31 = vmul.f32 100.0, %v13190_v20  ;;  %v13215_v12 = vadd.f32 %v4544_v24, %v13089_v18  ;;  %v4548_v16 = vpop.f32.mrf.mxu0 }
 0x3a5   : > { %18524 = vst [vmem:[#allocation121_spill] sm:$0xff] %v13202_v9  ;;  %9876 = vlog2.f32 %v13186_v27  ;;  %v4682_v60 = vmin.f32 %v13202_v9, 20.0  ;;  %v13221_v51 = vadd.f32 %v4617_v21, %v13089_v18  ;;  %v4619_v56 = vpop.f32.mrf.mxu1  ;;  %v13228_v24 = vadd.f32 %v4546_v3, %v13091_v44 }
 0x3a6   : > { %v13204_v26 = vpop.eup %9858  ;;  %18526 = vst [vmem:[#allocation23_spill] sm:$0xff] %v13208_v59  ;;  %9878 = vpow2.f32 %v4718_v13  ;;  %18527 = vst [vmem:[#allocation138_spill] sm:$0xff] %v13211_v31  ;;  %v4684_v46 = vmin.f32 %v13208_v59, 20.0  ;;  %v4679_v13 = vmin.f32 %v13199_v63, 20.0  ;;  %v4681_v21 = vmin.f32 %v13211_v31, 20.0  ;;  %v4552_v35 = vpop.f32.mrf.mxu0 }
 0x3a7   : > { %18525 = vst [vmem:[#allocation135_spill] sm:$0xff] %v13204_v26  ;;  %v13217_v52 = vpop.eup %9860  ;;  %9880 = vpow2.f32 %v4720_v55  ;;  %18529 = vst [vmem:[#allocation117_spill] sm:$0xff] %v13221_v51  ;;  %v13224_v28 = vadd.f32 1.0, %v13204_v26  ;;  %v4730_v4 = vmul.f32 1.442695, %v4682_v60  ;;  %v13235_v18 = vmul.f32 100.0, %v13215_v12  ;;  %v4621_v1 = vpop.f32.mrf.mxu1 }
 0x3a8   : > { %18528 = vst [vmem:[#allocation42_spill] sm:$0xff] %v13217_v52  ;;  %9882 = vpow2.f32 %v4722_v42  ;;  %v4734_v25 = vmul.f32 1.442695, %v4684_v46  ;;  %v13231_v55 = vadd.f32 1.0, %v13217_v52  ;;  %v13238_v5 = vadd.f32 %v4619_v56, %v13091_v44  ;;  %v13240_v42 = vpop.eup %9862  ;;  %v4554_v54 = vpop.f32.mrf.mxu0 }
 0x3a9   : > { %9884 = vpow2.f32 %v4726_v40  ;;  %18530 = vst [vmem:[#allocation142_spill] sm:$0xff] %v13235_v18  ;;  %v13243_v40 = vmul.f32 100.0, %v13221_v51  ;;  %v13246_v3 = vmul.f32 100.0, %v13228_v24  ;;  %v4724_v46 = vmul.f32 1.442695, %v4679_v13  ;;  %v4625_v48 = vpop.f32.mrf.mxu1 }
 0x3aa   : > { %9886 = vpow2.f32 %v4730_v4  ;;  %v13248_v60 = vpop.eup %9864  ;;  %v13252_v53 = vmul.f32 100.0, %v13238_v5  ;;  %v13255_v56 = vadd.f32 %v4548_v16, %v13091_v44  ;;  %v4728_v62 = vmul.f32 1.442695, %v4681_v21 }
 0x3ab   : > { %18531 = vst [vmem:[#allocation41_spill] sm:$0xff] %v13243_v40  ;;  %18532 = vst [vmem:[#allocation89_spill] sm:$0xff] %v13246_v3  ;;  %9888 = vlog2.f32 %v13224_v28  ;;  %v4686_v4 = vmin.f32 %v13246_v3, 20.0  ;;  %v4683_v13 = vmin.f32 %v13235_v18, 20.0  ;;  %v13268_v16 = vadd.f32 1.0, %v13248_v60  ;;  %v4627_v29 = vpop.f32.mrf.mxu1 }
 0x3ac   : > { %18533 = vst [vmem:[#allocation141_spill] sm:$0xff] %v13248_v60  ;;  %18534 = vst [vmem:[#allocation127_spill] sm:$0xff] %v13252_v53  ;;  %v13257_v14 = vpop.eup %9866  ;;  %9890 = vpow2.f32 %v4734_v25  ;;  %v4688_v2 = vmin.f32 %v13252_v53, 20.0  ;;  %v4685_v25 = vmin.f32 %v13243_v40, 20.0  ;;  %v13272_v49 = vmul.f32 100.0, %v13255_v56 }
 0x3ad   : > { %v13260_v33 = vpop.eup %9868  ;;  %9892 = vlog2.f32 %v13231_v55  ;;  %18536 = vst [vmem:[#allocation33_spill] sm:$0xff] %v13268_v16  ;;  %v4738_v0 = vmul.f32 1.442695, %v4686_v4  ;;  %v13277_v21 = vadd.f32 %v4621_v1, %v13091_v44  ;;  %v13280_v36 = vadd.f32 %v4552_v35, %v13085_v41 }
 0x3ae   : > { %18535 = vst [vmem:[#allocation145_spill] sm:$0xff] %v13260_v33  ;;  %v13265_v47 = vpop.eup %9870  ;;  %18537 = vst [vmem:[#allocation146_spill] sm:$0xff] %v13272_v49  ;;  %9894 = vpow2.f32 %v4724_v46  ;;  %v4742_v26 = vmul.f32 1.442695, %v4688_v2  ;;  %v13285_v60 = vadd.f32 1.0, %v13260_v33  ;;  %v4687_v4 = vmin.f32 %v13272_v49, 20.0 }
 0x3af   : > { %v13274_v23 = vpop.eup %9872  ;;  %18538 = vst [vmem:[#allocation37_spill] sm:$0xff] %v13277_v21  ;;  %9896 = vpow2.f32 %v4738_v0  ;;  %v4732_v17 = vmul.f32 1.442695, %v4683_v13  ;;  %v13291_v2 = vmul.f32 100.0, %v13277_v21  ;;  %v4736_v44 = vmul.f32 1.442695, %v4685_v25 }
 0x3b0   : > { %v13282_v20 = vpop.eup %9874  ;;  %18540 = vst [vmem:[#allocation120_spill] sm:$0xff] %v13285_v60  ;;  %9898 = vpow2.f32 %v4742_v26  ;;  %v13296_v35 = vmul.f32 100.0, %v13280_v36  ;;  %v4740_v0 = vmul.f32 1.442695, %v4687_v4  ;;  %v13312_v4 = vadd.f32 %v4625_v48, %v13085_v41 }
 0x3b1   : > { %18539 = vst [vmem:[#allocation43_spill] sm:$0xff] %v13282_v20  ;;  %18541 = vst [vmem:[#allocation148_spill] sm:$0xff] %v13291_v2  ;;  %9900 = vpow2.f32 %v4728_v62  ;;  %v4689_v33 = vmin.f32 %v13291_v2, 20.0  ;;  %v13315_v50 = vadd.f32 %v4554_v54, %v13085_v41  ;;  %v13323_v31 = vadd.f32 %v4627_v29, %v13085_v41  ;;  %v4629_v29 = vpop.f32.mrf.mxu1 }
 0x3b2   : > { %v13288_v52 = vpop.eup %9876  ;;  %18543 = vst [vmem:[#allocation123_spill] sm:$0xff] %v13296_v35  ;;  %9902 = vlog2.f32 %v13268_v16  ;;  %v4690_v26 = vmin.f32 %v13296_v35, 20.0  ;;  %18548 = vst [vmem:[#allocation131_spill] sm:$0xff] %v13312_v4  ;;  %v13331_v48 = vmul.f32 100.0, %v13312_v4  ;;  %v13364_v4 = vadd.f32 %v4629_v29, %v13078_v10 }
 0x3b3   : > { %v13293_v1 = vpop.eup %9878  ;;  %9904 = vlog2.f32 %v13285_v60  ;;  %v4744_v57 = vmul.f32 1.442695, %v4689_v33  ;;  %18549 = vst [vmem:[#allocation49_spill] sm:$0xff] %v13315_v50  ;;  %18552 = vst [vmem:[#allocation133_spill] sm:$0xff] %v13323_v31  ;;  %v13342_v41 = vmul.f32 100.0, %v13323_v31  ;;  %v4631_v61 = vpop.f32.mrf.mxu1  ;;  %vm17860_vm8 = vcmp.gt.f32.partialorder %v13127_v38, 20.0 }
 0x3b4   : > { %18542 = vst [vmem:[#allocation105_spill] sm:$0xff] %v13293_v1  ;;  %v13298_v46 = vpop.eup %9880  ;;  %v13309_v25 = vadd.f32 1.0, %v13293_v1  ;;  %9906 = vpow2.f32 %v4732_v17  ;;  %v4746_v16 = vmul.f32 1.442695, %v4690_v26  ;;  %v4556_v1 = vpop.f32.mrf.mxu0  ;;  %18554 = vst [vmem:[#allocation101_spill] sm:$0xff] %v13331_v48  ;;  %vm17880_vm2 = vcmp.gt.f32.partialorder %v13172_v43, 20.0 }
 0x3b5   : > { %18544 = vst [vmem:[#allocation48_spill] sm:$0xff] %v13298_v46  ;;  %v13302_v13 = vpop.eup %9882  ;;  %9908 = vpow2.f32 %v4736_v44  ;;  %18558 = vst [vmem:[#allocation114_spill] sm:$0xff] %v13342_v41  ;;  %vm17873_vm11 = vcmp.gt.f32.partialorder %v13178_v32, 20.0  ;;  %vm17870_vm6 = vcmp.gt.f32.partialorder %v13202_v9, 20.0  ;;  %vm17862_vm13 = vcmp.gt.f32.partialorder %v13246_v3, 20.0 }
 0x3b6   : > { %18545 = vst [vmem:[#allocation47_spill] sm:$0xff] %v13302_v13  ;;  %v13306_v62 = vpop.eup %9884  ;;  %18547 = vst [vmem:[#allocation107_spill] sm:$0xff] %v13309_v25  ;;  %v13320_v22 = vadd.f32 1.0, %v13302_v13  ;;  %9910 = vpow2.f32 %v4740_v0  ;;  %v13339_v0 = vmul.f32 100.0, %v13315_v50  ;;  %v4693_v50 = vmin.f32 %v13342_v41, 20.0 }
 0x3b7   : > { %18546 = vst [vmem:[#allocation130_spill] sm:$0xff] %v13306_v62  ;;  %v13317_v58 = vpop.eup %9886  ;;  %v13328_v33 = vadd.f32 1.0, %v13306_v62  ;;  %9912 = vpow2.f32 %v4746_v16  ;;  %v4692_v16 = vmin.f32 %v13331_v48, 20.0  ;;  %18563 = vst [vmem:[#allocation147_spill] sm:$0xff] %v13364_v4  ;;  %vm17864_vm12 = vcmp.gt.f32.partialorder %v13208_v59, 20.0 }
 0x3b8   : > { %18550 = vst [vmem:[#allocation64_spill] sm:$0xff] %v13317_v58  ;;  %18551 = vst [vmem:[#allocation100_spill] sm:$0xff] %v13320_v22  ;;  %v13325_v17 = vpop.eup %9888  ;;  %v13336_v44 = vadd.f32 1.0, %v13317_v58  ;;  %9914 = vpow2.f32 %v4744_v57  ;;  %v4691_v62 = vmin.f32 %v13339_v0, 20.0  ;;  %v4558_v58 = vpop.f32.mrf.mxu0  ;;  %vm17861_vm14 = vcmp.gt.f32.partialorder %v13252_v53, 20.0  ;;  %v18611_v53 = vld [vmem:[#allocation134_spill] sm:$0xff] }
 0x3b9   : > { %18553 = vst [vmem:[#allocation136_spill] sm:$0xff] %v13328_v33  ;;  %v13333_v54 = vpop.eup %9890  ;;  %18557 = vst [vmem:[#allocation139_spill] sm:$0xff] %v13339_v0  ;;  %9916 = vlog2.f32 %v13309_v25  ;;  %v4750_v31 = vmul.f32 1.442695, %v4692_v16  ;;  %v13369_v16 = vadd.f32 %v4558_v58, %v13078_v10  ;;  %v13389_v58 = vadd.f32 %v4631_v61, %v13078_v10 }
 0x3ba   : > { %18555 = vst [vmem:[#allocation140_spill] sm:$0xff] %v13333_v54  ;;  %18556 = vst [vmem:[#allocation102_spill] sm:$0xff] %v13336_v44  ;;  %v13344_v26 = vpop.eup %9892  ;;  %9918 = vlog2.f32 %v13320_v22  ;;  %v13354_v57 = vadd.f32 1.0, %v13333_v54  ;;  %v4748_v25 = vmul.f32 1.442695, %v4691_v62  ;;  %v13361_v22 = vadd.f32 %v4556_v1, %v13078_v10 }
 0x3bb   : > { %v13350_v13 = vpop.eup %9894  ;;  %9920 = vlog2.f32 %v13328_v33  ;;  %v4752_v54 = vmul.f32 1.442695, %v4693_v50  ;;  %18565 = vst [vmem:[#allocation149_spill] sm:$0xff] %v13369_v16  ;;  %v13386_v50 = vmul.f32 100.0, %v13369_v16  ;;  %18571 = vst [vmem:[#allocation155_spill] sm:$0xff] %v13389_v58  ;;  %v13404_v61 = vmul.f32 100.0, %v13389_v58 }
 0x3bc   : > { %18559 = vst [vmem:[#allocation143_spill] sm:$0xff] %v13350_v13  ;;  %18560 = vst [vmem:[#allocation109_spill] sm:$0xff] %v13354_v57  ;;  %v13357_v30 = vpop.eup %9896  ;;  %9922 = vlog2.f32 %v13336_v44  ;;  %v13377_v1 = vmul.f32 100.0, %v13361_v22  ;;  %v13383_v44 = vmul.f32 100.0, %v13364_v4  ;;  %v4835_v58 = vmul.f32 0.6931472, %v13325_v17 }
 0x3bd   : > { %18561 = vst [vmem:[#allocation144_spill] sm:$0xff] %v13357_v30  ;;  %18562 = vst [vmem:[#allocation116_spill] sm:$0xff] %v13361_v22  ;;  %v13366_v34 = vpop.eup %9898  ;;  %9924 = vpow2.f32 %v4750_v31  ;;  %v13374_v21 = vadd.f32 1.0, %v13357_v30  ;;  %v4695_v16 = vmin.f32 %v13386_v50, 20.0  ;;  %vm17863_vm7 = vcmp.gt.f32.partialorder %v13272_v49, 20.0  ;;  %v18607_v49 = vld [vmem:[#allocation67_spill] sm:$0xff] }
 0x3be   : > { %18564 = vst [vmem:[#allocation119_spill] sm:$0xff] %v13366_v34  ;;  %v13371_v33 = vpop.eup %9900  ;;  %9926 = vpow2.f32 %v4748_v25  ;;  %18568 = vst [vmem:[#allocation152_spill] sm:$0xff] %v13377_v1  ;;  %v13380_v29 = vadd.f32 1.0, %v13366_v34  ;;  %v4694_v25 = vmin.f32 %v13377_v1, 20.0  ;;  %v4696_v34 = vmin.f32 %v13383_v44, 20.0 }
 0x3bf   : > { %18566 = vst [vmem:[#allocation150_spill] sm:$0xff] %v13371_v33  ;;  %18567 = vst [vmem:[#allocation151_spill] sm:$0xff] %v13374_v21  ;;  %v9903_v62 = vpop.eup %9902  ;;  %9928 = vlog2.f32 %v13354_v57  ;;  %vm17866_vm9 = vcmp.gt.f32.partialorder %v13235_v18, 20.0  ;;  %vm17865_vm15 = vcmp.gt.f32.partialorder %v13296_v35, 20.0  ;;  %vm17868_vm0 = vcmp.gt.f32.partialorder %v13243_v40, 20.0  ;;  %v18606_v35 = vld [vmem:[#allocation76_spill] sm:$0xff] }
 0x3c0   : > { %18569 = vst [vmem:[#allocation153_spill] sm:$0xff] %v13380_v29  ;;  %18570 = vst [vmem:[#allocation154_spill] sm:$0xff] %v13386_v50  ;;  %v9905_v31 = vpop.eup %9904  ;;  %9930 = vpow2.f32 %v4752_v54  ;;  %v4754_v4 = vmul.f32 1.442695, %v4694_v25  ;;  %v4758_v10 = vmul.f32 1.442695, %v4696_v34 }
 0x3c1   : > { %v13393_v30 = vpop.eup %9906  ;;  %9932 = vlog2.f32 %v13374_v21  ;;  %18575 = vst [vmem:[#allocation159_spill] sm:$0xff] %v13404_v61  ;;  %v4756_v54 = vmul.f32 1.442695, %v4695_v16  ;;  %v4697_v34 = vmin.f32 %v13404_v61, 20.0  ;;  %v4843_v61 = vmul.f32 0.6931472, %v9903_v62 }
 0x3c2   : > { %18572 = vst [vmem:[#allocation156_spill] sm:$0xff] %v13393_v30  ;;  %v13396_v22 = vpop.eup %9908  ;;  %9934 = vlog2.f32 %v13380_v29  ;;  %v13409_v60 = vadd.f32 1.0, %v13393_v30  ;;  %v4894_v62 = vmul.f32 0.01, %v4835_v58  ;;  %v13458_v58 = vadd.f32 1.0, %v13298_v46  ;;  %v18615_v18 = vld [vmem:[#allocation128_spill] sm:$0xff] }
 0x3c3   : > { %18573 = vst [vmem:[#allocation157_spill] sm:$0xff] %v13396_v22  ;;  %v13400_v39 = vpop.eup %9910  ;;  %9936 = vpow2.f32 %v4754_v4  ;;  %v13424_v16 = vadd.f32 1.0, %v13396_v22  ;;  %v4827_v22 = vmul.f32 0.6931472, %v13288_v52  ;;  %v4898_v52 = vmul.f32 0.01, %v4843_v61 }
 0x3c4   : > { %18574 = vst [vmem:[#allocation158_spill] sm:$0xff] %v13400_v39  ;;  %v13406_v57 = vpop.eup %9912  ;;  %18577 = vst [vmem:[#allocation161_spill] sm:$0xff] %v13409_v60  ;;  %9938 = vpow2.f32 %v4758_v10  ;;  %v13421_v4 = vadd.f32 1.0, %v13400_v39  ;;  %v10576_v61 = vmov 2   ;;  %v13476_v46 = vsel %vm4766_vm4, %v13101_v45, %v4894_v62 }
 0x3c5   : > { %18576 = vst [vmem:[#allocation160_spill] sm:$0xff] %v13406_v57  ;;  %v13411_v51 = vpop.eup %9914  ;;  %v13414_v25 = vadd.f32 1.0, %v13406_v57  ;;  %9940 = vpow2.f32 %v4756_v54  ;;  %18581 = vst [vmem:[#allocation165_spill] sm:$0xff] %v13424_v16  ;;  %v4760_v57 = vmul.f32 1.442695, %v4697_v34  ;;  %v13443_v34 = vadd.f32 1.0, %v13282_v20  ;;  %9567 = vset.pattern.permute.xlu1 %v10576_v61  ;;  %9568 = vset.pattern.permute.xlu0 %v10576_v61 }
 0x3c6   : > { %18578 = vst [vmem:[#allocation162_spill] sm:$0xff] %v13411_v51  ;;  %v13416_v21 = vpop.eup %9916  ;;  %18580 = vst [vmem:[#allocation164_spill] sm:$0xff] %v13421_v4  ;;  %v13429_v10 = vadd.f32 1.0, %v13411_v51  ;;  %v13492_v45 = vsel %vm17860_vm8, %v13116_v15, %v4898_v52  ;;  %vm17872_vm1 = vcmp.gt.f32.partialorder %v13291_v2, 20.0  ;;  %vm17876_vm3 = vcmp.gt.f32.partialorder %v13331_v48, 20.0 }
 0x3c7   : > { %18579 = vst [vmem:[#allocation163_spill] sm:$0xff] %v13414_v25  ;;  %v9919_v29 = vpop.eup %9918  ;;  %9942 = vlog2.f32 %v13414_v25  ;;  %18591 = vst [vmem:[#allocation175_spill] sm:$0xff] %v13476_v46  ;;  %vm4775_vm10 = vcmp.gt.f32.partialorder %v13199_v63, 20.0  ;;  %vm4787_vm5 = vcmp.gt.f32.partialorder %v13339_v0, 20.0  ;;  %vm17883_vm8 = vcmp.gt.f32.partialorder %v13377_v1, 20.0  ;;  %v18622_v63 = vld [vmem:[#allocation61_spill] sm:$0xff] }
 0x3c8   : > { %v9921_v30 = vpop.eup %9920  ;;  %9944 = vlog2.f32 %v13409_v60  ;;  %18582 = vst [vmem:[#allocation166_spill] sm:$0xff] %v13429_v10  ;;  %v4839_v60 = vmul.f32 0.6931472, %v9905_v31  ;;  %v4851_v20 = vmul.f32 0.6931472, %v9919_v29  ;;  %v13466_v31 = vadd.f32 1.0, %v13371_v33 }
 0x3c9   : > { %v9923_v54 = vpop.eup %9922  ;;  %9946 = vlog2.f32 %v13421_v4  ;;  %v4855_v62 = vmul.f32 0.6931472, %v9921_v30 }
 0x3ca   : > { %v13432_v25 = vpop.eup %9924  ;;  %9948 = vpow2.f32 %v4760_v57  ;;  %v13450_v57 = vadd.f32 1.0, %v13350_v13 }
 0x3cb   : > { %18583 = vst [vmem:[#allocation167_spill] sm:$0xff] %v13432_v25  ;;  %v13435_v39 = vpop.eup %9926  ;;  %v13439_v17 = vadd.f32 1.0, %v13432_v25  ;;  %9950 = vlog2.f32 %v13424_v16  ;;  %v4904_v16 = vmul.f32 0.01, %v4855_v62 }
 0x3cc   : > { %18584 = vst [vmem:[#allocation168_spill] sm:$0xff] %v13435_v39  ;;  %v13446_v51 = vadd.f32 1.0, %v13435_v39  ;;  %9952 = vlog2.f32 %v13429_v10  ;;  %v9929_v4 = vpop.eup %9928 }
 0x3cd   : > { %18585 = vst [vmem:[#allocation169_spill] sm:$0xff] %v13439_v17  ;;  %9954 = vlog2.f32 %v13439_v17  ;;  %v13454_v25 = vpop.eup %9930  ;;  %v13468_v17 = vmul.f32 0.01, %v4827_v22  ;;  %v10485_v22 = vld [vmem:[%s17527_s2 + $0x38] sm:$0xff] }
 0x3ce   : > { %18586 = vst [vmem:[#allocation170_spill] sm:$0xff] %v13446_v51  ;;  %18587 = vst [vmem:[#allocation171_spill] sm:$0xff] %v13454_v25  ;;  %9956 = vlog2.f32 %v13446_v51  ;;  %v9933_v39 = vpop.eup %9932  ;;  %v13462_v13 = vadd.f32 1.0, %v13454_v25  ;;  %v13471_v51 = vmul.f32 0.6931472, %v13344_v26  ;;  %v10484_v25 = vld [vmem:[%s17527_s2 + $0x30] sm:$0xff]  ;;  %5467 = vperm.xlu0 %9568, %v10485_v22  }
 0x3cf   : > { %9958 = vlog2.f32 %v13443_v34  ;;  %v9935_v29 = vpop.eup %9934  ;;  %18589 = vst [vmem:[#allocation173_spill] sm:$0xff] %v13468_v17  ;;  %5463 = vperm.xlu1 %9567, %v10484_v25   ;;  %v13487_v26 = vmul.f32 0.01, %v4839_v60  ;;  %v4902_v25 = vmul.f32 0.01, %v4851_v20  ;;  %v13511_v20 = vadd.f32 1.0, %v13240_v42 }
 0x3d0   : > { %18588 = vst [vmem:[#allocation172_spill] sm:$0xff] %v13462_v13  ;;  %18590 = vst [vmem:[#allocation174_spill] sm:$0xff] %v13471_v51  ;;  %9960 = vlog2.f32 %v13450_v57  ;;  %v13485_v61 = vpop.eup %9936  ;;  %v4859_v22 = vmul.f32 0.6931472, %v9923_v54  ;;  %v4867_v15 = vmul.f32 0.6931472, %v9933_v39 }
 0x3d1   : > { %18592 = vst [vmem:[#allocation176_spill] sm:$0xff] %v13485_v61  ;;  %18593 = vst [vmem:[#allocation177_spill] sm:$0xff] %v13487_v26  ;;  %9962 = vlog2.f32 %v13462_v13  ;;  %v13495_v33 = vpop.eup %9938  ;;  %v13500_v10 = vadd.f32 1.0, %v13485_v61  ;;  %v4847_v54 = vmul.f32 0.6931472, %v13416_v21  ;;  %v13521_v39 = vadd.f32 1.0, %v13257_v14 }
 0x3d2   : > { %18594 = vst [vmem:[#allocation178_spill] sm:$0xff] %v13495_v33  ;;  %9964 = vlog2.f32 %v13458_v58  ;;  %v13503_v60 = vpop.eup %9940  ;;  %v13507_v30 = vadd.f32 1.0, %v13495_v33  ;;  %v10486_v33 = vld [vmem:[%s17527_s2 + $0x20] sm:$0xff]  ;;  %v10487_v21 = vld [vmem:[%s17527_s2 + $0x10] sm:$0xff]  ;;  %v4863_v13 = vmul.f32 0.6931472, %v9929_v4 }
 0x3d3   : > { %18595 = vst [vmem:[#allocation179_spill] sm:$0xff] %v13500_v10  ;;  %18596 = vst [vmem:[#allocation180_spill] sm:$0xff] %v13503_v60  ;;  %9966 = vlog2.f32 %v13466_v31  ;;  %v13518_v38 = vadd.f32 1.0, %v13503_v60  ;;  %5455 = vperm.xlu1 %9567, %v10486_v33   ;;  %5447 = vperm.xlu0 %9568, %v10487_v21   ;;  %v4871_v26 = vmul.f32 0.6931472, %v9935_v29  ;;  %v13532_v60 = vadd.f32 1.0, %v13265_v47 }
 0x3d4   : > { %18597 = vst [vmem:[#allocation181_spill] sm:$0xff] %v13507_v30  ;;  %v9943_v52 = vpop.eup %9942  ;;  %9968 = vlog2.f32 %v13500_v10  ;;  %v13537_v33 = vsel %vm17880_vm2, %v13165_v6, %v4902_v25  ;;  %v4906_v46 = vmul.f32 0.01, %v4859_v22  ;;  %v4910_v4 = vmul.f32 0.01, %v4867_v15  ;;  %v10488_v22 = vld [vmem:[%s17527_s2 + $0x28] sm:$0xff] }
 0x3d5   : > { %18598 = vst [vmem:[#allocation182_spill] sm:$0xff] %v13518_v38  ;;  %v9945_v61 = vpop.eup %9944  ;;  %9970 = vlog2.f32 %v13507_v30  ;;  %v13546_v30 = vadd.f32 1.0, %v13274_v23  ;;  %v4875_v6 = vmul.f32 0.6931472, %v9943_v52  ;;  %v4908_v52 = vmul.f32 0.01, %v4863_v13 }
 0x3d6   : > { %v9947_v10 = vpop.eup %9946  ;;  %9972 = vlog2.f32 %v13518_v38  ;;  %v4861_v25 = vmul.f32 0.6931472, %v9945_v61  ;;  %v13558_v38 = vmul.f32 0.01, %v4847_v54  ;;  %v13569_v13 = vsel %vm17873_vm11, %v13169_v7, %v4904_v16  ;;  %v10490_v7 = vld [vmem:[%s17527_s2 + $0x18] sm:$0xff]  ;;  %v18644_v11 = vld [vmem:[#allocation173_spill] sm:$0xff] }
 0x3d7   : > { %v13540_v21 = vpop.eup %9948  ;;  %v4869_v29 = vmul.f32 0.6931472, %v9947_v10  ;;  %9974 = vlog2.f32 %v13511_v20  ;;  %5459 = vperm.xlu1 %9567, %v10488_v22   ;;  %v10489_v10 = vld [vmem:[%s17527_s2] sm:$0xff]  ;;  %vm4773_vm2 = vcmp.gt.f32.partialorder %v18615_v18, 20.0 }
 0x3d8   : > { %18599 = vst [vmem:[#allocation183_spill] sm:$0xff] %v13540_v21  ;;  %v9951_v43 = vpop.eup %9950  ;;  %v13549_v62 = vadd.f32 1.0, %v13540_v21  ;;  %9976 = vlog2.f32 %v13521_v39  ;;  %5439 = vperm.xlu0 %9568, %v10489_v10   ;;  %v4912_v21 = vmul.f32 0.01, %v4871_v26  ;;  %v13574_v26 = vsel %vm17870_vm6, %v13193_v8, %v4906_v46 }
 0x3d9   : > { %v9953_v15 = vpop.eup %9952  ;;  %9978 = vlog2.f32 %v13532_v60  ;;  %v4911_v22 = vmul.f32 0.01, %v4869_v29  ;;  %v4865_v17 = vmul.f32 0.6931472, %v9951_v43  ;;  %v13580_v29 = vsel %vm17862_vm13, %v13228_v24, %v4910_v4 }
 0x3da   : > { %18600 = vst [vmem:[#allocation184_spill] sm:$0xff] %v13549_v62  ;;  %v9955_v61 = vpop.eup %9954  ;;  %9980 = vlog2.f32 %v13549_v62  ;;  %v4873_v54 = vmul.f32 0.6931472, %v9953_v15  ;;  %v4914_v43 = vmul.f32 0.01, %v4875_v6  ;;  %v13591_v46 = vsel %vm17864_vm12, %v13196_v19, %v4908_v52  ;;  %v18684_v18 = vld [vmem:[#allocation179_spill] sm:$0xff] }
 0x3db   : > { %v9957_v10 = vpop.eup %9956  ;;  %9982 = vlog2.f32 %v13546_v30  ;;  %v4907_v62 = vmul.f32 0.01, %v4861_v25  ;;  %5451 = vperm.xlu1 %9567, %v10490_v7   ;;  %v13596_v24 = vsel %vm17861_vm14, %v13238_v5, %v4912_v21  ;;  %v4879_v16 = vmul.f32 0.6931472, %v9955_v61  ;;  %v18605_v5 = vld [vmem:[#allocation37_spill] sm:$0xff] }
 0x3dc   : > { %v9959_v51 = vpop.eup %9958  ;;  %9984 = vrcp.f32 %v13186_v27  ;;  %v13604_v27 = vsel %vm17863_vm7, %v13255_v56, %v4911_v22  ;;  %v4909_v19 = vmul.f32 0.01, %v4865_v17  ;;  %vm4771_vm14 = vcmp.gt.f32.partialorder %v13151_v37, 20.0  ;;  %v9592_v37 = vld [vmem:[%s17526_s1 + $0x48] sm:$0xff]  }
 0x3dd   : > { %v9961_v8 = vpop.eup %9960  ;;  %9986 = vrcp.f32 %v13231_v55  ;;  %vm17888_vm13 = vcmp.gt.f32.partialorder %v13386_v50, 20.0  ;;  %v4877_v55 = vmul.f32 0.6931472, %v9957_v10  ;;  %v4913_v21 = vmul.f32 0.01, %v4873_v54 }
 0x3de   : > { %v9963_v4 = vpop.eup %9962  ;;  %v4853_v6 = vmul.f32 0.6931472, %v9961_v8  ;;  %9988 = vrcp.f32 %v13511_v20  ;;  %v4845_v15 = vmul.f32 0.6931472, %v9959_v51  ;;  %v13616_v17 = vsel %vm17865_vm15, %v13280_v36, %v4914_v43  ;;  %v10491_v51 = vld [vmem:[%s17527_s2 + $0x8] sm:$0xff]  ;;  %v18602_v8 = vld [vmem:[#allocation120_spill] sm:$0xff] }
 0x3df   : > { %v9965_v25 = vpop.eup %9964  ;;  %vm17890_vm7 = vcmp.gt.f32.partialorder %v13342_v41, 20.0  ;;  %v13622_v20 = vsel %vm17866_vm9, %v13215_v12, %v4907_v62  ;;  %5443 = vperm.xlu1 %9567, %v10491_v51   ;;  %9990 = vrcp.f32 %v13532_v60  ;;  %v4916_v22 = vmul.f32 0.01, %v4879_v16  ;;  %v18601_v62 = vld [vmem:[#allocation117_spill] sm:$0xff]  ;;  %v18603_v16 = vld [vmem:[#allocation82_spill] sm:$0xff] }
 0x3e0   : > { %v9967_v52 = vpop.eup %9966  ;;  %vm4792_vm12 = vcmp.gt.f32.partialorder %v13383_v44, 20.0  ;;  %v4881_v36 = vmul.f32 0.6931472, %v9963_v4  ;;  %9992 = vrcp.f32 %v13224_v28  ;;  %v13635_v43 = vsel %vm17868_vm0, %v18601_v62, %v4909_v19  ;;  %v18604_v4 = vld [vmem:[#allocation159_spill] sm:$0xff]  ;;  %v5148_v44 = vpop.f32.mrf.mxu0 }
 0x3e1   : > { %v9969_v61 = vpop.eup %9968  ;;  %v4903_v7 = vmul.f32 0.01, %v4853_v6  ;;  %9994 = vrcp.f32 %v18602_v8  ;;  %vm4762_vm15 = vcmp.gt.f32.partialorder %v18603_v16, 20.0  ;;  %vm4793_vm9 = vcmp.gt.f32.partialorder %v18604_v4, 20.0  ;;  %v18651_v16 = vld [vmem:[#allocation174_spill] sm:$0xff] }
 0x3e2   : > { %v9971_v54 = vpop.eup %9970  ;;  %v4883_v12 = vmul.f32 0.6931472, %v9969_v61  ;;  %v4915_v56 = vmul.f32 0.01, %v4877_v55  ;;  %v13643_v28 = vsel %vm17872_vm1, %v18605_v5, %v4913_v21  ;;  %v4899_v61 = vmul.f32 0.01, %v4845_v15 }
 0x3e3   : > { %v9973_v60 = vpop.eup %9972  ;;  %v4887_v51 = vmul.f32 0.6931472, %v9971_v54  ;;  %vm4764_vm0 = vcmp.gt.f32.partialorder %v18606_v35, 20.0  ;;  %v4849_v62 = vmul.f32 0.6931472, %v9965_v25  ;;  %9996 = vrcp.f32 %v13521_v39  ;;  %v18608_v54 = vld [vmem:[#allocation131_spill] sm:$0xff] }
 0x3e4   : > { %v9975_v10 = vpop.eup %9974  ;;  %v4918_v19 = vmul.f32 0.01, %v4883_v12  ;;  %v4885_v6 = vmul.f32 0.6931472, %v9973_v60  ;;  %vm4763_vm6 = vcmp.gt.f32.partialorder %v18607_v49, 20.0  ;;  %v13651_v55 = vsel %vm17876_vm3, %v18608_v54, %v4916_v22  ;;  %v18609_v15 = vld [vmem:[#allocation126_spill] sm:$0xff] }
 0x3e5   : > { %v9977_v8 = vpop.eup %9976  ;;  %v4917_v2 = vmul.f32 0.01, %v4881_v36  ;;  %v4857_v5 = vmul.f32 0.6931472, %v9967_v52  ;;  %9998 = vrcp.f32 %v13546_v30  ;;  %vm4767_vm1 = vcmp.gt.f32.partialorder %v18609_v15, 20.0  ;;  %v18610_v12 = vld [vmem:[#allocation138_spill] sm:$0xff] }
 0x3e6   : > { %v9979_v21 = vpop.eup %9978  ;;  %vm4777_vm11 = vcmp.gt.f32.partialorder %v18610_v12, 20.0  ;;  %v4920_v25 = vmul.f32 0.01, %v4887_v51  ;;  %v4919_v60 = vmul.f32 0.01, %v4885_v6  ;;  %v5061_v39 = vpack.c.bf16 %v13643_v28, %v13635_v43  ;;  %v18612_v54 = vld [vmem:[#allocation129_spill] sm:$0xff] }
 0x3e7   : > { %v4935_v48 = vsel %vm4775_vm10, %v18611_v53, %v4903_v7  ;;  %v9981_v22 = vpop.eup %9980  ;;  %vm4765_vm3 = vcmp.gt.f32.partialorder %v18612_v54, 20.0  ;;  %v18613_v52 = vld [vmem:[#allocation116_spill] sm:$0xff]  ;;  %v18614_v36 = vld [vmem:[#allocation49_spill] sm:$0xff]  ;;  %v4829_v51 = vmul.f32 0.6931472, %v9975_v10  ;;  %v18617_v28 = vld [vmem:[#allocation63_spill] sm:$0xff] }
 0x3e8   : > { %v4950_v30 = vsel %vm17883_vm8, %v18613_v52, %v4918_v19  ;;  %v4947_v3 = vsel %vm4787_vm5, %v18614_v36, %v4915_v56  ;;  %v4837_v6 = vmul.f32 0.6931472, %v9977_v8  ;;  %v9983_v40 = vpop.eup %9982  ;;  %v18616_v43 = vld [vmem:[#allocation149_spill] sm:$0xff]  ;;  %v4889_v7 = vmul.f32 0.6931472, %v9981_v22  ;;  %v18618_v52 = vld [vmem:[#allocation16_spill] sm:$0xff] }
 0x3e9   : > { %v4951_v53 = vsel %vm17888_vm13, %v18616_v43, %v4919_v60  ;;  %v4931_v59 = vsel %vm4771_vm14, %v18617_v28, %v4899_v61  ;;  %v4901_v1 = vmul.f32 0.01, %v4849_v62  ;;  %v9985_v19 = vpop.eup %9984  ;;  %vm4768_vm8 = vcmp.gt.f32.partialorder %v18618_v52, 20.0  ;;  %v18619_v56 = vld [vmem:[#allocation133_spill] sm:$0xff]  ;;  %v18620_v60 = vld [vmem:[#allocation147_spill] sm:$0xff]  ;;  %v18621_v61 = vld [vmem:[#allocation112_spill] sm:$0xff] }
 0x3ea   : > { %v5063_v0 = vpack.c.bf16 %v4951_v53, %v4947_v3  ;;  %v4949_v10 = vsel %vm17890_vm7, %v18619_v56, %v4917_v2  ;;  %v5055_v8 = vpack.c.bf16 %v4935_v48, %v4931_v59  ;;  %v4905_v36 = vmul.f32 0.01, %v4857_v5  ;;  %v9987_v9 = vpop.eup %9986  ;;  %v18623_v2 = vld [vmem:[#allocation42_spill] sm:$0xff]  ;;  %v18624_v48 = vld [vmem:[#allocation59_spill] sm:$0xff] }
 0x3eb   : > { %v5062_v50 = vpack.c.bf16 %v4950_v30, %v13616_v17  ;;  %v4952_v22 = vsel %vm4792_vm12, %v18620_v60, %v4920_v25  ;;  %v4921_v43 = vmul.f32 0.01, %v4889_v7  ;;  %v4955_v62 = vmul.f32 %v9985_v19, %v18621_v61  ;;  %v9989_v28 = vpop.eup %9988  ;;  %v18625_v5 = vld [vmem:[#allocation155_spill] sm:$0xff]  ;;  %v18637_v61 = vld [vmem:[#allocation145_spill] sm:$0xff] }
 0x3ec   : > { %vm4769_vm13 = vcmp.gt.f32.partialorder %v18622_v63, 20.0  ;;  %5300 = vmatprep.subr.bf16.mxu0 %v5063_v0  ;;  %v4891_v3 = vmul.f32 0.01, %v4829_v51  ;;  %v4895_v53 = vmul.f32 0.01, %v4837_v6  ;;  %v4959_v59 = vmul.f32 %v9987_v9, %v18623_v2  ;;  %v18627_v7 = vld [vmem:[#allocation107_spill] sm:$0xff]  ;;  %v9991_v0 = vpop.eup %9990 }
 0x3ed   : > { %v4841_v41 = vmul.f32 0.6931472, %v9983_v40  ;;  %vm4772_vm7 = vcmp.gt.f32.partialorder %v18624_v48, 20.0  ;;  %v4953_v17 = vsel %vm4793_vm9, %v18625_v5, %v4921_v43  ;;  %5301 = vmatpush1.bf16.msra.mxu0 %v5062_v50  ;;  %v13692_v25 = vsel %vm4762_vm15, 1.0, %v4955_v62  ;;  %v9993_v50 = vpop.eup %9992  ;;  %v18633_v60 = vld [vmem:[#allocation135_spill] sm:$0xff]  ;;  %v18638_v62 = vld [vmem:[#allocation136_spill] sm:$0xff] }
 0x3ee   : > { %18626 = vst [vmem:[#allocation117_spill] sm:$0xff] %v13692_v25  ;;  %v4957_v30 = vmul.f32 %v9989_v28, %v13240_v42  ;;  %10000 = vrcp.f32 %v18627_v7  ;;  %v5065_v51 = vpack.c.bf16 %v4953_v17, %v4949_v10  ;;  %v18628_v9 = vpack.c.bf16 %v13604_v27, %v13622_v20  ;;  %v9995_v27 = vpop.eup %9994  ;;  %v18631_v20 = vld [vmem:[#allocation35_spill] sm:$0xff]  ;;  %v18632_v10 = vld [vmem:[#allocation72_spill] sm:$0xff]  ;;  %v18677_v48 = vld [vmem:[#allocation130_spill] sm:$0xff] }
 0x3ef   : > { %v4833_v40 = vmul.f32 0.6931472, %v9979_v21  ;;  %v13701_v6 = vsel %vm4764_vm0, 1.0, %v4959_v59  ;;  %10002 = vrcp.f32 %v13443_v34  ;;  %v5064_v19 = vpack.c.bf16 %v4952_v22, %v13651_v55  ;;  %v18634_v22 = vld [vmem:[#allocation100_spill] sm:$0xff]  ;;  %v18640_v59 = vld [vmem:[#allocation74_spill] sm:$0xff] }
 0x3f0   : > { %5302 = vmatprep.subr.bf16.mxu0 %v18628_v9  ;;  %18629 = vst [vmem:[#allocation120_spill] sm:$0xff] %v13701_v6  ;;  %v13707_v42 = vsel %vm4763_vm6, 1.0, %v4957_v30  ;;  %v4961_v56 = vmul.f32 %v9991_v0, %v13265_v47  ;;  %10004 = vrcp.f32 %v13458_v58  ;;  %5373 = vmatprep.subr.bf16.mxu1 %v5065_v51  ;;  %v4937_v21 = vsel %vm4777_vm11, %v18631_v20, %v4905_v36  ;;  %v9997_v28 = vpop.eup %9996  ;;  %v18645_v30 = vld [vmem:[#allocation122_spill] sm:$0xff]  ;;  %v18650_v51 = vld [vmem:[#allocation109_spill] sm:$0xff] }
 0x3f1   : > { %18630 = vst [vmem:[#allocation82_spill] sm:$0xff] %v13707_v42  ;;  %v4927_v34 = vsel %vm4767_vm1, %v18632_v10, %v4895_v53  ;;  %v4963_v55 = vmul.f32 %v9993_v50, %v18633_v60  ;;  %10006 = vrcp.f32 %v18634_v22  ;;  %5374 = vmatpush1.bf16.msra.mxu1 %v5064_v19  ;;  %v18635_v47 = vpack.c.bf16 %v13580_v29, %v13574_v26  ;;  %v18639_v53 = vld [vmem:[#allocation132_spill] sm:$0xff]  ;;  %v18658_v20 = vld [vmem:[#allocation177_spill] sm:$0xff]  ;;  %v18662_v60 = vld [vmem:[#allocation103_spill] sm:$0xff] }
 0x3f2   : > { %v4897_v58 = vmul.f32 0.01, %v4841_v41  ;;  %v13724_v43 = vsel %vm4765_vm3, 1.0, %v4961_v56  ;;  %v4967_v36 = vmul.f32 %v9995_v27, %v18637_v61  ;;  %10008 = vrcp.f32 %v18638_v62  ;;  %5375 = vmatprep.subr.bf16.mxu1 %v5061_v39  ;;  %v9999_v29 = vpop.eup %9998  ;;  %v18656_v19 = vld [vmem:[#allocation124_spill] sm:$0xff]  ;;  %v18657_v27 = vld [vmem:[#allocation165_spill] sm:$0xff] }
 0x3f3   : > { %5303 = vmatpush1.bf16.msra.mxu0 %v18635_v47  ;;  %18636 = vst [vmem:[#allocation159_spill] sm:$0xff] %v13724_v43  ;;  %v4933_v2 = vsel %vm4773_vm2, %v18639_v53, %v4901_v1  ;;  %v4923_v26 = vsel %vm4763_vm6, %v18640_v59, %v4891_v3  ;;  %v13736_v41 = vsel %vm4766_vm4, 1.0, %v4963_v55  ;;  %10010 = vrcp.f32 %v13450_v57  ;;  %v18643_v3 = vld [vmem:[#allocation102_spill] sm:$0xff]  ;;  %v9591_v10 = vld [vmem:[%s17526_s1 + $0x40] sm:$0xff]   ;;  %v18663_v22 = vld [vmem:[#allocation164_spill] sm:$0xff] }
 0x3f4   : > { %5304 = vmatprep.subr.bf16.mxu0 %v5055_v8  ;;  %18641 = vst [vmem:[#allocation37_spill] sm:$0xff] %v13736_v41  ;;  %v4893_v5 = vmul.f32 0.01, %v4833_v40  ;;  %v13741_v39 = vsel %vm4768_vm8, 1.0, %v4967_v36  ;;  %v4965_v8 = vmul.f32 %v9997_v28, %v13257_v14  ;;  %10012 = vrcp.f32 %v13466_v31  ;;  %v18648_v31 = vld [vmem:[#allocation15_spill] sm:$0xff]  ;;  %v18665_v36 = vld [vmem:[#allocation166_spill] sm:$0xff] }
 0x3f5   : > { %18642 = vst [vmem:[#allocation76_spill] sm:$0xff] %v13741_v39  ;;  %v5057_v1 = vpack.c.bf16 %v4937_v21, %v4933_v2  ;;  %v5051_v17 = vpack.c.bf16 %v4927_v34, %v4923_v26  ;;  %v4969_v49 = vmul.f32 %v9999_v29, %v13274_v23  ;;  %10014 = vrcp.f32 %v18643_v3  ;;  %v18652_v40 = vld [vmem:[#allocation115_spill] sm:$0xff]  ;;  %v18671_v29 = vld [vmem:[#allocation48_spill] sm:$0xff] }
 0x3f6   : > { %v4922_v57 = vsel %vm4762_vm15, %v18645_v30, %v18644_v11  ;;  %v18646_v7 = vpack.c.bf16 %v13596_v24, %v13591_v46  ;;  %v18647_v14 = vpack.c.bf16 %v13537_v33, %v13492_v45  ;;  %v4929_v0 = vsel %vm4769_vm13, %v18648_v31, %v4897_v58  ;;  %v18654_v33 = vld [vmem:[#allocation161_spill] sm:$0xff]  ;;  %v18655_v24 = vld [vmem:[#allocation175_spill] sm:$0xff]  ;;  %v18675_v11 = vld [vmem:[#allocation170_spill] sm:$0xff] }
 0x3f7   : > { %v13762_v23 = vsel %vm4767_vm1, 1.0, %v4965_v8  ;;  %10016 = vrcp.f32 %v18650_v51  ;;  %v4892_v9 = vmul.f32 0.01, %v18651_v16  ;;  %v4932_v46 = vsel %vm4772_vm7, %v18652_v40, %v13558_v38  ;;  %v18659_v38 = vld [vmem:[#allocation68_spill] sm:$0xff]  ;;  %v18660_v34 = vld [vmem:[#allocation151_spill] sm:$0xff]  ;;  %v18664_v58 = vld [vmem:[#allocation105_spill] sm:$0xff] }
 0x3f8   : > { %5376 = vmatpush1.bf16.msra.mxu1 %v18646_v7  ;;  %5305 = vmatpush1.bf16.msra.mxu0 %v18647_v14  ;;  %18649 = vst [vmem:[#allocation67_spill] sm:$0xff] %v13762_v23  ;;  %v13772_v45 = vsel %vm4769_vm13, 1.0, %v4969_v49  ;;  %10018 = vrcp.f32 %v18654_v33  ;;  %v5050_v15 = vpack.c.bf16 %v18655_v24, %v4922_v57  ;;  %v5056_v50 = vpack.c.bf16 %v13569_v13, %v4932_v46  ;;  %v18661_v13 = vld [vmem:[#allocation153_spill] sm:$0xff]  ;;  %v18667_v28 = vld [vmem:[#allocation43_spill] sm:$0xff]  ;;  %v18678_v14 = vld [vmem:[#allocation172_spill] sm:$0xff] }
 0x3f9   : > { %5377 = vmatprep.subr.bf16.mxu1 %v5057_v1  ;;  %5306 = vmatprep.subr.bf16.mxu0 %v5051_v17  ;;  %18653 = vst [vmem:[#allocation131_spill] sm:$0xff] %v13772_v45  ;;  %v4925_v56 = vsel %vm4765_vm3, %v18656_v19, %v4893_v5  ;;  %10020 = vrcp.f32 %v18657_v27  ;;  %v4928_v21 = vsel %vm4768_vm8, %v18659_v38, %v18658_v20  ;;  %vm18666_vm4 = vcmask 523264   ;;  %v18668_v2 = vld [vmem:[#allocation163_spill] sm:$0xff]  ;;  %v18672_v8 = vld [vmem:[#allocation169_spill] sm:$0xff]  ;;  %v18687_v33 = vld [vmem:[#allocation150_spill] sm:$0xff] }
 0x3fa   : > { %v5053_v63 = vpack.c.bf16 %v4929_v0, %v4925_v56  ;;  %10022 = vrcp.f32 %v18660_v34  ;;  %v4924_v55 = vsel %vm4764_vm0, %v18662_v60, %v4892_v9  ;;  %v18669_v35 = vmov 0   ;;  %v18674_v49 = vld [vmem:[#allocation47_spill] sm:$0xff]  ;;  %vm18679_vm8 = vmmov %vm18666_vm4  ;;  %v18680_v0 = vld [vmem:[#allocation28_spill] sm:$0xff] }
 0x3fb   : > { %10024 = vrcp.f32 %v18661_v13  ;;  %v10001_v54 = vpop.eup %10000  ;;  %v5052_v47 = vpack.c.bf16 %v4928_v21, %v4924_v55  ;;  %vm18681_vm6 = vcmp.gt.f32.partialorder %v18680_v0, 20.0  ;;  %v18683_v16 = vld [vmem:[#allocation143_spill] sm:$0xff]  ;;  %v18691_v27 = vld [vmem:[#allocation64_spill] sm:$0xff]  ;;  %v18692_v38 = vld [vmem:[#allocation182_spill] sm:$0xff] }
 0x3fc   : > { %5378 = vmatpush1.bf16.msra.mxu1 %v5056_v50  ;;  %5307 = vmatpush1.bf16.msra.mxu0 %v5050_v15  ;;  %10026 = vrcp.f32 %v18663_v22  ;;  %v10003_v52 = vpop.eup %10002  ;;  %v4975_v61 = vmul.f32 %v10001_v54, %v18664_v58  ;;  %v18688_v15 = vld [vmem:[#allocation181_spill] sm:$0xff]  ;;  %v18695_v34 = vld [vmem:[#allocation184_spill] sm:$0xff]  ;;  %vm18696_vm13 = vmmov %vm18666_vm4 }
 0x3fd   : > { %5379 = vmatprep.subr.bf16.mxu1 %v5053_v63  ;;  %10028 = vrcp.f32 %v18665_v36  ;;  %v10005_v62 = vpop.eup %10004  ;;  %v4973_v53 = vmul.f32 %v10003_v52, %v18667_v28  ;;  %v18697_v54 = vld [vmem:[#allocation121_spill] sm:$0xff]  ;;  %v18700_v55 = vld [vmem:[#allocation156_spill] sm:$0xff]  ;;  %vm18713_vm0 = vmmov %vm18666_vm4 }
 0x3fe   : > { %10030 = vrcp.f32 %v18668_v2  ;;  %v10007_v59 = vpop.eup %10006  ;;  %v13802_v26 = vsel %vm4772_vm7, 1.0, %v4975_v61  ;;  %v4977_v5 = vmul.f32 %v10005_v62, %v18671_v29  ;;  %v18704_v58 = vld [vmem:[#allocation157_spill] sm:$0xff]  ;;  %v18705_v62 = vld [vmem:[#allocation142_spill] sm:$0xff] }
 0x3ff   : > { %9313 = vmatmul.mubr.msk.bf16.vlgmr.msra.gmra.mxu0 %vm18666_vm4, %v9591_v10  ;;  %18670 = vst [vmem:[#allocation126_spill] sm:$0xff] %v13802_v26  ;;  %10032 = vrcp.f32 %v18672_v8  ;;  %v10009_v1 = vpop.eup %10008  ;;  %v13808_v17 = vsel %vm4771_vm14, 1.0, %v4973_v53  ;;  %v4979_v3 = vmul.f32 %v10007_v59, %v18674_v49  ;;  %vm18698_vm14 = vcmp.gt.f32.partialorder %v18697_v54, 20.0  ;;  %v18708_v53 = vld [vmem:[#allocation144_spill] sm:$0xff]  ;;  %v18709_v29 = vld [vmem:[#allocation41_spill] sm:$0xff]  ;;  %v18712_v8 = vld [vmem:[#allocation119_spill] sm:$0xff] }
 0x400   : > { %5380 = vmatpush1.bf16.msra.mxu1 %v5052_v47  ;;  %5334 = vmatprep.mubr.bf16.mxu0 %v18669_v35  ;;  %18673 = vst [vmem:[#allocation138_spill] sm:$0xff] %v13808_v17  ;;  %10034 = vrcp.f32 %v18675_v11  ;;  %v10011_v30 = vpop.eup %10010  ;;  %v13814_v57 = vsel %vm4773_vm2, 1.0, %v4977_v5  ;;  %v4983_v7 = vmul.f32 %v10009_v1, %v18677_v48  ;;  %vm18685_vm2 = vcmp.gt.f32.partialorder %v13178_v32, 20.0  ;;  %v18694_v32 = vld [vmem:[#allocation140_spill] sm:$0xff]  ;;  %v18701_v47 = vld [vmem:[#allocation23_spill] sm:$0xff]  ;;  %v18714_v11 = vld [vmem:[#allocation89_spill] sm:$0xff] }
 0x401   : > { %18676 = vst [vmem:[#allocation134_spill] sm:$0xff] %v13814_v57  ;;  %10036 = vrcp.f32 %v18678_v14  ;;  %v10013_v31 = vpop.eup %10012  ;;  %v13824_v51 = vsel %vm18681_vm6, 1.0, %v4979_v3  ;;  %v4981_v9 = vmul.f32 %v10011_v30, %v18683_v16  ;;  %vm18702_vm7 = vcmp.gt.f32.partialorder %v18701_v47, 20.0  ;;  %v9593_v3 = vld [vmem:[%s17526_s1 + $0x50] sm:$0xff]   ;;  %v18717_v48 = vld [vmem:[#allocation158_spill] sm:$0xff]  ;;  %v18735_v54 = vld [vmem:[#allocation101_spill] sm:$0xff] }
 0x402   : > { %18682 = vst [vmem:[#allocation129_spill] sm:$0xff] %v13824_v51  ;;  %10038 = vrcp.f32 %v18684_v18  ;;  %v10015_v40 = vpop.eup %10014  ;;  %v13831_v46 = vsel %vm18685_vm2, 1.0, %v4983_v7  ;;  %v4985_v24 = vmul.f32 %v10013_v31, %v18687_v33  ;;  %vm18710_vm15 = vcmp.gt.f32.partialorder %v18709_v29, 20.0  ;;  %v18718_v31 = vld [vmem:[#allocation127_spill] sm:$0xff]  ;;  %v18721_v16 = vld [vmem:[#allocation162_spill] sm:$0xff]  ;;  %v18725_v33 = vld [vmem:[#allocation160_spill] sm:$0xff] }
 0x403   : > { %9317 = vmatmul.mubr.msk.bf16.vlgmr.msra.gmra.mxu1 %vm18679_vm8, %v9591_v10  ;;  %18686 = vst [vmem:[#allocation116_spill] sm:$0xff] %v13831_v46  ;;  %10040 = vrcp.f32 %v18688_v15  ;;  %v13837_v56 = vsel %vm4775_vm10, 1.0, %v4981_v9  ;;  %v4987_v20 = vmul.f32 %v10015_v40, %v18691_v27  ;;  %vm18715_vm1 = vcmp.gt.f32.partialorder %v18714_v11, 20.0  ;;  %v18722_v18 = vld [vmem:[#allocation146_spill] sm:$0xff]  ;;  %v18729_v27 = vld [vmem:[#allocation167_spill] sm:$0xff]  ;;  %vm18730_vm8 = vmmov %vm18713_vm0 }
 0x404   : > { %5407 = vmatprep.mubr.bf16.mxu1 %v18669_v35  ;;  %v10017_v50 = vpop.eup %10016  ;;  %18690 = vst [vmem:[#allocation49_spill] sm:$0xff] %v13837_v56  ;;  %10042 = vrcp.f32 %v18692_v38  ;;  %v13843_v63 = vsel %vm4777_vm11, 1.0, %v4985_v24  ;;  %vm18706_vm11 = vcmp.gt.f32.partialorder %v18705_v62, 20.0  ;;  %vm18719_vm3 = vcmp.gt.f32.partialorder %v18718_v31, 20.0  ;;  %v18745_v29 = vld [vmem:[#allocation178_spill] sm:$0xff]  ;;  %v18747_v11 = vld [vmem:[#allocation152_spill] sm:$0xff] }
 0x405   : > { %v10019_v21 = vpop.eup %10018  ;;  %18693 = vst [vmem:[#allocation128_spill] sm:$0xff] %v13843_v63  ;;  %v4991_v10 = vmul.f32 %v10017_v50, %v18694_v32  ;;  %10044 = vrcp.f32 %v18695_v34  ;;  %v13850_v60 = vsel %vm18698_vm14, 1.0, %v4987_v20  ;;  %vm18723_vm10 = vcmp.gt.f32.partialorder %v18722_v18, 20.0  ;;  %v18726_v50 = vld [vmem:[#allocation148_spill] sm:$0xff]  ;;  %vm18746_vm14 = vmmov %vm18713_vm0 }
 0x406   : > { %v10021_v13 = vpop.eup %10020  ;;  %18699 = vst [vmem:[#allocation149_spill] sm:$0xff] %v13850_v60  ;;  %v4989_v22 = vmul.f32 %v10019_v21, %v18700_v55  ;;  %vm18727_vm4 = vcmp.gt.f32.partialorder %v18726_v50, 20.0  ;;  %v18731_v21 = vld [vmem:[#allocation123_spill] sm:$0xff]  ;;  %vm18736_vm2 = vcmp.gt.f32.partialorder %v18735_v54, 20.0 }
 0x407   : > { %9314 = vmatmul.mubr.msk.bf16.gmra.mxu0 %vm18696_vm13, %v9592_v37  ;;  %v10023_v52 = vpop.eup %10022  ;;  %v13856_v12 = vsel %vm18702_vm7, 1.0, %v4991_v10  ;;  %v4993_v61 = vmul.f32 %v10021_v13, %v18704_v58  ;;  %vm18732_vm6 = vcmp.gt.f32.partialorder %v18731_v21, 20.0  ;;  %v18734_v10 = vld [vmem:[#allocation168_spill] sm:$0xff]  ;;  %vm18748_vm7 = vcmp.gt.f32.partialorder %v18747_v11, 20.0 }
 0x408   : > { %5344 = vmatprep.mubr.bf16.mxu0 %v18669_v35  ;;  %18703 = vst [vmem:[#allocation63_spill] sm:$0xff] %v13856_v12  ;;  %v10025_v36 = vpop.eup %10024  ;;  %v13861_v28 = vsel %vm18706_vm11, 1.0, %v4989_v22  ;;  %v4995_v2 = vmul.f32 %v10023_v52, %v18708_v53  ;;  %v18738_v22 = vld [vmem:[#allocation171_spill] sm:$0xff]  ;;  %vm18757_vm11 = vmmov %vm18713_vm0 }
 0x409   : > { %18707 = vst [vmem:[#allocation16_spill] sm:$0xff] %v13861_v28  ;;  %v10027_v59 = vpop.eup %10026  ;;  %v13866_v5 = vsel %vm18710_vm15, 1.0, %v4993_v61  ;;  %v4999_v1 = vmul.f32 %v10025_v36, %v18712_v8  ;;  %v18741_v36 = vld [vmem:[#allocation176_spill] sm:$0xff]  ;;  %vm18758_vm15 = vmmov %vm18713_vm0 }
 0x40a   : > { %18711 = vst [vmem:[#allocation133_spill] sm:$0xff] %v13866_v5  ;;  %v10029_v49 = vpop.eup %10028  ;;  %v13875_v30 = vsel %vm18715_vm1, 1.0, %v4995_v2  ;;  %v4997_v7 = vmul.f32 %v10027_v59, %v18717_v48  ;;  %v18742_v2 = vld [vmem:[#allocation114_spill] sm:$0xff] }
 0x40b   : > { %9318 = vmatmul.mubr.msk.bf16.gmra.mxu1 %vm18713_vm0, %v9592_v37  ;;  %18716 = vst [vmem:[#allocation147_spill] sm:$0xff] %v13875_v30  ;;  %v10031_v14 = vpop.eup %10030  ;;  %v13881_v0 = vsel %vm18719_vm3, 1.0, %v4999_v1  ;;  %v5001_v9 = vmul.f32 %v10029_v49, %v18721_v16  ;;  %vm18743_vm13 = vcmp.gt.f32.partialorder %v18742_v2, 20.0  ;;  %v9594_v49 = vld [vmem:[%s17526_s1 + $0x58] sm:$0xff]   ;;  %v18752_v16 = vld [vmem:[#allocation183_spill] sm:$0xff] }
 0x40c   : > { %5417 = vmatprep.mubr.bf16.mxu1 %v18669_v35  ;;  %18720 = vst [vmem:[#allocation112_spill] sm:$0xff] %v13881_v0  ;;  %v10033_v37 = vpop.eup %10032  ;;  %v13886_v40 = vsel %vm18723_vm10, 1.0, %v4997_v7  ;;  %v5003_v24 = vmul.f32 %v10031_v14, %v18725_v33  ;;  %v18750_v7 = vld [vmem:[#allocation180_spill] sm:$0xff]  ;;  %v5221_v33 = vpop.f32.mrf.mxu1 }
 0x40d   : > { %18724 = vst [vmem:[#allocation61_spill] sm:$0xff] %v13886_v40  ;;  %v10035_v15 = vpop.eup %10034  ;;  %v13891_v19 = vsel %vm18727_vm4, 1.0, %v5001_v9  ;;  %v5007_v20 = vmul.f32 %v10033_v37, %v18729_v27  ;;  %v18753_v37 = vld [vmem:[#allocation154_spill] sm:$0xff] }
 0x40e   : > { %18728 = vst [vmem:[#allocation42_spill] sm:$0xff] %v13891_v19  ;;  %v10037_v38 = vpop.eup %10036  ;;  %v13897_v32 = vsel %vm18732_vm6, 1.0, %v5003_v24  ;;  %v5005_v34 = vmul.f32 %v10035_v15, %v18734_v10  ;;  %v5150_v24 = vpop.f32.mrf.mxu0 }
 0x40f   : > { %9315 = vmatmul.mubr.msk.bf16.gmra.mxu0 %vm18730_vm8, %v9593_v3  ;;  %18733 = vst [vmem:[#allocation59_spill] sm:$0xff] %v13897_v32  ;;  %v10039_v13 = vpop.eup %10038  ;;  %v13903_v55 = vsel %vm18736_vm2, 1.0, %v5007_v20  ;;  %v5009_v52 = vmul.f32 %v10037_v38, %v18738_v22  ;;  %v5223_v15 = vpop.f32.mrf.mxu1 }
 0x410   : > { %5354 = vmatprep.mubr.bf16.mxu0 %v18669_v35  ;;  %18737 = vst [vmem:[#allocation155_spill] sm:$0xff] %v13903_v55  ;;  %v10041_v47 = vpop.eup %10040  ;;  %v13908_v61 = vsel %vm4787_vm5, 1.0, %v5005_v34  ;;  %v5011_v62 = vmul.f32 %v10039_v13, %v18741_v36  ;;  %vm18754_vm5 = vcmp.gt.f32.partialorder %v18753_v37, 20.0  ;;  %v5152_v50 = vpop.f32.mrf.mxu0 }
 0x411   : > { %18740 = vst [vmem:[#allocation107_spill] sm:$0xff] %v13908_v61  ;;  %v10043_v53 = vpop.eup %10042  ;;  %v13913_v59 = vsel %vm18743_vm13, 1.0, %v5009_v52  ;;  %v5015_v8 = vmul.f32 %v10041_v47, %v18745_v29  ;;  %v5225_v27 = vpop.f32.mrf.mxu1 }
 0x412   : > { %18744 = vst [vmem:[#allocation35_spill] sm:$0xff] %v13913_v59  ;;  %v10045_v1 = vpop.eup %10044  ;;  %v13922_v48 = vsel %vm18748_vm7, 1.0, %v5011_v62  ;;  %v5013_v14 = vmul.f32 %v10043_v53, %v18750_v7  ;;  %v5154_v20 = vpop.f32.mrf.mxu0 }
 0x413   : > { %9319 = vmatmul.mubr.msk.bf16.gmra.mxu1 %vm18746_vm14, %v9593_v3  ;;  %18749 = vst [vmem:[#allocation72_spill] sm:$0xff] %v13922_v48  ;;  %v13928_v31 = vsel %vm4792_vm12, 1.0, %v5015_v8  ;;  %v5017_v9 = vmul.f32 %v10045_v1, %v18752_v16  ;;  %v13943_v38 = vpop.f32.mrf.mxu1 }
 0x414   : > { %5427 = vmatprep.mubr.bf16.mxu1 %v18669_v35  ;;  %18751 = vst [vmem:[#allocation135_spill] sm:$0xff] %v13928_v31  ;;  %v13933_v3 = vsel %vm18754_vm5, 1.0, %v5013_v14  ;;  %v13945_v4 = vpop.f32.mrf.mxu0 }
 0x415   : > { %18755 = vst [vmem:[#allocation100_spill] sm:$0xff] %v13933_v3  ;;  %v13937_v18 = vsel %vm4793_vm9, 1.0, %v5017_v9  ;;  %v13947_v21 = vpop.f32.mrf.mxu1 }
 0x416   : > { %18756 = vst [vmem:[#allocation145_spill] sm:$0xff] %v13937_v18  ;;  %v13949_v10 = vpop.f32.mrf.mxu0 }
 0x417   : > { %9316 = vmatmul.mubr.msk.bf16.gmra.mxu0 %vm18757_vm11, %v9594_v49  ;;  %v13951_v34 = vpop.f32.mrf.mxu1 }
 0x418   : > { %6038 = vmatprep.mubr.bf16.mxu0 %v18669_v35  ;;  %v13953_v13 = vpop.f32.mrf.mxu0 }
 0x419   : > { %v13955_v54 = vpop.f32.mrf.mxu1 }
 0x41a   : > { %v13957_v22 = vpop.f32.mrf.mxu0 }
 0x41b   : > { %9320 = vmatmul.mubr.msk.bf16.gmra.mxu1 %vm18758_vm15, %v9594_v49  ;;  %v13959_v52 = vpop.f32.mrf.mxu1 }
 0x41c   : > { %6111 = vmatprep.mubr.bf16.mxu1 %v18669_v35  ;;  %v13961_v47 = vpop.f32.mrf.mxu0 }
 0x41d   : > { %v13963_v58 = vpop.f32.mrf.mxu1 }
 0x41e   : > { %v13965_v36 = vpop.f32.mrf.mxu0 }
 0x41f   : > { %v13967_v62 = vpop.f32.mrf.mxu1 }
 0x420   : > { %v13969_v53 = vpop.f32.mrf.mxu0 }
 0x421   : > { %v13971_v2 = vpop.f32.mrf.mxu1 }
 0x422   : > { %v13975_v8 = vpop.f32.mrf.mxu0 }
 0x423   : > { %v13977_v1 = vpop.f32.mrf.mxu1 }
 0x424   : > { %v13979_v49 = vpop.f32.mrf.mxu0 }
 0x425   : > { %v13985_v14 = vpop.f32.mrf.mxu1 }
 0x426   : > { %v13987_v16 = vpop.f32.mrf.mxu0 }
 0x427   : > { %v13989_v9 = vpop.f32.mrf.mxu1 }
 0x428   : > { %v13993_v51 = vpop.f32.mrf.mxu0 }
 0x429   : > { %v13997_v59 = vpop.f32.mrf.mxu1 }
 0x42a   : > { %v13999_v3 = vpop.f32.mrf.mxu0 }
 0x42b   : > { %v14003_v32 = vpop.f32.mrf.mxu1 }
 0x449   : > { %v13983_v7 = vpop.permute.xlu0 %5467 }
 0x44a   : > { %v13973_v29 = vpop.permute.xlu1 %5463 }
 0x44e   : > { %v13981_v11 = vpop.permute.xlu1 %5455  ;;  %v13995_v18 = vpop.permute.xlu0 %5447 }
 0x452   : > { %v13991_v37 = vpop.permute.xlu1 %5459 }
 0x453   : > { %v5440_v55 = vpop.permute.xlu0 %5439 }
 0x456   : > { %v14001_v31 = vpop.permute.xlu1 %5451 }
 0x45a   : > { %v5444_v57 = vpop.permute.xlu1 %5443 }
 0x4bf   : > { %v5326_v61 = vpop.f32.mrf.mxu0 }
 0x4c0   : > { %v5327_v48 = vadd.f32 %v5326_v61, %v5148_v44 }
 0x4c1   : > { %v5328_v19 = vpop.f32.mrf.mxu0 }
 0x4c2   : > { %v14005_v5 = vadd.f32 %v5440_v55, %v5327_v48  ;;  %v5329_v40 = vadd.f32 %v5328_v19, %v5150_v24 }
 0x4c3   : > { %v5399_v0 = vpop.f32.mrf.mxu1  ;;  %v5330_v28 = vpop.f32.mrf.mxu0 }
 0x4c4   : > { %18759 = vst [vmem:[#allocation136_spill] sm:$0xff] %v14005_v5  ;;  %v5400_v12 = vadd.f32 %v5399_v0, %v5221_v33  ;;  %v14008_v30 = vmul.f32 100.0, %v14005_v5  ;;  %v14010_v60 = vadd.f32 %v5440_v55, %v5329_v40  ;;  %v5331_v63 = vadd.f32 %v5330_v28, %v5152_v50 }
 0x4c5   : > { %v5401_v56 = vpop.f32.mrf.mxu1  ;;  %v5332_v46 = vpop.f32.mrf.mxu0 }
 0x4c6   : > { %18760 = vst [vmem:[#allocation132_spill] sm:$0xff] %v14008_v30  ;;  %18761 = vst [vmem:[#allocation74_spill] sm:$0xff] %v14010_v60  ;;  %v14012_v17 = vadd.f32 %v5440_v55, %v5400_v12  ;;  %v5534_v61 = vmin.f32 %v14008_v30, 20.0  ;;  %v5402_v44 = vadd.f32 %v5401_v56, %v5223_v15  ;;  %v14015_v26 = vadd.f32 %v5444_v57, %v5331_v63 }
 0x4c7   : > { %v5403_v48 = vpop.f32.mrf.mxu1  ;;  %v5333_v19 = vadd.f32 %v5332_v46, %v5154_v20  ;;  %v5336_v24 = vpop.f32.mrf.mxu0  ;;  %v14021_v40 = vmul.f32 100.0, %v14010_v60 }
 0x4c8   : > { %18762 = vst [vmem:[#allocation102_spill] sm:$0xff] %v14012_v17  ;;  %18763 = vst [vmem:[#allocation173_spill] sm:$0xff] %v14015_v26  ;;  %v14018_v0 = vmul.f32 100.0, %v14012_v17  ;;  %v14023_v28 = vadd.f32 %v5440_v55, %v5402_v44  ;;  %v5404_v33 = vadd.f32 %v5403_v48, %v5225_v27  ;;  %v14026_v12 = vmul.f32 100.0, %v14015_v26 }
 0x4c9   : > { %18765 = vst [vmem:[#allocation15_spill] sm:$0xff] %v14021_v40  ;;  %v5405_v50 = vpop.f32.mrf.mxu1  ;;  %v5338_v45 = vpop.f32.mrf.mxu0  ;;  %v14028_v56 = vadd.f32 %v5444_v57, %v5333_v19  ;;  %v5566_v63 = vmul.f32 1.442695, %v5534_v61  ;;  %v5535_v43 = vmin.f32 %v14021_v40, 20.0 }
 0x4ca   : > { %18764 = vst [vmem:[#allocation122_spill] sm:$0xff] %v14018_v0  ;;  %18766 = vst [vmem:[#allocation109_spill] sm:$0xff] %v14023_v28  ;;  %v14030_v15 = vadd.f32 %v5444_v57, %v5404_v33  ;;  %v5536_v20 = vmin.f32 %v14018_v0, 20.0  ;;  %v5406_v23 = vadd.f32 %v5405_v50, %v13943_v38  ;;  %v14036_v27 = vmul.f32 100.0, %v14023_v28 }
 0x4cb   : > { %18767 = vst [vmem:[#allocation174_spill] sm:$0xff] %v14026_v12  ;;  %18768 = vst [vmem:[#allocation115_spill] sm:$0xff] %v14028_v56  ;;  %v5409_v46 = vpop.f32.mrf.mxu1  ;;  %v5340_v55 = vpop.f32.mrf.mxu0  ;;  %v5538_v44 = vmin.f32 %v14026_v12, 20.0  ;;  %v14043_v61 = vmul.f32 100.0, %v14028_v56  ;;  %v5337_v33 = vadd.f32 %v5336_v24, %v13945_v4  ;;  %10046 = vpow2.f32 %v5566_v63 }
 0x4cc   : > { %18769 = vst [vmem:[#allocation161_spill] sm:$0xff] %v14030_v15  ;;  %18770 = vst [vmem:[#allocation175_spill] sm:$0xff] %v14036_v27  ;;  %v14040_v19 = vmul.f32 100.0, %v14030_v15  ;;  %v14046_v39 = vadd.f32 %v5444_v57, %v5406_v23  ;;  %v5570_v38 = vmul.f32 1.442695, %v5536_v20  ;;  %v5410_v41 = vadd.f32 %v5409_v46, %v13947_v21 }
 0x4cd   : > { %v5411_v48 = vpop.f32.mrf.mxu1  ;;  %18772 = vst [vmem:[#allocation165_spill] sm:$0xff] %v14043_v61  ;;  %v5568_v50 = vmul.f32 1.442695, %v5535_v43  ;;  %v14049_v6 = vadd.f32 %v13995_v18, %v5337_v33  ;;  %v5342_v25 = vpop.f32.mrf.mxu0  ;;  %v5537_v35 = vmin.f32 %v14036_v27, 20.0  ;;  %v5574_v17 = vmul.f32 1.442695, %v5538_v44 }
 0x4ce   : > { %18771 = vst [vmem:[#allocation124_spill] sm:$0xff] %v14040_v19  ;;  %18773 = vst [vmem:[#allocation177_spill] sm:$0xff] %v14046_v39  ;;  %v5339_v15 = vadd.f32 %v5338_v45, %v13949_v10  ;;  %v5412_v26 = vadd.f32 %v5411_v48, %v13951_v34  ;;  %v5540_v4 = vmin.f32 %v14040_v19, 20.0  ;;  %v5539_v23 = vmin.f32 %v14043_v61, 20.0 }
 0x4cf   : > { %v5413_v42 = vpop.f32.mrf.mxu1  ;;  %v14058_v57 = vmul.f32 100.0, %v14049_v6  ;;  %v14061_v43 = vadd.f32 %v13995_v18, %v5410_v41  ;;  %v14064_v21 = vmul.f32 100.0, %v14046_v39  ;;  %v5341_v10 = vadd.f32 %v5340_v55, %v13953_v13  ;;  %v5346_v41 = vpop.f32.mrf.mxu0 }
 0x4d0   : > { %v14067_v24 = vadd.f32 %v13995_v18, %v5339_v15  ;;  %v14070_v45 = vadd.f32 %v13995_v18, %v5412_v26  ;;  %10048 = vpow2.f32 %v5568_v50  ;;  %v5572_v20 = vmul.f32 1.442695, %v5537_v35 }
 0x4d1   : > { %18774 = vst [vmem:[#allocation68_spill] sm:$0xff] %v14058_v57  ;;  %18775 = vst [vmem:[#allocation151_spill] sm:$0xff] %v14064_v21  ;;  %v5415_v34 = vpop.f32.mrf.mxu1  ;;  %v5542_v63 = vmin.f32 %v14058_v57, 20.0  ;;  %v14075_v46 = vmul.f32 100.0, %v14061_v43  ;;  %10050 = vpow2.f32 %v5570_v38  ;;  %v14078_v44 = vadd.f32 %v14001_v31, %v5341_v10 }
 0x4d2   : > { %18776 = vst [vmem:[#allocation153_spill] sm:$0xff] %v14067_v24  ;;  %18777 = vst [vmem:[#allocation103_spill] sm:$0xff] %v14070_v45  ;;  %v5414_v15 = vadd.f32 %v5413_v42, %v13955_v54  ;;  %10052 = vpow2.f32 %v5574_v17  ;;  %v5576_v26 = vmul.f32 1.442695, %v5539_v23  ;;  %v5578_v55 = vmul.f32 1.442695, %v5540_v4  ;;  %v5348_v17 = vpop.f32.mrf.mxu0 }
 0x4d3   : > { %18778 = vst [vmem:[#allocation164_spill] sm:$0xff] %v14075_v46  ;;  %v5582_v18 = vmul.f32 1.442695, %v5542_v63  ;;  %v5544_v13 = vmin.f32 %v14075_v46, 20.0  ;;  %v5541_v48 = vmin.f32 %v14064_v21, 20.0  ;;  %v14084_v33 = vmul.f32 100.0, %v14067_v24  ;;  %v5419_v35 = vpop.f32.mrf.mxu1 }
 0x4d4   : > { %v14087_v50 = vmul.f32 100.0, %v14070_v45  ;;  %v14090_v10 = vmul.f32 100.0, %v14078_v44  ;;  %v14093_v42 = vadd.f32 %v14001_v31, %v5414_v15  ;;  %v5343_v28 = vadd.f32 %v5342_v25, %v13957_v22 }
 0x4d5   : > { %10054 = vpow2.f32 %v5582_v18  ;;  %v5586_v38 = vmul.f32 1.442695, %v5544_v13  ;;  %v5543_v23 = vmin.f32 %v14084_v33, 20.0  ;;  %v5347_v18 = vadd.f32 %v5346_v41, %v13961_v47  ;;  %v5421_v13 = vpop.f32.mrf.mxu1 }
 0x4d6   : > { %18779 = vst [vmem:[#allocation105_spill] sm:$0xff] %v14087_v50  ;;  %18780 = vst [vmem:[#allocation166_spill] sm:$0xff] %v14090_v10  ;;  %10056 = vpow2.f32 %v5572_v20  ;;  %v5546_v54 = vmin.f32 %v14090_v10, 20.0  ;;  %v14097_v4 = vmul.f32 100.0, %v14093_v42  ;;  %v5545_v63 = vmin.f32 %v14087_v50, 20.0 }
 0x4d7   : > { %10058 = vpow2.f32 %v5586_v38  ;;  %v5580_v15 = vmul.f32 1.442695, %v5541_v48  ;;  %v5350_v38 = vpop.f32.mrf.mxu0  ;;  %v5416_v60 = vadd.f32 %v5415_v34, %v13959_v52  ;;  %v5420_v56 = vadd.f32 %v5419_v35, %v13963_v58  ;;  %v5423_v22 = vpop.f32.mrf.mxu1 }
 0x4d8   : > { %18781 = vst [vmem:[#allocation43_spill] sm:$0xff] %v14097_v4  ;;  %10060 = vpow2.f32 %v5576_v26  ;;  %v14102_v5 = vpop.eup %10046  ;;  %v5590_v39 = vmul.f32 1.442695, %v5546_v54  ;;  %v5548_v20 = vmin.f32 %v14097_v4, 20.0  ;;  %v14108_v26 = vadd.f32 %v13981_v11, %v5347_v18 }
 0x4d9   : > { %10062 = vpow2.f32 %v5578_v55  ;;  %v5349_v41 = vadd.f32 %v5348_v17, %v13965_v36  ;;  %v5422_v55 = vadd.f32 %v5421_v13, %v13967_v62  ;;  %v5584_v48 = vmul.f32 1.442695, %v5543_v23  ;;  %v5352_v36 = vpop.f32.mrf.mxu0  ;;  %v5425_v13 = vpop.f32.mrf.mxu1 }
 0x4da   : > { %10064 = vpow2.f32 %v5590_v39  ;;  %v5594_v47 = vmul.f32 1.442695, %v5548_v20  ;;  %v5588_v54 = vmul.f32 1.442695, %v5545_v63  ;;  %v14114_v45 = vmul.f32 100.0, %v14108_v26 }
 0x4db   : > { %v14117_v25 = vadd.f32 %v13981_v11, %v5420_v56  ;;  %v14120_v52 = vadd.f32 %v13981_v11, %v5349_v41  ;;  %v14123_v39 = vadd.f32 %v13981_v11, %v5422_v55  ;;  %v5351_v58 = vadd.f32 %v5350_v38, %v13969_v53  ;;  %v5356_v55 = vpop.f32.mrf.mxu0 }
 0x4dc   : > { %18782 = vst [vmem:[#allocation163_spill] sm:$0xff] %v14114_v45  ;;  %10066 = vpow2.f32 %v5594_v47  ;;  %v14129_v34 = vadd.f32 %v14001_v31, %v5343_v28  ;;  %v14132_v56 = vadd.f32 %v14001_v31, %v5416_v60  ;;  %v5550_v35 = vmin.f32 %v14114_v45, 20.0 }
 0x4dd   : > { %18783 = vst [vmem:[#allocation48_spill] sm:$0xff] %v14123_v39  ;;  %v14126_v62 = vpop.eup %10048  ;;  %10068 = vpow2.f32 %v5580_v15  ;;  %v14138_v23 = vmul.f32 100.0, %v14117_v25  ;;  %v14141_v11 = vmul.f32 100.0, %v14120_v52  ;;  %v14144_v53 = vmul.f32 100.0, %v14123_v39 }
 0x4de   : > { %18784 = vst [vmem:[#allocation169_spill] sm:$0xff] %v14129_v34  ;;  %18785 = vst [vmem:[#allocation47_spill] sm:$0xff] %v14132_v56  ;;  %v14135_v17 = vpop.eup %10050  ;;  %v14147_v63 = vadd.f32 %v13991_v37, %v5351_v58  ;;  %10070 = vpow2.f32 %v5584_v48  ;;  %v5598_v60 = vmul.f32 1.442695, %v5550_v35  ;;  %v5424_v31 = vadd.f32 %v5423_v22, %v13971_v2 }
 0x4df   : > { %18786 = vst [vmem:[#allocation170_spill] sm:$0xff] %v14138_v23  ;;  %18787 = vst [vmem:[#allocation130_spill] sm:$0xff] %v14141_v11  ;;  %v14149_v28 = vpop.eup %10052  ;;  %v5353_v18 = vadd.f32 %v5352_v36, %v13975_v8  ;;  %10072 = vpow2.f32 %v5588_v54  ;;  %v5552_v15 = vmin.f32 %v14138_v23, 20.0  ;;  %v5551_v20 = vmin.f32 %v14141_v11, 20.0 }
 0x4e0   : > { %18788 = vst [vmem:[#allocation172_spill] sm:$0xff] %v14144_v53  ;;  %18789 = vst [vmem:[#allocation28_spill] sm:$0xff] %v14149_v28  ;;  %v14158_v47 = vmul.f32 100.0, %v14129_v34  ;;  %10074 = vpow2.f32 %v5598_v60  ;;  %v5553_v41 = vmin.f32 %v14144_v53, 20.0  ;;  %v14167_v8 = vmul.f32 100.0, %v14132_v56 }
 0x4e1   : > { %v5602_v54 = vmul.f32 1.442695, %v5552_v15  ;;  %v14170_v22 = vmul.f32 100.0, %v14147_v63  ;;  %v5600_v36 = vmul.f32 1.442695, %v5551_v20  ;;  %v14175_v35 = vadd.f32 %v13991_v37, %v5424_v31 }
 0x4e2   : > { %v14155_v38 = vpop.eup %10054  ;;  %18793 = vst [vmem:[#allocation181_spill] sm:$0xff] %v14167_v8  ;;  %v14178_v60 = vadd.f32 %v13991_v37, %v5353_v18  ;;  %v5426_v19 = vadd.f32 %v5425_v13, %v13977_v1  ;;  %v5604_v56 = vmul.f32 1.442695, %v5553_v41  ;;  %v5358_v13 = vpop.f32.mrf.mxu0  ;;  %v5357_v41 = vadd.f32 %v5356_v55, %v13979_v49 }
 0x4e3   : > { %18790 = vst [vmem:[#allocation143_spill] sm:$0xff] %v14155_v38  ;;  %v14161_v48 = vpop.eup %10056  ;;  %v14164_v2 = vadd.f32 1.0, %v14155_v38  ;;  %18794 = vst [vmem:[#allocation88_spill] sm:$0xff] %v14170_v22  ;;  %v5429_v38 = vpop.f32.mrf.mxu1  ;;  %v5554_v12 = vmin.f32 %v14170_v22, 20.0  ;;  %v14191_v31 = vmul.f32 100.0, %v14175_v35  ;;  %vm17984_vm12 = vcmp.gt.f32.partialorder %v14058_v57, 20.0 }
 0x4e4   : > { %18791 = vst [vmem:[#allocation179_spill] sm:$0xff] %v14161_v48  ;;  %v14172_v58 = vpop.eup %10058  ;;  %v14194_v18 = vmul.f32 100.0, %v14178_v60  ;;  %v14197_v1 = vadd.f32 %v13991_v37, %v5426_v19  ;;  %v14214_v49 = vadd.f32 %v13973_v29, %v5357_v41  ;;  %vm17983_vm9 = vcmp.gt.f32.partialorder %v14075_v46, 20.0 }
 0x4e5   : > { %18792 = vst [vmem:[#allocation150_spill] sm:$0xff] %v14164_v2  ;;  %18795 = vst [vmem:[#allocation64_spill] sm:$0xff] %v14172_v58  ;;  %v14181_v0 = vpop.eup %10060  ;;  %10076 = vlog2.f32 %v14164_v2  ;;  %v14185_v15 = vadd.f32 1.0, %v14172_v58  ;;  %v5606_v58 = vmul.f32 1.442695, %v5554_v12  ;;  %v5430_v2 = vadd.f32 %v5429_v38, %v13985_v14  ;;  %v5431_v14 = vpop.f32.mrf.mxu1 }
 0x4e6   : > { %v14188_v20 = vpop.eup %10062  ;;  %10078 = vpow2.f32 %v5602_v54  ;;  %18798 = vst [vmem:[#allocation184_spill] sm:$0xff] %v14191_v31  ;;  %v5547_v54 = vmin.f32 %v14158_v47, 20.0  ;;  %v5556_v30 = vmin.f32 %v14191_v31, 20.0  ;;  %v5555_v40 = vmin.f32 %v14194_v18, 20.0 }
 0x4e7   : > { %18796 = vst [vmem:[#allocation182_spill] sm:$0xff] %v14185_v15  ;;  %18797 = vst [vmem:[#allocation140_spill] sm:$0xff] %v14188_v20  ;;  %10080 = vlog2.f32 %v14185_v15  ;;  %v14202_v27 = vpop.eup %10064  ;;  %v14211_v19 = vmul.f32 100.0, %v14197_v1  ;;  %v5360_v15 = vpop.f32.mrf.mxu0  ;;  %vm5642_vm0 = vcmp.gt.f32.partialorder %v14090_v10, 20.0  ;;  %vm5644_vm1 = vcmp.gt.f32.partialorder %v14097_v4, 20.0 }
 0x4e8   : > { %18799 = vst [vmem:[#allocation121_spill] sm:$0xff] %v14202_v27  ;;  %10082 = vpow2.f32 %v5600_v36  ;;  %v14208_v37 = vadd.f32 1.0, %v14202_v27  ;;  %v5610_v38 = vmul.f32 1.442695, %v5556_v30  ;;  %v5608_v55 = vmul.f32 1.442695, %v5555_v40  ;;  %v5433_v24 = vpop.f32.mrf.mxu1 }
 0x4e9   : > { %10084 = vpow2.f32 %v5604_v56  ;;  %v14216_v12 = vpop.eup %10066  ;;  %v14219_v36 = vadd.f32 %v13973_v29, %v5430_v2  ;;  %v5557_v41 = vmin.f32 %v14211_v19, 20.0  ;;  %v14229_v27 = vmul.f32 100.0, %v14214_v49 }
 0x4ea   : > { %18800 = vst [vmem:[#allocation156_spill] sm:$0xff] %v14208_v37  ;;  %18801 = vst [vmem:[#allocation23_spill] sm:$0xff] %v14216_v12  ;;  %10086 = vpow2.f32 %v5606_v58  ;;  %v14221_v21 = vpop.eup %10068  ;;  %v14225_v56 = vadd.f32 1.0, %v14216_v12  ;;  %v5359_v40 = vadd.f32 %v5358_v13, %v13987_v16  ;;  %v5432_v2 = vadd.f32 %v5431_v14, %v13989_v9  ;;  %v5362_v9 = vpop.f32.mrf.mxu0 }
 0x4eb   : > { %18802 = vst [vmem:[#allocation157_spill] sm:$0xff] %v14219_v36  ;;  %10088 = vlog2.f32 %v14208_v37  ;;  %18804 = vst [vmem:[#allocation144_spill] sm:$0xff] %v14229_v27  ;;  %v14232_v30 = vmul.f32 100.0, %v14219_v36  ;;  %v14236_v58 = vpop.eup %10070  ;;  %v5549_v12 = vmin.f32 %v14167_v8, 20.0  ;;  %v5612_v37 = vmul.f32 1.442695, %v5557_v41 }
 0x4ec   : > { %18803 = vst [vmem:[#allocation142_spill] sm:$0xff] %v14225_v56  ;;  %10090 = vpow2.f32 %v5610_v38  ;;  %18806 = vst [vmem:[#allocation119_spill] sm:$0xff] %v14236_v58  ;;  %v5558_v34 = vmin.f32 %v14229_v27, 20.0  ;;  %v14241_v50 = vpop.eup %10072  ;;  %v5592_v38 = vmul.f32 1.442695, %v5547_v54  ;;  %v14245_v16 = vadd.f32 %v13973_v29, %v5359_v40 }
 0x4ed   : > { %18805 = vst [vmem:[#allocation41_spill] sm:$0xff] %v14232_v30  ;;  %10092 = vlog2.f32 %v14225_v56  ;;  %18807 = vst [vmem:[#allocation89_spill] sm:$0xff] %v14241_v50  ;;  %v5560_v61 = vmin.f32 %v14232_v30, 20.0  ;;  %v14247_v13 = vpop.eup %10074  ;;  %v14250_v56 = vadd.f32 %v13973_v29, %v5432_v2  ;;  %v5361_v41 = vadd.f32 %v5360_v15, %v13993_v51 }
 0x4ee   : > { %10094 = vpow2.f32 %v5608_v55  ;;  %18808 = vst [vmem:[#allocation158_spill] sm:$0xff] %v14245_v16  ;;  %18809 = vst [vmem:[#allocation127_spill] sm:$0xff] %v14247_v13  ;;  %v5614_v14 = vmul.f32 1.442695, %v5558_v34  ;;  %v14254_v39 = vadd.f32 1.0, %v14247_v13  ;;  %v14257_v55 = vmul.f32 100.0, %v14245_v16 }
 0x4ef   : > { %10096 = vpow2.f32 %v5612_v37  ;;  %18810 = vst [vmem:[#allocation162_spill] sm:$0xff] %v14250_v56  ;;  %v5618_v54 = vmul.f32 1.442695, %v5560_v61  ;;  %v5434_v40 = vadd.f32 %v5433_v24, %v13997_v59  ;;  %v14261_v36 = vmul.f32 100.0, %v14250_v56 }
 0x4f0   : > { %18811 = vst [vmem:[#allocation146_spill] sm:$0xff] %v14254_v39  ;;  %18812 = vst [vmem:[#allocation160_spill] sm:$0xff] %v14257_v55  ;;  %10098 = vpow2.f32 %v5614_v14  ;;  %v14264_v34 = vadd.f32 %v13983_v7, %v5361_v41  ;;  %v5363_v29 = vadd.f32 %v5362_v9, %v13999_v3  ;;  %v5559_v51 = vmin.f32 %v14257_v55, 20.0 }
 0x4f1   : > { %18813 = vst [vmem:[#allocation148_spill] sm:$0xff] %v14261_v36  ;;  %10100 = vlog2.f32 %v14254_v39  ;;  %v14270_v61 = vadd.f32 %v13983_v7, %v5434_v40  ;;  %v5561_v59 = vmin.f32 %v14261_v36, 20.0  ;;  %v5596_v40 = vmul.f32 1.442695, %v5549_v12 }
 0x4f2   : > { %18814 = vst [vmem:[#allocation167_spill] sm:$0xff] %v14264_v34  ;;  %v10077_v37 = vpop.eup %10076  ;;  %10102 = vpow2.f32 %v5618_v54  ;;  %v5616_v14 = vmul.f32 1.442695, %v5559_v51  ;;  %v14279_v3 = vmul.f32 100.0, %v14264_v34  ;;  %v14287_v54 = vadd.f32 %v13983_v7, %v5363_v29  ;;  %v5435_v34 = vpop.f32.mrf.mxu1 }
 0x4f3   : > { %18815 = vst [vmem:[#allocation123_spill] sm:$0xff] %v14270_v61  ;;  %v14272_v15 = vpop.eup %10078  ;;  %v14282_v9 = vmul.f32 100.0, %v14270_v61  ;;  %10104 = vpow2.f32 %v5592_v38  ;;  %v5620_v13 = vmul.f32 1.442695, %v5561_v59  ;;  %v5436_v16 = vadd.f32 %v5435_v34, %v14003_v32 }
 0x4f4   : > { %18816 = vst [vmem:[#allocation168_spill] sm:$0xff] %v14272_v15  ;;  %v10081_v24 = vpop.eup %10080  ;;  %v14276_v2 = vadd.f32 1.0, %v14272_v15  ;;  %18820 = vst [vmem:[#allocation176_spill] sm:$0xff] %v14287_v54  ;;  %v5562_v51 = vmin.f32 %v14279_v3, 20.0  ;;  %vm5646_vm3 = vcmp.gt.f32.partialorder %v14114_v45, 20.0  ;;  %vm5648_vm10 = vcmp.gt.f32.partialorder %v14138_v23, 20.0 }
 0x4f5   : > { %18818 = vst [vmem:[#allocation171_spill] sm:$0xff] %v14282_v9  ;;  %v14284_v41 = vpop.eup %10082  ;;  %v5564_v15 = vmin.f32 %v14282_v9, 20.0  ;;  %v14319_v32 = vadd.f32 %v13983_v7, %v5436_v16  ;;  %vm17990_vm4 = vcmp.gt.f32.partialorder %v14170_v22, 20.0  ;;  %vm17985_vm8 = vcmp.gt.f32.partialorder %v14191_v31, 20.0 }
 0x4f6   : > { %18817 = vst [vmem:[#allocation101_spill] sm:$0xff] %v14276_v2  ;;  %18819 = vst [vmem:[#allocation139_spill] sm:$0xff] %v14284_v41  ;;  %v14289_v39 = vpop.eup %10084  ;;  %10106 = vlog2.f32 %v14276_v2  ;;  %v5622_v12 = vmul.f32 1.442695, %v5562_v51  ;;  %v14302_v2 = vmul.f32 100.0, %v14287_v54  ;;  %vm5651_vm6 = vcmp.gt.f32.partialorder %v14194_v18, 20.0 }
 0x4f7   : > { %18821 = vst [vmem:[#allocation114_spill] sm:$0xff] %v14289_v39  ;;  %v14294_v56 = vpop.eup %10086  ;;  %10108 = vpow2.f32 %v5616_v14  ;;  %v5626_v59 = vmul.f32 1.442695, %v5564_v15  ;;  %v5711_v51 = vmul.f32 0.6931472, %v10077_v37  ;;  %18827 = vst [vmem:[#allocation185_spill] sm:$0xff] %v14319_v32 }
 0x4f8   : > { %18822 = vst [vmem:[#allocation178_spill] sm:$0xff] %v14294_v56  ;;  %v10089_v61 = vpop.eup %10088  ;;  %v14297_v38 = vadd.f32 1.0, %v14294_v56  ;;  %10110 = vpow2.f32 %v5620_v13  ;;  %v14310_v56 = vadd.f32 1.0, %v14284_v41  ;;  %v5715_v41 = vmul.f32 0.6931472, %v10081_v24 }
 0x4f9   : > { %v14299_v29 = vpop.eup %10090  ;;  %10112 = vpow2.f32 %v5596_v40  ;;  %v5563_v40 = vmin.f32 %v14302_v2, 20.0  ;;  %v14325_v54 = vmul.f32 100.0, %v14319_v32  ;;  %v5719_v8 = vmul.f32 0.6931472, %v10089_v61 }
 0x4fa   : > { %18823 = vst [vmem:[#allocation152_spill] sm:$0xff] %v14297_v38  ;;  %18824 = vst [vmem:[#allocation180_spill] sm:$0xff] %v14299_v29  ;;  %v10093_v9 = vpop.eup %10092  ;;  %10114 = vlog2.f32 %v14297_v38  ;;  %v14307_v14 = vadd.f32 1.0, %v14299_v29  ;;  %v5766_v16 = vmul.f32 0.01, %v5711_v51  ;;  %v14340_v61 = vadd.f32 1.0, %v14289_v39 }
 0x4fb   : > { %18826 = vst [vmem:[#allocation154_spill] sm:$0xff] %v14310_v56  ;;  %v14312_v13 = vpop.eup %10094  ;;  %10116 = vpow2.f32 %v5622_v12  ;;  %v5624_v29 = vmul.f32 1.442695, %v5563_v40  ;;  %v5723_v37 = vmul.f32 0.6931472, %v10093_v9  ;;  %v10577_v4 = vmov 3  }
 0x4fc   : > { %18825 = vst [vmem:[#allocation183_spill] sm:$0xff] %v14307_v14  ;;  %v14315_v15 = vpop.eup %10096  ;;  %10118 = vlog2.f32 %v14307_v14  ;;  %v5683_v34 = vadd.f32 1.0, %v14312_v13  ;;  %18832 = vst [vmem:[#allocation190_spill] sm:$0xff] %v14340_v61  ;;  %v5770_v32 = vmul.f32 0.01, %v5719_v8  ;;  %9570 = vset.pattern.permute.xlu1 %v10577_v4  ;;  %9569 = vset.pattern.permute.xlu0 %v10577_v4  ;;  %v14442_v4 = vld [vmem:[%s17527_s2 + $0x30] sm:$0xff] }
 0x4fd   : > { %10120 = vpow2.f32 %v5626_v59  ;;  %v14322_v38 = vpop.eup %10098  ;;  %v5565_v59 = vmin.f32 %v14325_v54, 20.0  ;;  %v5685_v51 = vadd.f32 1.0, %v14315_v15  ;;  %5967 = vperm.xlu0 %9569, %v14442_v4   ;;  %vm17991_vm2 = vcmp.gt.f32.partialorder %v14141_v11, 20.0 }
 0x4fe   : > { %18828 = vst [vmem:[#allocation186_spill] sm:$0xff] %v14322_v38  ;;  %10122 = vlog2.f32 %v14310_v56  ;;  %v10101_v12 = vpop.eup %10100  ;;  %v14329_v14 = vadd.f32 1.0, %v14322_v38  ;;  %v5768_v56 = vmul.f32 0.01, %v5715_v41  ;;  %v14381_v57 = vsel %vm5642_vm0, %v14078_v44, %v5770_v32 }
 0x4ff   : > { %10124 = vpow2.f32 %v5624_v29  ;;  %v14331_v7 = vpop.eup %10102  ;;  %v5727_v24 = vmul.f32 0.6931472, %v10101_v12  ;;  %v5628_v29 = vmul.f32 1.442695, %v5565_v59  ;;  %v5772_v12 = vmul.f32 0.01, %v5723_v37 }
 0x500   : > { %18829 = vst [vmem:[#allocation187_spill] sm:$0xff] %v14329_v14  ;;  %18830 = vst [vmem:[#allocation188_spill] sm:$0xff] %v14331_v7  ;;  %10126 = vlog2.f32 %v5683_v34  ;;  %v14337_v40 = vadd.f32 1.0, %v14331_v7  ;;  %v14342_v9 = vpop.eup %10104  ;;  %vm17986_vm13 = vcmp.gt.f32.partialorder %v14229_v27, 20.0  ;;  %vm5653_vm14 = vcmp.gt.f32.partialorder %v14211_v19, 20.0  ;;  %v18853_v19 = vld [vmem:[#allocation48_spill] sm:$0xff] }
 0x501   : > { %10128 = vlog2.f32 %v14329_v14  ;;  %v5774_v8 = vmul.f32 0.01, %v5727_v24  ;;  %v14376_v24 = vsel %vm17983_vm9, %v14061_v43, %v5768_v56  ;;  %v5675_v43 = vadd.f32 1.0, %v14342_v9 }
 0x502   : > { %18831 = vst [vmem:[#allocation189_spill] sm:$0xff] %v14337_v40  ;;  %10130 = vrcp.f32 %v5683_v34  ;;  %v14357_v34 = vsel %vm17984_vm12, %v14049_v6, %v5766_v16  ;;  %v14371_v6 = vadd.f32 1.0, %v14236_v58  ;;  %18837 = vst [vmem:[#allocation195_spill] sm:$0xff] %v14376_v24  ;;  %v14395_v56 = vadd.f32 1.0, %v14241_v50 }
 0x503   : > { %v10107_v38 = vpop.eup %10106  ;;  %10132 = vlog2.f32 %v14337_v40  ;;  %vm17992_vm7 = vcmp.gt.f32.partialorder %v14232_v30, 20.0  ;;  %vm5649_vm5 = vcmp.gt.f32.partialorder %v14144_v53, 20.0  ;;  %vm18003_vm11 = vcmp.gt.f32.partialorder %v14257_v55, 20.0 }
 0x504   : > { %v14347_v14 = vpop.eup %10108  ;;  %10134 = vpow2.f32 %v5628_v29  ;;  %v5731_v59 = vmul.f32 0.6931472, %v10107_v38  ;;  %v14386_v38 = vsel %vm5644_vm1, %v14093_v42, %v5772_v12  ;;  %v14400_v42 = vsel %vm5646_vm3, %v14108_v26, %v5774_v8 }
 0x505   : > { %18833 = vst [vmem:[#allocation191_spill] sm:$0xff] %v14347_v14  ;;  %v14352_v7 = vpop.eup %10110  ;;  %v14361_v41 = vadd.f32 1.0, %v14347_v14  ;;  %10136 = vlog2.f32 %v14340_v61  ;;  %18838 = vst [vmem:[#allocation196_spill] sm:$0xff] %v14386_v38  ;;  %vm18001_vm15 = vcmp.gt.f32.partialorder %v14261_v36, 20.0  ;;  %vm18000_vm9 = vcmp.gt.f32.partialorder %v14279_v3, 20.0  ;;  %v18861_v61 = vld [vmem:[#allocation176_spill] sm:$0xff] }
 0x506   : > { %18834 = vst [vmem:[#allocation192_spill] sm:$0xff] %v14352_v7  ;;  %v14364_v37 = vpop.eup %10112  ;;  %v14368_v29 = vadd.f32 1.0, %v14352_v7  ;;  %10138 = vlog2.f32 %v5685_v51  ;;  %v5776_v46 = vmul.f32 0.01, %v5731_v59  ;;  %v14436_v59 = vld [vmem:[%s17527_s2 + $0x38] sm:$0xff]  ;;  %vm5643_vm12 = vcmp.gt.f32.partialorder %v14158_v47, 20.0 }
 0x507   : > { %18835 = vst [vmem:[#allocation193_spill] sm:$0xff] %v14361_v41  ;;  %v10115_v16 = vpop.eup %10114  ;;  %10140 = vlog2.f32 %v14361_v41  ;;  %v5677_v12 = vadd.f32 1.0, %v14364_v37  ;;  %18845 = vst [vmem:[#allocation203_spill] sm:$0xff] %v14436_v59  ;;  %5971 = vperm.xlu1 %9570, %v14436_v59  }
 0x508   : > { %18836 = vst [vmem:[#allocation194_spill] sm:$0xff] %v14368_v29  ;;  %v14390_v7 = vpop.eup %10116  ;;  %v5735_v14 = vmul.f32 0.6931472, %v10115_v16  ;;  %10142 = vlog2.f32 %v14368_v29  ;;  %v14448_v45 = vsel %vm5648_vm10, %v14117_v25, %v5776_v46 }
 0x509   : > { %18839 = vst [vmem:[#allocation197_spill] sm:$0xff] %v14390_v7  ;;  %v10119_v44 = vpop.eup %10118  ;;  %v14403_v32 = vadd.f32 1.0, %v14390_v7  ;;  %10144 = vrcp.f32 %v5685_v51  ;;  %v14428_v7 = vadd.f32 1.0, %v14181_v0 }
 0x50a   : > { %v14406_v16 = vpop.eup %10120  ;;  %v5739_v39 = vmul.f32 0.6931472, %v10119_v44  ;;  %10146 = vlog2.f32 %v14371_v6  ;;  %v5778_v50 = vmul.f32 0.01, %v5735_v14  ;;  %v14421_v44 = vadd.f32 1.0, %v14126_v62 }
 0x50b   : > { %18840 = vst [vmem:[#allocation198_spill] sm:$0xff] %v14403_v32  ;;  %18841 = vst [vmem:[#allocation199_spill] sm:$0xff] %v14406_v16  ;;  %v10123_v10 = vpop.eup %10122  ;;  %10148 = vlog2.f32 %v14403_v32  ;;  %v14413_v26 = vadd.f32 1.0, %v14406_v16  ;;  %v14453_v32 = vadd.f32 1.0, %v14221_v21 }
 0x50c   : > { %v14416_v51 = vpop.eup %10124  ;;  %v5780_v8 = vmul.f32 0.01, %v5739_v39  ;;  %10150 = vlog2.f32 %v5675_v43  ;;  %v14431_v39 = vadd.f32 1.0, %v14161_v48  ;;  %v14458_v29 = vsel %vm17990_vm4, %v14147_v63, %v5778_v50 }
 0x50d   : > { %18842 = vst [vmem:[#allocation200_spill] sm:$0xff] %v14413_v26  ;;  %18843 = vst [vmem:[#allocation201_spill] sm:$0xff] %v14416_v51  ;;  %v10127_v14 = vpop.eup %10126  ;;  %10152 = vlog2.f32 %v14413_v26  ;;  %v14425_v16 = vadd.f32 1.0, %v14416_v51  ;;  %v5729_v46 = vmul.f32 0.6931472, %v10123_v10  ;;  %v14477_v10 = vadd.f32 1.0, %v14135_v17 }
 0x50e   : > { %v10129_v51 = vpop.eup %10128  ;;  %v5737_v26 = vmul.f32 0.6931472, %v10127_v14  ;;  %10154 = vrcp.f32 %v5675_v43  ;;  %v14464_v23 = vsel %vm17985_vm8, %v14175_v35, %v5780_v8  ;;  %v14468_v43 = vadd.f32 1.0, %v14102_v5 }
 0x50f   : > { %18844 = vst [vmem:[#allocation202_spill] sm:$0xff] %v14425_v16  ;;  %v10131_v58 = vpop.eup %10130  ;;  %v5743_v41 = vmul.f32 0.6931472, %v10129_v51  ;;  %10156 = vlog2.f32 %v14425_v16  ;;  %v14471_v14 = vadd.f32 1.0, %v14149_v28  ;;  %v14480_v35 = vadd.f32 1.0, %v14188_v20  ;;  %v14485_v51 = vld [vmem:[%s17527_s2 + $0x20] sm:$0xff] }
 0x510   : > { %v10133_v25 = vpop.eup %10132  ;;  %10158 = vlog2.f32 %v14395_v56  ;;  %v5779_v63 = vmul.f32 0.01, %v5737_v26  ;;  %5959 = vperm.xlu1 %9570, %v14485_v51   ;;  %v14491_v26 = vld [vmem:[%s17527_s2 + $0x28] sm:$0xff]  ;;  %v5865_v16 = vmul.f32 %v10131_v58, %v14312_v13  ;;  %v5775_v28 = vmul.f32 0.01, %v5729_v46 }
 0x511   : > { %v14473_v50 = vpop.eup %10134  ;;  %10160 = vlog2.f32 %v5677_v12  ;;  %5963 = vperm.xlu0 %9569, %v14491_v26   ;;  %v5782_v20 = vmul.f32 0.01, %v5743_v41  ;;  %v5747_v48 = vmul.f32 0.6931472, %v10133_v25  ;;  %vm18002_vm8 = vcmp.gt.f32.partialorder %v14302_v2, 20.0 }
 0x512   : > { %18846 = vst [vmem:[#allocation204_spill] sm:$0xff] %v14473_v50  ;;  %v10137_v8 = vpop.eup %10136  ;;  %v14495_v31 = vadd.f32 1.0, %v14473_v50  ;;  %10162 = vrcp.f32 %v5677_v12  ;;  %v14507_v12 = vsel %vm5651_vm6, 1.0, %v5865_v16  ;;  %v14514_v41 = vsel %vm5651_vm6, %v14178_v60, %v5779_v63  ;;  %v14526_v16 = vld [vmem:[%s17527_s2 + $0x18] sm:$0xff] }
 0x513   : > { %v10139_v40 = vpop.eup %10138  ;;  %18848 = vst [vmem:[#allocation206_spill] sm:$0xff] %v14507_v12  ;;  %v5733_v46 = vmul.f32 0.6931472, %v10137_v8  ;;  %vm5639_vm6 = vcmp.gt.f32.partialorder %v14084_v33, 20.0  ;;  %v14535_v63 = vsel %vm17986_vm13, %v14214_v49, %v5782_v20  ;;  %v14540_v8 = vsel %vm17991_vm2, %v14120_v52, %v5775_v28 }
 0x514   : > { %18847 = vst [vmem:[#allocation205_spill] sm:$0xff] %v14495_v31  ;;  %v10141_v38 = vpop.eup %10140  ;;  %10164 = vlog2.f32 %v14495_v31  ;;  %v5741_v50 = vmul.f32 0.6931472, %v10139_v40  ;;  %v14520_v40 = vld [vmem:[%s17527_s2 + $0x10] sm:$0xff]  ;;  %v5784_v24 = vmul.f32 0.01, %v5747_v48 }
 0x515   : > { %v10143_v58 = vpop.eup %10142  ;;  %v5745_v13 = vmul.f32 0.6931472, %v10141_v38  ;;  %10166 = vlog2.f32 %v14421_v44  ;;  %5951 = vperm.xlu1 %9570, %v14520_v40   ;;  %5955 = vperm.xlu0 %9569, %v14526_v16   ;;  %v5777_v28 = vmul.f32 0.01, %v5733_v46  ;;  %v14559_v48 = vld [vmem:[%s17527_s2 + $0x8] sm:$0xff]  ;;  %v18851_v31 = vld [vmem:[#allocation157_spill] sm:$0xff] }
 0x516   : > { %v10145_v18 = vpop.eup %10144  ;;  %v5749_v60 = vmul.f32 0.6931472, %v10143_v58  ;;  %v5781_v38 = vmul.f32 0.01, %v5741_v50  ;;  %10168 = vlog2.f32 %v14428_v7  ;;  %vm18004_vm2 = vcmp.gt.f32.partialorder %v14325_v54, 20.0 }
 0x517   : > { %v10147_v25 = vpop.eup %10146  ;;  %10170 = vrcp.f32 %v14428_v7  ;;  %v5869_v58 = vmul.f32 %v10145_v18, %v14315_v15  ;;  %v5783_v52 = vmul.f32 0.01, %v5745_v13  ;;  %v14553_v15 = vld [vmem:[%s17527_s2] sm:$0xff] }
 0x518   : > { %v10149_v50 = vpop.eup %10148  ;;  %v5713_v20 = vmul.f32 0.6931472, %v10147_v25  ;;  %10172 = vlog2.f32 %v14431_v39  ;;  %v5785_v18 = vmul.f32 0.01, %v5749_v60  ;;  %v14565_v13 = vsel %vm5653_vm14, %v14197_v1, %v5781_v38  ;;  %v18849_v25 = vld [vmem:[#allocation181_spill] sm:$0xff]  ;;  %v18852_v38 = vld [vmem:[#allocation171_spill] sm:$0xff] }
 0x519   : > { %v10151_v49 = vpop.eup %10150  ;;  %v5751_v12 = vmul.f32 0.6931472, %v10149_v50  ;;  %10174 = vlog2.f32 %v14453_v32  ;;  %5943 = vperm.xlu1 %9570, %v14553_v15   ;;  %5947 = vperm.xlu0 %9569, %v14559_v48   ;;  %vm5645_vm13 = vcmp.gt.f32.partialorder %v18849_v25, 20.0  ;;  %v14572_v11 = vsel %vm5653_vm14, 1.0, %v5869_v58  ;;  %v18875_v25 = vld [vmem:[#allocation124_spill] sm:$0xff] }
 0x51a   : > { %v10153_v7 = vpop.eup %10152  ;;  %v5721_v46 = vmul.f32 0.6931472, %v10151_v49  ;;  %10176 = vrcp.f32 %v14453_v32  ;;  %v5767_v27 = vmul.f32 0.01, %v5713_v20  ;;  %18850 = vst [vmem:[#allocation181_spill] sm:$0xff] %v14572_v11  ;;  %v14577_v1 = vsel %vm17992_vm7, %v18851_v31, %v5784_v24 }
 0x51b   : > { %v10155_v50 = vpop.eup %10154  ;;  %v5786_v22 = vmul.f32 0.01, %v5751_v12  ;;  %10178 = vlog2.f32 %v14468_v43  ;;  %vm5660_vm4 = vcmp.gt.f32.partialorder %v18852_v38, 20.0  ;;  %v5755_v49 = vmul.f32 0.6931472, %v10153_v7  ;;  %v18854_v7 = vld [vmem:[#allocation158_spill] sm:$0xff] }
 0x51c   : > { %v10157_v60 = vpop.eup %10156  ;;  %10180 = vlog2.f32 %v14471_v14  ;;  %v5849_v32 = vmul.f32 %v10155_v50, %v14342_v9  ;;  %v14586_v58 = vsel %vm5649_vm5, %v18853_v19, %v5777_v28  ;;  %v5771_v11 = vmul.f32 0.01, %v5721_v46  ;;  %v18855_v50 = vld [vmem:[#allocation162_spill] sm:$0xff]  ;;  %v18856_v19 = vld [vmem:[#allocation165_spill] sm:$0xff] }
 0x51d   : > { %v10159_v12 = vpop.eup %10158  ;;  %v5753_v20 = vmul.f32 0.6931472, %v10157_v60  ;;  %10182 = vlog2.f32 %v14477_v10  ;;  %v10578_v31 = vmov 4   ;;  %v5815_v9 = vsel %vm18003_vm11, %v18854_v7, %v5783_v52  ;;  %v18858_v52 = vld [vmem:[#allocation167_spill] sm:$0xff] }
 0x51e   : > { %9571 = vset.pattern.permute.xlu1 %v10578_v31  ;;  %9572 = vset.pattern.permute.xlu0 %v10578_v31  ;;  %v10161_v24 = vpop.eup %10160  ;;  %v14595_v60 = vsel %vm18001_vm15, %v18855_v50, %v5785_v18  ;;  %vm5635_vm14 = vcmp.gt.f32.partialorder %v18856_v19, 20.0  ;;  %10184 = vlog2.f32 %v14480_v35  ;;  %v18857_v31 = vld [vmem:[#allocation105_spill] sm:$0xff]  ;;  %v5818_v7 = vsel %vm18000_vm9, %v18858_v52, %v5786_v22 }
 0x51f   : > { %6593 = vperm.xlu1 %9571, %v14442_v4   ;;  %6597 = vperm.xlu0 %9572, %v14436_v59   ;;  %v10163_v46 = vpop.eup %10162  ;;  %vm5641_vm7 = vcmp.gt.f32.partialorder %v18857_v31, 20.0  ;;  %v5787_v18 = vmul.f32 0.01, %v5753_v20  ;;  %v18859_v50 = vld [vmem:[#allocation153_spill] sm:$0xff]  ;;  %v5725_v36 = vmul.f32 0.6931472, %v10161_v24  ;;  %10186 = vrcp.f32 %v14468_v43 }
 0x520   : > { %v14610_v28 = vsel %vm5639_vm6, %v18859_v50, %v5767_v27  ;;  %v5788_v55 = vmul.f32 0.01, %v5755_v49  ;;  %v5717_v30 = vmul.f32 0.6931472, %v10159_v12  ;;  %v14615_v53 = vsel %vm5643_vm12, 1.0, %v5849_v32  ;;  %v18862_v20 = vld [vmem:[#allocation169_spill] sm:$0xff] }
 0x521   : > { %18860 = vst [vmem:[#allocation157_spill] sm:$0xff] %v14615_v53  ;;  %v10165_v59 = vpop.eup %10164  ;;  %v5819_v22 = vsel %vm18002_vm8, %v18861_v61, %v5787_v18  ;;  %v5803_v52 = vsel %vm5643_vm12, %v18862_v20, %v5771_v11  ;;  %v18863_v27 = vld [vmem:[#allocation151_spill] sm:$0xff]  ;;  %10188 = vrcp.f32 %v14477_v10  ;;  %v5853_v49 = vmul.f32 %v10163_v46, %v14364_v37 }
 0x522   : > { %vm5637_vm9 = vcmp.gt.f32.partialorder %v18863_v27, 20.0  ;;  %v10167_v43 = vpop.eup %10166  ;;  %v18864_v12 = vld [vmem:[#allocation15_spill] sm:$0xff]  ;;  %v5931_v32 = vpack.c.bf16 %v5819_v22, %v5815_v9  ;;  %v5757_v24 = vmul.f32 0.6931472, %v10165_v59  ;;  %v5773_v50 = vmul.f32 0.01, %v5725_v36 }
 0x523   : > { %vm5631_vm15 = vcmp.gt.f32.partialorder %v18864_v12, 20.0  ;;  %6585 = vperm.xlu1 %9571, %v14485_v51   ;;  %6577 = vperm.xlu0 %9572, %v14520_v40   ;;  %10190 = vrcp.f32 %v14421_v44  ;;  %v10169_v47 = vpop.eup %10168  ;;  %v5930_v11 = vpack.c.bf16 %v5818_v7, %v14535_v63  ;;  %v5697_v61 = vmul.f32 0.6931472, %v10167_v43  ;;  %v18866_v9 = vld [vmem:[#allocation132_spill] sm:$0xff]  ;;  %v18867_v36 = vld [vmem:[#allocation175_spill] sm:$0xff]  ;;  %v18868_v63 = vld [vmem:[#allocation174_spill] sm:$0xff] }
 0x524   : > { %10192 = vrcp.f32 %v14431_v39  ;;  %v14634_v37 = vsel %vm5645_vm13, 1.0, %v5853_v49  ;;  %v10171_v10 = vpop.eup %10170  ;;  %vm5630_vm12 = vcmp.gt.f32.partialorder %v18866_v9, 20.0  ;;  %vm5633_vm8 = vcmp.gt.f32.partialorder %v18867_v36, 20.0  ;;  %6014 = vmatprep.subr.bf16.mxu0 %v5931_v32  ;;  %v18869_v7 = vld [vmem:[#allocation123_spill] sm:$0xff]  ;;  %v18870_v43 = vld [vmem:[#allocation185_spill] sm:$0xff] }
 0x525   : > { %18865 = vst [vmem:[#allocation171_spill] sm:$0xff] %v14634_v37  ;;  %v5789_v59 = vmul.f32 0.01, %v5757_v24  ;;  %v5769_v46 = vmul.f32 0.01, %v5717_v30  ;;  %10194 = vrcp.f32 %v14471_v14  ;;  %v10173_v44 = vpop.eup %10172  ;;  %vm5634_vm11 = vcmp.gt.f32.partialorder %v18868_v63, 20.0  ;;  %6015 = vmatpush1.bf16.msra.mxu0 %v5930_v11 }
 0x526   : > { %v5705_v18 = vmul.f32 0.6931472, %v10169_v47  ;;  %v5820_v39 = vsel %vm5660_vm4, %v18869_v7, %v5788_v55  ;;  %v5923_v22 = vpack.c.bf16 %v5803_v52, %v14610_v28  ;;  %10196 = vrcp.f32 %v14480_v35  ;;  %v10175_v49 = vpop.eup %10174  ;;  %v18872_v32 = vld [vmem:[#allocation47_spill] sm:$0xff] }
 0x527   : > { %v5833_v20 = vmul.f32 %v10171_v10, %v14181_v0  ;;  %v5821_v30 = vsel %vm18004_vm2, %v18870_v43, %v5789_v59  ;;  %v18871_v14 = vpack.c.bf16 %v14514_v41, %v14540_v8  ;;  %v5805_v55 = vsel %vm5645_vm13, %v18872_v32, %v5773_v50  ;;  %6589 = vperm.xlu1 %9571, %v14491_v26   ;;  %v10177_v35 = vpop.eup %10176  ;;  %v18874_v8 = vld [vmem:[#allocation122_spill] sm:$0xff]  ;;  %v18876_v10 = vld [vmem:[#allocation103_spill] sm:$0xff] }
 0x528   : > { %v5763_v24 = vmul.f32 0.01, %v5705_v18  ;;  %v5701_v47 = vmul.f32 0.6931472, %v10173_v44  ;;  %v5933_v0 = vpack.c.bf16 %v5821_v30, %v14595_v60  ;;  %v5759_v28 = vmul.f32 0.01, %v5697_v61  ;;  %6569 = vperm.xlu0 %9572, %v14553_v15   ;;  %v10179_v41 = vpop.eup %10178 }
 0x529   : > { %6016 = vmatprep.subr.bf16.mxu0 %v18871_v14  ;;  %v5709_v52 = vmul.f32 0.6931472, %v10175_v49  ;;  %v14660_v11 = vsel %vm5635_vm14, 1.0, %v5833_v20  ;;  %vm5632_vm2 = vcmp.gt.f32.partialorder %v18874_v8, 20.0  ;;  %vm5636_vm13 = vcmp.gt.f32.partialorder %v18875_v25, 20.0  ;;  %v18877_v60 = vld [vmem:[#allocation115_spill] sm:$0xff]  ;;  %v10181_v44 = vpop.eup %10180 }
 0x52a   : > { %18873 = vst [vmem:[#allocation48_spill] sm:$0xff] %v14660_v11  ;;  %v5932_v50 = vpack.c.bf16 %v5820_v39, %v14577_v1  ;;  %v5801_v59 = vsel %vm5641_vm7, %v18876_v10, %v5769_v46  ;;  %v5795_v61 = vsel %vm5635_vm14, %v18877_v60, %v5763_v24  ;;  %v5837_v18 = vmul.f32 %v10177_v35, %v14221_v21  ;;  %v10183_v1 = vpop.eup %10182  ;;  %v18888_v10 = vld [vmem:[#allocation146_spill] sm:$0xff]  ;;  %v18912_v8 = vld [vmem:[#allocation189_spill] sm:$0xff]  ;;  %v18917_v63 = vld [vmem:[#allocation119_spill] sm:$0xff] }
 0x52b   : > { %6087 = vmatprep.subr.bf16.mxu1 %v5933_v0  ;;  %v18878_v7 = vpack.c.bf16 %v14458_v29, %v14400_v42  ;;  %v5761_v20 = vmul.f32 0.01, %v5701_v47  ;;  %v5765_v49 = vmul.f32 0.01, %v5709_v52  ;;  %v5695_v43 = vmul.f32 0.6931472, %v10179_v41  ;;  %v10185_v21 = vpop.eup %10184  ;;  %6581 = vperm.xlu1 %9571, %v14526_v16  }
 0x52c   : > { %10198 = vrcp.f32 %v14371_v6  ;;  %6088 = vmatpush1.bf16.msra.mxu1 %v5932_v50  ;;  %v5925_v46 = vpack.c.bf16 %v5805_v55, %v5801_v59  ;;  %v5703_v39 = vmul.f32 0.6931472, %v10181_v44  ;;  %v14678_v19 = vsel %vm5637_vm9, 1.0, %v5837_v18  ;;  %v18881_v42 = vld [vmem:[#allocation74_spill] sm:$0xff]  ;;  %v10187_v35 = vpop.eup %10186  ;;  %v18887_v41 = vld [vmem:[#allocation136_spill] sm:$0xff]  ;;  %v18891_v18 = vld [vmem:[#allocation101_spill] sm:$0xff] }
 0x52d   : > { %6017 = vmatpush1.bf16.msra.mxu0 %v18878_v7  ;;  %18879 = vst [vmem:[#allocation158_spill] sm:$0xff] %v14678_v19  ;;  %10200 = vrcp.f32 %v14395_v56  ;;  %v18880_v29 = vpack.c.bf16 %v14565_v13, %v14586_v58  ;;  %v5791_v6 = vsel %vm5631_vm15, %v18881_v42, %v5759_v28  ;;  %v5758_v30 = vmul.f32 0.01, %v5695_v43  ;;  %v18883_v47 = vld [vmem:[#allocation142_spill] sm:$0xff]  ;;  %v18885_v58 = vld [vmem:[#allocation109_spill] sm:$0xff] }
 0x52e   : > { %6018 = vmatprep.subr.bf16.mxu0 %v5923_v22  ;;  %v5699_v14 = vmul.f32 0.6931472, %v10183_v1  ;;  %v18882_v22 = vld [vmem:[#allocation156_spill] sm:$0xff]  ;;  %v5919_v32 = vpack.c.bf16 %v5795_v61, %v5791_v6  ;;  %v5762_v55 = vmul.f32 0.01, %v5703_v39  ;;  %v10579_v56 = vmov 5   ;;  %v10189_v59 = vpop.eup %10188 }
 0x52f   : > { %6089 = vmatprep.subr.bf16.mxu1 %v18880_v29  ;;  %10202 = vrcp.f32 %v18882_v22  ;;  %v5707_v24 = vmul.f32 0.6931472, %v10185_v21  ;;  %9573 = vset.pattern.permute.xlu0 %v10579_v56  ;;  %v18884_v13 = vpack.c.bf16 %v14381_v57, %v14357_v34  ;;  %v5793_v0 = vsel %vm5633_vm8, %v18885_v58, %v5761_v20  ;;  %v18886_v28 = vld [vmem:[#allocation177_spill] sm:$0xff]  ;;  %v18894_v39 = vld [vmem:[#allocation190_spill] sm:$0xff]  ;;  %v18897_v6 = vld [vmem:[#allocation179_spill] sm:$0xff] }
 0x530   : > { %10204 = vrcp.f32 %v18883_v47  ;;  %v5797_v52 = vsel %vm5637_vm9, %v18886_v28, %v5765_v49  ;;  %v5790_v50 = vsel %vm5630_vm12, %v18887_v41, %v5758_v30  ;;  %8521 = vperm.xlu0 %9573, %v14442_v4   ;;  %v18889_v57 = vpack.c.bf16 %v14464_v23, %v14448_v45  ;;  %v18890_v34 = vld [vmem:[#allocation173_spill] sm:$0xff]  ;;  %v10191_v44 = vpop.eup %10190  ;;  %6573 = vperm.xlu1 %9571, %v14559_v48   ;;  %v18892_v45 = vld [vmem:[#allocation154_spill] sm:$0xff]  ;;  %v18900_v22 = vld [vmem:[#allocation195_spill] sm:$0xff] }
 0x531   : > { %6019 = vmatpush1.bf16.msra.mxu0 %v18884_v13  ;;  %10206 = vrcp.f32 %v18888_v10  ;;  %v5794_v60 = vsel %vm5634_vm11, %v18890_v34, %v5762_v55  ;;  %v5764_v27 = vmul.f32 0.01, %v5707_v24  ;;  %v5823_v61 = vmul.f32 %v10187_v35, %v14102_v5  ;;  %v10193_v23 = vpop.eup %10192  ;;  %v9595_v1 = vld [vmem:[%s17526_s1 + $0x80] sm:$0xff]   ;;  %v18903_v24 = vld [vmem:[#allocation28_spill] sm:$0xff]  ;;  %v18904_v35 = vld [vmem:[#allocation183_spill] sm:$0xff] }
 0x532   : > { %6090 = vmatpush1.bf16.msra.mxu1 %v18889_v57  ;;  %6020 = vmatprep.subr.bf16.mxu0 %v5919_v32  ;;  %10208 = vrcp.f32 %v18891_v18  ;;  %v5918_v7 = vpack.c.bf16 %v5794_v60, %v5790_v50  ;;  %v5760_v20 = vmul.f32 0.01, %v5699_v14  ;;  %v5827_v49 = vmul.f32 %v10189_v59, %v14135_v17  ;;  %v10195_v21 = vpop.eup %10194  ;;  %v18895_v29 = vld [vmem:[#allocation161_spill] sm:$0xff]  ;;  %v18898_v14 = vld [vmem:[#allocation152_spill] sm:$0xff]  ;;  %v18905_v13 = vld [vmem:[#allocation102_spill] sm:$0xff] }
 0x533   : > { %6091 = vmatprep.subr.bf16.mxu1 %v5925_v46  ;;  %10210 = vrcp.f32 %v18892_v45  ;;  %v5921_v43 = vpack.c.bf16 %v5797_v52, %v5793_v0  ;;  %v14720_v5 = vsel %vm5630_vm12, 1.0, %v5823_v61  ;;  %v5825_v46 = vmul.f32 %v10191_v44, %v14126_v62  ;;  %v10197_v9 = vpop.eup %10196  ;;  %v18899_v62 = vld [vmem:[#allocation196_spill] sm:$0xff]  ;;  %v18908_v41 = vld [vmem:[#allocation187_spill] sm:$0xff]  ;;  %v18915_v59 = vld [vmem:[#allocation193_spill] sm:$0xff] }
 0x534   : > { %18893 = vst [vmem:[#allocation162_spill] sm:$0xff] %v14720_v5  ;;  %10212 = vrcp.f32 %v18894_v39  ;;  %v5796_v17 = vsel %vm5636_vm13, %v18895_v29, %v5764_v27  ;;  %v14729_v42 = vsel %vm5632_vm2, 1.0, %v5827_v49  ;;  %v5829_v30 = vmul.f32 %v10193_v23, %v18897_v6  ;;  %8517 = vperm.xlu0 %9573, %v14491_v26   ;;  %9574 = vset.pattern.permute.xlu1 %v10579_v56  ;;  %v18907_v28 = vld [vmem:[#allocation140_spill] sm:$0xff]  ;;  %v18910_v50 = vld [vmem:[#allocation203_spill] sm:$0xff]  ;;  %v18916_v34 = vld [vmem:[#allocation194_spill] sm:$0xff] }
 0x535   : > { %6021 = vmatpush1.bf16.msra.mxu0 %v5918_v7  ;;  %18896 = vst [vmem:[#allocation165_spill] sm:$0xff] %v14729_v42  ;;  %10214 = vrcp.f32 %v18898_v14  ;;  %v18901_v32 = vpack.c.bf16 %v18899_v62, %v18900_v22  ;;  %v14739_v55 = vsel %vm5631_vm15, 1.0, %v5825_v46  ;;  %v5831_v47 = vmul.f32 %v10195_v21, %v18903_v24  ;;  %8525 = vperm.xlu1 %9574, %v18910_v50   ;;  %v18918_v61 = vld [vmem:[#allocation198_spill] sm:$0xff]  ;;  %v18919_v44 = vld [vmem:[#allocation89_spill] sm:$0xff]  ;;  %v18926_v29 = vld [vmem:[#allocation23_spill] sm:$0xff] }
 0x536   : > { %18902 = vst [vmem:[#allocation105_spill] sm:$0xff] %v14739_v55  ;;  %10216 = vrcp.f32 %v18904_v35  ;;  %v5792_v58 = vsel %vm5632_vm2, %v18905_v13, %v5760_v20  ;;  %v14748_v0 = vsel %vm5633_vm8, 1.0, %v5829_v30  ;;  %v5835_v52 = vmul.f32 %v10197_v9, %v18907_v28  ;;  %v9596_v25 = vld [vmem:[%s17526_s1 + $0x88] sm:$0xff]   ;;  %v18920_v20 = vld [vmem:[#allocation200_spill] sm:$0xff]  ;;  %v18923_v23 = vld [vmem:[#allocation121_spill] sm:$0xff] }
 0x537   : > { %6092 = vmatpush1.bf16.msra.mxu1 %v18901_v32  ;;  %18906 = vst [vmem:[#allocation167_spill] sm:$0xff] %v14748_v0  ;;  %10218 = vrcp.f32 %v18908_v41  ;;  %v5920_v12 = vpack.c.bf16 %v5796_v17, %v5792_v58  ;;  %vm18909_vm9 = vcmask 523264   ;;  %v14756_v10 = vsel %vm5634_vm11, 1.0, %v5831_v47  ;;  %v18924_v46 = vld [vmem:[#allocation202_spill] sm:$0xff]  ;;  %v18930_v14 = vld [vmem:[#allocation127_spill] sm:$0xff]  ;;  %v18934_v32 = vld [vmem:[#allocation168_spill] sm:$0xff] }
 0x538   : > { %6093 = vmatprep.subr.bf16.mxu1 %v5921_v43  ;;  %9325 = vmatmul.mubr.msk.bf16.vlgmr.msra.gmra.mxu0 %vm18909_vm9, %v9595_v1  ;;  %18911 = vst [vmem:[#allocation153_spill] sm:$0xff] %v14756_v10  ;;  %10220 = vrcp.f32 %v18912_v8  ;;  %v18913_v56 = vmov 0   ;;  %v14762_v36 = vsel %vm5636_vm13, 1.0, %v5835_v52  ;;  %vm18921_vm8 = vmmov %vm18909_vm9  ;;  %v18937_v58 = vld [vmem:[#allocation139_spill] sm:$0xff]  ;;  %v10580_v52 = vmov 6   ;;  %v18956_v6 = vld [vmem:[#allocation188_spill] sm:$0xff] }
 0x539   : > { %6048 = vmatprep.mubr.bf16.mxu0 %v18913_v56  ;;  %18914 = vst [vmem:[#allocation176_spill] sm:$0xff] %v14762_v36  ;;  %10222 = vrcp.f32 %v18915_v59  ;;  %8509 = vperm.xlu0 %9573, %v14526_v16   ;;  %v10199_v57 = vpop.eup %10198  ;;  %vm18931_vm2 = vmmov %vm18921_vm8  ;;  %v18940_v59 = vld [vmem:[#allocation114_spill] sm:$0xff]  ;;  %v18960_v22 = vld [vmem:[#allocation191_spill] sm:$0xff]  ;;  %vm18974_vm14 = vcmp.gt.f32.partialorder %v14279_v3, 20.0  ;;  %vm18980_vm13 = vcmp.gt.f32.partialorder %v14302_v2, 20.0  ;;  %vm18982_vm9 = vcmp.gt.f32.partialorder %v14325_v54, 20.0 }
 0x53a   : > { %10224 = vrcp.f32 %v18916_v34  ;;  %v10201_v60 = vpop.eup %10200  ;;  %v5841_v27 = vmul.f32 %v10199_v57, %v18917_v63  ;;  %8513 = vperm.xlu1 %9574, %v14485_v51   ;;  %v6684_v2 = vld [vmem:[%s17527_s2 + $0x3] sm:$0x1] }
 0x53b   : > { %6094 = vmatpush1.bf16.msra.mxu1 %v5920_v12  ;;  %10226 = vrcp.f32 %v18918_v61  ;;  %v5845_v7 = vmul.f32 %v10201_v60, %v18919_v44  ;;  %v18941_v60 = vld [vmem:[#allocation130_spill] sm:$0xff]  ;;  %v9597_v44 = vld [vmem:[%s17526_s1 + $0x90] sm:$0xff]  }
 0x53c   : > { %v10203_v18 = vpop.eup %10202  ;;  %10228 = vrcp.f32 %v18920_v20  ;;  %v14778_v45 = vsel %vm5639_vm6, 1.0, %v5841_v27  ;;  %v18944_v27 = vld [vmem:[#allocation178_spill] sm:$0xff] }
 0x53d   : > { %v10205_v49 = vpop.eup %10204  ;;  %18922 = vst [vmem:[#allocation169_spill] sm:$0xff] %v14778_v45  ;;  %v5847_v43 = vmul.f32 %v10203_v18, %v18923_v23  ;;  %10230 = vrcp.f32 %v18924_v46  ;;  %8501 = vperm.xlu0 %9573, %v14559_v48   ;;  %v14786_v21 = vsel %vm5641_vm7, 1.0, %v5845_v7 }
 0x53e   : > { %9329 = vmatmul.mubr.msk.bf16.vlgmr.msra.gmra.mxu1 %vm18921_vm8, %v9595_v1  ;;  %v10207_v39 = vpop.eup %10206  ;;  %18925 = vst [vmem:[#allocation151_spill] sm:$0xff] %v14786_v21  ;;  %v5851_v17 = vmul.f32 %v10205_v49, %v18926_v29  ;;  %v18927_v1 = vld [vmem:[#allocation205_spill] sm:$0xff]  ;;  %8505 = vperm.xlu1 %9574, %v14520_v40   ;;  %v18947_v49 = vld [vmem:[#allocation180_spill] sm:$0xff] }
 0x53f   : > { %6121 = vmatprep.mubr.bf16.mxu1 %v18913_v56  ;;  %10232 = vrcp.f32 %v18927_v1  ;;  %v10209_v33 = vpop.eup %10208  ;;  %v14792_v30 = vsel %vm5642_vm0, 1.0, %v5847_v43  ;;  %v5855_v9 = vmul.f32 %v10207_v39, %v18930_v14  ;;  %vm18942_vm0 = vcmp.gt.f32.partialorder %v18941_v60, 20.0  ;;  %v18949_v43 = vld [vmem:[#allocation88_spill] sm:$0xff]  ;;  %v18952_v39 = vld [vmem:[#allocation186_spill] sm:$0xff] }
 0x540   : > { %18929 = vst [vmem:[#allocation15_spill] sm:$0xff] %v14792_v30  ;;  %v10211_v62 = vpop.eup %10210  ;;  %9326 = vmatmul.mubr.msk.bf16.gmra.mxu0 %vm18931_vm2, %v9596_v25  ;;  %v14799_v31 = vsel %vm5644_vm1, 1.0, %v5851_v17  ;;  %v5859_v24 = vmul.f32 %v10209_v33, %v18934_v32  ;;  %vm18948_vm1 = vmmov %vm18931_vm2  ;;  %v18953_v1 = vld [vmem:[#allocation184_spill] sm:$0xff] }
 0x541   : > { %18933 = vst [vmem:[#allocation132_spill] sm:$0xff] %v14799_v31  ;;  %v10213_v47 = vpop.eup %10212  ;;  %6058 = vmatprep.mubr.bf16.mxu0 %v18913_v56  ;;  %v14805_v13 = vsel %vm5646_vm3, 1.0, %v5855_v9  ;;  %v5857_v28 = vmul.f32 %v10211_v62, %v18937_v58  ;;  %9576 = vset.pattern.permute.xlu0 %v10580_v52  ;;  %vm18950_vm3 = vcmp.gt.f32.partialorder %v18949_v43, 20.0  ;;  %v18957_v62 = vld [vmem:[#allocation144_spill] sm:$0xff]  ;;  %vm18979_vm12 = vmmov %vm18948_vm1 }
 0x542   : > { %18936 = vst [vmem:[#allocation175_spill] sm:$0xff] %v14805_v13  ;;  %v10215_v41 = vpop.eup %10214  ;;  %v14810_v8 = vsel %vm5648_vm10, 1.0, %v5859_v24  ;;  %v5861_v57 = vmul.f32 %v10213_v47, %v18940_v59  ;;  %8645 = vperm.xlu0 %9576, %v18910_v50   ;;  %8497 = vperm.xlu1 %9574, %v14553_v15   ;;  %vm18954_vm10 = vcmp.gt.f32.partialorder %v18953_v1, 20.0  ;;  %vm18958_vm7 = vcmp.gt.f32.partialorder %v18957_v62, 20.0  ;;  %v18962_v47 = vld [vmem:[#allocation41_spill] sm:$0xff]  ;;  %v18965_v58 = vld [vmem:[#allocation192_spill] sm:$0xff]  ;;  %vm18985_vm8 = vmmov %vm18948_vm1 }
 0x543   : > { %18939 = vst [vmem:[#allocation174_spill] sm:$0xff] %v14810_v8  ;;  %v10217_v34 = vpop.eup %10216  ;;  %v14816_v63 = vsel %vm18942_vm0, 1.0, %v5857_v28  ;;  %v5863_v61 = vmul.f32 %v10215_v41, %v18944_v27  ;;  %vm18963_vm11 = vcmp.gt.f32.partialorder %v18962_v47, 20.0  ;;  %v18969_v59 = vld [vmem:[#allocation197_spill] sm:$0xff]  ;;  %v18970_v60 = vld [vmem:[#allocation148_spill] sm:$0xff]  ;;  %v18973_v27 = vld [vmem:[#allocation199_spill] sm:$0xff] }
 0x544   : > { %18943 = vst [vmem:[#allocation123_spill] sm:$0xff] %v14816_v63  ;;  %v10219_v18 = vpop.eup %10218  ;;  %v14825_v20 = vsel %vm5649_vm5, 1.0, %v5861_v57  ;;  %v5867_v50 = vmul.f32 %v10217_v34, %v18947_v49  ;;  %vm18961_vm5 = vmmov %vm18948_vm1  ;;  %vm18971_vm6 = vcmp.gt.f32.partialorder %v18970_v60, 20.0  ;;  %v18978_v43 = vld [vmem:[#allocation204_spill] sm:$0xff] }
 0x545   : > { %18946 = vst [vmem:[#allocation185_spill] sm:$0xff] %v14825_v20  ;;  %v10221_v23 = vpop.eup %10220  ;;  %v14831_v46 = vsel %vm18950_vm3, 1.0, %v5863_v61  ;;  %v5871_v29 = vmul.f32 %v10219_v18, %v18952_v39 }
 0x546   : > { %9330 = vmatmul.mubr.msk.bf16.gmra.mxu1 %vm18948_vm1, %v9596_v25  ;;  %18951 = vst [vmem:[#allocation47_spill] sm:$0xff] %v14831_v46  ;;  %v10223_v17 = vpop.eup %10222  ;;  %v14837_v33 = vsel %vm18954_vm10, 1.0, %v5867_v50  ;;  %v5875_v14 = vmul.f32 %v10221_v23, %v18956_v6  ;;  %8625 = vperm.xlu0 %9576, %v14520_v40   ;;  %v18966_v40 = vld [vmem:[#allocation160_spill] sm:$0xff] }
 0x547   : > { %6131 = vmatprep.mubr.bf16.mxu1 %v18913_v56  ;;  %18955 = vst [vmem:[#allocation122_spill] sm:$0xff] %v14837_v33  ;;  %v10225_v9 = vpop.eup %10224  ;;  %v14843_v25 = vsel %vm18958_vm7, 1.0, %v5871_v29  ;;  %v5873_v32 = vmul.f32 %v10223_v17, %v18960_v22  ;;  %9575 = vset.pattern.permute.xlu1 %v10580_v52  ;;  %vm18967_vm15 = vcmp.gt.f32.partialorder %v18966_v40, 20.0  ;;  %v9598_v50 = vld [vmem:[%s17526_s1 + $0x98] sm:$0xff]   ;;  %v10581_v29 = vmov 7  }
 0x548   : > { %18959 = vst [vmem:[#allocation124_spill] sm:$0xff] %v14843_v25  ;;  %v10227_v24 = vpop.eup %10226  ;;  %9327 = vmatmul.mubr.msk.bf16.gmra.mxu0 %vm18961_vm5, %v9597_v44  ;;  %v14849_v35 = vsel %vm18963_vm11, 1.0, %v5875_v14  ;;  %v5877_v28 = vmul.f32 %v10225_v9, %v18965_v58  ;;  %8641 = vperm.xlu1 %9575, %v14442_v4   ;;  %v18976_v4 = vld [vmem:[#allocation201_spill] sm:$0xff] }
 0x549   : > { %18964 = vst [vmem:[#allocation103_spill] sm:$0xff] %v14849_v35  ;;  %v10229_v41 = vpop.eup %10228  ;;  %6068 = vmatprep.mubr.bf16.mxu0 %v18913_v56  ;;  %v14856_v12 = vsel %vm18967_vm15, 1.0, %v5873_v32  ;;  %v5879_v57 = vmul.f32 %v10227_v24, %v18969_v59 }
 0x54a   : > { %18968 = vst [vmem:[#allocation115_spill] sm:$0xff] %v14856_v12  ;;  %v10231_v34 = vpop.eup %10230  ;;  %v14861_v52 = vsel %vm18971_vm6, 1.0, %v5877_v28  ;;  %v5883_v61 = vmul.f32 %v10229_v41, %v18973_v27  ;;  %8617 = vperm.xlu0 %9576, %v14553_v15  }
 0x54b   : > { %18972 = vst [vmem:[#allocation74_spill] sm:$0xff] %v14861_v52  ;;  %v14867_v7 = vsel %vm18974_vm14, 1.0, %v5879_v57  ;;  %v5881_v49 = vmul.f32 %v10231_v34, %v18976_v4 }
 0x54c   : > { %v10233_v18 = vpop.eup %10232  ;;  %18975 = vst [vmem:[#allocation156_spill] sm:$0xff] %v14867_v7  ;;  %v14875_v23 = vsel %vm5660_vm4, 1.0, %v5883_v61  ;;  %8633 = vperm.xlu1 %9575, %v14485_v51   ;;  %vm18984_vm4 = vmmov %vm18948_vm1 }
 0x54d   : > { %18977 = vst [vmem:[#allocation142_spill] sm:$0xff] %v14875_v23  ;;  %v5885_v39 = vmul.f32 %v10233_v18, %v18978_v43  ;;  %v14882_v3 = vsel %vm18980_vm13, 1.0, %v5881_v49 }
 0x54e   : > { %9331 = vmatmul.mubr.msk.bf16.gmra.mxu1 %vm18979_vm12, %v9597_v44  ;;  %18981 = vst [vmem:[#allocation109_spill] sm:$0xff] %v14882_v3  ;;  %9577 = vset.pattern.permute.xlu0 %v10581_v29 }
 0x54f   : > { %6141 = vmatprep.mubr.bf16.mxu1 %v18913_v56  ;;  %v14887_v15 = vsel %vm18982_vm9, 1.0, %v5885_v39 }
 0x550   : > { %18983 = vst [vmem:[#allocation177_spill] sm:$0xff] %v14887_v15  ;;  %9328 = vmatmul.mubr.msk.bf16.gmra.mxu0 %vm18984_vm4, %v9598_v50  ;;  %8637 = vperm.xlu1 %9575, %v14491_v26  }
 0x551   : > { %6814 = vmatprep.mubr.bf16.mxu0 %v18913_v56 }
 0x554   : > { %8629 = vperm.xlu1 %9575, %v14526_v16  }
 0x556   : > { %9332 = vmatmul.mubr.msk.bf16.gmra.mxu1 %vm18985_vm8, %v9598_v50 }
 0x557   : > { %6887 = vmatprep.mubr.bf16.mxu1 %v18913_v56 }
 0x558   : > { %8621 = vperm.xlu1 %9575, %v14559_v48  }
 0x55c   : > { %9578 = vset.pattern.permute.xlu1 %v10581_v29 }
 0x55d   : > { %6687 = vperm.xlu1 %9578, %v6684_v2  }
 0x578   : > { %v14901_v51 = vpop.permute.xlu0 %5967 }
 0x582   : > { %v14899_v54 = vpop.permute.xlu1 %5971 }
 0x58b   : > { %v14903_v26 = vpop.permute.xlu1 %5959 }
 0x58c   : > { %v14905_v38 = vpop.permute.xlu0 %5963 }
 0x590   : > { %v14907_v44 = vpop.permute.xlu1 %5951  ;;  %v14909_v16 = vpop.permute.xlu0 %5955 }
 0x594   : > { %v5944_v17 = vpop.permute.xlu1 %5943  ;;  %v5948_v14 = vpop.permute.xlu0 %5947 }
 0x5f8   : > { %v6040_v48 = vpop.f32.mrf.mxu0 }
 0x5f9   : > { %v14911_v1 = vadd.f32 %v6040_v48, %v5944_v17 }
 0x5fa   : > { %v6042_v6 = vpop.f32.mrf.mxu0 }
 0x5fb   : > { %v14914_v9 = vmul.f32 100.0, %v14911_v1  ;;  %v14916_v62 = vadd.f32 %v6042_v6, %v5944_v17 }
 0x5fc   : > { %v6044_v22 = vpop.f32.mrf.mxu0 }
 0x5fd   : > { %v6184_v32 = vmin.f32 %v14914_v9, 20.0  ;;  %v14920_v47 = vmul.f32 100.0, %v14916_v62  ;;  %v14922_v58 = vadd.f32 %v6044_v22, %v5948_v14  ;;  %vm6280_vm2 = vcmp.gt.f32.partialorder %v14914_v9, 20.0 }
 0x5fe   : > { %v6113_v24 = vpop.f32.mrf.mxu1  ;;  %v6046_v41 = vpop.f32.mrf.mxu0 }
 0x5ff   : > { %v14924_v28 = vadd.f32 %v6113_v24, %v5944_v17  ;;  %v6216_v40 = vmul.f32 1.442695, %v6184_v32  ;;  %v6185_v59 = vmin.f32 %v14920_v47, 20.0  ;;  %v14928_v34 = vmul.f32 100.0, %v14922_v58 }
 0x600   : > { %v6115_v57 = vpop.f32.mrf.mxu1  ;;  %v14935_v61 = vadd.f32 %v6046_v41, %v5948_v14  ;;  %v6050_v18 = vpop.f32.mrf.mxu0  ;;  %vm6281_vm0 = vcmp.gt.f32.partialorder %v14920_v47, 20.0 }
 0x601   : > { %v14931_v60 = vmul.f32 100.0, %v14924_v28  ;;  %v14933_v27 = vadd.f32 %v6115_v57, %v5944_v17  ;;  %10234 = vpow2.f32 %v6216_v40  ;;  %v6218_v4 = vmul.f32 1.442695, %v6185_v59 }
 0x602   : > { %v6188_v49 = vmin.f32 %v14928_v34, 20.0  ;;  %v6117_v50 = vpop.f32.mrf.mxu1  ;;  %v14945_v17 = vmul.f32 100.0, %v14935_v61  ;;  %v14948_v6 = vadd.f32 %v6050_v18, %v14907_v44  ;;  %v6052_v15 = vpop.f32.mrf.mxu0  ;;  %vm6284_vm1 = vcmp.gt.f32.partialorder %v14928_v34, 20.0 }
 0x603   : > { %v6186_v43 = vmin.f32 %v14931_v60, 20.0  ;;  %v14940_v39 = vmul.f32 100.0, %v14933_v27  ;;  %v14942_v29 = vadd.f32 %v6117_v50, %v5948_v14  ;;  %10236 = vpow2.f32 %v6218_v4 }
 0x604   : > { %v6224_v2 = vmul.f32 1.442695, %v6188_v49  ;;  %v6119_v48 = vpop.f32.mrf.mxu1  ;;  %v6189_v41 = vmin.f32 %v14945_v17, 20.0  ;;  %v14962_v50 = vmul.f32 100.0, %v14948_v6  ;;  %v6054_v23 = vpop.f32.mrf.mxu0  ;;  %v14977_v12 = vadd.f32 %v6052_v15, %v14907_v44 }
 0x605   : > { %v6220_v22 = vmul.f32 1.442695, %v6186_v43  ;;  %v6187_v32 = vmin.f32 %v14940_v39, 20.0  ;;  %v14952_v24 = vmul.f32 100.0, %v14942_v29  ;;  %v14955_v40 = vadd.f32 %v6119_v48, %v5948_v14 }
 0x606   : > { %10238 = vpow2.f32 %v6224_v2  ;;  %v6123_v59 = vpop.f32.mrf.mxu1  ;;  %v6226_v49 = vmul.f32 1.442695, %v6189_v41  ;;  %v6192_v48 = vmin.f32 %v14962_v50, 20.0  ;;  %18987 = vst [vmem:[#allocation146_spill] sm:$0xff] %v14977_v12  ;;  %v6056_v35 = vpop.f32.mrf.mxu0  ;;  %v14997_v25 = vmul.f32 100.0, %v14977_v12 }
 0x607   : > { %18986 = vst [vmem:[#allocation136_spill] sm:$0xff] %v14952_v24  ;;  %10240 = vpow2.f32 %v6220_v22  ;;  %v6222_v57 = vmul.f32 1.442695, %v6187_v32  ;;  %v6190_v4 = vmin.f32 %v14952_v24, 20.0  ;;  %v14959_v18 = vmul.f32 100.0, %v14955_v40 }
 0x608   : > { %v14965_v43 = vadd.f32 %v6123_v59, %v14907_v44  ;;  %v6125_v22 = vpop.f32.mrf.mxu1  ;;  %v6232_v52 = vmul.f32 1.442695, %v6192_v48  ;;  %v6060_v63 = vpop.f32.mrf.mxu0  ;;  %vm6282_vm3 = vcmp.gt.f32.partialorder %v14931_v60, 20.0  ;;  %vm6283_vm10 = vcmp.gt.f32.partialorder %v14940_v39, 20.0 }
 0x609   : > { %10242 = vpow2.f32 %v6222_v57  ;;  %v6228_v2 = vmul.f32 1.442695, %v6190_v4  ;;  %v6191_v14 = vmin.f32 %v14959_v18, 20.0  ;;  %v14983_v48 = vadd.f32 %v6125_v22, %v14907_v44 }
 0x60a   : > { %10244 = vpow2.f32 %v6226_v49  ;;  %v14970_v32 = vmul.f32 100.0, %v14965_v43  ;;  %v6127_v59 = vpop.f32.mrf.mxu1  ;;  %v15000_v44 = vadd.f32 %v6056_v35, %v14909_v16  ;;  %v15031_v31 = vadd.f32 %v6060_v63, %v14903_v26  ;;  %v6062_v19 = vpop.f32.mrf.mxu0 }
 0x60b   : > { %10246 = vpow2.f32 %v6228_v2  ;;  %v6230_v41 = vmul.f32 1.442695, %v6191_v14  ;;  %18988 = vst [vmem:[#allocation173_spill] sm:$0xff] %v14983_v48  ;;  %v14991_v7 = vadd.f32 %v6127_v59, %v14909_v16  ;;  %v15009_v59 = vmul.f32 100.0, %v14983_v48 }
 0x60c   : > { %v6194_v3 = vmin.f32 %v14970_v32, 20.0  ;;  %18991 = vst [vmem:[#allocation190_spill] sm:$0xff] %v15000_v44  ;;  %v15024_v13 = vmul.f32 100.0, %v15000_v44  ;;  %18996 = vst [vmem:[#allocation195_spill] sm:$0xff] %v15031_v31  ;;  %v15047_v5 = vmul.f32 100.0, %v15031_v31  ;;  %v15059_v31 = vadd.f32 %v6062_v19, %v14903_v26 }
 0x60d   : > { %10248 = vpow2.f32 %v6230_v41  ;;  %v14986_v41 = vadd.f32 %v6054_v23, %v14909_v16  ;;  %18990 = vst [vmem:[#allocation154_spill] sm:$0xff] %v14991_v7  ;;  %v15018_v46 = vmul.f32 100.0, %v14991_v7  ;;  %v6064_v7 = vpop.f32.mrf.mxu0  ;;  %vm6286_vm7 = vcmp.gt.f32.partialorder %v14952_v24, 20.0 }
 0x60e   : > { %v14973_v57 = vpop.eup %10234  ;;  %10250 = vpow2.f32 %v6232_v52  ;;  %v6236_v4 = vmul.f32 1.442695, %v6194_v3  ;;  %v6129_v52 = vpop.f32.mrf.mxu1  ;;  %18994 = vst [vmem:[#allocation152_spill] sm:$0xff] %v15024_v13  ;;  %v6197_v55 = vmin.f32 %v15024_v13, 20.0  ;;  %18997 = vst [vmem:[#allocation28_spill] sm:$0xff] %v15047_v5  ;;  %vm6285_vm5 = vcmp.gt.f32.partialorder %v14945_v17, 20.0 }
 0x60f   : > { %v6312_v49 = vadd.f32 1.0, %v14973_v57  ;;  %18989 = vst [vmem:[#allocation101_spill] sm:$0xff] %v14986_v41  ;;  %v15004_v22 = vadd.f32 %v6129_v52, %v14909_v16  ;;  %v15012_v33 = vmul.f32 100.0, %v14986_v41  ;;  %18993 = vst [vmem:[#allocation179_spill] sm:$0xff] %v15018_v46  ;;  %v6193_v52 = vmin.f32 %v14997_v25, 20.0 }
 0x610   : > { %v14979_v2 = vpop.eup %10236  ;;  %10252 = vpow2.f32 %v6236_v4  ;;  %v6133_v37 = vpop.f32.mrf.mxu1  ;;  %v6198_v11 = vmin.f32 %v15018_v46, 20.0  ;;  %18999 = vst [vmem:[#allocation102_spill] sm:$0xff] %v15059_v31  ;;  %vm6287_vm11 = vcmp.gt.f32.partialorder %v14959_v18, 20.0  ;;  %vm6288_vm15 = vcmp.gt.f32.partialorder %v14962_v50, 20.0 }
 0x611   : > { %10254 = vlog2.f32 %v6312_v49  ;;  %v6313_v14 = vadd.f32 1.0, %v14979_v2  ;;  %18992 = vst [vmem:[#allocation161_spill] sm:$0xff] %v15004_v22  ;;  %v15028_v53 = vmul.f32 100.0, %v15004_v22  ;;  %v6196_v30 = vmin.f32 %v15012_v33, 20.0 }
 0x612   : > { %v6135_v42 = vpop.f32.mrf.mxu1  ;;  %vm6290_vm6 = vcmp.gt.f32.partialorder %v14970_v32, 20.0  ;;  %vm6289_vm14 = vcmp.gt.f32.partialorder %v14997_v25, 20.0  ;;  %vm6291_vm12 = vcmp.gt.f32.partialorder %v15009_v59, 20.0  ;;  %vm6292_vm13 = vcmp.gt.f32.partialorder %v15012_v33, 20.0  ;;  %v15408_v33 = vpop.permute.xlu0 %6597 }
 0x613   : > { %v14988_v3 = vpop.eup %10238  ;;  %10256 = vlog2.f32 %v6313_v14  ;;  %18995 = vst [vmem:[#allocation196_spill] sm:$0xff] %v15028_v53  ;;  %v6199_v10 = vmin.f32 %v15028_v53, 20.0  ;;  %v6240_v44 = vmul.f32 1.442695, %v6196_v30  ;;  %v6242_v30 = vmul.f32 1.442695, %v6197_v55 }
 0x614   : > { %v14993_v15 = vpop.eup %10240  ;;  %v6316_v4 = vadd.f32 1.0, %v14988_v3 }
 0x615   : > { %v6314_v23 = vadd.f32 1.0, %v14993_v15  ;;  %v6246_v13 = vmul.f32 1.442695, %v6199_v10 }
 0x616   : > { %v15006_v20 = vpop.eup %10242  ;;  %10258 = vlog2.f32 %v6316_v4 }
 0x617   : > { %v15014_v8 = vpop.eup %10244  ;;  %10260 = vlog2.f32 %v6314_v23  ;;  %v6315_v35 = vadd.f32 1.0, %v15006_v20 }
 0x618   : > { %v15020_v16 = vpop.eup %10246  ;;  %10262 = vrcp.f32 %v6312_v49  ;;  %v6317_v45 = vadd.f32 1.0, %v15014_v8  ;;  %v6195_v49 = vmin.f32 %v15009_v59, 20.0 }
 0x619   : > { %10264 = vlog2.f32 %v6315_v35  ;;  %v6318_v21 = vadd.f32 1.0, %v15020_v16 }
 0x61a   : > { %10266 = vrcp.f32 %v6313_v14  ;;  %v15036_v0 = vpop.eup %10248  ;;  %v6234_v14 = vmul.f32 1.442695, %v6193_v52  ;;  %v6238_v52 = vmul.f32 1.442695, %v6195_v49  ;;  %v6137_v49 = vpop.f32.mrf.mxu1 }
 0x61b   : > { %10268 = vrcp.f32 %v6314_v23  ;;  %v15040_v36 = vpop.eup %10250  ;;  %v6319_v63 = vadd.f32 1.0, %v15036_v0  ;;  %v15050_v23 = vadd.f32 %v6133_v37, %v14903_v26  ;;  %v15062_v37 = vadd.f32 %v6135_v42, %v14903_v26 }
 0x61c   : > { %10270 = vlog2.f32 %v6318_v21  ;;  %v15055_v22 = vadd.f32 1.0, %v15040_v36  ;;  %v15075_v26 = vadd.f32 %v6064_v7, %v14905_v38 }
 0x61d   : > { %10272 = vrcp.f32 %v6315_v35  ;;  %18998 = vst [vmem:[#allocation183_spill] sm:$0xff] %v15050_v23  ;;  %v15052_v56 = vpop.eup %10252  ;;  %v6244_v35 = vmul.f32 1.442695, %v6198_v11  ;;  %19000 = vst [vmem:[#allocation140_spill] sm:$0xff] %v15062_v37  ;;  %v6200_v11 = vmin.f32 %v15047_v5, 20.0  ;;  %v15070_v19 = vmul.f32 100.0, %v15050_v23 }
 0x61e   : > { %10274 = vlog2.f32 %v6317_v45  ;;  %v10255_v41 = vpop.eup %10254  ;;  %v15066_v53 = vadd.f32 1.0, %v15052_v56  ;;  %v15081_v10 = vmul.f32 100.0, %v15062_v37  ;;  %v15084_v23 = vadd.f32 %v6137_v49, %v14905_v38 }
 0x61f   : > { %10276 = vrcp.f32 %v6316_v4  ;;  %v6345_v48 = vmul.f32 0.6931472, %v10255_v41  ;;  %19001 = vst [vmem:[#allocation187_spill] sm:$0xff] %v15070_v19  ;;  %v6066_v41 = vpop.f32.mrf.mxu0  ;;  %v6202_v37 = vmin.f32 %v15070_v19, 20.0 }
 0x620   : > { %10278 = vlog2.f32 %v6319_v63  ;;  %v10257_v12 = vpop.eup %10256  ;;  %19002 = vst [vmem:[#allocation203_spill] sm:$0xff] %v15084_v23  ;;  %v15097_v49 = vadd.f32 %v6066_v41, %v14905_v38  ;;  %v15111_v41 = vmul.f32 100.0, %v15084_v23 }
 0x621   : > { %10280 = vrcp.f32 %v6318_v21  ;;  %v6408_v4 = vmul.f32 0.01, %v6345_v48  ;;  %v6347_v42 = vmul.f32 0.6931472, %v10257_v12  ;;  %v15078_v21 = vmul.f32 100.0, %v15059_v31 }
 0x622   : > { %10282 = vlog2.f32 %v15055_v22 }
 0x623   : > { %v10259_v55 = vpop.eup %10258  ;;  %10284 = vrcp.f32 %v6317_v45  ;;  %v15089_v48 = vsel %vm6280_vm2, %v14911_v1, %v6408_v4  ;;  %v6409_v7 = vmul.f32 0.01, %v6347_v42  ;;  %v15105_v42 = vmul.f32 100.0, %v15075_v26 }
 0x624   : > { %v10261_v12 = vpop.eup %10260  ;;  %19003 = vst [vmem:[#allocation189_spill] sm:$0xff] %v15089_v48  ;;  %v6353_v5 = vmul.f32 0.6931472, %v10259_v55  ;;  %10286 = vlog2.f32 %v15066_v53  ;;  %v15138_v48 = vmul.f32 100.0, %v15097_v49 }
 0x625   : > { %v15092_v45 = vpop.eup %10262  ;;  %v6349_v31 = vmul.f32 0.6931472, %v10261_v12  ;;  %10288 = vrcp.f32 %v6319_v63  ;;  %v15102_v1 = vsel %vm6281_vm0, %v14916_v62, %v6409_v7 }
 0x626   : > { %v10265_v46 = vpop.eup %10264  ;;  %19004 = vst [vmem:[#allocation193_spill] sm:$0xff] %v15102_v1  ;;  %v6412_v4 = vmul.f32 0.01, %v6353_v5  ;;  %10290 = vpow2.f32 %v6234_v14  ;;  %v6201_v5 = vmin.f32 %v15078_v21, 20.0  ;;  %v6203_v14 = vmin.f32 %v15081_v10, 20.0 }
 0x627   : > { %v15107_v55 = vpop.eup %10266  ;;  %v6410_v12 = vmul.f32 0.01, %v6349_v31  ;;  %v6351_v63 = vmul.f32 0.6931472, %v10265_v46  ;;  %10292 = vpow2.f32 %v6238_v52 }
 0x628   : > { %v10269_v19 = vpop.eup %10268  ;;  %v15116_v62 = vsel %vm6284_vm1, %v14922_v58, %v6412_v4  ;;  %10294 = vpow2.f32 %v6240_v44  ;;  %v6248_v44 = vmul.f32 1.442695, %v6200_v11  ;;  %v6254_v11 = vmul.f32 1.442695, %v6203_v14 }
 0x629   : > { %19005 = vst [vmem:[#allocation194_spill] sm:$0xff] %v15116_v62  ;;  %v10271_v7 = vpop.eup %10270  ;;  %v15123_v31 = vsel %vm6282_vm3, %v14924_v28, %v6410_v12  ;;  %v6411_v46 = vmul.f32 0.01, %v6351_v63  ;;  %10296 = vrcp.f32 %v15055_v22  ;;  %v6204_v28 = vmin.f32 %v15105_v42, 20.0 }
 0x62a   : > { %19006 = vst [vmem:[#allocation119_spill] sm:$0xff] %v15123_v31  ;;  %v10273_v1 = vpop.eup %10272  ;;  %v6357_v58 = vmul.f32 0.6931472, %v10271_v7  ;;  %10298 = vpow2.f32 %v6244_v35  ;;  %v6206_v12 = vmin.f32 %v15111_v41, 20.0  ;;  %v6252_v7 = vmul.f32 1.442695, %v6202_v37 }
 0x62b   : > { %v10275_v4 = vpop.eup %10274  ;;  %v15132_v23 = vsel %vm6283_vm10, %v14933_v27, %v6411_v46  ;;  %10300 = vpow2.f32 %v6242_v30  ;;  %v6250_v35 = vmul.f32 1.442695, %v6201_v5 }
 0x62c   : > { %19007 = vst [vmem:[#allocation198_spill] sm:$0xff] %v15132_v23  ;;  %v10277_v63 = vpop.eup %10276  ;;  %v6414_v52 = vmul.f32 0.01, %v6357_v58  ;;  %v6355_v22 = vmul.f32 0.6931472, %v10275_v4  ;;  %10302 = vpow2.f32 %v6246_v13 }
 0x62d   : > { %v10279_v62 = vpop.eup %10278  ;;  %10304 = vrcp.f32 %v15066_v53  ;;  %v6256_v53 = vmul.f32 1.442695, %v6204_v28  ;;  %v6260_v5 = vmul.f32 1.442695, %v6206_v12  ;;  %v6139_v28 = vpop.f32.mrf.mxu1 }
 0x62e   : > { %v15140_v27 = vpop.eup %10280  ;;  %v15145_v30 = vsel %vm6286_vm7, %v14942_v29, %v6414_v52  ;;  %v6413_v46 = vmul.f32 0.01, %v6355_v22  ;;  %v6359_v58 = vmul.f32 0.6931472, %v10279_v62  ;;  %10306 = vpow2.f32 %v6248_v44 }
 0x62f   : > { %19008 = vst [vmem:[#allocation89_spill] sm:$0xff] %v15145_v30  ;;  %v10283_v13 = vpop.eup %10282  ;;  %10308 = vpow2.f32 %v6252_v7  ;;  %v6473_v62 = vmul.f32 %v15092_v45, %v14973_v57  ;;  %v6205_v44 = vmin.f32 %v15138_v48, 20.0  ;;  %v6070_v7 = vpop.f32.mrf.mxu0  ;;  %v6477_v57 = vmul.f32 %v10269_v19, %v14993_v15 }
 0x630   : > { %v10285_v14 = vpop.eup %10284  ;;  %v15153_v4 = vsel %vm6285_vm5, %v14935_v61, %v6413_v46  ;;  %v6415_v24 = vmul.f32 0.01, %v6359_v58  ;;  %v6361_v29 = vmul.f32 0.6931472, %v10283_v13  ;;  %10310 = vpow2.f32 %v6250_v35 }
 0x631   : > { %19009 = vst [vmem:[#allocation200_spill] sm:$0xff] %v15153_v4  ;;  %v10287_v52 = vpop.eup %10286  ;;  %10312 = vpow2.f32 %v6254_v11  ;;  %v6475_v45 = vmul.f32 %v15107_v55, %v14979_v2  ;;  %v6258_v35 = vmul.f32 1.442695, %v6205_v44  ;;  %v6479_v15 = vmul.f32 %v10273_v1, %v15006_v20  ;;  %v6143_v55 = vpop.f32.mrf.mxu1 }
 0x632   : > { %v10289_v12 = vpop.eup %10288  ;;  %v15162_v22 = vsel %vm6287_vm11, %v14955_v40, %v6415_v24  ;;  %v6416_v61 = vmul.f32 0.01, %v6361_v29  ;;  %v6365_v46 = vmul.f32 0.6931472, %v10287_v52  ;;  %10314 = vpow2.f32 %v6256_v53  ;;  %v6072_v44 = vpop.f32.mrf.mxu0 }
 0x633   : > { %19010 = vst [vmem:[#allocation121_spill] sm:$0xff] %v15162_v22  ;;  %v15164_v58 = vpop.eup %10290  ;;  %10316 = vpow2.f32 %v6260_v5  ;;  %v6481_v19 = vmul.f32 %v10277_v63, %v14988_v3  ;;  %v15189_v5 = vadd.f32 %v6139_v28, %v14905_v38  ;;  %v15195_v3 = vsel %vm6280_vm2, 1.0, %v6473_v62  ;;  %v6145_v34 = vpop.f32.mrf.mxu1 }
 0x634   : > { %v15169_v13 = vpop.eup %10292  ;;  %v15174_v24 = vsel %vm6288_vm15, %v14948_v6, %v6416_v61  ;;  %v6418_v40 = vmul.f32 0.01, %v6365_v46  ;;  %v6321_v11 = vadd.f32 1.0, %v15164_v58  ;;  %10318 = vpow2.f32 %v6258_v35  ;;  %19014 = vst [vmem:[#allocation166_spill] sm:$0xff] %v15195_v3 }
 0x635   : > { %19011 = vst [vmem:[#allocation202_spill] sm:$0xff] %v15174_v24  ;;  %v15177_v29 = vpop.eup %10294  ;;  %v6323_v2 = vadd.f32 1.0, %v15169_v13  ;;  %19013 = vst [vmem:[#allocation205_spill] sm:$0xff] %v15189_v5  ;;  %v15198_v1 = vadd.f32 %v6070_v7, %v14901_v51  ;;  %v15208_v28 = vadd.f32 %v6143_v55, %v14901_v51  ;;  %v15214_v9 = vsel %vm6282_vm3, 1.0, %v6477_v57 }
 0x636   : > { %v10297_v53 = vpop.eup %10296  ;;  %v15185_v6 = vsel %vm6290_vm6, %v14965_v43, %v6418_v40  ;;  %10320 = vlog2.f32 %v6321_v11  ;;  %v6324_v52 = vadd.f32 1.0, %v15177_v29  ;;  %v15204_v43 = vsel %vm6281_vm0, 1.0, %v6475_v45  ;;  %19018 = vst [vmem:[#allocation163_spill] sm:$0xff] %v15214_v9 }
 0x637   : > { %19012 = vst [vmem:[#allocation23_spill] sm:$0xff] %v15185_v6  ;;  %v15191_v20 = vpop.eup %10298  ;;  %10322 = vrcp.f32 %v6321_v11  ;;  %19015 = vst [vmem:[#allocation127_spill] sm:$0xff] %v15198_v1  ;;  %v15218_v62 = vsel %vm6283_vm10, 1.0, %v6479_v15  ;;  %v15221_v47 = vadd.f32 %v6072_v44, %v14901_v51  ;;  %v15225_v7 = vsel %vm6284_vm1, 1.0, %v6481_v19 }
 0x638   : > { %v15200_v63 = vpop.eup %10300  ;;  %19016 = vst [vmem:[#allocation43_spill] sm:$0xff] %v15204_v43  ;;  %10324 = vlog2.f32 %v6323_v2  ;;  %v6326_v38 = vadd.f32 1.0, %v15191_v20  ;;  %19017 = vst [vmem:[#allocation168_spill] sm:$0xff] %v15208_v28  ;;  %v15229_v60 = vmul.f32 100.0, %v15189_v5  ;;  %v15235_v39 = vmul.f32 %v15140_v27, %v15020_v16 }
 0x639   : > { %v15210_v61 = vpop.eup %10302  ;;  %19019 = vst [vmem:[#allocation139_spill] sm:$0xff] %v15218_v62  ;;  %10326 = vrcp.f32 %v6323_v2  ;;  %19020 = vst [vmem:[#allocation170_spill] sm:$0xff] %v15221_v47  ;;  %v6325_v45 = vadd.f32 1.0, %v15200_v63  ;;  %v6483_v35 = vmul.f32 %v10285_v14, %v15014_v8  ;;  %v15239_v40 = vmul.f32 100.0, %v15198_v1  ;;  %v6074_v2 = vpop.f32.mrf.mxu0 }
 0x63a   : > { %v10305_v46 = vpop.eup %10304  ;;  %19021 = vst [vmem:[#allocation114_spill] sm:$0xff] %v15225_v7  ;;  %10328 = vlog2.f32 %v6324_v52  ;;  %19022 = vst [vmem:[#allocation130_spill] sm:$0xff] %v15229_v60  ;;  %v6487_v11 = vmul.f32 %v10289_v12, %v15036_v0  ;;  %v6327_v15 = vadd.f32 1.0, %v15210_v61  ;;  %v15244_v19 = vmul.f32 100.0, %v15208_v28  ;;  %v19036_v28 = vld [vmem:[#allocation179_spill] sm:$0xff] }
 0x63b   : > { %v15231_v57 = vpop.eup %10306  ;;  %19023 = vst [vmem:[#allocation178_spill] sm:$0xff] %v15235_v39  ;;  %10330 = vrcp.f32 %v6324_v52  ;;  %19024 = vst [vmem:[#allocation172_spill] sm:$0xff] %v15239_v40  ;;  %v6489_v16 = vmul.f32 %v10297_v53, %v15040_v36  ;;  %v6493_v8 = vmul.f32 %v10305_v46, %v15052_v56  ;;  %v15251_v27 = vmul.f32 100.0, %v15221_v47 }
 0x63c   : > { %10332 = vlog2.f32 %v6326_v38  ;;  %19025 = vst [vmem:[#allocation180_spill] sm:$0xff] %v15244_v19  ;;  %v15246_v55 = vpop.eup %10308  ;;  %v6328_v0 = vadd.f32 1.0, %v15231_v57  ;;  %v6207_v12 = vmin.f32 %v15229_v60, 20.0  ;;  %v15258_v52 = vadd.f32 %v6145_v34, %v14901_v51  ;;  %v19047_v60 = vld [vmem:[#allocation28_spill] sm:$0xff] }
 0x63d   : > { %10334 = vrcp.f32 %v6326_v38  ;;  %19026 = vst [vmem:[#allocation88_spill] sm:$0xff] %v15251_v27  ;;  %v15253_v14 = vpop.eup %10310  ;;  %v15264_v36 = vsel %vm6285_vm5, 1.0, %v6483_v35  ;;  %v6208_v56 = vmin.f32 %v15239_v40, 20.0  ;;  %v15269_v53 = vadd.f32 %v6074_v2, %v14899_v54  ;;  %v6147_v35 = vpop.f32.mrf.mxu1  ;;  %v19045_v40 = vld [vmem:[#allocation173_spill] sm:$0xff] }
 0x63e   : > { %10336 = vlog2.f32 %v6325_v45  ;;  %19027 = vst [vmem:[#allocation186_spill] sm:$0xff] %v15258_v52  ;;  %v15260_v44 = vpop.eup %10312  ;;  %19028 = vst [vmem:[#allocation184_spill] sm:$0xff] %v15264_v36  ;;  %v15275_v51 = vsel %vm6287_vm11, 1.0, %v6487_v11  ;;  %v6330_v46 = vadd.f32 1.0, %v15246_v55  ;;  %v6210_v17 = vmin.f32 %v15244_v19, 20.0  ;;  %v19037_v36 = vld [vmem:[#allocation152_spill] sm:$0xff] }
 0x63f   : > { %10338 = vrcp.f32 %v6325_v45  ;;  %19029 = vst [vmem:[#allocation188_spill] sm:$0xff] %v15269_v53  ;;  %v15271_v38 = vpop.eup %10314  ;;  %19030 = vst [vmem:[#allocation144_spill] sm:$0xff] %v15275_v51  ;;  %v15283_v45 = vsel %vm6288_vm15, 1.0, %v6489_v16  ;;  %v6209_v2 = vmin.f32 %v15251_v27, 20.0  ;;  %v15288_v18 = vmul.f32 100.0, %v15258_v52  ;;  %v6149_v1 = vpop.f32.mrf.mxu1 }
 0x640   : > { %10340 = vlog2.f32 %v6327_v15  ;;  %v15279_v34 = vpop.eup %10316  ;;  %19031 = vst [vmem:[#allocation191_spill] sm:$0xff] %v15283_v45  ;;  %v15294_v37 = vsel %vm6290_vm6, 1.0, %v6493_v8  ;;  %v6329_v9 = vadd.f32 1.0, %v15253_v14  ;;  %v15297_v50 = vmul.f32 1.442695, %v6207_v12  ;;  %v6076_v12 = vpop.f32.mrf.mxu0  ;;  %v19042_v45 = vld [vmem:[#allocation196_spill] sm:$0xff] }
 0x641   : > { %10342 = vrcp.f32 %v6327_v15  ;;  %19032 = vst [vmem:[#allocation41_spill] sm:$0xff] %v15288_v18  ;;  %v15290_v11 = vpop.eup %10318  ;;  %19033 = vst [vmem:[#allocation192_spill] sm:$0xff] %v15294_v37  ;;  %v15300_v15 = vmul.f32 1.442695, %v6208_v56  ;;  %v15303_v3 = vmul.f32 100.0, %v15269_v53  ;;  %v15306_v7 = vadd.f32 %v6147_v35, %v14899_v54 }
 0x642   : > { %10344 = vlog2.f32 %v6328_v0  ;;  %v6331_v39 = vadd.f32 1.0, %v15260_v44  ;;  %v15309_v52 = vmul.f32 1.442695, %v6210_v17  ;;  %vm6294_vm9 = vcmp.gt.f32.partialorder %v19036_v28, 20.0 }
 0x643   : > { %v10321_v16 = vpop.eup %10320  ;;  %10346 = vrcp.f32 %v6328_v0  ;;  %19034 = vst [vmem:[#allocation160_spill] sm:$0xff] %v15303_v3  ;;  %19035 = vst [vmem:[#allocation197_spill] sm:$0xff] %v15306_v7  ;;  %v6332_v0 = vadd.f32 1.0, %v15271_v38  ;;  %v15313_v56 = vmul.f32 1.442695, %v6209_v2  ;;  %v6211_v53 = vmin.f32 %v15288_v18, 20.0 }
 0x644   : > { %v10323_v32 = vpop.eup %10322  ;;  %v6363_v8 = vmul.f32 0.6931472, %v10321_v16  ;;  %10348 = vlog2.f32 %v6330_v46  ;;  %v6334_v16 = vadd.f32 1.0, %v15279_v34  ;;  %vm6293_vm4 = vcmp.gt.f32.partialorder %v19037_v36, 20.0  ;;  %v19040_v18 = vld [vmem:[#allocation146_spill] sm:$0xff] }
 0x645   : > { %v10325_v47 = vpop.eup %10324  ;;  %10350 = vrcp.f32 %v6330_v46  ;;  %v6212_v43 = vmin.f32 %v15303_v3, 20.0  ;;  %v15320_v46 = vmul.f32 100.0, %v15306_v7  ;;  %v15323_v2 = vadd.f32 %v6076_v12, %v14899_v54  ;;  %v15332_v3 = vpop.permute.xlu1 %6593 }
 0x646   : > { %v10327_v35 = vpop.eup %10326  ;;  %v6417_v51 = vmul.f32 0.01, %v6363_v8  ;;  %v6367_v62 = vmul.f32 0.6931472, %v10325_v47  ;;  %10352 = vlog2.f32 %v6329_v9  ;;  %vm6295_vm8 = vcmp.gt.f32.partialorder %v19042_v45, 20.0  ;;  %19043 = vst [vmem:[#allocation204_spill] sm:$0xff] %v15332_v3 }
 0x647   : > { %v10329_v17 = vpop.eup %10328  ;;  %10354 = vrcp.f32 %v6329_v9  ;;  %19038 = vst [vmem:[#allocation148_spill] sm:$0xff] %v15320_v46  ;;  %19039 = vst [vmem:[#allocation199_spill] sm:$0xff] %v15323_v2  ;;  %v6333_v9 = vadd.f32 1.0, %v15290_v11  ;;  %v6270_v7 = vmul.f32 1.442695, %v6211_v53  ;;  %v15335_v12 = vadd.f32 %v6149_v1, %v14899_v54  ;;  %v19048_v3 = vld [vmem:[#allocation101_spill] sm:$0xff] }
 0x648   : > { %v10331_v5 = vpop.eup %10330  ;;  %v15328_v47 = vsel %vm6289_vm14, %v19040_v18, %v6417_v51  ;;  %v6419_v8 = vmul.f32 0.01, %v6367_v62  ;;  %v6369_v37 = vmul.f32 0.6931472, %v10329_v17  ;;  %10356 = vlog2.f32 %v6331_v39 }
 0x649   : > { %19041 = vst [vmem:[#allocation201_spill] sm:$0xff] %v15328_v47  ;;  %v10333_v27 = vpop.eup %10332  ;;  %10358 = vrcp.f32 %v6331_v39  ;;  %19044 = vst [vmem:[#allocation179_spill] sm:$0xff] %v15335_v12  ;;  %v6491_v39 = vmul.f32 %v10323_v32, %v15164_v58  ;;  %vm6296_vm2 = vcmp.gt.f32.partialorder %v19047_v60, 20.0  ;;  %v15344_v53 = vmul.f32 1.442695, %v6212_v43  ;;  %v19050_v32 = vld [vmem:[#allocation187_spill] sm:$0xff]  ;;  %v15368_v58 = vpop.permute.xlu1 %6585 }
 0x64a   : > { %v10335_v19 = vpop.eup %10334  ;;  %v15340_v51 = vsel %vm6291_vm12, %v19045_v40, %v6419_v8  ;;  %v6420_v62 = vmul.f32 0.01, %v6369_v37  ;;  %v6373_v18 = vmul.f32 0.6931472, %v10333_v27  ;;  %10360 = vlog2.f32 %v6332_v0 }
 0x64b   : > { %19046 = vst [vmem:[#allocation152_spill] sm:$0xff] %v15340_v51  ;;  %v10337_v17 = vpop.eup %10336  ;;  %10362 = vrcp.f32 %v6332_v0  ;;  %v6214_v54 = vmin.f32 %v15320_v46, 20.0  ;;  %v6495_v8 = vmul.f32 %v10327_v35, %v15169_v13  ;;  %vm6298_vm0 = vcmp.gt.f32.partialorder %v19050_v32, 20.0  ;;  %v19051_v46 = vld [vmem:[#allocation154_spill] sm:$0xff] }
 0x64c   : > { %v10339_v1 = vpop.eup %10338  ;;  %v15350_v22 = vsel %vm6292_vm13, %v19048_v3, %v6420_v62  ;;  %v6422_v40 = vmul.f32 0.01, %v6373_v18  ;;  %v6371_v37 = vmul.f32 0.6931472, %v10337_v17  ;;  %10364 = vlog2.f32 %v6334_v16 }
 0x64d   : > { %19049 = vst [vmem:[#allocation146_spill] sm:$0xff] %v15350_v22  ;;  %v10341_v27 = vpop.eup %10340  ;;  %10366 = vrcp.f32 %v6334_v16  ;;  %v15357_v43 = vmul.f32 100.0, %v15323_v2  ;;  %v6497_v13 = vmul.f32 %v10331_v5, %v15177_v29  ;;  %vm6297_vm1 = vcmp.gt.f32.partialorder %v15078_v21, 20.0  ;;  %v19053_v22 = vld [vmem:[#allocation190_spill] sm:$0xff] }
 0x64e   : > { %v10343_v0 = vpop.eup %10342  ;;  %v15362_v3 = vsel %vm6294_vm9, %v19051_v46, %v6422_v40  ;;  %v6421_v62 = vmul.f32 0.01, %v6371_v37  ;;  %v6375_v18 = vmul.f32 0.6931472, %v10341_v27  ;;  %10368 = vlog2.f32 %v6333_v9  ;;  %v19055_v27 = vld [vmem:[#allocation161_spill] sm:$0xff] }
 0x64f   : > { %19052 = vst [vmem:[#allocation196_spill] sm:$0xff] %v15362_v3  ;;  %v10345_v17 = vpop.eup %10344  ;;  %10370 = vrcp.f32 %v6333_v9  ;;  %v6276_v16 = vmul.f32 1.442695, %v6214_v54  ;;  %v15378_v5 = vsel %vm6289_vm14, 1.0, %v6491_v39  ;;  %v15382_v9 = vsel %vm6291_vm12, 1.0, %v6495_v8 }
 0x650   : > { %v10347_v2 = vpop.eup %10346  ;;  %v15373_v46 = vsel %vm6293_vm4, %v19053_v22, %v6421_v62  ;;  %v6423_v40 = vmul.f32 0.01, %v6375_v18  ;;  %v6377_v37 = vmul.f32 0.6931472, %v10345_v17  ;;  %10372 = vpow2.f32 %v15297_v50  ;;  %v19057_v17 = vld [vmem:[#allocation195_spill] sm:$0xff] }
 0x651   : > { %19054 = vst [vmem:[#allocation173_spill] sm:$0xff] %v15373_v46  ;;  %v10349_v29 = vpop.eup %10348  ;;  %vm6299_vm3 = vcmp.gt.f32.partialorder %v15081_v10, 20.0  ;;  %10374 = vpow2.f32 %v15300_v15  ;;  %v6213_v22 = vmin.f32 %v15357_v43, 20.0  ;;  %v15395_v59 = vsel %vm6292_vm13, 1.0, %v6497_v13 }
 0x652   : > { %v10351_v54 = vpop.eup %10350  ;;  %v15390_v50 = vsel %vm6295_vm8, %v19055_v27, %v6423_v40  ;;  %v6424_v62 = vmul.f32 0.01, %v6377_v37  ;;  %v6381_v25 = vmul.f32 0.6931472, %v10349_v29  ;;  %10376 = vpow2.f32 %v15309_v52  ;;  %v15414_v27 = vpop.permute.xlu1 %6589 }
 0x653   : > { %19056 = vst [vmem:[#allocation28_spill] sm:$0xff] %v15390_v50  ;;  %v10353_v39 = vpop.eup %10352  ;;  %v6501_v8 = vmul.f32 %v10335_v19, %v15191_v20  ;;  %vm6300_vm10 = vcmp.gt.f32.partialorder %v15105_v42, 20.0  ;;  %10378 = vpow2.f32 %v15313_v56  ;;  %v15401_v15 = vmul.f32 100.0, %v15335_v12  ;;  %v19061_v12 = vld [vmem:[#allocation102_spill] sm:$0xff] }
 0x654   : > { %v10355_v18 = vpop.eup %10354  ;;  %v15406_v40 = vsel %vm6296_vm2, %v19057_v17, %v6424_v62  ;;  %v6426_v52 = vmul.f32 0.01, %v6381_v25  ;;  %v6379_v37 = vmul.f32 0.6931472, %v10353_v39  ;;  %10380 = vpow2.f32 %v6270_v7  ;;  %v19059_v62 = vld [vmem:[#allocation183_spill] sm:$0xff] }
 0x655   : > { %19058 = vst [vmem:[#allocation101_spill] sm:$0xff] %v15406_v40  ;;  %v10357_v13 = vpop.eup %10356  ;;  %v6499_v20 = vmul.f32 %v10339_v1, %v15200_v63  ;;  %v6503_v19 = vmul.f32 %v10343_v0, %v15210_v61  ;;  %vm6302_vm5 = vcmp.gt.f32.partialorder %v15111_v41, 20.0  ;;  %v6274_v56 = vmul.f32 1.442695, %v6213_v22 }
 0x656   : > { %v6215_v29 = vmin.f32 %v15401_v15, 20.0  ;;  %v10359_v35 = vpop.eup %10358  ;;  %v15419_v25 = vsel %vm6298_vm0, %v19059_v62, %v6426_v52  ;;  %v6425_v7 = vmul.f32 0.01, %v6379_v37  ;;  %v6383_v39 = vmul.f32 0.6931472, %v10357_v13 }
 0x657   : > { %19060 = vst [vmem:[#allocation187_spill] sm:$0xff] %v15419_v25  ;;  %10382 = vpow2.f32 %v15344_v53  ;;  %v10361_v63 = vpop.eup %10360  ;;  %v6505_v61 = vmul.f32 %v10347_v2, %v15231_v57  ;;  %v6509_v1 = vmul.f32 %v10351_v54, %v15246_v55  ;;  %v6507_v0 = vmul.f32 %v10355_v18, %v15253_v14  ;;  %v19063_v54 = vld [vmem:[#allocation140_spill] sm:$0xff] }
 0x658   : > { %vm6301_vm11 = vcmp.gt.f32.partialorder %v15138_v48, 20.0  ;;  %v6278_v22 = vmul.f32 1.442695, %v6215_v29  ;;  %v10363_v17 = vpop.eup %10362  ;;  %v15429_v52 = vsel %vm6297_vm1, %v19061_v12, %v6425_v7  ;;  %v6427_v37 = vmul.f32 0.01, %v6383_v39  ;;  %v19074_v48 = vld [vmem:[#allocation146_spill] sm:$0xff] }
 0x659   : > { %19062 = vst [vmem:[#allocation154_spill] sm:$0xff] %v15429_v52  ;;  %v6385_v13 = vmul.f32 0.6931472, %v10361_v63  ;;  %10384 = vpow2.f32 %v6276_v16  ;;  %v10365_v53 = vpop.eup %10364  ;;  %v15433_v57 = vsel %vm6294_vm9, 1.0, %v6501_v8  ;;  %v6511_v55 = vmul.f32 %v10359_v35, %v15260_v44  ;;  %v15442_v16 = vpop.permute.xlu0 %6577 }
 0x65a   : > { %v6513_v14 = vmul.f32 %v10363_v17, %v15271_v38  ;;  %10386 = vpow2.f32 %v6274_v56  ;;  %v10367_v2 = vpop.eup %10366  ;;  %v15440_v18 = vsel %vm6299_vm3, %v19063_v54, %v6427_v37  ;;  %v6389_v29 = vmul.f32 0.6931472, %v10365_v53  ;;  %v15460_v8 = vpop.permute.xlu1 %6581  ;;  %v19072_v37 = vld [vmem:[#allocation194_spill] sm:$0xff] }
 0x65b   : > { %19064 = vst [vmem:[#allocation190_spill] sm:$0xff] %v15440_v18  ;;  %v6428_v12 = vmul.f32 0.01, %v6385_v13  ;;  %10388 = vpow2.f32 %v6278_v22  ;;  %v10369_v62 = vpop.eup %10368  ;;  %v15446_v28 = vsel %vm6293_vm4, 1.0, %v6499_v20  ;;  %v15450_v44 = vsel %vm6295_vm8, 1.0, %v6503_v19 }
 0x65c   : > { %v15454_v38 = vsel %vm6296_vm2, 1.0, %v6505_v61  ;;  %v15458_v35 = vsel %vm6298_vm0, 1.0, %v6509_v1  ;;  %v10371_v56 = vpop.eup %10370  ;;  %v15464_v36 = vsel %vm6297_vm1, 1.0, %v6507_v0  ;;  %v6430_v20 = vmul.f32 0.01, %v6389_v29  ;;  %v19066_v61 = vld [vmem:[#allocation203_spill] sm:$0xff] }
 0x65d   : > { %v15469_v45 = vsel %vm6300_vm10, %v15075_v26, %v6428_v12  ;;  %v6387_v60 = vmul.f32 0.6931472, %v10369_v62  ;;  %v15471_v19 = vpop.eup %10372  ;;  %v15475_v32 = vsel %vm6299_vm3, 1.0, %v6511_v55  ;;  %v15481_v21 = vmul.f32 %v15442_v16, %v15174_v24  ;;  %v19070_v62 = vld [vmem:[#allocation189_spill] sm:$0xff] }
 0x65e   : > { %19065 = vst [vmem:[#allocation161_spill] sm:$0xff] %v15469_v45  ;;  %v15485_v39 = vmul.f32 %v15442_v16, %v15328_v47  ;;  %v15487_v26 = vpop.eup %10374  ;;  %v6556_v63 = vsel %vm6300_vm10, 1.0, %v6513_v14  ;;  %v15494_v10 = vsel %vm6302_vm5, %v19066_v61, %v6430_v20  ;;  %v6335_v0 = vadd.f32 1.0, %v15471_v19  ;;  %v15527_v20 = vpop.permute.xlu1 %6573  ;;  %v19073_v24 = vld [vmem:[#allocation121_spill] sm:$0xff]  ;;  %v19083_v47 = vld [vmem:[#allocation191_spill] sm:$0xff] }
 0x65f   : > { %19067 = vst [vmem:[#allocation195_spill] sm:$0xff] %v15494_v10  ;;  %v6429_v1 = vmul.f32 0.01, %v6387_v60  ;;  %v15497_v22 = vpop.eup %10376  ;;  %v6517_v17 = vmul.f32 %v10367_v2, %v15279_v34  ;;  %v6336_v13 = vadd.f32 1.0, %v15487_v26  ;;  %v15505_v42 = vmul.f32 %v15442_v16, %v15185_v6  ;;  %v15519_v2 = vpop.permute.xlu0 %6569  ;;  %v19071_v60 = vld [vmem:[#allocation193_spill] sm:$0xff] }
 0x660   : > { %v15507_v53 = vpop.eup %10378  ;;  %10390 = vlog2.f32 %v6335_v0  ;;  %v6338_v14 = vadd.f32 1.0, %v15497_v22  ;;  %v15517_v34 = vmul.f32 %v15442_v16, %v15340_v51  ;;  %19069 = vst [vmem:[#allocation102_spill] sm:$0xff] %v15519_v2  ;;  %v6515_v12 = vmul.f32 %v10371_v56, %v15290_v11 }
 0x661   : > { %v15512_v55 = vsel %vm6301_vm11, %v15097_v49, %v6429_v1  ;;  %v15521_v54 = vpop.eup %10380  ;;  %10392 = vrcp.f32 %v6335_v0  ;;  %v6337_v29 = vadd.f32 1.0, %v15507_v53  ;;  %v6600_v49 = vmul.f32 %v15519_v2, %v19070_v62 }
 0x662   : > { %19068 = vst [vmem:[#allocation183_spill] sm:$0xff] %v15512_v55  ;;  %10394 = vlog2.f32 %v6336_v13  ;;  %v6601_v61 = vmul.f32 %v15519_v2, %v19071_v60  ;;  %v6602_v1 = vmul.f32 %v15519_v2, %v15123_v31  ;;  %v6604_v7 = vmul.f32 %v15527_v20, %v19072_v37 }
 0x663   : > { %10396 = vrcp.f32 %v6336_v13  ;;  %v6339_v11 = vadd.f32 1.0, %v15521_v54  ;;  %v6605_v56 = vmul.f32 %v15527_v20, %v15153_v4  ;;  %v6606_v0 = vmul.f32 %v15527_v20, %v15145_v30 }
 0x664   : > { %v15535_v6 = vpop.eup %10382  ;;  %10398 = vlog2.f32 %v6338_v14  ;;  %v6603_v62 = vmul.f32 %v15519_v2, %v15132_v23  ;;  %v6607_v31 = vmul.f32 %v15527_v20, %v19073_v24  ;;  %v15546_v60 = vadd.f32 %v6604_v7, %v6600_v49 }
 0x665   : > { %v6557_v13 = vsel %vm6301_vm11, 1.0, %v6515_v12  ;;  %10400 = vrcp.f32 %v6338_v14  ;;  %v15552_v51 = vadd.f32 %v6605_v56, %v6601_v61  ;;  %v15554_v4 = vadd.f32 %v6606_v0, %v6602_v1 }
 0x666   : > { %v15548_v37 = vpop.eup %10384  ;;  %v6558_v23 = vsel %vm6302_vm5, 1.0, %v6517_v17  ;;  %10402 = vlog2.f32 %v6337_v29  ;;  %v6340_v24 = vadd.f32 1.0, %v15535_v6  ;;  %v15561_v7 = vadd.f32 %v6607_v31, %v6603_v62  ;;  %v19075_v17 = vld [vmem:[#allocation130_spill] sm:$0xff] }
 0x667   : > { %v15556_v30 = vpop.eup %10386  ;;  %10404 = vrcp.f32 %v6337_v29  ;;  %v15567_v14 = vmul.f32 %v15460_v8, %v19074_v48  ;;  %v15571_v12 = vmul.f32 %v15460_v8, %v15373_v46  ;;  %v15575_v41 = vmul.f32 %v15460_v8, %v15362_v3 }
 0x668   : > { %v15563_v49 = vpop.eup %10388  ;;  %vm6303_vm15 = vcmp.gt.f32.partialorder %v19075_v17, 20.0  ;;  %10406 = vlog2.f32 %v6339_v11  ;;  %v6342_v31 = vadd.f32 1.0, %v15548_v37  ;;  %v15581_v29 = vmul.f32 %v15460_v8, %v15390_v50  ;;  %v19082_v50 = vld [vmem:[#allocation180_spill] sm:$0xff] }
 0x669   : > { %v15584_v62 = vmul.f32 %v15414_v27, %v6557_v13  ;;  %10408 = vrcp.f32 %v6339_v11  ;;  %v6341_v61 = vadd.f32 1.0, %v15556_v30  ;;  %v15588_v1 = vmul.f32 %v15414_v27, %v6556_v63  ;;  %v19078_v11 = vld [vmem:[#allocation172_spill] sm:$0xff] }
 0x66a   : > { %19076 = vst [vmem:[#allocation140_spill] sm:$0xff] %v15581_v29  ;;  %v15591_v56 = vmul.f32 %v15414_v27, %v6558_v23  ;;  %10410 = vlog2.f32 %v6340_v24  ;;  %v6343_v0 = vadd.f32 1.0, %v15563_v49  ;;  %v15596_v3 = vmul.f32 %v15368_v58, %v15464_v36  ;;  %v19096_v17 = vld [vmem:[#allocation184_spill] sm:$0xff] }
 0x66b   : > { %v15600_v13 = vmul.f32 %v15460_v8, %v15446_v28  ;;  %vm6304_vm6 = vcmp.gt.f32.partialorder %v19078_v11, 20.0  ;;  %10412 = vrcp.f32 %v6340_v24  ;;  %v15605_v63 = vmul.f32 %v15368_v58, %v15454_v38 }
 0x66c   : > { %19077 = vst [vmem:[#allocation203_spill] sm:$0xff] %v15591_v56  ;;  %v15609_v23 = vmul.f32 %v15368_v58, %v15458_v35  ;;  %v15613_v48 = vmul.f32 %v15460_v8, %v15450_v44  ;;  %10414 = vlog2.f32 %v6342_v31  ;;  %v15619_v36 = vmul.f32 %v15368_v58, %v15475_v32  ;;  %v19087_v56 = vld [vmem:[#allocation192_spill] sm:$0xff] }
 0x66d   : > { %19079 = vst [vmem:[#allocation130_spill] sm:$0xff] %v15605_v63  ;;  %v15623_v24 = vmul.f32 %v15442_v16, %v15378_v5  ;;  %v10391_v38 = vpop.eup %10390  ;;  %vm6306_vm14 = vcmp.gt.f32.partialorder %v19082_v50, 20.0  ;;  %10416 = vrcp.f32 %v6342_v31  ;;  %v15632_v28 = vmul.f32 %v15442_v16, %v15382_v9  ;;  %v19085_v63 = vld [vmem:[#allocation88_spill] sm:$0xff]  ;;  %v19108_v50 = vld [vmem:[#allocation170_spill] sm:$0xff] }
 0x66e   : > { %19080 = vst [vmem:[#allocation172_spill] sm:$0xff] %v15609_v23  ;;  %v10393_v32 = vpop.eup %10392  ;;  %v6391_v46 = vmul.f32 0.6931472, %v10391_v38  ;;  %10418 = vlog2.f32 %v6341_v61  ;;  %v15638_v29 = vmul.f32 %v15442_v16, %v19083_v47  ;;  %vm6305_vm12 = vcmp.gt.f32.partialorder %v19085_v63, 20.0 }
 0x66f   : > { %19081 = vst [vmem:[#allocation207_spill] sm:$0xff] %v15623_v24  ;;  %v10395_v31 = vpop.eup %10394  ;;  %v6519_v44 = vmul.f32 %v10393_v32, %v15471_v19  ;;  %10420 = vrcp.f32 %v6341_v61  ;;  %v15646_v38 = vmul.f32 %v15460_v8, %v15395_v59  ;;  %v15650_v47 = vmul.f32 %v15442_v16, %v19087_v56  ;;  %v19089_v32 = vld [vmem:[#allocation41_spill] sm:$0xff] }
 0x670   : > { %19084 = vst [vmem:[#allocation180_spill] sm:$0xff] %v15638_v29  ;;  %v10397_v35 = vpop.eup %10396  ;;  %v6431_v23 = vmul.f32 0.01, %v6391_v46  ;;  %v6393_v5 = vmul.f32 0.6931472, %v10395_v31  ;;  %10422 = vlog2.f32 %v6343_v0  ;;  %vm6307_vm13 = vcmp.gt.f32.partialorder %v19089_v32, 20.0 }
 0x671   : > { %19086 = vst [vmem:[#allocation191_spill] sm:$0xff] %v15646_v38  ;;  %19088 = vst [vmem:[#allocation88_spill] sm:$0xff] %v15650_v47  ;;  %v10399_v24 = vpop.eup %10398  ;;  %v6559_v19 = vsel %vm6303_vm15, 1.0, %v6519_v44  ;;  %v6521_v61 = vmul.f32 %v10397_v35, %v15487_v26  ;;  %10424 = vrcp.f32 %v6343_v0  ;;  %v15658_v59 = vmul.f32 %v15460_v8, %v15433_v57  ;;  %v19091_v31 = vld [vmem:[#allocation205_spill] sm:$0xff]  ;;  %v19093_v47 = vld [vmem:[#allocation160_spill] sm:$0xff] }
 0x672   : > { %v10401_v46 = vpop.eup %10400  ;;  %v15663_v9 = vsel %vm6303_vm15, %v19091_v31, %v6431_v23  ;;  %v6432_v16 = vmul.f32 0.01, %v6393_v5  ;;  %v6397_v56 = vmul.f32 0.6931472, %v10399_v24  ;;  %vm6308_vm9 = vcmp.gt.f32.partialorder %v19093_v47, 20.0  ;;  %v19094_v44 = vld [vmem:[#allocation43_spill] sm:$0xff] }
 0x673   : > { %19090 = vst [vmem:[#allocation192_spill] sm:$0xff] %v15658_v59  ;;  %19092 = vst [vmem:[#allocation41_spill] sm:$0xff] %v15663_v9  ;;  %v15668_v26 = vmul.f32 %v15519_v2, %v19094_v44  ;;  %v10403_v35 = vpop.eup %10402  ;;  %v6525_v0 = vmul.f32 %v10401_v46, %v15497_v22  ;;  %v15672_v57 = vmul.f32 %v15414_v27, %v6559_v19  ;;  %v19098_v5 = vld [vmem:[#allocation127_spill] sm:$0xff]  ;;  %v6560_v44 = vsel %vm6304_vm6, 1.0, %v6521_v61  ;;  %v19100_v19 = vld [vmem:[#allocation148_spill] sm:$0xff] }
 0x674   : > { %v15678_v23 = vmul.f32 %v15527_v20, %v19096_v17  ;;  %v10405_v24 = vpop.eup %10404  ;;  %v15683_v31 = vsel %vm6304_vm6, %v19098_v5, %v6432_v16  ;;  %v6434_v22 = vmul.f32 0.01, %v6397_v56  ;;  %v6395_v46 = vmul.f32 0.6931472, %v10403_v35  ;;  %v19101_v29 = vld [vmem:[#allocation139_spill] sm:$0xff]  ;;  %v19103_v38 = vld [vmem:[#allocation144_spill] sm:$0xff] }
 0x675   : > { %19095 = vst [vmem:[#allocation205_spill] sm:$0xff] %v15668_v26  ;;  %19099 = vst [vmem:[#allocation43_spill] sm:$0xff] %v15683_v31  ;;  %vm6310_vm4 = vcmp.gt.f32.partialorder %v19100_v19, 20.0  ;;  %v10407_v26 = vpop.eup %10406  ;;  %v6523_v8 = vmul.f32 %v10405_v24, %v15507_v53  ;;  %v15691_v17 = vmul.f32 %v15519_v2, %v19101_v29  ;;  %v15699_v16 = vmul.f32 %v15368_v58, %v15406_v40  ;;  %v19105_v61 = vld [vmem:[#allocation168_spill] sm:$0xff] }
 0x676   : > { %19097 = vst [vmem:[#allocation160_spill] sm:$0xff] %v15678_v23  ;;  %v15695_v23 = vmul.f32 %v15527_v20, %v19103_v38  ;;  %v10409_v11 = vpop.eup %10408  ;;  %v15704_v56 = vsel %vm6306_vm14, %v19105_v61, %v6434_v22  ;;  %v6562_v53 = vsel %vm6306_vm14, 1.0, %v6525_v0  ;;  %v6433_v35 = vmul.f32 0.01, %v6395_v46  ;;  %v19107_v5 = vld [vmem:[#allocation204_spill] sm:$0xff] }
 0x677   : > { %19102 = vst [vmem:[#allocation184_spill] sm:$0xff] %v15691_v17  ;;  %19106 = vst [vmem:[#allocation148_spill] sm:$0xff] %v15704_v56  ;;  %v6399_v29 = vmul.f32 0.6931472, %v10407_v26  ;;  %vm6309_vm8 = vcmp.gt.f32.partialorder %v15357_v43, 20.0  ;;  %v10411_v24 = vpop.eup %10410  ;;  %v6527_v38 = vmul.f32 %v10409_v11, %v15521_v54  ;;  %v15717_v22 = vmul.f32 %v15368_v58, %v15429_v52  ;;  %v19115_v43 = vld [vmem:[#allocation179_spill] sm:$0xff] }
 0x678   : > { %19104 = vst [vmem:[#allocation127_spill] sm:$0xff] %v15695_v23  ;;  %v15711_v23 = vmul.f32 %v19107_v5, %v6560_v44  ;;  %v10413_v61 = vpop.eup %10412  ;;  %v15722_v26 = vsel %vm6305_vm12, %v19108_v50, %v6433_v35  ;;  %v6561_v0 = vsel %vm6305_vm12, 1.0, %v6523_v8  ;;  %v6401_v46 = vmul.f32 0.6931472, %v10411_v24  ;;  %v19109_v8 = vld [vmem:[#allocation186_spill] sm:$0xff] }
 0x679   : > { %v6435_v54 = vmul.f32 0.01, %v6399_v29  ;;  %vm6311_vm2 = vcmp.gt.f32.partialorder %v15401_v15, 20.0  ;;  %v10415_v44 = vpop.eup %10414  ;;  %v6529_v11 = vmul.f32 %v10413_v61, %v15535_v6  ;;  %v15729_v40 = vmul.f32 %v19107_v5, %v6562_v53 }
 0x67a   : > { %v15733_v17 = vmul.f32 %v15368_v58, %v15419_v25  ;;  %v15737_v35 = vmul.f32 %v15368_v58, %v15440_v18  ;;  %v10417_v63 = vpop.eup %10416  ;;  %v6436_v24 = vmul.f32 0.01, %v6401_v46  ;;  %v6405_v50 = vmul.f32 0.6931472, %v10415_v44  ;;  %v19226_v18 = vld [vmem:[#allocation16_spill] sm:$0xff] }
 0x67b   : > { %v15742_v29 = vsel %vm6307_vm13, %v19109_v8, %v6435_v54  ;;  %v15746_v6 = vmul.f32 %v15414_v27, %v15469_v45  ;;  %v10419_v53 = vpop.eup %10418  ;;  %v6563_v61 = vsel %vm6307_vm13, 1.0, %v6527_v38  ;;  %v6564_v58 = vsel %vm6308_vm9, 1.0, %v6529_v11  ;;  %v19110_v54 = vld [vmem:[#allocation188_spill] sm:$0xff] }
 0x67c   : > { %v6533_v25 = vmul.f32 %v10417_v63, %v15548_v37  ;;  %v6719_v2 = vmul.f32 %v19107_v5, %v6561_v0  ;;  %v10421_v59 = vpop.eup %10420  ;;  %v15757_v46 = vsel %vm6308_vm9, %v19110_v54, %v6436_v24  ;;  %v6438_v44 = vmul.f32 0.01, %v6405_v50  ;;  %v19112_v63 = vld [vmem:[#allocation197_spill] sm:$0xff] }
 0x67d   : > { %19111 = vst [vmem:[#allocation139_spill] sm:$0xff] %v15757_v46  ;;  %v6403_v8 = vmul.f32 0.6931472, %v10419_v53  ;;  %v6621_v45 = vmul.f32 %v15414_v27, %v15512_v55  ;;  %v10423_v32 = vpop.eup %10422  ;;  %v6531_v0 = vmul.f32 %v10421_v59, %v15556_v30  ;;  %v6622_v11 = vmul.f32 %v15414_v27, %v15494_v10  ;;  %v19114_v10 = vld [vmem:[#allocation199_spill] sm:$0xff] }
 0x67e   : > { %v6566_v37 = vsel %vm6310_vm4, 1.0, %v6533_v25  ;;  %v10425_v47 = vpop.eup %10424  ;;  %v15771_v24 = vsel %vm6310_vm4, %v19112_v63, %v6438_v44  ;;  %v6407_v53 = vmul.f32 0.6931472, %v10423_v32  ;;  %v6722_v54 = vmul.f32 %v15408_v33, %v6564_v58  ;;  %v19231_v55 = vld [vmem:[#allocation59_spill] sm:$0xff] }
 0x67f   : > { %19113 = vst [vmem:[#allocation144_spill] sm:$0xff] %v15771_v24  ;;  %v6437_v50 = vmul.f32 0.01, %v6403_v8  ;;  %v6565_v25 = vsel %vm6309_vm8, 1.0, %v6531_v0  ;;  %v6535_v30 = vmul.f32 %v10425_v47, %v15563_v49  ;;  %v6724_v59 = vmul.f32 %v15408_v33, %v6566_v37 }
 0x680   : > { %v6439_v44 = vmul.f32 0.01, %v6407_v53  ;;  %v6723_v8 = vmul.f32 %v15408_v33, %v6565_v25  ;;  %v6721_v58 = vmul.f32 %v19107_v5, %v6563_v61  ;;  %v6623_v0 = vmul.f32 %v15414_v27, %v15663_v9 }
 0x681   : > { %v15783_v19 = vsel %vm6309_vm8, %v19114_v10, %v6437_v50  ;;  %v6567_v32 = vsel %vm6311_vm2, 1.0, %v6535_v30  ;;  %v6624_v49 = vmul.f32 %v19107_v5, %v15683_v31  ;;  %v6625_v37 = vmul.f32 %v19107_v5, %v15722_v26 }
 0x682   : > { %v15798_v10 = vsel %vm6311_vm2, %v19115_v43, %v6439_v44  ;;  %v6739_v47 = vpack.c.bf16 %v6723_v8, %v6719_v2  ;;  %v6725_v61 = vmul.f32 %v15408_v33, %v6567_v32  ;;  %v6738_v63 = vpack.c.bf16 %v6722_v54, %v15711_v23 }
 0x683   : > { %v6740_v50 = vpack.c.bf16 %v6724_v59, %v15729_v40  ;;  %v6626_v27 = vmul.f32 %v19107_v5, %v15704_v56  ;;  %v6633_v53 = vadd.f32 %v15546_v60, %v15481_v21  ;;  %v6646_v25 = vadd.f32 %v15552_v51, %v15485_v39  ;;  %v19116_v60 = vld [vmem:[#allocation178_spill] sm:$0xff] }
 0x684   : > { %6790 = vmatprep.subr.bf16.mxu0 %v6739_v47  ;;  %v6741_v15 = vpack.c.bf16 %v6725_v61, %v6721_v58  ;;  %v6627_v2 = vmul.f32 %v19107_v5, %v15742_v29  ;;  %v6659_v30 = vadd.f32 %v15554_v4, %v15505_v42  ;;  %v6672_v40 = vadd.f32 %v15561_v7, %v15517_v34  ;;  %v19119_v7 = vld [vmem:[#allocation140_spill] sm:$0xff]  ;;  %v19121_v58 = vld [vmem:[#allocation114_spill] sm:$0xff] }
 0x685   : > { %6791 = vmatpush1.bf16.msra.mxu0 %v6738_v63  ;;  %v6628_v23 = vmul.f32 %v15408_v33, %v15757_v46  ;;  %v6629_v21 = vmul.f32 %v15408_v33, %v15783_v19  ;;  %v6634_v51 = vadd.f32 %v6633_v53, %v15567_v14  ;;  %v6647_v39 = vadd.f32 %v6646_v25, %v15571_v12 }
 0x686   : > { %v6542_v5 = vsel %vm6286_vm7, 1.0, %v19116_v60  ;;  %6863 = vmatprep.subr.bf16.mxu1 %v6741_v15  ;;  %v19118_v4 = vpack.c.bf16 %v15584_v62, %v15596_v3  ;;  %v6630_v42 = vmul.f32 %v15408_v33, %v15771_v24  ;;  %v6660_v34 = vadd.f32 %v6659_v30, %v15575_v41  ;;  %v19221_v60 = vld [vmem:[#allocation128_spill] sm:$0xff] }
 0x687   : > { %v6673_v59 = vadd.f32 %v6672_v40, %v19119_v7  ;;  %6864 = vmatpush1.bf16.msra.mxu1 %v6740_v50  ;;  %v6631_v14 = vmul.f32 %v15408_v33, %v15798_v10  ;;  %v6635_v12 = vadd.f32 %v6634_v51, %v15699_v16  ;;  %v6648_v44 = vadd.f32 %v6647_v39, %v15717_v22  ;;  %v19122_v16 = vld [vmem:[#allocation130_spill] sm:$0xff]  ;;  %v19191_v7 = vld [vmem:[#allocation185_spill] sm:$0xff]  ;;  %v19225_v50 = vld [vmem:[#allocation63_spill] sm:$0xff] }
 0x688   : > { %6792 = vmatprep.subr.bf16.mxu0 %v19118_v4  ;;  %v19120_v3 = vpack.c.bf16 %v15672_v57, %v15619_v36  ;;  %v6661_v62 = vadd.f32 %v6660_v34, %v15733_v17  ;;  %v6698_v32 = vmul.f32 %v15527_v20, %v19121_v58  ;;  %v19123_v22 = vpack.c.bf16 %v15588_v1, %v19122_v16  ;;  %v19124_v17 = vld [vmem:[#allocation207_spill] sm:$0xff] }
 0x689   : > { %v6674_v41 = vadd.f32 %v6673_v59, %v15737_v35  ;;  %v6636_v43 = vadd.f32 %v6635_v12, %v15746_v6  ;;  %v6649_v47 = vadd.f32 %v6648_v44, %v6621_v45  ;;  %v19125_v35 = vpack.c.bf16 %v15600_v13, %v19124_v17  ;;  %v19130_v6 = vld [vmem:[#allocation203_spill] sm:$0xff]  ;;  %v19131_v45 = vld [vmem:[#allocation172_spill] sm:$0xff]  ;;  %v19140_v44 = vld [vmem:[#allocation205_spill] sm:$0xff] }
 0x68a   : > { %6865 = vmatprep.subr.bf16.mxu1 %v19120_v3  ;;  %6793 = vmatpush1.bf16.msra.mxu0 %v19123_v22  ;;  %v6662_v61 = vadd.f32 %v6661_v62, %v6622_v11  ;;  %v19132_v40 = vpack.c.bf16 %v19130_v6, %v19131_v45  ;;  %v19137_v11 = vpack.c.bf16 %v15613_v48, %v15632_v28  ;;  %v19139_v59 = vld [vmem:[#allocation192_spill] sm:$0xff]  ;;  %v19148_v17 = vld [vmem:[#allocation102_spill] sm:$0xff]  ;;  %v19150_v6 = vld [vmem:[#allocation127_spill] sm:$0xff]  ;;  %vm19154_vm7 = vcmask 523264  }
 0x68b   : > { %6794 = vmatprep.subr.bf16.mxu0 %v19125_v35  ;;  %v6675_v63 = vadd.f32 %v6674_v41, %v6623_v0  ;;  %v6637_v51 = vadd.f32 %v6636_v43, %v6624_v49  ;;  %v6650_v39 = vadd.f32 %v6649_v47, %v6625_v37  ;;  %v19138_v0 = vld [vmem:[#allocation88_spill] sm:$0xff]  ;;  %v19142_v49 = vld [vmem:[#allocation191_spill] sm:$0xff]  ;;  %v19147_v47 = vld [vmem:[#allocation166_spill] sm:$0xff]  ;;  %v6700_v28 = vmul.f32 %v15527_v20, %v6542_v5 }
 0x68c   : > { %6866 = vmatpush1.bf16.msra.mxu1 %v19132_v40  ;;  %v6732_v12 = vpack.c.bf16 %v19139_v59, %v19138_v0  ;;  %v19141_v3 = vld [vmem:[#allocation160_spill] sm:$0xff]  ;;  %v6663_v41 = vadd.f32 %v6662_v61, %v6626_v27  ;;  %v6694_v48 = vmul.f32 %v19148_v17, %v19147_v47  ;;  %v19153_v61 = vld [vmem:[#allocation163_spill] sm:$0xff]  ;;  %v19155_v5 = vmov 0   ;;  %vm19156_vm0 = vmmov %vm19154_vm7 }
 0x68d   : > { %6867 = vmatprep.subr.bf16.mxu1 %v19137_v11  ;;  %v6727_v62 = vpack.c.bf16 %v19141_v3, %v19140_v44  ;;  %v6676_v58 = vadd.f32 %v6675_v63, %v6627_v2  ;;  %v19143_v37 = vld [vmem:[#allocation180_spill] sm:$0xff]  ;;  %v15878_v22 = vadd.f32 %v6637_v51, %v6628_v23  ;;  %v15880_v43 = vadd.f32 %v6650_v39, %v6629_v21  ;;  %v9599_v21 = vld [vmem:[%s17526_s1 + $0x108] sm:$0xff]   ;;  %vm19157_vm1 = vmmov %vm19156_vm0 }
 0x68e   : > { %v19144_v16 = vpack.c.bf16 %v19142_v49, %v19143_v37  ;;  %v19149_v35 = vld [vmem:[#allocation184_spill] sm:$0xff]  ;;  %v15887_v40 = vadd.f32 %v6663_v41, %v6630_v42  ;;  %v6726_v2 = vpack.c.bf16 %v6698_v32, %v6694_v48  ;;  %v6696_v23 = vmul.f32 %v19148_v17, %v19153_v61  ;;  %v9600_v42 = vld [vmem:[%s17526_s1 + $0x110] sm:$0xff]   ;;  %vm19158_vm3 = vmmov %vm19156_vm0 }
 0x68f   : > { %19145 = vst [vmem:[#allocation168_spill] sm:$0xff] %v15878_v22  ;;  %19146 = vst [vmem:[#allocation204_spill] sm:$0xff] %v15880_v43  ;;  %v6729_v45 = vpack.c.bf16 %v19150_v6, %v19149_v35  ;;  %v15889_v27 = vadd.f32 %v6676_v58, %v6631_v14  ;;  %v9601_v14 = vld [vmem:[%s17526_s1 + $0x118] sm:$0xff]   ;;  %v9602_v32 = vld [vmem:[%s17526_s1 + $0x120] sm:$0xff]  }
 0x690   : > { %6795 = vmatpush1.bf16.msra.mxu0 %v19144_v16  ;;  %19151 = vst [vmem:[#allocation170_spill] sm:$0xff] %v15887_v40  ;;  %6868 = vmatpush1.bf16.msra.mxu1 %v6732_v12  ;;  %v6728_v20 = vpack.c.bf16 %v6700_v28, %v6696_v23  ;;  %vm19159_vm10 = vmmov %vm19156_vm0  ;;  %v19163_v63 = vld [vmem:[#allocation150_spill] sm:$0xff]  ;;  %v19166_v58 = vld [vmem:[#allocation153_spill] sm:$0xff] }
 0x691   : > { %6796 = vmatprep.subr.bf16.mxu0 %v6727_v62  ;;  %19152 = vst [vmem:[#allocation186_spill] sm:$0xff] %v15889_v27  ;;  %6869 = vmatprep.subr.bf16.mxu1 %v6729_v45  ;;  %vm19160_vm5 = vmmov %vm19156_vm0  ;;  %10426 = vrcp.f32 %v19163_v63  ;;  %v19164_v51 = vld [vmem:[#allocation182_spill] sm:$0xff]  ;;  %v19167_v37 = vld [vmem:[#allocation165_spill] sm:$0xff] }
 0x692   : > { %vm19161_vm11 = vmmov %vm19156_vm0  ;;  %10428 = vrcp.f32 %v19164_v51  ;;  %v19165_v62 = vld [vmem:[#allocation162_spill] sm:$0xff]  ;;  %v19168_v48 = vld [vmem:[#allocation105_spill] sm:$0xff] }
 0x693   : > { %vm19162_vm15 = vmmov %vm19156_vm0  ;;  %v19169_v6 = vld [vmem:[#allocation176_spill] sm:$0xff]  ;;  %v19173_v63 = vld [vmem:[#allocation167_spill] sm:$0xff] }
 0x694   : > { %6797 = vmatpush1.bf16.msra.mxu0 %v6726_v2  ;;  %6870 = vmatpush1.bf16.msra.mxu1 %v6728_v20  ;;  %v19170_v2 = vld [vmem:[#allocation48_spill] sm:$0xff]  ;;  %vm19201_vm12 = vmmov %vm19156_vm0  ;;  %v19220_v22 = vld [vmem:[#allocation134_spill] sm:$0xff] }
 0x695   : > { %vm19202_vm13 = vmmov %vm19156_vm0  ;;  %v19218_v27 = vld [vmem:[#allocation116_spill] sm:$0xff] }
 0x696   : > { %vm19203_vm9 = vmmov %vm19156_vm0 }
 0x697   : > { %9337 = vmatmul.mubr.msk.bf16.vlgmr.msra.gmra.mxu0 %vm19154_vm7, %v9599_v21  ;;  %9341 = vmatmul.mubr.msk.bf16.vlgmr.msra.gmra.mxu1 %vm19156_vm0, %v9599_v21  ;;  %v19171_v21 = vld [vmem:[#allocation143_spill] sm:$0xff]  ;;  %vm19204_vm4 = vmmov %vm19156_vm0 }
 0x698   : > { %6824 = vmatprep.mubr.bf16.mxu0 %v19155_v5  ;;  %6897 = vmatprep.mubr.bf16.mxu1 %v19155_v5  ;;  %vm19205_vm8 = vmmov %vm19156_vm0 }
 0x699   : > { %vm19206_vm2 = vmmov %vm19156_vm0 }
 0x69a   : > { %vm19207_vm7 = vmmov %vm19156_vm0 }
 0x69e   : > { %v10427_v59 = vpop.eup %10426 }
 0x69f   : > { %9338 = vmatmul.mubr.msk.bf16.gmra.mxu0 %vm19157_vm1, %v9600_v42  ;;  %9342 = vmatmul.mubr.msk.bf16.gmra.mxu1 %vm19158_vm3, %v9600_v42  ;;  %v10429_v3 = vpop.eup %10428  ;;  %v5839_v20 = vmul.f32 %v10427_v59, %v19171_v21  ;;  %v19181_v21 = vld [vmem:[#allocation132_spill] sm:$0xff]  ;;  %vm19247_vm3 = vmmov %vm19156_vm0 }
 0x6a0   : > { %6834 = vmatprep.mubr.bf16.mxu0 %v19155_v5  ;;  %6907 = vmatprep.mubr.bf16.mxu1 %v19155_v5 }
 0x6a7   : > { %9339 = vmatmul.mubr.msk.bf16.gmra.mxu0 %vm19159_vm10, %v9601_v14  ;;  %9343 = vmatmul.mubr.msk.bf16.gmra.mxu1 %vm19160_vm5, %v9601_v14  ;;  %v19172_v14 = vld [vmem:[#allocation64_spill] sm:$0xff]  ;;  %vm19248_vm10 = vmmov %vm19156_vm0 }
 0x6a8   : > { %6844 = vmatprep.mubr.bf16.mxu0 %v19155_v5  ;;  %6917 = vmatprep.mubr.bf16.mxu1 %v19155_v5  ;;  %vm19249_vm5 = vmmov %vm19156_vm0 }
 0x6af   : > { %9340 = vmatmul.mubr.msk.bf16.gmra.mxu0 %vm19161_vm11, %v9602_v32  ;;  %9344 = vmatmul.mubr.msk.bf16.gmra.mxu1 %vm19162_vm15, %v9602_v32  ;;  %v5843_v32 = vmul.f32 %v10429_v3, %v19172_v14  ;;  %vm19250_vm11 = vmmov %vm19156_vm0 }
 0x6b0   : > { %7048 = vmatprep.mubr.bf16.mxu0 %v19155_v5  ;;  %7121 = vmatprep.mubr.bf16.mxu1 %v19155_v5  ;;  %vm19251_vm15 = vmmov %vm19156_vm0 }
 0x757   : > { %v6816_v39 = vpop.f32.mrf.mxu0  ;;  %v6889_v11 = vpop.f32.mrf.mxu1 }
 0x758   : > { %v6928_v41 = vmul.f32 %v6816_v39, %v19165_v62  ;;  %v6930_v16 = vmul.f32 %v6889_v11, %v19167_v37 }
 0x759   : > { %v6818_v0 = vpop.f32.mrf.mxu0  ;;  %v6891_v12 = vpop.f32.mrf.mxu1 }
 0x75a   : > { %v6929_v28 = vmul.f32 %v6818_v0, %v19168_v48  ;;  %v6931_v51 = vmul.f32 %v6891_v12, %v19173_v63  ;;  %v19177_v48 = vld [vmem:[#allocation164_spill] sm:$0xff]  ;;  %v19179_v12 = vld [vmem:[#allocation15_spill] sm:$0xff]  ;;  %v19182_v63 = vld [vmem:[#allocation157_spill] sm:$0xff] }
 0x75b   : > { %v6820_v44 = vpop.f32.mrf.mxu0  ;;  %v6893_v47 = vpop.f32.mrf.mxu1  ;;  %vm19178_vm14 = vcmp.gt.f32.partialorder %v19177_v48, 20.0 }
 0x75c   : > { %v6932_v49 = vmul.f32 %v6820_v44, %v19166_v58  ;;  %v6934_v45 = vmul.f32 %v6893_v47, %v19169_v6  ;;  %v19174_v44 = vld [vmem:[#allocation158_spill] sm:$0xff]  ;;  %v5896_v3 = vsel %vm19178_vm14, 1.0, %v5843_v32  ;;  %vm19253_vm14 = vmmov %vm19156_vm0 }
 0x75d   : > { %v6822_v17 = vpop.f32.mrf.mxu0  ;;  %v6895_v23 = vpop.f32.mrf.mxu1 }
 0x75e   : > { %v15927_v35 = vpack.c.bf16 %v6932_v49, %v6928_v41  ;;  %v6933_v61 = vmul.f32 %v6822_v17, %v19170_v2  ;;  %v15934_v39 = vpack.c.bf16 %v6934_v45, %v6930_v16  ;;  %v6935_v0 = vmul.f32 %v6895_v23, %v19174_v44  ;;  %v19175_v49 = vld [vmem:[#allocation68_spill] sm:$0xff]  ;;  %v19180_v2 = vld [vmem:[#allocation169_spill] sm:$0xff] }
 0x75f   : > { %v6826_v42 = vpop.f32.mrf.mxu0  ;;  %v6899_v62 = vpop.f32.mrf.mxu1  ;;  %vm19176_vm6 = vcmp.gt.f32.partialorder %v19175_v49, 20.0 }
 0x760   : > { %v15936_v11 = vpack.c.bf16 %v6933_v61, %v6929_v28  ;;  %v15939_v58 = vpack.c.bf16 %v6935_v0, %v6931_v51  ;;  %v5894_v37 = vsel %vm19176_vm6, 1.0, %v5839_v20  ;;  %v6938_v6 = vmul.f32 %v6899_v62, %v5896_v3  ;;  %v19183_v0 = vld [vmem:[#allocation151_spill] sm:$0xff]  ;;  %vm19252_vm6 = vmmov %vm19156_vm0 }
 0x761   : > { %v6828_v41 = vpop.f32.mrf.mxu0  ;;  %v6901_v47 = vpop.f32.mrf.mxu1  ;;  %v6936_v17 = vmul.f32 %v6826_v42, %v5894_v37  ;;  %v19184_v37 = vld [vmem:[#allocation171_spill] sm:$0xff] }
 0x762   : > { %v6937_v61 = vmul.f32 %v6828_v41, %v19180_v2  ;;  %v6939_v42 = vmul.f32 %v6901_v47, %v19183_v0  ;;  %v19187_v2 = vld [vmem:[#allocation174_spill] sm:$0xff] }
 0x763   : > { %v6830_v59 = vpop.f32.mrf.mxu0  ;;  %v6903_v28 = vpop.f32.mrf.mxu1  ;;  %v19190_v0 = vld [vmem:[#allocation206_spill] sm:$0xff] }
 0x764   : > { %v6940_v16 = vmul.f32 %v6830_v59, %v19179_v12  ;;  %v6942_v14 = vmul.f32 %v6903_v28, %v19181_v21  ;;  %v19185_v12 = vld [vmem:[#allocation175_spill] sm:$0xff] }
 0x765   : > { %v6832_v45 = vpop.f32.mrf.mxu0  ;;  %v6905_v20 = vpop.f32.mrf.mxu1  ;;  %v19186_v28 = vld [vmem:[#allocation47_spill] sm:$0xff] }
 0x766   : > { %v15947_v23 = vpack.c.bf16 %v6940_v16, %v6936_v17  ;;  %v6941_v51 = vmul.f32 %v6832_v45, %v19182_v63  ;;  %v15952_v49 = vpack.c.bf16 %v6942_v14, %v6938_v6  ;;  %v6943_v62 = vmul.f32 %v6905_v20, %v19184_v37  ;;  %v19188_v6 = vld [vmem:[#allocation123_spill] sm:$0xff] }
 0x767   : > { %v6836_v44 = vpop.f32.mrf.mxu0  ;;  %v6909_v59 = vpop.f32.mrf.mxu1 }
 0x768   : > { %v15954_v32 = vpack.c.bf16 %v6941_v51, %v6937_v61  ;;  %v15957_v3 = vpack.c.bf16 %v6943_v62, %v6939_v42  ;;  %v6944_v16 = vmul.f32 %v6836_v44, %v19185_v12  ;;  %v6946_v21 = vmul.f32 %v6909_v59, %v19187_v2  ;;  %v19189_v51 = vld [vmem:[#allocation122_spill] sm:$0xff] }
 0x769   : > { %v6838_v48 = vpop.f32.mrf.mxu0  ;;  %v6911_v41 = vpop.f32.mrf.mxu1 }
 0x76a   : > { %v6945_v14 = vmul.f32 %v6838_v48, %v19188_v6  ;;  %v6947_v4 = vmul.f32 %v6911_v41, %v19191_v7  ;;  %v19194_v6 = vld [vmem:[#allocation156_spill] sm:$0xff]  ;;  %v19196_v41 = vld [vmem:[#allocation115_spill] sm:$0xff] }
 0x76b   : > { %v6840_v17 = vpop.f32.mrf.mxu0  ;;  %v6913_v63 = vpop.f32.mrf.mxu1 }
 0x76c   : > { %v6948_v45 = vmul.f32 %v6840_v17, %v19186_v28  ;;  %v6950_v20 = vmul.f32 %v6913_v63, %v19189_v51  ;;  %v19192_v17 = vld [vmem:[#allocation181_spill] sm:$0xff]  ;;  %v19195_v51 = vld [vmem:[#allocation103_spill] sm:$0xff] }
 0x76d   : > { %v6842_v47 = vpop.f32.mrf.mxu0  ;;  %v6915_v42 = vpop.f32.mrf.mxu1 }
 0x76e   : > { %v15963_v61 = vpack.c.bf16 %v6948_v45, %v6944_v16  ;;  %v6949_v37 = vmul.f32 %v6842_v47, %v19190_v0  ;;  %v15968_v30 = vpack.c.bf16 %v6950_v20, %v6946_v21  ;;  %v6951_v59 = vmul.f32 %v6915_v42, %v19192_v17  ;;  %v19193_v45 = vld [vmem:[#allocation124_spill] sm:$0xff]  ;;  %v19197_v20 = vld [vmem:[#allocation142_spill] sm:$0xff]  ;;  %v19198_v42 = vld [vmem:[#allocation109_spill] sm:$0xff] }
 0x76f   : > { %v6846_v62 = vpop.f32.mrf.mxu0  ;;  %v6919_v12 = vpop.f32.mrf.mxu1 }
 0x770   : > { %v15970_v44 = vpack.c.bf16 %v6949_v37, %v6945_v14  ;;  %v15973_v2 = vpack.c.bf16 %v6951_v59, %v6947_v4  ;;  %v6952_v63 = vmul.f32 %v6846_v62, %v19193_v45  ;;  %v6954_v0 = vmul.f32 %v6919_v12, %v19195_v51  ;;  %v19199_v59 = vld [vmem:[#allocation74_spill] sm:$0xff] }
 0x771   : > { %v6848_v28 = vpop.f32.mrf.mxu0  ;;  %v6921_v48 = vpop.f32.mrf.mxu1 }
 0x772   : > { %v6953_v21 = vmul.f32 %v6848_v28, %v19196_v41  ;;  %v6955_v57 = vmul.f32 %v6921_v48, %v19199_v59  ;;  %v9605_v28 = vld [vmem:[%s17526_s1 + $0x138] sm:$0xff]   ;;  %v9606_v48 = vld [vmem:[%s17526_s1 + $0x140] sm:$0xff]   ;;  %v19211_v59 = vld [vmem:[#allocation82_spill] sm:$0xff] }
 0x773   : > { %v6850_v16 = vpop.f32.mrf.mxu0  ;;  %v6923_v25 = vpop.f32.mrf.mxu1 }
 0x774   : > { %v6956_v47 = vmul.f32 %v6850_v16, %v19194_v6  ;;  %v6958_v37 = vmul.f32 %v6923_v25, %v19197_v20  ;;  %v19200_v16 = vld [vmem:[#allocation177_spill] sm:$0xff]  ;;  %v9604_v25 = vld [vmem:[%s17526_s1 + $0x130] sm:$0xff]  }
 0x775   : > { %v6852_v7 = vpop.f32.mrf.mxu0  ;;  %v6925_v4 = vpop.f32.mrf.mxu1 }
 0x776   : > { %v15979_v14 = vpack.c.bf16 %v6956_v47, %v6952_v63  ;;  %v6957_v17 = vmul.f32 %v6852_v7, %v19198_v42  ;;  %v15984_v38 = vpack.c.bf16 %v6958_v37, %v6954_v0  ;;  %v6959_v45 = vmul.f32 %v6925_v4, %v19200_v16  ;;  %v19208_v7 = vld [vmem:[#allocation117_spill] sm:$0xff]  ;;  %v19210_v37 = vld [vmem:[#allocation120_spill] sm:$0xff] }
 0x778   : > { %v15986_v62 = vpack.c.bf16 %v6957_v17, %v6953_v21  ;;  %v15989_v12 = vpack.c.bf16 %v6959_v45, %v6955_v57  ;;  %v9603_v57 = vld [vmem:[%s17526_s1 + $0x128] sm:$0xff]   ;;  %v19209_v21 = vld [vmem:[#allocation37_spill] sm:$0xff] }
 0x779   : > { %v19217_v45 = vld [vmem:[#allocation138_spill] sm:$0xff] }
 0x77a   : > { %7024 = vmatprep.subr.bf16.mxu0 %v15986_v62  ;;  %7097 = vmatprep.subr.bf16.mxu1 %v15989_v12 }
 0x77b   : > { %7025 = vmatpush1.bf16.msra.mxu0 %v15979_v14  ;;  %7098 = vmatpush1.bf16.msra.mxu1 %v15984_v38 }
 0x77c   : > { %7026 = vmatprep.subr.bf16.mxu0 %v15970_v44  ;;  %7099 = vmatprep.subr.bf16.mxu1 %v15973_v2 }
 0x77f   : > { %7027 = vmatpush1.bf16.msra.mxu0 %v15963_v61  ;;  %7100 = vmatpush1.bf16.msra.mxu1 %v15968_v30 }
 0x780   : > { %7028 = vmatprep.subr.bf16.mxu0 %v15954_v32  ;;  %7101 = vmatprep.subr.bf16.mxu1 %v15957_v3 }
 0x783   : > { %7029 = vmatpush1.bf16.msra.mxu0 %v15947_v23  ;;  %7102 = vmatpush1.bf16.msra.mxu1 %v15952_v49 }
 0x784   : > { %7030 = vmatprep.subr.bf16.mxu0 %v15936_v11  ;;  %7103 = vmatprep.subr.bf16.mxu1 %v15939_v58 }
 0x787   : > { %7031 = vmatpush1.bf16.msra.mxu0 %v15927_v35  ;;  %7104 = vmatpush1.bf16.msra.mxu1 %v15934_v39 }
 0x78a   : > { %9349 = vmatmul.mubr.msk.bf16.vlgmr.msra.gmra.mxu0 %vm19201_vm12, %v9603_v57  ;;  %9353 = vmatmul.mubr.msk.bf16.vlgmr.msra.gmra.mxu1 %vm19202_vm13, %v9603_v57  ;;  %v19212_v57 = vld [vmem:[#allocation76_spill] sm:$0xff]  ;;  %vm19254_vm12 = vmmov %vm19156_vm0 }
 0x78b   : > { %7058 = vmatprep.mubr.bf16.mxu0 %v19155_v5  ;;  %7131 = vmatprep.mubr.bf16.mxu1 %v19155_v5  ;;  %vm19255_vm13 = vmmov %vm19156_vm0 }
 0x792   : > { %9350 = vmatmul.mubr.msk.bf16.gmra.mxu0 %vm19203_vm9, %v9604_v25  ;;  %9354 = vmatmul.mubr.msk.bf16.gmra.mxu1 %vm19204_vm4, %v9604_v25  ;;  %vm19256_vm9 = vmmov %vm19156_vm0 }
 0x793   : > { %7068 = vmatprep.mubr.bf16.mxu0 %v19155_v5  ;;  %7141 = vmatprep.mubr.bf16.mxu1 %v19155_v5  ;;  %vm19257_vm4 = vmmov %vm19156_vm0 }
 0x79a   : > { %9351 = vmatmul.mubr.msk.bf16.gmra.mxu0 %vm19205_vm8, %v9605_v28  ;;  %9355 = vmatmul.mubr.msk.bf16.gmra.mxu1 %vm19206_vm2, %v9605_v28  ;;  %v19213_v28 = vld [vmem:[#allocation67_spill] sm:$0xff]  ;;  %vm19258_vm8 = vmmov %vm19156_vm0 }
 0x79b   : > { %7078 = vmatprep.mubr.bf16.mxu0 %v19155_v5  ;;  %7151 = vmatprep.mubr.bf16.mxu1 %v19155_v5  ;;  %vm19259_vm2 = vmmov %vm19156_vm0 }
 0x7a2   : > { %9352 = vmatmul.mubr.msk.bf16.gmra.mxu0 %vm19207_vm7, %v9606_v48  ;;  %9356 = vmatmul.mubr.msk.bf16.gmra.mxu1 %vm19156_vm0, %v9606_v48  ;;  %vm19260_vm7 = vmmov %vm19156_vm0 }
 0x7a3   : > { %7282 = vmatprep.mubr.bf16.mxu0 %v19155_v5  ;;  %7355 = vmatprep.mubr.bf16.mxu1 %v19155_v5 }
 0x84a   : > { %v7050_v63 = vpop.f32.mrf.mxu0  ;;  %v7123_v6 = vpop.f32.mrf.mxu1 }
 0x84b   : > { %v16036_v41 = vmul.f32 %v7050_v63, %v19208_v7  ;;  %v16042_v42 = vmul.f32 %v7123_v6, %v19210_v37  ;;  %v19214_v7 = vld [vmem:[#allocation159_spill] sm:$0xff] }
 0x84c   : > { %v7052_v47 = vpop.f32.mrf.mxu0  ;;  %v7125_v51 = vpop.f32.mrf.mxu1  ;;  %v19215_v37 = vld [vmem:[#allocation131_spill] sm:$0xff] }
 0x84d   : > { %v16045_v16 = vmul.f32 %v7052_v47, %v19211_v59  ;;  %v16058_v6 = vmul.f32 %v7125_v51, %v19214_v7  ;;  %v19216_v51 = vld [vmem:[#allocation126_spill] sm:$0xff]  ;;  %v19219_v47 = vld [vmem:[#allocation49_spill] sm:$0xff] }
 0x84e   : > { %v7054_v0 = vpop.f32.mrf.mxu0  ;;  %v7127_v17 = vpop.f32.mrf.mxu1 }
 0x84f   : > { %v16039_v20 = vmul.f32 %v7054_v0, %v19209_v21  ;;  %v16050_v25 = vmul.f32 %v7127_v17, %v19212_v57 }
 0x850   : > { %v7056_v4 = vpop.f32.mrf.mxu0  ;;  %v7129_v63 = vpop.f32.mrf.mxu1 }
 0x851   : > { %v16053_v48 = vmul.f32 %v7056_v4, %v19213_v28  ;;  %v16065_v59 = vmul.f32 %v7129_v63, %v19215_v37 }
 0x852   : > { %v16055_v0 = vpop.f32.mrf.mxu0  ;;  %v7133_v17 = vpop.f32.mrf.mxu1 }
 0x853   : > { %v16070_v7 = vmul.f32 %v7133_v17, %v19216_v51  ;;  %v19222_v51 = vld [vmem:[#allocation33_spill] sm:$0xff] }
 0x854   : > { %v7062_v57 = vpop.f32.mrf.mxu0  ;;  %v7135_v28 = vpop.f32.mrf.mxu1  ;;  %10430 = vrcp.f32 %v19222_v51 }
 0x855   : > { %v7171_v21 = vmul.f32 %v7062_v57, %v19217_v45  ;;  %v7173_v34 = vmul.f32 %v7135_v28, %v19220_v22 }
 0x856   : > { %v7064_v36 = vpop.f32.mrf.mxu0  ;;  %v7137_v33 = vpop.f32.mrf.mxu1 }
 0x857   : > { %v16074_v40 = vmul.f32 %v7137_v33, %v19218_v27  ;;  %v19223_v27 = vld [vmem:[#allocation149_spill] sm:$0xff] }
 0x858   : > { %v7066_v8 = vpop.f32.mrf.mxu0  ;;  %v7139_v37 = vpop.f32.mrf.mxu1 }
 0x859   : > { %v7175_v63 = vmul.f32 %v7066_v8, %v19219_v47  ;;  %v7200_v4 = vpack.c.bf16 %v16074_v40, %v16070_v7  ;;  %v7177_v54 = vmul.f32 %v7139_v37, %v19221_v60  ;;  %v19224_v8 = vld [vmem:[#allocation147_spill] sm:$0xff]  ;;  %v19227_v7 = vld [vmem:[#allocation112_spill] sm:$0xff] }
 0x85a   : > { %v7070_v43 = vpop.f32.mrf.mxu0  ;;  %v7143_v1 = vpop.f32.mrf.mxu1 }
 0x85b   : > { %v7199_v13 = vpack.c.bf16 %v7175_v63, %v7171_v21  ;;  %v7201_v45 = vpack.c.bf16 %v7177_v54, %v7173_v34  ;;  %v7178_v15 = vmul.f32 %v7070_v43, %v19223_v27  ;;  %v7180_v53 = vmul.f32 %v7143_v1, %v19225_v50  ;;  %v19228_v63 = vld [vmem:[#allocation61_spill] sm:$0xff]  ;;  %v19230_v43 = vld [vmem:[#allocation42_spill] sm:$0xff] }
 0x85c   : > { %v7072_v17 = vpop.f32.mrf.mxu0  ;;  %v7145_v57 = vpop.f32.mrf.mxu1  ;;  %v19229_v54 = vld [vmem:[#allocation133_spill] sm:$0xff] }
 0x85d   : > { %v7179_v40 = vmul.f32 %v7072_v17, %v19226_v18  ;;  %v7181_v34 = vmul.f32 %v7145_v57, %v19229_v54 }
 0x85e   : > { %v7074_v33 = vpop.f32.mrf.mxu0  ;;  %v7147_v22 = vpop.f32.mrf.mxu1 }
 0x85f   : > { %v7182_v47 = vmul.f32 %v7074_v33, %v19224_v8  ;;  %v7184_v60 = vmul.f32 %v7147_v22, %v19227_v7 }
 0x860   : > { %v7076_v28 = vpop.f32.mrf.mxu0  ;;  %v7149_v9 = vpop.f32.mrf.mxu1 }
 0x861   : > { %v7202_v21 = vpack.c.bf16 %v7182_v47, %v7178_v15  ;;  %v7183_v37 = vmul.f32 %v7076_v28, %v19228_v63  ;;  %v7204_v56 = vpack.c.bf16 %v7184_v60, %v7180_v53  ;;  %v7185_v27 = vmul.f32 %v7149_v9, %v19230_v43  ;;  %v19232_v15 = vld [vmem:[#allocation72_spill] sm:$0xff]  ;;  %v19233_v47 = vld [vmem:[#allocation155_spill] sm:$0xff] }
 0x862   : > { %v7080_v51 = vpop.f32.mrf.mxu0  ;;  %v7153_v33 = vpop.f32.mrf.mxu1  ;;  %v19234_v63 = vld [vmem:[#allocation107_spill] sm:$0xff]  ;;  %v19236_v60 = vld [vmem:[#allocation100_spill] sm:$0xff] }
 0x863   : > { %v7203_v24 = vpack.c.bf16 %v7183_v37, %v7179_v40  ;;  %v7205_v50 = vpack.c.bf16 %v7185_v27, %v7181_v34  ;;  %v7186_v18 = vmul.f32 %v7080_v51, %v19231_v55  ;;  %v7188_v22 = vmul.f32 %v7153_v33, %v19233_v47  ;;  %v19235_v53 = vld [vmem:[#allocation135_spill] sm:$0xff]  ;;  %v10431_v37 = vpop.eup %10430  ;;  %v19238_v55 = vld [vmem:[#allocation145_spill] sm:$0xff] }
 0x864   : > { %v7082_v8 = vpop.f32.mrf.mxu0  ;;  %v7155_v1 = vpop.f32.mrf.mxu1  ;;  %v19237_v34 = vld [vmem:[#allocation35_spill] sm:$0xff] }
 0x865   : > { %v7187_v31 = vmul.f32 %v7082_v8, %v19234_v63  ;;  %v7189_v43 = vmul.f32 %v7155_v1, %v19237_v34  ;;  %v19240_v8 = vld [vmem:[#allocation129_spill] sm:$0xff] }
 0x866   : > { %v7084_v52 = vpop.f32.mrf.mxu0  ;;  %v7157_v28 = vpop.f32.mrf.mxu1 }
 0x867   : > { %v7190_v17 = vmul.f32 %v7084_v52, %v19232_v15  ;;  %v7192_v40 = vmul.f32 %v7157_v28, %v19235_v53  ;;  %v19239_v52 = vld [vmem:[#allocation141_spill] sm:$0xff] }
 0x868   : > { %v7086_v7 = vpop.f32.mrf.mxu0  ;;  %v7159_v54 = vpop.f32.mrf.mxu1  ;;  %v4971_v15 = vmul.f32 %v10431_v37, %v19239_v52  ;;  %v19269_v37 = vld [vmem:[#allocation97_spill] sm:$0xff]  ;;  %v19273_v52 = vld [vmem:[#allocation79_spill] sm:$0xff] }
 0x869   : > { %v7206_v57 = vpack.c.bf16 %v7190_v17, %v7186_v18  ;;  %v7191_v9 = vmul.f32 %v7086_v7, %v19236_v60  ;;  %v7208_v27 = vpack.c.bf16 %v7192_v40, %v7188_v22  ;;  %v7193_v51 = vmul.f32 %v7159_v54, %v19238_v55  ;;  %v19241_v17 = vld [vmem:[#allocation83_spill] sm:$0xff]  ;;  %v19267_v7 = vld [vmem:[#allocation113_spill] sm:$0xff]  ;;  %v19268_v40 = vld [vmem:[#allocation104_spill] sm:$0xff] }
 0x86a   : > { %v7174_v18 = vmul.f32 %v7064_v36, %v19240_v8  ;;  %vm19242_vm1 = vcmp.gt.f32.partialorder %v19241_v17, 20.0  ;;  %v9607_v36 = vld [vmem:[%s17526_s1 + $0x148] sm:$0xff]   ;;  %10432 = vrcp.f32 %v19267_v7  ;;  %v19270_v54 = vld [vmem:[#allocation87_spill] sm:$0xff]  ;;  %v19272_v55 = vld [vmem:[#allocation85_spill] sm:$0xff] }
 0x86b   : > { %v7207_v46 = vpack.c.bf16 %v7191_v9, %v7187_v31  ;;  %v7209_v33 = vpack.c.bf16 %v7193_v51, %v7189_v43  ;;  %v5026_v47 = vsel %vm19242_vm1, 1.0, %v4971_v15  ;;  %10434 = vrcp.f32 %v19268_v40  ;;  %v19271_v43 = vld [vmem:[#allocation98_spill] sm:$0xff] }
 0x86c   : > { %v7170_v1 = vmul.f32 %v16055_v0, %v5026_v47  ;;  %10436 = vrcp.f32 %v19269_v37  ;;  %v19275_v17 = vld [vmem:[#allocation110_spill] sm:$0xff] }
 0x86d   : > { %7258 = vmatprep.subr.bf16.mxu0 %v7207_v46  ;;  %7331 = vmatprep.subr.bf16.mxu1 %v7209_v33  ;;  %v19243_v46 = vpack.c.bf16 %v16053_v48, %v16045_v16  ;;  %v19264_v16 = vld [vmem:[#allocation71_spill] sm:$0xff]  ;;  %v19286_v37 = vld [vmem:[#allocation106_spill] sm:$0xff] }
 0x86e   : > { %7259 = vmatpush1.bf16.msra.mxu0 %v7206_v57  ;;  %7332 = vmatpush1.bf16.msra.mxu1 %v7208_v27  ;;  %v7198_v31 = vpack.c.bf16 %v7174_v18, %v7170_v1  ;;  %v19274_v33 = vld [vmem:[#allocation91_spill] sm:$0xff] }
 0x86f   : > { %7260 = vmatprep.subr.bf16.mxu0 %v7203_v24  ;;  %7333 = vmatprep.subr.bf16.mxu1 %v7205_v50  ;;  %v19244_v24 = vpack.c.bf16 %v16065_v59, %v16058_v6  ;;  %v19265_v6 = vld [vmem:[#allocation84_spill] sm:$0xff]  ;;  %10438 = vrcp.f32 %v19274_v33 }
 0x872   : > { %7261 = vmatpush1.bf16.msra.mxu0 %v7202_v21  ;;  %7334 = vmatpush1.bf16.msra.mxu1 %v7204_v56  ;;  %v19246_v56 = vpack.c.bf16 %v16050_v25, %v16042_v42  ;;  %v19266_v21 = vld [vmem:[#allocation56_spill] sm:$0xff] }
 0x873   : > { %7262 = vmatprep.subr.bf16.mxu0 %v7199_v13  ;;  %7335 = vmatprep.subr.bf16.mxu1 %v7201_v45  ;;  %v19245_v13 = vpack.c.bf16 %v16039_v20, %v16036_v41  ;;  %v19263_v20 = vld [vmem:[#allocation99_spill] sm:$0xff] }
 0x876   : > { %7263 = vmatpush1.bf16.msra.mxu0 %v7198_v31  ;;  %7336 = vmatpush1.bf16.msra.mxu1 %v7200_v4 }
 0x877   : > { %7264 = vmatprep.subr.bf16.mxu0 %v19243_v46  ;;  %7337 = vmatprep.subr.bf16.mxu1 %v19244_v24  ;;  %v19276_v46 = vld [vmem:[#allocation95_spill] sm:$0xff] }
 0x87a   : > { %7265 = vmatpush1.bf16.msra.mxu0 %v19245_v13  ;;  %7338 = vmatpush1.bf16.msra.mxu1 %v19246_v56  ;;  %v19277_v56 = vld [vmem:[#allocation81_spill] sm:$0xff] }
 0x87b   : > { %7488 = vmatprep.subr.bf16.mxu0 %v15986_v62  ;;  %7549 = vmatprep.subr.bf16.mxu1 %v15989_v12  ;;  %v9608_v62 = vld [vmem:[%s17526_s1 + $0x150] sm:$0xff]   ;;  %10440 = vrcp.f32 %v19277_v56  ;;  %v19288_v56 = vld [vmem:[#allocation90_spill] sm:$0xff] }
 0x87c   : > { %v19262_v12 = vld [vmem:[#allocation111_spill] sm:$0xff] }
 0x87d   : > { %9361 = vmatmul.mubr.msk.bf16.vlgmr.msra.gmra.mxu0 %vm19247_vm3, %v9607_v36  ;;  %9365 = vmatmul.mubr.msk.bf16.vlgmr.msra.gmra.mxu1 %vm19248_vm10, %v9607_v36 }
 0x87e   : > { %7489 = vmatpush1.bf16.msra.mxu0 %v15979_v14  ;;  %7292 = vmatprep.mubr.bf16.mxu0 %v19155_v5 }
 0x87f   : > { %7490 = vmatprep.subr.bf16.mxu0 %v15970_v44  ;;  %7550 = vmatpush1.bf16.msra.mxu1 %v15984_v38  ;;  %v9609_v38 = vld [vmem:[%s17526_s1 + $0x158] sm:$0xff]  }
 0x880   : > { %7365 = vmatprep.mubr.bf16.mxu1 %v19155_v5  ;;  %7551 = vmatprep.subr.bf16.mxu1 %v15973_v2  ;;  %v19261_v2 = vld [vmem:[#allocation92_spill] sm:$0xff] }
 0x882   : > { %7491 = vmatpush1.bf16.msra.mxu0 %v15963_v61 }
 0x883   : > { %7492 = vmatprep.subr.bf16.mxu0 %v15954_v32  ;;  %7552 = vmatpush1.bf16.msra.mxu1 %v15968_v30  ;;  %v9610_v30 = vld [vmem:[%s17526_s1 + $0x160] sm:$0xff]  }
 0x884   : > { %7553 = vmatprep.subr.bf16.mxu1 %v15957_v3 }
 0x885   : > { %9362 = vmatmul.mubr.msk.bf16.gmra.mxu0 %vm19249_vm5, %v9608_v62  ;;  %9366 = vmatmul.mubr.msk.bf16.gmra.mxu1 %vm19250_vm11, %v9608_v62 }
 0x886   : > { %7493 = vmatpush1.bf16.msra.mxu0 %v15947_v23  ;;  %7302 = vmatprep.mubr.bf16.mxu0 %v19155_v5 }
 0x887   : > { %7494 = vmatprep.subr.bf16.mxu0 %v15936_v11  ;;  %7554 = vmatpush1.bf16.msra.mxu1 %v15952_v49  ;;  %v9613_v11 = vld [vmem:[%s17526_s1 + $0x178] sm:$0xff]  }
 0x888   : > { %7375 = vmatprep.mubr.bf16.mxu1 %v19155_v5  ;;  %7555 = vmatprep.subr.bf16.mxu1 %v15939_v58 }
 0x88a   : > { %7495 = vmatpush1.bf16.msra.mxu0 %v15927_v35  ;;  %v9611_v35 = vld [vmem:[%s17526_s1 + $0x168] sm:$0xff]  }
 0x88b   : > { %7556 = vmatpush1.bf16.msra.mxu1 %v15934_v39  ;;  %v9612_v39 = vld [vmem:[%s17526_s1 + $0x170] sm:$0xff]  }
 0x88d   : > { %9363 = vmatmul.mubr.msk.bf16.gmra.mxu0 %vm19251_vm15, %v9609_v38  ;;  %9367 = vmatmul.mubr.msk.bf16.gmra.mxu1 %vm19252_vm6, %v9609_v38  ;;  %vm19316_vm6 = vmmov %vm19259_vm2 }
 0x88e   : > { %7312 = vmatprep.mubr.bf16.mxu0 %v19155_v5  ;;  %7385 = vmatprep.mubr.bf16.mxu1 %v19155_v5 }
 0x895   : > { %9364 = vmatmul.mubr.msk.bf16.gmra.mxu0 %vm19253_vm14, %v9610_v30  ;;  %9368 = vmatmul.mubr.msk.bf16.gmra.mxu1 %vm19254_vm12, %v9610_v30  ;;  %vm19320_vm14 = vmmov %vm19259_vm2 }
 0x896   : > { %7512 = vmatprep.mubr.bf16.mxu0 %v19155_v5  ;;  %7573 = vmatprep.mubr.bf16.mxu1 %v19155_v5  ;;  %vm19342_vm12 = vmmov %vm19259_vm2 }
 0x89d   : > { %9372 = vmatmul.mubr.msk.bf16.vlgmr.msra.gmra.mxu0 %vm19255_vm13, %v9611_v35  ;;  %9375 = vmatmul.mubr.msk.bf16.vlgmr.msra.gmra.mxu1 %vm19256_vm9, %v9611_v35  ;;  %v19278_v35 = vld [vmem:[#allocation77_spill] sm:$0xff]  ;;  %vm19346_vm13 = vmmov %vm19259_vm2 }
 0x89e   : > { %7522 = vmatprep.mubr.bf16.mxu0 %v19155_v5  ;;  %7583 = vmatprep.mubr.bf16.mxu1 %v19155_v5  ;;  %10442 = vrcp.f32 %v19278_v35  ;;  %vm19362_vm9 = vmmov %vm19259_vm2 }
 0x8a5   : > { %9373 = vmatmul.mubr.msk.bf16.gmra.mxu0 %vm19257_vm4, %v9612_v39  ;;  %9376 = vmatmul.mubr.msk.bf16.gmra.mxu1 %vm19258_vm8, %v9612_v39  ;;  %v19279_v39 = vld [vmem:[#allocation69_spill] sm:$0xff]  ;;  %vm19363_vm4 = vmmov %vm19259_vm2  ;;  %vm19374_vm8 = vcmask 1042432  }
 0x8a6   : > { %7532 = vmatprep.mubr.bf16.mxu0 %v19155_v5  ;;  %7593 = vmatprep.mubr.bf16.mxu1 %v19155_v5  ;;  %10444 = vrcp.f32 %v19279_v39  ;;  %v19289_v39 = vld [vmem:[#allocation65_spill] sm:$0xff] }
 0x8a7   : > { %vm19290_vm0 = vcmp.gt.f32.partialorder %v19289_v39, 20.0  ;;  %v19300_v39 = vld [vmem:[#allocation52_spill] sm:$0xff] }
 0x8ad   : > { %9374 = vmatmul.mubr.msk.bf16.gmra.mxu0 %vm19259_vm2, %v9613_v11  ;;  %9377 = vmatmul.mubr.msk.bf16.gmra.mxu1 %vm19260_vm7, %v9613_v11  ;;  %vm19376_vm2 = vmmov %vm19374_vm8 }
 0x8ae   : > { %7658 = vmatprep.mubr.bf16.mxu0 %v19155_v5  ;;  %7719 = vmatprep.mubr.bf16.mxu1 %v19155_v5  ;;  %vm19379_vm7 = vmmov %vm19376_vm2 }
 0x93d   : > { %v16180_v58 = vpop.f32.mrf.mxu0  ;;  %v7357_v23 = vpop.f32.mrf.mxu1 }
 0x93e   : > { %v16185_v14 = vmul.f32 %v7357_v23, %v19261_v2 }
 0x93f   : > { %v7286_v49 = vpop.f32.mrf.mxu0  ;;  %v7359_v32 = vpop.f32.mrf.mxu1 }
 0x940   : > { %v16188_v41 = vmul.f32 %v7286_v49, %v19262_v12  ;;  %v16199_v59 = vmul.f32 %v7359_v32, %v19265_v6  ;;  %v10433_v49 = vpop.eup %10432  ;;  %v19280_v32 = vld [vmem:[#allocation55_spill] sm:$0xff]  ;;  %v19282_v12 = vld [vmem:[#allocation108_spill] sm:$0xff] }
 0x941   : > { %v16182_v3 = vpop.f32.mrf.mxu0  ;;  %v7361_v61 = vpop.f32.mrf.mxu1 }
 0x942   : > { %v16191_v42 = vmul.f32 %v7361_v61, %v19263_v20 }
 0x943   : > { %v7290_v44 = vpop.f32.mrf.mxu0  ;;  %v7363_v48 = vpop.f32.mrf.mxu1 }
 0x944   : > { %v16194_v25 = vmul.f32 %v7290_v44, %v19264_v16  ;;  %v7430_v4 = vpack.c.bf16 %v16191_v42, %v16185_v14  ;;  %v16206_v50 = vmul.f32 %v7363_v48, %v19266_v21  ;;  %v19281_v44 = vld [vmem:[#allocation66_spill] sm:$0xff]  ;;  %v19283_v16 = vld [vmem:[#allocation73_spill] sm:$0xff]  ;;  %v19324_v14 = vld [vmem:[#allocation144_spill] sm:$0xff] }
 0x945   : > { %v16196_v0 = vpop.f32.mrf.mxu0  ;;  %v7367_v22 = vpop.f32.mrf.mxu1  ;;  %v19325_v42 = vld [vmem:[#allocation148_spill] sm:$0xff] }
 0x946   : > { %v7429_v45 = vpack.c.bf16 %v16194_v25, %v16188_v41  ;;  %v7431_v63 = vpack.c.bf16 %v16206_v50, %v16199_v59  ;;  %v16216_v34 = vmul.f32 %v7367_v22, %v19270_v54  ;;  %v10435_v22 = vpop.eup %10434  ;;  %v4353_v54 = vmul.f32 %v10433_v49, %v19286_v37  ;;  %v19317_v25 = vld [vmem:[#allocation139_spill] sm:$0xff] }
 0x947   : > { %v7296_v28 = vpop.f32.mrf.mxu0  ;;  %v7369_v57 = vpop.f32.mrf.mxu1  ;;  %v19315_v41 = vpack.c.bf16 %v15798_v10, %v15742_v29  ;;  %v19318_v59 = vld [vmem:[#allocation43_spill] sm:$0xff]  ;;  %v19327_v29 = vld [vmem:[#allocation41_spill] sm:$0xff]  ;;  %v19328_v10 = vld [vmem:[#allocation190_spill] sm:$0xff] }
 0x948   : > { %v16219_v27 = vmul.f32 %v7296_v28, %v19271_v43  ;;  %v16229_v47 = vmul.f32 %v7369_v57, %v19275_v17  ;;  %v19284_v28 = vld [vmem:[#allocation78_spill] sm:$0xff] }
 0x949   : > { %v16211_v53 = vpop.f32.mrf.mxu0  ;;  %v7371_v60 = vpop.f32.mrf.mxu1 }
 0x94a   : > { %v16222_v51 = vmul.f32 %v7371_v60, %v19272_v55  ;;  %v19285_v60 = vld [vmem:[#allocation93_spill] sm:$0xff] }
 0x94b   : > { %v7300_v9 = vpop.f32.mrf.mxu0  ;;  %v7373_v8 = vpop.f32.mrf.mxu1 }
 0x94c   : > { %v16225_v15 = vmul.f32 %v7300_v9, %v19273_v52  ;;  %v7434_v1 = vpack.c.bf16 %v16222_v51, %v16216_v34  ;;  %v16236_v24 = vmul.f32 %v7373_v8, %v19276_v46  ;;  %v10437_v52 = vpop.eup %10436  ;;  %v19287_v8 = vld [vmem:[#allocation96_spill] sm:$0xff]  ;;  %v9615_v34 = vld [vmem:[%s17526_s1 + $0x188] sm:$0xff]   ;;  %v19330_v51 = vld [vmem:[#allocation161_spill] sm:$0xff] }
 0x94d   : > { %v7304_v18 = vpop.f32.mrf.mxu0  ;;  %v7377_v36 = vpop.f32.mrf.mxu1  ;;  %v4345_v17 = vmul.f32 %v10435_v22, %v19287_v8  ;;  %v4337_v35 = vmul.f32 %v10437_v52, %v19288_v56  ;;  %v19299_v52 = vld [vmem:[#allocation54_spill] sm:$0xff] }
 0x94e   : > { %v7433_v31 = vpack.c.bf16 %v16225_v15, %v16219_v27  ;;  %v7435_v62 = vpack.c.bf16 %v16236_v24, %v16229_v47  ;;  %v16244_v61 = vmul.f32 %v7377_v36, %v19280_v32  ;;  %v19331_v15 = vld [vmem:[#allocation101_spill] sm:$0xff] }
 0x94f   : > { %v7306_v13 = vpop.f32.mrf.mxu0  ;;  %v7379_v38 = vpop.f32.mrf.mxu1  ;;  %v19332_v47 = vpack.c.bf16 %v19330_v51, %v19331_v15 }
 0x950   : > { %v7413_v2 = vmul.f32 %v7306_v13, %v19281_v44  ;;  %v7415_v7 = vmul.f32 %v7379_v38, %v19284_v28  ;;  %v10439_v13 = vpop.eup %10438  ;;  %v4392_v38 = vsel %vm19290_vm0, 1.0, %v4353_v54  ;;  %v19292_v44 = vld [vmem:[#allocation125_spill] sm:$0xff]  ;;  %v19296_v28 = vld [vmem:[#allocation86_spill] sm:$0xff] }
 0x951   : > { %v7308_v30 = vpop.f32.mrf.mxu0  ;;  %v7381_v11 = vpop.f32.mrf.mxu1 }
 0x952   : > { %v7418_v20 = vmul.f32 %v7381_v11, %v19282_v12  ;;  %v19291_v11 = vld [vmem:[#allocation137_spill] sm:$0xff]  ;;  %v10441_v22 = vpop.eup %10440 }
 0x953   : > { %v7310_v23 = vpop.f32.mrf.mxu0  ;;  %v7383_v6 = vpop.f32.mrf.mxu1 }
 0x954   : > { %v7417_v48 = vmul.f32 %v7310_v23, %v19283_v16  ;;  %v7438_v57 = vpack.c.bf16 %v7418_v20, %v16244_v61  ;;  %v7419_v9 = vmul.f32 %v7383_v6, %v19285_v60  ;;  %v19294_v20 = vld [vmem:[#allocation94_spill] sm:$0xff]  ;;  %v19297_v60 = vld [vmem:[#allocation60_spill] sm:$0xff] }
 0x955   : > { %v7314_v21 = vpop.f32.mrf.mxu0  ;;  %v7387_v43 = vpop.f32.mrf.mxu1  ;;  %vm19298_vm1 = vcmp.gt.f32.partialorder %v19297_v60, 20.0 }
 0x956   : > { %v7437_v40 = vpack.c.bf16 %v7417_v48, %v7413_v2  ;;  %v7439_v33 = vpack.c.bf16 %v7419_v9, %v7415_v7  ;;  %v7422_v49 = vmul.f32 %v7387_v43, %v19292_v44  ;;  %v19293_v2 = vld [vmem:[#allocation118_spill] sm:$0xff]  ;;  %v19295_v48 = vld [vmem:[#allocation80_spill] sm:$0xff]  ;;  %v4329_v7 = vmul.f32 %v10439_v13, %v19296_v28 }
 0x957   : > { %v7316_v55 = vpop.f32.mrf.mxu0  ;;  %v7389_v46 = vpop.f32.mrf.mxu1  ;;  %v4388_v9 = vsel %vm19298_vm1, 1.0, %v4345_v17  ;;  %v7420_v37 = vmul.f32 %v7314_v21, %v4392_v38  ;;  %v19304_v21 = vld [vmem:[#allocation70_spill] sm:$0xff] }
 0x958   : > { %v7421_v12 = vmul.f32 %v7316_v55, %v19293_v2  ;;  %v7423_v8 = vmul.f32 %v7389_v46, %v19299_v52  ;;  %v7416_v55 = vmul.f32 %v7308_v30, %v4388_v9  ;;  %v19301_v2 = vld [vmem:[#allocation75_spill] sm:$0xff]  ;;  %v19305_v46 = vld [vmem:[#allocation57_spill] sm:$0xff]  ;;  %v19339_v9 = vld [vmem:[#allocation28_spill] sm:$0xff] }
 0x959   : > { %v7318_v36 = vpop.f32.mrf.mxu0  ;;  %v7391_v32 = vpop.f32.mrf.mxu1  ;;  %vm19306_vm10 = vcmp.gt.f32.partialorder %v19305_v46, 20.0  ;;  %v19343_v52 = vld [vmem:[#allocation146_spill] sm:$0xff] }
 0x95a   : > { %v7424_v23 = vmul.f32 %v7318_v36, %v19291_v11  ;;  %v7426_v16 = vmul.f32 %v7391_v32, %v19294_v20  ;;  %v10443_v11 = vpop.eup %10442  ;;  %v19302_v20 = vld [vmem:[#allocation58_spill] sm:$0xff] }
 0x95b   : > { %v7320_v61 = vpop.f32.mrf.mxu0  ;;  %v7393_v54 = vpop.f32.mrf.mxu1  ;;  %vm19303_vm3 = vcmp.gt.f32.partialorder %v19302_v20, 20.0  ;;  %v4313_v38 = vmul.f32 %v10443_v11, %v19304_v21  ;;  %v19350_v11 = vld [vmem:[#allocation196_spill] sm:$0xff]  ;;  %v9616_v20 = vld [vmem:[%s17526_s1 + $0x190] sm:$0xff]   ;;  %v19359_v21 = vld [vmem:[#allocation89_spill] sm:$0xff] }
 0x95c   : > { %v7425_v6 = vmul.f32 %v7320_v61, %v19295_v48  ;;  %v7442_v36 = vpack.c.bf16 %v7426_v16, %v7422_v49  ;;  %v7427_v43 = vmul.f32 %v7393_v54, %v19300_v39  ;;  %v7440_v44 = vpack.c.bf16 %v7424_v23, %v7420_v37  ;;  %v10445_v32 = vpop.eup %10444  ;;  %v19340_v37 = vld [vmem:[#allocation152_spill] sm:$0xff]  ;;  %v19348_v39 = vld [vmem:[#allocation193_spill] sm:$0xff] }
 0x95d   : > { %v4321_v61 = vmul.f32 %v10441_v22, %v19301_v2  ;;  %v4384_v13 = vsel %vm19303_vm3, 1.0, %v4337_v35  ;;  %v4380_v49 = vsel %vm19306_vm10, 1.0, %v4329_v7  ;;  %v19310_v22 = vld [vmem:[#allocation51_spill] sm:$0xff]  ;;  %v19312_v7 = vld [vmem:[#allocation50_spill] sm:$0xff]  ;;  %v19341_v54 = vpack.c.bf16 %v19339_v9, %v19340_v37 }
 0x95e   : > { %v7441_v56 = vpack.c.bf16 %v7425_v6, %v7421_v12  ;;  %v7443_v48 = vpack.c.bf16 %v7427_v43, %v7423_v8  ;;  %v7412_v17 = vmul.f32 %v7304_v18, %v4384_v13  ;;  %v7408_v30 = vmul.f32 %v16211_v53, %v4380_v49  ;;  %v19307_v12 = vld [vmem:[#allocation62_spill] sm:$0xff]  ;;  %v19308_v6 = vld [vmem:[#allocation53_spill] sm:$0xff]  ;;  %v16371_v49 = vpop.f32.mrf.mxu0 }
 0x95f   : > { %v4305_v16 = vmul.f32 %v10445_v32, %v19307_v12  ;;  %vm19309_vm5 = vcmp.gt.f32.partialorder %v19308_v6, 20.0  ;;  %vm19311_vm11 = vcmp.gt.f32.partialorder %v19310_v22, 20.0  ;;  %vm19313_vm15 = vcmp.gt.f32.partialorder %v19312_v7, 20.0  ;;  %v19344_v8 = vld [vmem:[#allocation202_spill] sm:$0xff]  ;;  %v19353_v32 = vld [vmem:[#allocation121_spill] sm:$0xff] }
 0x960   : > { %7634 = vmatprep.subr.bf16.mxu0 %v7441_v56  ;;  %7695 = vmatprep.subr.bf16.mxu1 %v7443_v48  ;;  %v7436_v23 = vpack.c.bf16 %v7416_v55, %v7412_v17  ;;  %v4376_v35 = vsel %vm19309_vm5, 1.0, %v4321_v61  ;;  %v4372_v28 = vsel %vm19311_vm11, 1.0, %v4313_v38  ;;  %v19347_v56 = vld [vmem:[#allocation200_spill] sm:$0xff]  ;;  %v19351_v55 = vld [vmem:[#allocation23_spill] sm:$0xff]  ;;  %v19354_v2 = vld [vmem:[#allocation198_spill] sm:$0xff] }
 0x961   : > { %7635 = vmatpush1.bf16.msra.mxu0 %v7440_v44  ;;  %7696 = vmatpush1.bf16.msra.mxu1 %v7442_v36  ;;  %v7404_v18 = vmul.f32 %v16196_v0, %v4376_v35  ;;  %v7400_v53 = vmul.f32 %v16182_v3, %v4372_v28  ;;  %v4368_v60 = vsel %vm19313_vm15, 1.0, %v4305_v16  ;;  %v9614_v3 = vld [vmem:[%s17526_s1 + $0x180] sm:$0xff]   ;;  %v19345_v36 = vpack.c.bf16 %v19343_v52, %v19344_v8  ;;  %v19356_v13 = vld [vmem:[#allocation194_spill] sm:$0xff]  ;;  %v19360_v38 = vld [vmem:[#allocation119_spill] sm:$0xff] }
 0x962   : > { %7636 = vmatprep.subr.bf16.mxu0 %v7437_v40  ;;  %7697 = vmatprep.subr.bf16.mxu1 %v7439_v33  ;;  %v7396_v0 = vmul.f32 %v16180_v58, %v4368_v60  ;;  %v19314_v58 = vpack.c.bf16 %v15783_v19, %v15722_v26  ;;  %v19321_v26 = vld [vmem:[#allocation183_spill] sm:$0xff]  ;;  %v19322_v19 = vld [vmem:[#allocation154_spill] sm:$0xff]  ;;  %v19349_v43 = vpack.c.bf16 %v19347_v56, %v19348_v39  ;;  %v19357_v48 = vld [vmem:[#allocation189_spill] sm:$0xff] }
 0x963   : > { %v7432_v40 = vpack.c.bf16 %v7408_v30, %v7404_v18  ;;  %v19323_v50 = vpack.c.bf16 %v19321_v26, %v19322_v19  ;;  %v19352_v44 = vpack.c.bf16 %v19350_v11, %v19351_v55  ;;  %v19355_v61 = vpack.c.bf16 %v19353_v32, %v19354_v2  ;;  %v16373_v30 = vpop.f32.mrf.mxu1  ;;  %v19370_v26 = vld [vmem:[#allocation9_spill] sm:$0xff] }
 0x964   : > { %v7428_v27 = vpack.c.bf16 %v7400_v53, %v7396_v0  ;;  %v19358_v17 = vpack.c.bf16 %v19356_v13, %v19357_v48  ;;  %v19361_v46 = vpack.c.bf16 %v19359_v21, %v19360_v38  ;;  %v277_v19 = vrot.slane %v19370_v26, 3 }
 0x965   : > { %7637 = vmatpush1.bf16.msra.mxu0 %v7436_v23  ;;  %7698 = vmatpush1.bf16.msra.mxu1 %v7438_v57  ;;  %v19337_v57 = vld [vmem:[#allocation187_spill] sm:$0xff]  ;;  %v16375_v23 = vpop.f32.mrf.mxu0  ;;  %v16377_v12 = vpop.f32.mrf.mxu1  ;;  %v19380_v32 = vmov 683565275   ;;  %v19382_v48 = vmov 2131351028  }
 0x966   : > { %7638 = vmatprep.subr.bf16.mxu0 %v7433_v31  ;;  %7699 = vmatprep.subr.bf16.mxu1 %v7435_v62  ;;  %v19334_v31 = vld [vmem:[#allocation201_spill] sm:$0xff]  ;;  %v19336_v62 = vld [vmem:[#allocation195_spill] sm:$0xff]  ;;  %v19384_v26 = vmov 920167782  }
 0x967   : > { %v19338_v33 = vpack.c.bf16 %v19336_v62, %v19337_v57  ;;  %v16379_v16 = vpop.f32.mrf.mxu0  ;;  %v16381_v6 = vpop.f32.mrf.mxu1 }
 0x968   : > { %19364 = vst [vmem:[#allocation188_spill] sm:$0xff] %v16381_v6 }
 0x969   : > { %7639 = vmatpush1.bf16.msra.mxu0 %v7432_v40  ;;  %7700 = vmatpush1.bf16.msra.mxu1 %v7434_v1  ;;  %v19333_v1 = vld [vmem:[#allocation173_spill] sm:$0xff]  ;;  %v16383_v35 = vpop.f32.mrf.mxu0  ;;  %v16385_v18 = vpop.f32.mrf.mxu1 }
 0x96a   : > { %7640 = vmatprep.subr.bf16.mxu0 %v7429_v45  ;;  %7701 = vmatprep.subr.bf16.mxu1 %v7431_v63  ;;  %v19319_v45 = vpack.c.bf16 %v19317_v25, %v19318_v59  ;;  %v19329_v63 = vpack.c.bf16 %v19327_v29, %v19328_v10  ;;  %v19335_v24 = vpack.c.bf16 %v19333_v1, %v19334_v31  ;;  %v19369_v59 = vld [vmem:[#allocation7_spill] sm:$0xff]  ;;  %v19375_v29 = vld [vmem:[#allocation8_spill] sm:$0xff] }
 0x96b   : > { %19365 = vst [vmem:[#allocation197_spill] sm:$0xff] %v16383_v35  ;;  %19366 = vst [vmem:[#allocation199_spill] sm:$0xff] %v16385_v18  ;;  %v16387_v22 = vpop.f32.mrf.mxu0  ;;  %v16389_v28 = vpop.f32.mrf.mxu1 }
 0x96d   : > { %7641 = vmatpush1.bf16.msra.mxu0 %v7428_v27  ;;  %7702 = vmatpush1.bf16.msra.mxu1 %v7430_v4  ;;  %v19326_v4 = vpack.c.bf16 %v19324_v14, %v19325_v42  ;;  %v16391_v53 = vpop.f32.mrf.mxu0  ;;  %v16393_v40 = vpop.f32.mrf.mxu1  ;;  %v19373_v42 = vld [vmem:[#allocation6_spill] sm:$0xff] }
 0x96e   : > { %8180 = vmatprep.subr.bf16.mxu0 %v19314_v58  ;;  %8253 = vmatprep.subr.bf16.mxu1 %v19315_v41  ;;  %19367 = vst [vmem:[#allocation179_spill] sm:$0xff] %v16393_v40  ;;  %v19368_v41 = vld [vmem:[#allocation5_spill] sm:$0xff] }
 0x96f   : > { %v16395_v7 = vpop.f32.mrf.mxu0  ;;  %v16397_v60 = vpop.f32.mrf.mxu1  ;;  %v278_v25 = vrot.slane %v19368_v41, 3 }
 0x970   : > { %9381 = vmatmul.mubr.msk.bf16.vlgmr.msra.gmra.mxu0 %vm19316_vm6, %v9614_v3  ;;  %9384 = vmatmul.mubr.msk.bf16.vlgmr.msra.gmra.mxu1 %vm19320_vm14, %v9614_v3 }
 0x971   : > { %8181 = vmatpush1.bf16.msra.mxu0 %v19319_v45  ;;  %7668 = vmatprep.mubr.bf16.mxu0 %v19155_v5  ;;  %v16399_v0 = vpop.f32.mrf.mxu0  ;;  %v16401_v27 = vpop.f32.mrf.mxu1  ;;  %v280_v45 = vrot.slane %v19369_v59, 3 }
 0x972   : > { %8182 = vmatprep.subr.bf16.mxu0 %v19323_v50  ;;  %8254 = vmatpush1.bf16.msra.mxu1 %v19326_v4  ;;  %v16416_v4 = vsel %vm19374_vm8, %v278_v25, %v19373_v42  ;;  %v19383_v25 = vmov 2102212464  }
 0x973   : > { %7729 = vmatprep.mubr.bf16.mxu1 %v19155_v5  ;;  %8255 = vmatprep.subr.bf16.mxu1 %v19329_v63  ;;  %v16403_v3 = vpop.f32.mrf.mxu0  ;;  %v16405_v58 = vpop.f32.mrf.mxu1  ;;  %v16420_v10 = vsel %vm19376_vm2, %v280_v45, %v19375_v29  ;;  %v1679_v63 = vand.u32 2139095040, %v16416_v4  ;;  %v18103_v11 = vand.u32 2147483647, %v16416_v4 }
 0x974   : > { %19377 = vst [vmem:[#allocation140_spill] sm:$0xff] %v16420_v10 }
 0x975   : > { %8183 = vmatpush1.bf16.msra.mxu0 %v19332_v47  ;;  %v16410_v50 = vpop.f32.mrf.mxu0  ;;  %v16412_v14 = vpop.f32.mrf.mxu1  ;;  %v19378_v47 = vld [vmem:[#allocation10_spill] sm:$0xff]  ;;  %v1680_v31 = vshrl.u32 %v1679_v63, 23  ;;  %v1683_v21 = vand.u32 8388607, %v18103_v11 }
 0x976   : > { %8184 = vmatprep.subr.bf16.mxu0 %v19335_v24  ;;  %8256 = vmatpush1.bf16.msra.mxu1 %v19338_v33  ;;  %19371 = vst [vmem:[#allocation178_spill] sm:$0xff] %v16410_v50  ;;  %19372 = vst [vmem:[#allocation136_spill] sm:$0xff] %v16412_v14  ;;  %v16426_v1 = vsel %vm19379_vm7, %v277_v19, %v19378_v47 }
 0x977   : > { %8257 = vmatprep.subr.bf16.mxu1 %v19341_v54  ;;  %v7538_v51 = vpop.f32.mrf.mxu0  ;;  %v7599_v15 = vpop.f32.mrf.mxu1  ;;  %v9173_v33 = vadd.s32 4294967169, %v1680_v31  ;;  %v1575_v37 = vand.u32 2139095040, %v16426_v1  ;;  %v19385_v31 = vmov 1326507024  }
 0x978   : > { %9382 = vmatmul.mubr.msk.bf16.gmra.mxu0 %vm19342_vm12, %v9615_v34  ;;  %9385 = vmatmul.mubr.msk.bf16.gmra.mxu1 %vm19346_vm13, %v9615_v34  ;;  %v1887_v34 = vand.u32 2139095040, %v16420_v10  ;;  %v1684_v15 = vor.u32 8388608, %v1683_v21 }
 0x979   : > { %8185 = vmatpush1.bf16.msra.mxu0 %v19345_v36  ;;  %7678 = vmatprep.mubr.bf16.mxu0 %v19155_v5  ;;  %v7539_v62 = vpop.f32.mrf.mxu0  ;;  %v7600_v57 = vpop.f32.mrf.mxu1  ;;  %v1686_v54 = vadd.s32 1, %v9173_v33  ;;  %v1576_v8 = vshrl.u32 %v1575_v37, 23 }
 0x97a   : > { %8186 = vmatprep.subr.bf16.mxu0 %v19349_v43  ;;  %8258 = vmatpush1.bf16.msra.mxu1 %v19352_v44  ;;  %v1888_v24 = vshrl.u32 %v1887_v34, 23 }
 0x97b   : > { %7739 = vmatprep.mubr.bf16.mxu1 %v19155_v5  ;;  %8259 = vmatprep.subr.bf16.mxu1 %v19355_v61  ;;  %vm1687_vm0 = vcmp.gt.s32.totalorder %v1686_v54, 0  ;;  %v9169_v39 = vadd.s32 4294967169, %v1576_v8  ;;  %v19381_v61 = vmov 2475754826  }
 0x97c   : > { %v9181_v9 = vadd.s32 4294967169, %v1888_v24  ;;  %v1688_v36 = vsel %vm1687_vm0, %v1686_v54, 0 }
 0x97d   : > { %8187 = vmatpush1.bf16.msra.mxu0 %v19358_v17  ;;  %v1690_v56 = vand.u32 31, %v1688_v36  ;;  %v1582_v44 = vadd.s32 1, %v9169_v39  ;;  %v1689_v41 = vshrl.u32 %v1688_v36, 5 }
 0x97e   : > { %8260 = vmatpush1.bf16.msra.mxu1 %v19361_v46  ;;  %v1894_v52 = vadd.s32 1, %v9181_v9 }
 0x97f   : > { %v1691_v43 = vsub.s32 32, %v1690_v56  ;;  %v1693_v2 = vshll.u32 %v19380_v32, %v1690_v56  ;;  %v1696_v13 = vshll.u32 %v19381_v61, %v1690_v56  ;;  %v1699_v38 = vshll.u32 %v19382_v48, %v1690_v56 }
 0x980   : > { %9383 = vmatmul.mubr.msk.bf16.gmra.mxu0 %vm19362_vm9, %v9616_v20  ;;  %9386 = vmatmul.mubr.msk.bf16.gmra.mxu1 %vm19363_vm4, %v9616_v20  ;;  %vm1895_vm1 = vcmp.gt.s32.totalorder %v1894_v52, 0  ;;  %v1702_v45 = vshll.u32 %v19383_v25, %v1690_v56  ;;  %v1705_v42 = vshll.u32 %v19384_v26, %v1690_v56  ;;  %vm1583_vm3 = vcmp.gt.s32.totalorder %v1582_v44, 0  ;;  %vm19388_vm4 = vmmov %vm19376_vm2 }
 0x981   : > { %8204 = vmatprep.mubr.bf16.mxu0 %v19155_v5  ;;  %8277 = vmatprep.mubr.bf16.mxu1 %v19155_v5  ;;  %v1896_v55 = vsel %vm1895_vm1, %v1894_v52, 0  ;;  %v1694_v20 = vshrl.u32 %v19381_v61, %v1691_v43  ;;  %v1697_v17 = vshrl.u32 %v19382_v48, %v1691_v43  ;;  %v1700_v59 = vshrl.u32 %v19383_v25, %v1691_v43 }
 0x982   : > { %v1898_v46 = vand.u32 31, %v1896_v55  ;;  %v1703_v19 = vshrl.u32 %v19384_v26, %v1691_v43  ;;  %v1692_v47 = vshrl.u32 %v19380_v32, %v1691_v43  ;;  %v1706_v24 = vshrl.u32 %v19385_v31, %v1691_v43 }
 0x983   : > { %v1695_v29 = vor.u32 %v1694_v20, %v1693_v2  ;;  %v1698_v63 = vor.u32 %v1697_v17, %v1696_v13  ;;  %v1701_v34 = vor.u32 %v1700_v59, %v1699_v38  ;;  %vm1708_vm10 = vcmp.lt.s32.totalorder %v1689_v41, 1 }
 0x984   : > { %v1704_v51 = vor.u32 %v1703_v19, %v1702_v45  ;;  %vm1710_vm5 = vcmp.lt.s32.totalorder %v1689_v41, 3  ;;  %v1899_v62 = vsub.s32 32, %v1898_v46  ;;  %v16443_v57 = vsel %vm1583_vm3, %v1582_v44, 0 }
 0x985   : > { %v1707_v33 = vor.u32 %v1706_v24, %v1705_v42  ;;  %vm1709_vm11 = vcmp.lt.s32.totalorder %v1689_v41, 2  ;;  %vm1711_vm15 = vcmp.lt.s32.totalorder %v1689_v41, 4  ;;  %v1712_v9 = vsel %vm1708_vm10, %v1692_v47, %v1695_v29 }
 0x986   : > { %v1713_v37 = vsel %vm1711_vm15, %v1701_v34, 2102212464  ;;  %v1716_v54 = vsel %vm1708_vm10, %v1695_v29, %v1698_v63  ;;  %v1717_v52 = vsel %vm1711_vm15, %v1704_v51, 920167782  ;;  %v1720_v8 = vsel %vm1708_vm10, %v1698_v63, %v1701_v34 }
 0x987   : > { %v1714_v36 = vsel %vm1710_vm5, %v1698_v63, %v1713_v37  ;;  %v1718_v56 = vsel %vm1710_vm5, %v1701_v34, %v1717_v52  ;;  %v1721_v39 = vsel %vm1711_vm15, %v1707_v33, 1326507024  ;;  %v1724_v2 = vshll.u32 %v1684_v15, 8  ;;  %v19386_v33 = vld [vmem:[#allocation17_spill] sm:$0xff] }
 0x988   : > { %v1719_v43 = vsel %vm1709_vm11, %v1716_v54, %v1718_v56  ;;  %v1722_v20 = vsel %vm1710_vm5, %v1704_v51, %v1721_v39  ;;  %v18101_v44 = vand.u32 2147483647, %v16420_v10  ;;  %v1715_v13 = vsel %vm1709_vm11, %v1712_v9, %v1714_v36 }
 0x989   : > { %v1723_v17 = vsel %vm1709_vm11, %v1720_v8, %v1722_v20  ;;  %v16449_v21 = vmul.u32.u64.low %v1724_v2, %v1719_v43  ;;  %v16450_v38 = vmul.u32.u64.high %v1724_v2, %v1719_v43, %v16449_v21  ;;  %v16457_v19 = vand.u32 31, %v16443_v57 }
 0x98a   : > { %v16453_v59 = vmul.u32.u64.low %v1724_v2, %v1723_v17  ;;  %v16454_v45 = vmul.u32.u64.high %v1724_v2, %v1723_v17, %v16453_v59  ;;  %v1901_v42 = vshll.u32 %v19380_v32, %v1898_v46  ;;  %v1902_v29 = vshrl.u32 %v19381_v61, %v1899_v62 }
 0x98b   : > { %v1731_v41 = vmul.u32 %v1724_v2, %v1715_v13  ;;  %v1891_v63 = vand.u32 8388607, %v18101_v44  ;;  %v1904_v34 = vshll.u32 %v19381_v61, %v1898_v46  ;;  %v1905_v51 = vshrl.u32 %v19382_v48, %v1899_v62 }
 0x98c   : > { %v1734_v15 = vadd.s32 1, %v16450_v38  ;;  %v1897_v47 = vshrl.u32 %v1896_v55, 5  ;;  %v1907_v24 = vshll.u32 %v19382_v48, %v1898_v46  ;;  %v279_v9 = vrot.slane %v19386_v33, 3 }
 0x98d   : > { %vm1733_vm6 = vc.u32 %v16454_v45, %v16449_v21  ;;  %v1900_v37 = vshrl.u32 %v19380_v32, %v1899_v62  ;;  %v1903_v54 = vor.u32 %v1902_v29, %v1901_v42  ;;  %v16472_v52 = vsub.s32 32, %v16457_v19 }
 0x98e   : > { %v1735_v8 = vsel %vm1733_vm6, %v1734_v15, %v16450_v38  ;;  %v1906_v36 = vor.u32 %v1905_v51, %v1904_v34  ;;  %v1908_v56 = vshrl.u32 %v19383_v25, %v1899_v62  ;;  %v1910_v55 = vshll.u32 %v19383_v25, %v1898_v46 }
 0x98f   : > { %v1736_v39 = vadd.s32 %v1735_v8, %v1731_v41  ;;  %v1892_v2 = vor.u32 8388608, %v1891_v63  ;;  %v1911_v43 = vshrl.u32 %v19384_v26, %v1899_v62  ;;  %v1913_v20 = vshll.u32 %v19384_v26, %v1898_v46 }
 0x990   : > { %v1909_v13 = vor.u32 %v1908_v56, %v1907_v24  ;;  %v1914_v17 = vshrl.u32 %v19385_v31, %v1899_v62  ;;  %vm1916_vm14 = vcmp.lt.s32.totalorder %v1897_v47, 1  ;;  %vm1917_vm12 = vcmp.lt.s32.totalorder %v1897_v47, 2 }
 0x991   : > { %v1737_v59 = vadd.s32 536870912, %v1736_v39  ;;  %v1912_v42 = vor.u32 %v1911_v43, %v1910_v55  ;;  %vm1918_vm13 = vcmp.lt.s32.totalorder %v1897_v47, 3  ;;  %vm1919_vm9 = vcmp.lt.s32.totalorder %v1897_v47, 4 }
 0x992   : > { %v1915_v38 = vor.u32 %v1914_v17, %v1913_v20  ;;  %v1920_v29 = vsel %vm1916_vm14, %v1900_v37, %v1903_v54  ;;  %v1921_v34 = vsel %vm1919_vm9, %v1909_v13, 2102212464  ;;  %v1924_v51 = vsel %vm1916_vm14, %v1903_v54, %v1906_v36 }
 0x993   : > { %v16480_v15 = vshrl.u32 %v1737_v59, 30  ;;  %v1922_v41 = vsel %vm1918_vm13, %v1906_v36, %v1921_v34  ;;  %v1925_v63 = vsel %vm1919_vm9, %v1912_v42, 920167782  ;;  %v1928_v33 = vsel %vm1916_vm14, %v1906_v36, %v1909_v13 }
 0x994   : > { %v1923_v46 = vsel %vm1917_vm12, %v1920_v29, %v1922_v41  ;;  %v1926_v62 = vsel %vm1918_vm13, %v1909_v13, %v1925_v63  ;;  %v1929_v24 = vsel %vm1919_vm9, %v1915_v38, 1326507024  ;;  %v1932_v8 = vshll.u32 %v1892_v2, 8 }
 0x995   : > { %v1739_v56 = vshll.u32 %v16480_v15, 30  ;;  %v1927_v55 = vsel %vm1917_vm12, %v1924_v51, %v1926_v62  ;;  %v1930_v37 = vsel %vm1918_vm13, %v1912_v42, %v1929_v24  ;;  %v18102_v54 = vand.u32 2147483647, %v16426_v1  ;;  %v19387_v62 = vld [vmem:[#allocation19_spill] sm:$0xff] }
 0x996   : > { %v1931_v43 = vsel %vm1917_vm12, %v1928_v33, %v1930_v37  ;;  %v16490_v20 = vmul.u32.u64.low %v1932_v8, %v1927_v55  ;;  %v16491_v17 = vmul.u32.u64.high %v1932_v8, %v1927_v55, %v16490_v20  ;;  %v1589_v36 = vshll.u32 %v19380_v32, %v16457_v19 }
 0x997   : > { %v16496_v13 = vsub.s32 %v1736_v39, %v1739_v56  ;;  %v16498_v2 = vmul.u32.u64.low %v1932_v8, %v1931_v43  ;;  %v16499_v59 = vmul.u32.u64.high %v1932_v8, %v1931_v43, %v16498_v2  ;;  %v1939_v38 = vmul.u32 %v1932_v8, %v1923_v46 }
 0x998   : > { %v1585_v29 = vshrl.u32 %v16443_v57, 5  ;;  %v1590_v42 = vshrl.u32 %v19381_v61, %v16472_v52  ;;  %v1592_v47 = vshll.u32 %v19381_v61, %v16457_v19  ;;  %v1593_v34 = vshrl.u32 %v19382_v48, %v16472_v52 }
 0x999   : > { %v1742_v51 = vsub.s32 0, %v16496_v13  ;;  %v1595_v39 = vshll.u32 %v19382_v48, %v16457_v19  ;;  %v1596_v41 = vshrl.u32 %v19383_v25, %v16472_v52  ;;  %v1598_v57 = vshll.u32 %v19383_v25, %v16457_v19 }
 0x99a   : > { %v1942_v63 = vadd.s32 1, %v16491_v17  ;;  %v1579_v33 = vand.u32 8388607, %v18102_v54  ;;  %v1599_v46 = vshrl.u32 %v19384_v26, %v16472_v52  ;;  %v16522_v24 = vsel %vm19388_vm4, %v279_v9, %v19387_v62 }
 0x99b   : > { %19389 = vst [vmem:[#allocation114_spill] sm:$0xff] %v16522_v24  ;;  %v9174_v8 = vmin.u32 %v1742_v51, %v16496_v13  ;;  %vm1941_vm8 = vc.u32 %v16499_v59, %v16490_v20  ;;  %v1591_v56 = vor.u32 %v1590_v42, %v1589_v36  ;;  %v1594_v55 = vor.u32 %v1593_v34, %v1592_v47 }
 0x99c   : > { %v1943_v37 = vsel %vm1941_vm8, %v1942_v63, %v16491_v17  ;;  %v1600_v43 = vor.u32 %v1599_v46, %v1598_v57  ;;  %v1601_v2 = vshll.u32 %v19384_v26, %v16457_v19  ;;  %v1602_v44 = vshrl.u32 %v19385_v31, %v16472_v52 }
 0x99d   : > { %v1944_v54 = vadd.s32 %v1943_v37, %v1939_v38  ;;  %v1597_v11 = vor.u32 %v1596_v41, %v1595_v39  ;;  %vm1604_vm2 = vcmp.lt.s32.totalorder %v1585_v29, 1  ;;  %v1580_v9 = vor.u32 8388608, %v1579_v33 }
 0x99e   : > { %vm1606_vm7 = vcmp.lt.s32.totalorder %v1585_v29, 3  ;;  %v1783_v51 = vand.u32 2139095040, %v16522_v24  ;;  %v1744_v62 = vclz %v9174_v8  ;;  %v1588_v36 = vshrl.u32 %v19380_v32, %v16472_v52 }
 0x99f   : > { %v1945_v14 = vadd.s32 536870912, %v1944_v54  ;;  %vm1607_vm0 = vcmp.lt.s32.totalorder %v1585_v29, 4  ;;  %v1603_v17 = vor.u32 %v1602_v44, %v1601_v2  ;;  %vm1605_vm1 = vcmp.lt.s32.totalorder %v1585_v29, 2 }
 0x9a0   : > { %v1612_v19 = vsel %vm1604_vm2, %v1591_v56, %v1594_v55  ;;  %v1613_v42 = vsel %vm1607_vm0, %v1600_v43, 920167782  ;;  %v1609_v38 = vsel %vm1607_vm0, %v1597_v11, 2102212464  ;;  %v9175_v39 = vadd.s32 4294967294, %v1744_v62 }
 0x9a1   : > { %v16536_v47 = vshrl.u32 %v1945_v14, 30  ;;  %v1614_v34 = vsel %vm1606_vm7, %v1597_v11, %v1613_v42  ;;  %v1608_v41 = vsel %vm1604_vm2, %v1588_v36, %v1591_v56  ;;  %v1784_v63 = vshrl.u32 %v1783_v51, 23  ;;  %v9617_v56 = vld [vmem:[%s17526_s1 + $0xc0] sm:$0xff]  }
 0x9a2   : > { %v1615_v57 = vsel %vm1605_vm1, %v1612_v19, %v1614_v34  ;;  %v1610_v33 = vsel %vm1606_vm7, %v1594_v55, %v1609_v38  ;;  %v1616_v52 = vsel %vm1604_vm2, %v1594_v55, %v1597_v11  ;;  %v1617_v44 = vsel %vm1607_vm0, %v1603_v17, 1326507024 }
 0x9a3   : > { %v1620_v46 = vshll.u32 %v1580_v9, 8  ;;  %v1947_v8 = vshll.u32 %v16536_v47, 30  ;;  %v1618_v14 = vsel %vm1606_vm7, %v1600_v43, %v1617_v44  ;;  %vm9176_vm3 = vcmp.lt.s32.totalorder %v9175_v39, 0 }
 0x9a4   : > { %v1619_v37 = vsel %vm1605_vm1, %v1616_v52, %v1618_v14  ;;  %v1611_v51 = vsel %vm1605_vm1, %v1608_v41, %v1610_v33  ;;  %v9177_v9 = vadd.s32 4294967169, %v1784_v63  ;;  %vm19390_vm10 = vcmask 523264   ;;  %v9619_v14 = vld [vmem:[%s17526_s1 + $0xd0] sm:$0xff]  }
 0x9a5   : > { %v16546_v2 = vmul.u32.u64.low %v1620_v46, %v1615_v57  ;;  %v16547_v42 = vmul.u32.u64.high %v1620_v46, %v1615_v57, %v16546_v2  ;;  %v16554_v11 = vmul.u32.u64.low %v1620_v46, %v1619_v37  ;;  %v16555_v55 = vmul.u32.u64.high %v1620_v46, %v1619_v37, %v16554_v11  ;;  %9391 = vmatmul.mubr.msk.bf16.vlgmr.msra.gmra.mxu0 %vm19390_vm10, %v9617_v56  ;;  %vm19391_vm5 = vmmov %vm19390_vm10 }
 0x9a6   : > { %9395 = vmatmul.mubr.msk.bf16.vlgmr.msra.gmra.mxu1 %vm19391_vm5, %v9617_v56  ;;  %v16559_v43 = vsub.s32 %v1944_v54, %v1947_v8  ;;  %8214 = vmatprep.mubr.bf16.mxu0 %v19155_v5  ;;  %v1747_v62 = vsel %vm9176_vm3, 0, %v9175_v39  ;;  %v1627_v36 = vmul.u32 %v1620_v46, %v1611_v51  ;;  %v1790_v29 = vadd.s32 1, %v9177_v9  ;;  %v9618_v54 = vld [vmem:[%s17526_s1 + $0xc8] sm:$0xff]   ;;  %vm19392_vm6 = vmmov %vm19391_vm5 }
 0x9a7   : > { %8287 = vmatprep.mubr.bf16.mxu1 %v19155_v5  ;;  %v1630_v17 = vadd.s32 1, %v16547_v42  ;;  %vm1629_vm11 = vc.u32 %v16555_v55, %v16546_v2  ;;  %v1752_v19 = vsub.s32 4294967266, %v1747_v62  ;;  %vm19393_vm14 = vmmov %vm19391_vm5  ;;  %v1732_v39 = vadd.s32 %v16449_v21, %v16454_v45 }
 0x9a8   : > { %v1950_v38 = vsub.s32 0, %v16559_v43  ;;  %vm1791_vm15 = vcmp.gt.s32.totalorder %v1790_v29, 0  ;;  %v1748_v63 = vsub.s32 32, %v1747_v62  ;;  %v1749_v46 = vshll.u32 %v16496_v13, %v1747_v62  ;;  %vm19394_vm12 = vmmov %vm19391_vm5 }
 0x9a9   : > { %v1631_v34 = vsel %vm1629_vm11, %v1630_v17, %v16547_v42  ;;  %v1753_v33 = vadd.s32 127, %v1752_v19  ;;  %v1792_v8 = vsel %vm1791_vm15, %v1790_v29, 0  ;;  %vm19395_vm13 = vmmov %vm19391_vm5  ;;  %v18104_v13 = vand.u32 2147483647, %v16522_v24  ;;  %v9620_v17 = vld [vmem:[%s17526_s1 + $0xd8] sm:$0xff]  }
 0x9aa   : > { %v1632_v41 = vadd.s32 %v1631_v34, %v1627_v36  ;;  %v9182_v52 = vmin.u32 %v1950_v38, %v16559_v43  ;;  %v1750_v37 = vshrl.u32 %v1732_v39, %v1748_v63  ;;  %v1794_v56 = vand.u32 31, %v1792_v8  ;;  %vm19396_vm4 = vmmov %vm19391_vm5 }
 0x9ab   : > { %v1754_v42 = vshll.u32 %v1753_v33, 23  ;;  %v1940_v34 = vadd.s32 %v16490_v20, %v16499_v59  ;;  %vm19397_vm8 = vmmov %vm19396_vm4  ;;  %v1628_v20 = vadd.s32 %v16546_v2, %v16555_v55  ;;  %vm1678_vm10 = vcmp.lt.s32.totalorder %v16416_v4, 0 }
 0x9ac   : > { %v1633_v57 = vadd.s32 536870912, %v1632_v41  ;;  %v1952_v21 = vclz %v9182_v52  ;;  %v1751_v51 = vor.u32 %v1750_v37, %v1749_v46  ;;  %v1795_v62 = vsub.s32 32, %v1794_v56 }
 0x9ad   : > { %9392 = vmatmul.mubr.msk.bf16.gmra.mxu0 %vm19392_vm6, %v9618_v54  ;;  %v1755_v11 = vor.u32 4788187, %v1754_v42  ;;  %v1797_v39 = vshll.u32 %v19380_v32, %v1794_v56  ;;  %v1800_v52 = vshll.u32 %v19381_v61, %v1794_v56  ;;  %vm1574_vm15 = vcmp.lt.s32.totalorder %v16426_v1, 0 }
 0x9ae   : > { %9396 = vmatmul.mubr.msk.bf16.gmra.mxu1 %vm19393_vm14, %v9618_v54  ;;  %8224 = vmatprep.mubr.bf16.mxu0 %v19155_v5  ;;  %v16578_v44 = vshrl.u32 %v1633_v57, 30  ;;  %v9183_v9 = vadd.s32 4294967294, %v1952_v21  ;;  %v1758_v19 = vcvt.s32.f32 %v1751_v51  ;;  %v1787_v57 = vand.u32 8388607, %v18104_v13 }
 0x9af   : > { %8297 = vmatprep.mubr.bf16.mxu1 %v19155_v5  ;;  %v1756_v29 = vand.u32 2147483647, %v1755_v11  ;;  %v1798_v63 = vshrl.u32 %v19381_v61, %v1795_v62  ;;  %v1801_v46 = vshrl.u32 %v19382_v48, %v1795_v62  ;;  %v1807_v37 = vshrl.u32 %v19384_v26, %v1795_v62 }
 0x9b0   : > { %v1635_v45 = vshll.u32 %v16578_v44, 30  ;;  %vm9184_vm9 = vcmp.lt.s32.totalorder %v9183_v9, 0  ;;  %v1804_v2 = vshrl.u32 %v19383_v25, %v1795_v62  ;;  %v1788_v55 = vor.u32 8388608, %v1787_v57 }
 0x9b1   : > { %v16599_v54 = vsel %vm9184_vm9, 0, %v9183_v9  ;;  %v16607_v33 = vmul.f32 %v1758_v19, %v1756_v29  ;;  %v1793_v51 = vshrl.u32 %v1792_v8, 5  ;;  %v1796_v61 = vshrl.u32 %v19380_v32, %v1795_v62 }
 0x9b2   : > { %v16587_v36 = vsub.s32 %v1632_v41, %v1635_v45  ;;  %v1960_v42 = vsub.s32 4294967266, %v16599_v54  ;;  %v1803_v45 = vshll.u32 %v19382_v48, %v1794_v56  ;;  %v1799_v11 = vor.u32 %v1798_v63, %v1797_v39 }
 0x9b3   : > { %v1956_v9 = vsub.s32 32, %v16599_v54  ;;  %v1809_v29 = vshll.u32 %v19384_v26, %v1794_v56  ;;  %v1810_v48 = vshrl.u32 %v19385_v31, %v1795_v62  ;;  %vm1812_vm7 = vcmp.lt.s32.totalorder %v1793_v51, 1 }
 0x9b4   : > { %v1638_v38 = vsub.s32 0, %v16587_v36  ;;  %v1805_v8 = vor.u32 %v1804_v2, %v1803_v45  ;;  %vm1814_vm0 = vcmp.lt.s32.totalorder %v1793_v51, 3  ;;  %vm1815_vm1 = vcmp.lt.s32.totalorder %v1793_v51, 4 }
 0x9b5   : > { %9393 = vmatmul.mubr.msk.bf16.gmra.mxu0 %vm19394_vm12, %v9619_v14  ;;  %v1811_v39 = vor.u32 %v1810_v48, %v1809_v29  ;;  %v1958_v63 = vshrl.u32 %v1940_v34, %v1956_v9  ;;  %vm1813_vm3 = vcmp.lt.s32.totalorder %v1793_v51, 2  ;;  %v1816_v62 = vsel %vm1812_vm7, %v1796_v61, %v1799_v11 }
 0x9b6   : > { %9397 = vmatmul.mubr.msk.bf16.gmra.mxu1 %vm19395_vm13, %v9619_v14  ;;  %8234 = vmatprep.mubr.bf16.mxu0 %v19155_v5  ;;  %v9170_v41 = vmin.u32 %v1638_v38, %v16587_v36  ;;  %v1806_v14 = vshll.u32 %v19383_v25, %v1794_v56  ;;  %v1802_v38 = vor.u32 %v1801_v46, %v1800_v52  ;;  %v1817_v26 = vsel %vm1815_vm1, %v1805_v8, 2102212464 }
 0x9b7   : > { %8307 = vmatprep.mubr.bf16.mxu1 %v19155_v5  ;;  %v1825_v34 = vsel %vm1815_vm1, %v1811_v39, 1326507024  ;;  %v1828_v45 = vshll.u32 %v1788_v55, 8  ;;  %v1760_v2 = vxor.u32 2147483648, %v16607_v33  ;;  %v19398_v55 = vand.u32 2147483647, %v16416_v4 }
 0x9b8   : > { %v1640_v59 = vclz %v9170_v41  ;;  %v1808_v41 = vor.u32 %v1807_v37, %v1806_v14  ;;  %v1820_v56 = vsel %vm1812_vm7, %v1799_v11, %v1802_v38  ;;  %v1824_v37 = vsel %vm1812_vm7, %v1802_v38, %v1805_v8 }
 0x9b9   : > { %vm16647_vm5 = vcmp.le.f32.partialorder %v19398_v55, 0.7853982  ;;  %vm19409_vm6 = vcmask 1042432   ;;  %vm1886_vm14 = vcmp.lt.s32.totalorder %v16420_v10, 0 }
 0x9ba   : > { %v9171_v21 = vadd.s32 4294967294, %v1640_v59  ;;  %v1961_v59 = vadd.s32 127, %v1960_v42  ;;  %vm19415_vm13 = vmmov %vm19409_vm6 }
 0x9bb   : > { %vm19417_vm9 = vmmov %vm19409_vm6 }
 0x9bc   : > { %vm9172_vm2 = vcmp.lt.s32.totalorder %v9171_v21, 0  ;;  %v1962_v52 = vshll.u32 %v1961_v59, 23 }
 0x9bd   : > { %9394 = vmatmul.mubr.msk.bf16.gmra.mxu0 %vm19396_vm4, %v9620_v17  ;;  %v1643_v19 = vsel %vm9172_vm2, 0, %v9171_v21  ;;  %v1826_v21 = vsel %vm1814_vm0, %v1808_v41, %v1825_v34  ;;  %v19404_v34 = vld [vmem:[#allocation30_spill] sm:$0xff]  ;;  %vm19420_vm4 = vmmov %vm19409_vm6 }
 0x9be   : > { %9398 = vmatmul.mubr.msk.bf16.gmra.mxu1 %vm19397_vm8, %v9620_v17  ;;  %8382 = vmatprep.mubr.bf16.mxu0 %v19155_v5  ;;  %v1957_v17 = vshll.u32 %v16559_v43, %v16599_v54  ;;  %v1644_v25 = vsub.s32 32, %v1643_v19  ;;  %v1648_v57 = vsub.s32 4294967266, %v1643_v19  ;;  %v1645_v32 = vshll.u32 %v16587_v36, %v1643_v19  ;;  %vm19427_vm2 = vmmov %vm19420_vm4 }
 0x9bf   : > { %8455 = vmatprep.mubr.bf16.mxu1 %v19155_v5  ;;  %v1821_v54 = vsel %vm1815_vm1, %v1808_v41, 920167782  ;;  %v1818_v36 = vsel %vm1814_vm0, %v1802_v38, %v1817_v26  ;;  %v1827_v9 = vsel %vm1813_vm3, %v1824_v37, %v1826_v21  ;;  %v1963_v29 = vor.u32 4788187, %v1962_v52  ;;  %vm19431_vm7 = vmmov %vm19427_vm2 }
 0x9c0   : > { %v1646_v13 = vshrl.u32 %v1628_v20, %v1644_v25  ;;  %v1649_v43 = vadd.s32 127, %v1648_v57  ;;  %v1822_v46 = vsel %vm1814_vm0, %v1805_v8, %v1821_v54  ;;  %v1959_v61 = vor.u32 %v1958_v63, %v1957_v17  ;;  %vm19434_vm0 = vmmov %vm19427_vm2 }
 0x9c1   : > { %v1823_v42 = vsel %vm1813_vm3, %v1820_v56, %v1822_v46  ;;  %v1819_v19 = vsel %vm1813_vm3, %v1816_v62, %v1818_v36  ;;  %v1761_v17 = vsel %vm1678_vm10, %v1760_v2, %v16607_v33  ;;  %v1964_v8 = vand.u32 2147483647, %v1963_v29  ;;  %v19401_v56 = vld [vmem:[#allocation25_spill] sm:$0xff]  ;;  %vm19438_vm1 = vmmov %vm19434_vm0 }
 0x9c2   : > { %v1650_v31 = vshll.u32 %v1649_v43, 23  ;;  %v1647_v14 = vor.u32 %v1646_v13, %v1645_v32  ;;  %v16637_v11 = vmul.u32.u64.low %v1828_v45, %v1827_v9  ;;  %v16638_v13 = vmul.u32.u64.high %v1828_v45, %v1827_v9, %v16637_v11  ;;  %v19403_v36 = vld [vmem:[#allocation45_spill] sm:$0xff]  ;;  %v19407_v9 = vld [vmem:[#allocation36_spill] sm:$0xff] }
 0x9c3   : > { %v16641_v38 = vmul.u32.u64.low %v1828_v45, %v1823_v42  ;;  %v16642_v48 = vmul.u32.u64.high %v1828_v45, %v1823_v42, %v16641_v38  ;;  %v1835_v57 = vmul.u32 %v1828_v45, %v1819_v19  ;;  %v1966_v51 = vcvt.s32.f32 %v1959_v61  ;;  %v19405_v42 = vld [vmem:[#allocation12_spill] sm:$0xff]  ;;  %v19406_v45 = vld [vmem:[#allocation34_spill] sm:$0xff] }
 0x9c4   : > { %v1651_v20 = vor.u32 4788187, %v1650_v31  ;;  %v1654_v41 = vcvt.s32.f32 %v1647_v14  ;;  %v1764_v39 = vsel %vm16647_vm5, %v16416_v4, %v1761_v17  ;;  %v7752_v54 = vrot.slane %v19401_v56, 5  ;;  %v19402_v31 = vld [vmem:[#allocation39_spill] sm:$0xff]  ;;  %v19408_v11 = vld [vmem:[#allocation20_spill] sm:$0xff] }
 0x9c5   : > { %vm1837_vm11 = vc.u32 %v16638_v13, %v16641_v38  ;;  %v1838_v32 = vadd.s32 1, %v16642_v48  ;;  %v1762_v33 = vsub.s32 4, %v16480_v15  ;;  %10446 = vcosq.f32 %v1764_v39 }
 0x9c6   : > { %v1652_v59 = vand.u32 2147483647, %v1651_v20  ;;  %v1967_v52 = vmul.f32 %v1966_v51, %v1964_v8  ;;  %v18107_v62 = vrot.slane %v19402_v31, 5  ;;  %10448 = vsinq.f32 %v1764_v39 }
 0x9c7   : > { %v1839_v43 = vsel %vm1837_vm11, %v1838_v32, %v16642_v48  ;;  %v18106_v37 = vrot.slane %v19403_v36, 5  ;;  %v7756_v20 = vrot.slane %v19404_v34, 5  ;;  %v7754_v21 = vrot.slane %v19405_v42, 5 }
 0x9c8   : > { %v1655_v63 = vmul.f32 %v1654_v41, %v1652_v59  ;;  %v1840_v26 = vadd.s32 %v1839_v43, %v1835_v57  ;;  %v18105_v2 = vrot.slane %v19406_v45, 5  ;;  %v18108_v61 = vrot.slane %v19407_v9, 5  ;;  %v19411_v59 = vld [vmem:[#allocation27_spill] sm:$0xff]  ;;  %v19419_v43 = vld [vmem:[#allocation32_spill] sm:$0xff] }
 0x9c9   : > { %v7758_v29 = vrot.slane %v19408_v11, 5  ;;  %v16676_v48 = vsel %vm19409_vm6, %v18107_v62, %v7752_v54  ;;  %v7760_v41 = vrot.slane %v19411_v59, 5  ;;  %v1763_v55 = vsel %vm1678_vm10, %v1762_v33, %v16480_v15  ;;  %v19423_v11 = vld [vmem:[#allocation14_spill] sm:$0xff] }
 0x9ca   : > { %v1656_v46 = vxor.u32 2147483648, %v1655_v63  ;;  %v1841_v14 = vadd.s32 536870912, %v1840_v26  ;;  %19410 = vst [vmem:[#allocation130_spill] sm:$0xff] %v16676_v48  ;;  %v1968_v17 = vxor.u32 2147483648, %v1967_v52  ;;  %v19412_v57 = vand.u32 2147483647, %v16426_v1 }
 0x9cb   : > { %v16695_v39 = vsel %vm19415_vm13, %v18106_v37, %v7756_v20  ;;  %v16700_v15 = vsel %vm19417_vm9, %v18105_v2, %v7754_v21  ;;  %v7764_v56 = vrot.slane %v19419_v43, 5  ;;  %v1970_v33 = vsub.s32 4, %v16536_v47  ;;  %v19433_v43 = vld [vmem:[#allocation46_spill] sm:$0xff]  ;;  %v19446_v37 = vld [vmem:[#allocation31_spill] sm:$0xff] }
 0x9cc   : > { %v16671_v19 = vshrl.u32 %v1841_v14, 30  ;;  %vm16685_vm12 = vcmp.le.f32.partialorder %v19412_v57, 0.7853982  ;;  %v1657_v51 = vsel %vm1574_vm15, %v1656_v46, %v1655_v63  ;;  %19416 = vst [vmem:[#allocation207_spill] sm:$0xff] %v16695_v39  ;;  %19418 = vst [vmem:[#allocation203_spill] sm:$0xff] %v16700_v15  ;;  %v16707_v63 = vsel %vm19420_vm4, %v18108_v61, %v7758_v29  ;;  %v19422_v46 = vld [vmem:[#allocation40_spill] sm:$0xff] }
 0x9cd   : > { %19421 = vst [vmem:[#allocation172_spill] sm:$0xff] %v16707_v63  ;;  %v1765_v34 = vsel %vm16647_vm5, 0, %v1763_v55  ;;  %v7762_v57 = vrot.slane %v19423_v11, 5  ;;  %v19424_v2 = vand.u32 2147483647, %v16420_v10  ;;  %v1969_v62 = vsel %vm1886_vm14, %v1968_v17, %v1967_v52 }
 0x9ce   : > { %v1843_v32 = vshll.u32 %v16671_v19, 30  ;;  %v1660_v61 = vsel %vm16685_vm12, %v16426_v1, %v1657_v51  ;;  %v16727_v25 = vsel %vm19427_vm2, %v7752_v54, %v7760_v41  ;;  %v1769_v63 = vadd.s32 3, %v1765_v34 }
 0x9cf   : > { %vm16717_vm8 = vcmp.le.f32.partialorder %v19424_v2, 0.7853982  ;;  %19428 = vst [vmem:[#allocation88_spill] sm:$0xff] %v16727_v25  ;;  %v16733_v2 = vsel %vm19431_vm7, %v7756_v20, %v7764_v56  ;;  %v1971_v52 = vsel %vm1886_vm14, %v1970_v33, %v16536_v47  ;;  %v1658_v41 = vsub.s32 4, %v16578_v44  ;;  %v19436_v20 = vld [vmem:[#allocation38_spill] sm:$0xff] }
 0x9d0   : > { %v16712_v42 = vsub.s32 %v1840_v26, %v1843_v32  ;;  %v19429_v26 = vld [vmem:[#allocation22_spill] sm:$0xff]  ;;  %v19430_v32 = vld [vmem:[#allocation24_spill] sm:$0xff]  ;;  %19432 = vst [vmem:[#allocation192_spill] sm:$0xff] %v16733_v2  ;;  %v1972_v54 = vsel %vm16717_vm8, %v16420_v10, %v1969_v62  ;;  %10450 = vcosq.f32 %v1660_v61  ;;  %v16745_v51 = vsel %vm19434_vm0, %v7754_v21, %v7762_v57  ;;  %v19442_v10 = vld [vmem:[#allocation29_spill] sm:$0xff] }
 0x9d1   : > { %v7766_v55 = vrot.slane %v19429_v26, 5  ;;  %v7796_v14 = vrot.slane %v19430_v32, 3  ;;  %19435 = vst [vmem:[#allocation205_spill] sm:$0xff] %v16745_v51  ;;  %v19437_v32 = vld [vmem:[#allocation44_spill] sm:$0xff]  ;;  %10452 = vsinq.f32 %v1660_v61  ;;  %v19440_v62 = vrot.slane %v19422_v46, 3  ;;  %v19443_v2 = vld [vmem:[#allocation11_spill] sm:$0xff] }
 0x9d2   : > { %v1846_v5 = vsub.s32 0, %v16712_v42  ;;  %v16749_v26 = vpop.eup %10446  ;;  %vm19441_vm3 = vcmask 1044480   ;;  %v7800_v56 = vrot.slane %v19442_v10, 3  ;;  %v7798_v59 = vrot.slane %v19443_v2, 3  ;;  %v19444_v51 = vld [vmem:[#allocation18_spill] sm:$0xff]  ;;  %v19448_v10 = vld [vmem:[#allocation21_spill] sm:$0xff] }
 0x9d3   : > { %v16752_v47 = vsel %vm19438_vm1, %v7758_v29, %v7766_v55  ;;  %v16757_v33 = vsel %vm19441_vm3, %v19440_v62, %v7796_v14  ;;  %v10449_v57 = vpop.eup %10448  ;;  %v1770_v61 = vand.u32 3, %v1769_v63  ;;  %10454 = vcosq.f32 %v1972_v54  ;;  %v19445_v62 = vld [vmem:[#allocation26_spill] sm:$0xff]  ;;  %vm19452_vm6 = vmmov %vm19441_vm3 }
 0x9d4   : > { %v9178_v17 = vmin.u32 %v1846_v5, %v16712_v42  ;;  %19439 = vst [vmem:[#allocation160_spill] sm:$0xff] %v16752_v47  ;;  %v1973_v5 = vsel %vm16717_vm8, 0, %v1971_v52  ;;  %v7802_v25 = vrot.slane %v19444_v51, 3  ;;  %10456 = vsinq.f32 %v1972_v54  ;;  %vm19454_vm14 = vmmov %vm19441_vm3 }
 0x9d5   : > { %v1659_v29 = vsel %vm1574_vm15, %v1658_v41, %v16578_v44  ;;  %v7804_v47 = vrot.slane %v19445_v62, 3  ;;  %v7808_v52 = vrot.slane %v19446_v37, 3  ;;  %v1977_v39 = vadd.s32 3, %v1973_v5  ;;  %vm19450_vm15 = vmmov %vm19441_vm3 }
 0x9d6   : > { %v1848_v21 = vclz %v9178_v17  ;;  %v19447_v17 = vld [vmem:[#allocation13_spill] sm:$0xff]  ;;  %v7810_v48 = vrot.slane %v19448_v10, 3  ;;  %v1773_v2 = vxor.u32 2147483648, %v10449_v57  ;;  %v1776_v63 = vxor.u32 2147483648, %v16749_v26  ;;  %vm19456_vm13 = vmmov %vm19441_vm3 }
 0x9d7   : > { %v7806_v15 = vrot.slane %v19447_v17, 3  ;;  %vm1772_vm5 = vcmp.eq.s32.totalorder %v1770_v61, 0  ;;  %vm1775_vm11 = vcmp.eq.s32.totalorder %v1770_v61, 2  ;;  %v1661_v54 = vsel %vm16685_vm12, 0, %v1659_v29  ;;  %vm19457_vm12 = vmmov %vm19441_vm3 }
 0x9d8   : > { %v9179_v55 = vadd.s32 4294967294, %v1848_v21  ;;  %v19449_v41 = vrot.slane %v19433_v43, 3  ;;  %v19451_v21 = vrot.slane %v19436_v20, 3  ;;  %v19453_v10 = vrot.slane %v19437_v32, 3  ;;  %vm19459_vm4 = vmmov %vm19441_vm3 }
 0x9d9   : > { %v3420_v40 = vand.u32 3, %v1765_v34  ;;  %v16792_v8 = vsel %vm19456_vm13, %v7796_v14, %v7804_v47  ;;  %v16795_v29 = vsel %vm19457_vm12, %v7800_v56, %v7808_v52  ;;  %vm1771_vm9 = vcmp.lt.s32.totalorder %v1770_v61, 2  ;;  %vm19461_vm8 = vmmov %vm19441_vm3 }
 0x9da   : > { %vm9180_vm10 = vcmp.lt.s32.totalorder %v9179_v55, 0  ;;  %v16779_v51 = vsel %vm19450_vm15, %v19449_v41, %v7800_v56  ;;  %v16784_v37 = vsel %vm19452_vm6, %v19451_v21, %v7798_v59  ;;  %v16789_v18 = vsel %vm19454_vm14, %v19453_v10, %v7802_v25  ;;  %19458 = vst [vmem:[#allocation180_spill] sm:$0xff] %v16795_v29 }
 0x9db   : > { %v16774_v44 = vsel %vm9180_vm10, 0, %v9179_v55  ;;  %19455 = vst [vmem:[#allocation191_spill] sm:$0xff] %v16789_v18  ;;  %v16797_v55 = vand.u32 3, %v1977_v39  ;;  %v1774_v21 = vsel %vm1772_vm5, %v16749_v26, %v1773_v2  ;;  %v1777_v20 = vsel %vm1775_vm11, %v1776_v63, %v10449_v57 }
 0x9dc   : > { %v1856_v41 = vsub.s32 4294967266, %v16774_v44  ;;  %v1665_v9 = vadd.s32 3, %v1661_v54  ;;  %v16802_v32 = vsel %vm19459_vm4, %v7798_v59, %v7806_v15  ;;  %v16805_v34 = vsel %vm19461_vm8, %v7802_v25, %v7810_v48 }
 0x9dd   : > { %19460 = vst [vmem:[#allocation166_spill] sm:$0xff] %v16802_v32  ;;  %19462 = vst [vmem:[#allocation102_spill] sm:$0xff] %v16805_v34  ;;  %v16807_v14 = vand.u32 3, %v1973_v5  ;;  %v19463_v56 = vand.u32 2147483647, %v16522_v24  ;;  %v19464_v39 = vmov 0  ;;  %vm1768_vm7 = vweird.f32 %v16416_v4  ;;  %v16817_v61 = vpop.eup %10450 }
 0x9de   : > { %vm3422_vm0 = vcmp.eq.s32.totalorder %v3420_v40, 0  ;;  %vm3425_vm1 = vcmp.eq.s32.totalorder %v3420_v40, 2  ;;  %v1866_v47 = vsub.s32 4, %v16671_v19  ;;  %v1778_v59 = vsel %vm1771_vm9, %v1774_v21, %v1777_v20  ;;  %v16822_v5 = vpop.eup %10452 }
 0x9df   : > { %vm16811_vm2 = vcmp.le.f32.partialorder %v19463_v56, 0.7853982  ;;  %v1836_v48 = vadd.s32 %v16641_v38, %v16638_v13  ;;  %v1852_v15 = vsub.s32 32, %v16774_v44  ;;  %v1857_v25 = vadd.s32 127, %v1856_v41 }
 0x9e0   : > { %v19465_v39 = vsel %vm16811_vm2, 4294967295, %v19464_v39  ;;  %vm3421_vm3 = vcmp.lt.s32.totalorder %v3420_v40, 2  ;;  %vm1980_vm10 = vcmp.eq.s32.totalorder %v16797_v55, 0  ;;  %v1666_v10 = vand.u32 3, %v1665_v9  ;;  %v10455_v13 = vpop.eup %10454 }
 0x9e1   : > { %19466 = vst [vmem:[#allocation184_spill] sm:$0xff] %v19465_v39  ;;  %vm18117_vm5 = vcmp.lt.s32.totalorder %v16522_v24, 0  ;;  %v3427_v56 = vsel %vm3425_vm1, %v1776_v63, %v10449_v57  ;;  %vm1983_vm11 = vcmp.eq.s32.totalorder %v16797_v55, 2  ;;  %vm3628_vm15 = vcmp.eq.s32.totalorder %v16807_v14, 0  ;;  %v10457_v63 = vpop.eup %10456 }
 0x9e2   : > { %v16830_v20 = vand.u32 3, %v1661_v54  ;;  %v1779_v21 = vsel %vm1768_vm7, nan, %v1778_v59  ;;  %v3424_v34 = vsel %vm3422_vm0, %v16749_v26, %v1773_v2  ;;  %vm1979_vm6 = vcmp.lt.s32.totalorder %v16797_v55, 2 }
 0x9e3   : > { %v1672_v9 = vxor.u32 2147483648, %v16817_v61  ;;  %v1867_v57 = vsel %vm18117_vm5, %v1866_v47, %v16671_v19  ;;  %v1669_v54 = vxor.u32 2147483648, %v16822_v5  ;;  %v1853_v32 = vshll.u32 %v16712_v42, %v16774_v44 }
 0x9e4   : > { %v1854_v29 = vshrl.u32 %v1836_v48, %v1852_v15  ;;  %v1858_v18 = vshll.u32 %v1857_v25, 23  ;;  %vm3631_vm14 = vcmp.eq.s32.totalorder %v16807_v14, 2  ;;  %vm1668_vm13 = vcmp.eq.s32.totalorder %v1666_v10, 0 }
 0x9e5   : > { %vm1671_vm12 = vcmp.eq.s32.totalorder %v1666_v10, 2  ;;  %v8045_v26 = vrot.slane %v19447_v17, 4  ;;  %v8050_v2 = vrot.slane %v1779_v21, 4  ;;  %v1984_v19 = vxor.u32 2147483648, %v10455_v13 }
 0x9e6   : > { %vm1664_vm9 = vweird.f32 %v16426_v1  ;;  %vm3318_vm4 = vcmp.lt.s32.totalorder %v16830_v20, 2  ;;  %v3428_v47 = vsel %vm3421_vm3, %v3424_v34, %v3427_v56  ;;  %v1981_v48 = vxor.u32 2147483648, %v10457_v63  ;;  %v10500_v34 = vld [vmem:[%s10655_s28 + $0x8] sm:$0x3f] }
 0x9e7   : > { %vm1667_vm8 = vcmp.lt.s32.totalorder %v1666_v10, 2  ;;  %v1869_v15 = vsel %vm16811_vm2, 0, %v1867_v57  ;;  %v1670_v17 = vsel %vm1668_vm13, %v16817_v61, %v1669_v54  ;;  %v1673_v25 = vsel %vm1671_vm12, %v1672_v9, %v16822_v5 }
 0x9e8   : > { %v1855_v21 = vor.u32 %v1854_v29, %v1853_v32  ;;  %v1859_v24 = vor.u32 4788187, %v1858_v18  ;;  %vm3319_vm0 = vcmp.eq.s32.totalorder %v16830_v20, 0  ;;  %vm3322_vm1 = vcmp.eq.s32.totalorder %v16830_v20, 2 }
 0x9e9   : > { %vm19468_vm5 = vcmask 1043456   ;;  %vm19469_vm3 = vcmask 1045504   ;;  %v16874_v57 = vsel %vm1768_vm7, nan, %v3428_v47  ;;  %vm19471_vm13 = vcmask 1041408  }
 0x9ea   : > { %v16866_v40 = vsel %vm19468_vm5, %v8045_v26, %v8050_v2  ;;  %v16870_v56 = vsel %vm19469_vm3, %v10500_v34, %v8045_v26  ;;  %19470 = vst [vmem:[#allocation163_spill] sm:$0xff] %v16874_v57  ;;  %v16878_v18 = vsel %vm19471_vm13, %v8050_v2, %v19423_v11  ;;  %v1985_v32 = vsel %vm1983_vm11, %v1984_v19, %v10457_v63  ;;  %vm19478_vm7 = vmmov %vm19469_vm3 }
 0x9eb   : > { %19472 = vst [vmem:[#allocation150_spill] sm:$0xff] %v16878_v18  ;;  %v16884_v29 = vsel %vm3631_vm14, %v1984_v19, %v10457_v63  ;;  %v1982_v4 = vsel %vm1980_vm10, %v10455_v13, %v1981_v48  ;;  %v1674_v47 = vsel %vm1667_vm8, %v1670_v17, %v1673_v25  ;;  %v1873_v57 = vadd.s32 3, %v1869_v15  ;;  %vm19492_vm5 = vmmov %vm19469_vm3 }
 0x9ec   : > { %v1860_v11 = vand.u32 2147483647, %v1859_v24  ;;  %v1862_v2 = vcvt.s32.f32 %v1855_v21  ;;  %v8097_v18 = vpack.c.bf16 %v16866_v40, %v16870_v56  ;;  %v16901_v19 = vsel %vm3628_vm15, %v10455_v13, %v1981_v48  ;;  %vm19500_vm11 = vmmov %vm19469_vm3 }
 0x9ed   : > { %v3321_v24 = vsel %vm3319_vm0, %v16817_v61, %v1669_v54  ;;  %v3324_v10 = vsel %vm3322_vm1, %v1672_v9, %v16822_v5  ;;  %v16921_v13 = vsel %vm1664_vm9, nan, %v1674_v47  ;;  %v19473_v61 = vrot.slane %v19422_v46, 3  ;;  %vm19504_vm15 = vmmov %vm19469_vm3 }
 0x9ee   : > { %v16937_v48 = vsel %vm3318_vm4, %v3321_v24, %v3324_v10  ;;  %v1863_v25 = vmul.f32 %v1862_v2, %v1860_v11  ;;  %v19474_v46 = vrot.slane %v19402_v31, 5  ;;  %v19476_v20 = vrot.slane %v19406_v45, 5  ;;  %vm19508_vm14 = vmmov %vm19471_vm13 }
 0x9ef   : > { %v19477_v45 = vrot.slane %v19433_v43, 3  ;;  %vm19512_vm4 = vmmov %vm19471_vm13  ;;  %vm19513_vm8 = vcmask 1040384  }
 0x9f0   : > { %vm19514_vm0 = vmmov %vm19512_vm4 }
 0x9f1   : > { %vm19517_vm13 = vmmov %vm19513_vm8 }
 0xa30   : > { %v16824_v52 = vpop.f32.mrf.mxu0  ;;  %v7721_v38 = vpop.f32.mrf.mxu1 }
 0xa31   : > { %v16897_v63 = vadd.f32 %v16824_v52, %v16371_v49  ;;  %v16910_v17 = vadd.f32 %v7721_v38, %v16373_v30  ;;  %v16917_v52 = vsel %vm1979_vm6, %v1982_v4, %v1985_v32  ;;  %v16927_v38 = vand.u32 3, %v1873_v57 }
 0xa32   : > { %v7662_v41 = vpop.f32.mrf.mxu0  ;;  %v16844_v59 = vpop.f32.mrf.mxu1 }
 0xa33   : > { %v16913_v49 = vadd.f32 %v7662_v41, %v16375_v23  ;;  %v16929_v23 = vand.u32 3, %v1869_v15  ;;  %v16955_v31 = vadd.f32 %v16844_v59, %v16377_v12  ;;  %v1864_v59 = vxor.u32 2147483648, %v1863_v25 }
 0xa34   : > { %v16846_v50 = vpop.f32.mrf.mxu0  ;;  %v16852_v42 = vpop.f32.mrf.mxu1  ;;  %vm1876_vm1 = vcmp.eq.s32.totalorder %v16927_v38, 0 }
 0xa35   : > { %v16951_v4 = vmul.f32 %v19476_v20, %v16913_v49  ;;  %v7665_v24 = vadd.f32 %v16846_v50, %v16379_v16  ;;  %v19480_v50 = vld [vmem:[#allocation197_spill] sm:$0xff] }
 0xa36   : > { %v16854_v44 = vpop.f32.mrf.mxu0  ;;  %v16861_v35 = vpop.f32.mrf.mxu1 }
 0xa37   : > { %19467 = vst [vmem:[#allocation127_spill] sm:$0xff] %v16861_v35  ;;  %v8044_v35 = vrot.slane %v19445_v62, 4  ;;  %v7667_v43 = vadd.f32 %v16854_v44, %v19480_v50 }
 0xa38   : > { %v7670_v6 = vpop.f32.mrf.mxu0  ;;  %v7731_v26 = vpop.f32.mrf.mxu1 }
 0xa39   : > { %v16887_v39 = vadd.f32 %v7670_v6, %v16387_v22  ;;  %v16932_v55 = vadd.f32 %v7731_v26, %v16389_v28  ;;  %v8048_v28 = vrot.slane %v16921_v13, 4 }
 0xa3a   : > { %v7672_v34 = vpop.f32.mrf.mxu0  ;;  %v7733_v6 = vpop.f32.mrf.mxu1 }
 0xa3b   : > { %v7824_v54 = vmul.f32 %v19473_v61, %v16887_v39  ;;  %v7673_v47 = vadd.f32 %v7672_v34, %v16391_v53  ;;  %v7826_v10 = vmul.f32 %v19477_v45, %v16932_v55  ;;  %v19489_v45 = vld [vmem:[#allocation114_spill] sm:$0xff] }
 0xa3c   : > { %v7674_v22 = vpop.f32.mrf.mxu0  ;;  %v7735_v9 = vpop.f32.mrf.mxu1  ;;  %vm19490_vm10 = vcmp.lt.s32.totalorder %v19489_v45, 0 }
 0xa3d   : > { %v7675_v5 = vadd.f32 %v7674_v22, %v16395_v7  ;;  %v7736_v41 = vadd.f32 %v7735_v9, %v16397_v60  ;;  %v7780_v7 = vmul.f32 %v19474_v46, %v16897_v63  ;;  %v19475_v60 = vrot.slane %v19403_v36, 5 }
 0xa3e   : > { %v7676_v30 = vpop.f32.mrf.mxu0  ;;  %v7737_v15 = vpop.f32.mrf.mxu1  ;;  %v7854_v44 = vrot.slane %v7826_v10, 2 }
 0xa3f   : > { %v7828_v21 = vmul.f32 %v16757_v33, %v7675_v5  ;;  %v7677_v57 = vadd.f32 %v7676_v30, %v16399_v0  ;;  %v7782_v26 = vmul.f32 %v19475_v60, %v16910_v17  ;;  %v7848_v0 = vrot.slane %v7824_v54, 2  ;;  %v19479_v5 = vld [vmem:[#allocation188_spill] sm:$0xff] }
 0xa40   : > { %v7680_v32 = vpop.f32.mrf.mxu0  ;;  %v7830_v2 = vmul.f32 %v16779_v51, %v7736_v41  ;;  %v7741_v22 = vpop.f32.mrf.mxu1  ;;  %v7738_v53 = vadd.f32 %v7737_v15, %v16401_v27  ;;  %v7726_v16 = vadd.f32 %v16852_v42, %v19479_v5  ;;  %v19482_v41 = vld [vmem:[#allocation36_spill] sm:$0xff]  ;;  %v19484_v27 = vld [vmem:[#allocation38_spill] sm:$0xff]  ;;  %v19487_v42 = vld [vmem:[#allocation199_spill] sm:$0xff] }
 0xa41   : > { %v7681_v33 = vadd.f32 %v7680_v32, %v16403_v3  ;;  %v7849_v11 = vrot.slane %v7828_v21, 2  ;;  %v7829_v61 = vmul.f32 %v16784_v37, %v7677_v57  ;;  %v7742_v51 = vadd.f32 %v7741_v22, %v16405_v58  ;;  %v19486_v57 = vld [vmem:[#allocation179_spill] sm:$0xff] }
 0xa42   : > { %v7682_v36 = vpop.f32.mrf.mxu0  ;;  %v16970_v34 = vpop.f32.mrf.mxu1  ;;  %v19483_v46 = vrot.slane %v19482_v41, 5  ;;  %v19485_v21 = vrot.slane %v19484_v27, 3  ;;  %v7734_v15 = vadd.f32 %v7733_v6, %v19486_v57  ;;  %v7855_v32 = vrot.slane %v7830_v2, 2  ;;  %v19494_v2 = vld [vmem:[#allocation130_spill] sm:$0xff]  ;;  %v19495_v27 = vld [vmem:[#allocation207_spill] sm:$0xff] }
 0xa43   : > { %v7832_v12 = vmul.f32 %v16792_v8, %v7681_v33  ;;  %v7850_v3 = vsel %vm19478_vm7, %v7848_v0, %v7849_v11  ;;  %v19481_v8 = vld [vmem:[#allocation178_spill] sm:$0xff]  ;;  %v19488_v33 = vld [vmem:[#allocation127_spill] sm:$0xff] }
 0xa44   : > { %v7684_v54 = vpop.f32.mrf.mxu0  ;;  %v7683_v30 = vadd.f32 %v7682_v36, %v19481_v8  ;;  %v16980_v37 = vmul.f32 %v19483_v46, %v16955_v31  ;;  %v7825_v58 = vmul.f32 %v19485_v21, %v7673_v47  ;;  %v7745_v60 = vpop.f32.mrf.mxu1  ;;  %v7728_v0 = vadd.f32 %v19488_v33, %v19487_v42  ;;  %v19493_v8 = vld [vmem:[#allocation180_spill] sm:$0xff]  ;;  %v19496_v57 = vld [vmem:[#allocation203_spill] sm:$0xff] }
 0xa45   : > { %v7860_v9 = vrot.slane %v7832_v12, 2  ;;  %v7880_v22 = vsub.f32 %v7780_v7, %v7850_v3  ;;  %v1865_v36 = vsel %vm19490_vm10, %v1864_v59, %v1863_v25  ;;  %v7852_v12 = vrot.slane %v7829_v61, 2  ;;  %v19491_v54 = vld [vmem:[#allocation191_spill] sm:$0xff]  ;;  %v19497_v7 = vld [vmem:[#allocation166_spill] sm:$0xff]  ;;  %v19498_v25 = vld [vmem:[#allocation44_spill] sm:$0xff] }
 0xa46   : > { %v7685_v20 = vpop.f32.mrf.mxu0  ;;  %v16990_v5 = vmul.f32 %v19491_v54, %v7738_v53  ;;  %v16994_v41 = vmul.f32 %v19493_v8, %v7742_v51  ;;  %v7746_v6 = vpop.f32.mrf.mxu1  ;;  %v7784_v46 = vmul.f32 %v19494_v2, %v7665_v24  ;;  %v7786_v21 = vmul.f32 %v19495_v27, %v7726_v16  ;;  %v19503_v24 = vld [vmem:[#allocation88_spill] sm:$0xff] }
 0xa47   : > { %v7861_v50 = vsel %vm19492_vm5, %v7849_v11, %v7860_v9  ;;  %v7785_v10 = vmul.f32 %v19496_v57, %v7667_v43  ;;  %v7833_v3 = vmul.f32 %v19497_v7, %v7683_v30  ;;  %v7851_v60 = vrot.slane %v7825_v58, 2  ;;  %v19502_v20 = vld [vmem:[#allocation172_spill] sm:$0xff] }
 0xa48   : > { %v19499_v59 = vrot.slane %v19498_v25, 3  ;;  %v7856_v53 = vsel %vm19500_vm11, %v7854_v44, %v7855_v32  ;;  %v1868_v51 = vsel %vm16811_vm2, %v19489_v45, %v1865_v36  ;;  %v17007_v42 = vmul.f32 %v19502_v20, %v7728_v0  ;;  %v19505_v36 = vld [vmem:[#allocation205_spill] sm:$0xff]  ;;  %vm19506_vm2 = vmmov %vm19469_vm3 }
 0xa49   : > { %v7788_v16 = vmul.f32 %v19503_v24, %v16887_v39  ;;  %v7908_v33 = vmul.f32 2.0, %v7880_v22  ;;  %v7884_v43 = vsub.f32 %v7784_v46, %v7861_v50  ;;  %v7896_v54 = vrot.slane %v7880_v22, 3  ;;  %vm19507_vm6 = vmmov %vm19506_vm2  ;;  %v19510_v24 = vld [vmem:[#allocation192_spill] sm:$0xff] }
 0xa4a   : > { %v7827_v61 = vmul.f32 %v19499_v59, %v7734_v15  ;;  %v7853_v30 = vsel %vm19504_vm15, %v7851_v60, %v7852_v12  ;;  %v7858_v58 = vrot.slane %v16990_v5, 2  ;;  %v7864_v8 = vrot.slane %v16994_v41, 2  ;;  %vm19509_vm12 = vmmov %vm19506_vm2 }
 0xa4b   : > { %v7882_v44 = vsub.f32 %v7782_v26, %v7856_v53  ;;  %v7912_v6 = vmul.f32 2.0, %v7884_v43  ;;  %v7862_v2 = vrot.slane %v7833_v3, 2  ;;  %10458 = vcosq.f32 %v1868_v51  ;;  %vm19518_vm7 = vmmov %vm19506_vm2 }
 0xa4c   : > { %v7789_v27 = vmul.f32 %v19505_v36, %v7673_v47  ;;  %v7857_v0 = vrot.slane %v7827_v61, 2  ;;  %v7888_v57 = vsub.f32 %v7788_v16, %v7860_v9  ;;  %v7865_v7 = vsel %vm19506_vm2, %v7855_v32, %v7864_v8 }
 0xa4d   : > { %v7924_v39 = vrot.slane %v7908_v33, 6  ;;  %v7881_v50 = vsub.f32 %v16951_v4, %v7853_v30  ;;  %v7925_v22 = vrot.slane %v7912_v6, 6  ;;  %v7944_v46 = vmul.f32 4.0, %v7884_v43 }
 0xa4e   : > { %v7904_v60 = vadd.f32 %v7896_v54, %v16897_v63  ;;  %v7859_v26 = vsel %vm19507_vm6, %v7857_v0, %v7858_v58  ;;  %v7886_v41 = vsub.f32 %v7786_v21, %v7865_v7  ;;  %10460 = vsinq.f32 %v1868_v51  ;;  %v19511_v54 = vld [vmem:[#allocation160_spill] sm:$0xff] }
 0xa4f   : > { %v7898_v3 = vrot.slane %v7882_v44, 3  ;;  %v7910_v25 = vmul.f32 2.0, %v7882_v44  ;;  %v7926_v47 = vsel %vm19508_vm14, %v7924_v39, %v7925_v22  ;;  %v7863_v9 = vsel %vm19509_vm12, %v7852_v12, %v7862_v2  ;;  %vm19524_vm14 = vmmov %vm19513_vm8 }
 0xa50   : > { %v7940_v32 = vadd.f32 %v7926_v47, %v7904_v60  ;;  %v7984_v59 = vmul.f32 16.0, %v7884_v43  ;;  %v7988_v61 = vmul.f32 16.0, %v7888_v57  ;;  %v7914_v4 = vmul.f32 2.0, %v7886_v41  ;;  %vm19525_vm12 = vmmov %vm19514_vm0 }
 0xa51   : > { %v7897_v53 = vrot.slane %v7881_v50, 3  ;;  %v7909_v11 = vmul.f32 2.0, %v7881_v50  ;;  %v7952_v20 = vrot.slane %v7944_v46, 1  ;;  %v7964_v63 = vmul.f32 8.0, %v7884_v43 }
 0xa52   : > { %v7790_v16 = vmul.f32 %v19510_v24, %v16932_v55  ;;  %v7931_v33 = vrot.slane %v7914_v4, 6  ;;  %v7885_v21 = vsub.f32 %v7785_v10, %v7863_v9  ;;  %v7889_v51 = vsub.f32 %v7789_v27, %v7862_v2 }
 0xa53   : > { %v7791_v30 = vmul.f32 %v19511_v54, %v7734_v15  ;;  %v7906_v44 = vadd.f32 %v7898_v3, %v16910_v17  ;;  %v17028_v12 = vsub.f32 %v16980_v37, %v7859_v26  ;;  %v7960_v6 = vadd.f32 %v7952_v20, %v7940_v32 }
 0xa54   : > { %v7930_v36 = vrot.slane %v7910_v25, 6  ;;  %v8000_v0 = vrot.slane %v7984_v59, 7  ;;  %v8001_v7 = vrot.slane %v7988_v61, 7  ;;  %v7913_v39 = vmul.f32 2.0, %v7885_v21 }
 0xa55   : > { %v7905_v43 = vadd.f32 %v7897_v53, %v16913_v49  ;;  %v7927_v50 = vrot.slane %v7909_v11, 6  ;;  %v7972_v22 = vrot.slane %v7964_v63, 4  ;;  %v7945_v55 = vmul.f32 4.0, %v7885_v21  ;;  %v19515_v49 = vld [vmem:[#allocation136_spill] sm:$0xff] }
 0xa56   : > { %v7932_v10 = vsel %vm19512_vm4, %v7930_v36, %v7931_v33  ;;  %v7928_v2 = vrot.slane %v7913_v39, 6  ;;  %v7985_v27 = vmul.f32 16.0, %v7885_v21  ;;  %v7989_v15 = vmul.f32 16.0, %v7889_v51  ;;  %vm19526_vm4 = vmmov %vm19513_vm8 }
 0xa57   : > { %v7980_v46 = vadd.f32 %v7972_v22, %v7960_v6  ;;  %v8020_v17 = vmul.f32 32.0, %v7888_v57  ;;  %v7946_v60 = vmul.f32 4.0, %v7886_v41  ;;  %v7965_v37 = vmul.f32 8.0, %v7885_v21  ;;  %v19516_v57 = vld [vmem:[#allocation102_spill] sm:$0xff] }
 0xa58   : > { %v17032_v26 = vpop.eup %10458  ;;  %v8002_v3 = vsel %vm19513_vm8, %v8000_v0, %v8001_v7  ;;  %v7890_v25 = vsub.f32 %v7790_v16, %v7864_v8  ;;  %v7929_v47 = vsel %vm19514_vm0, %v7927_v50, %v7928_v2  ;;  %v7744_v9 = vadd.f32 %v16970_v34, %v19515_v49 }
 0xa59   : > { %v7942_v32 = vadd.f32 %v7932_v10, %v7906_v44  ;;  %v7966_v59 = vmul.f32 8.0, %v7886_v41  ;;  %v7941_v61 = vadd.f32 %v7929_v47, %v7905_v43  ;;  %v7953_v4 = vrot.slane %v7945_v55, 1  ;;  %v19519_v55 = vld [vmem:[#allocation140_spill] sm:$0xff]  ;;  %v19522_v47 = vld [vmem:[#allocation27_spill] sm:$0xff] }
 0xa5a   : > { %v8003_v53 = vrot.slane %v7985_v27, 7  ;;  %v8004_v11 = vrot.slane %v7989_v15, 7  ;;  %v8021_v20 = vmul.f32 32.0, %v7889_v51  ;;  %v7835_v63 = vmul.f32 %v19516_v57, %v7744_v9 }
 0xa5b   : > { %vm1879_vm3 = vcmp.eq.s32.totalorder %v16927_v38, 2  ;;  %v17041_v24 = vpop.eup %10460  ;;  %v8016_v8 = vadd.f32 %v8002_v3, %v7980_v46  ;;  %v7954_v16 = vrot.slane %v7946_v60, 1  ;;  %v7961_v33 = vadd.f32 %v7953_v4, %v7941_v61 }
 0xa5c   : > { %v7973_v21 = vrot.slane %v7965_v37, 4  ;;  %v7899_v34 = vrot.slane %v17028_v12, 3  ;;  %v7986_v54 = vmul.f32 16.0, %v7886_v41  ;;  %v7990_v44 = vmul.f32 16.0, %v7890_v25 }
 0xa5d   : > { %v7866_v6 = vrot.slane %v7835_v63, 2  ;;  %v7911_v36 = vmul.f32 2.0, %v17028_v12  ;;  %v8028_v51 = vrot.slane %v8020_v17, 2  ;;  %v7962_v0 = vadd.f32 %v7954_v16, %v7942_v32 }
 0xa5e   : > { %v7981_v7 = vadd.f32 %v7973_v21, %v7961_v33  ;;  %v7974_v39 = vrot.slane %v7966_v59, 4  ;;  %v8005_v43 = vsel %vm19517_vm13, %v8003_v53, %v8004_v11  ;;  %v8029_v50 = vrot.slane %v8021_v20, 2  ;;  %v19531_v21 = vld [vmem:[#allocation163_spill] sm:$0xff]  ;;  %vm19532_vm13 = vmmov %vm19518_vm7 }
 0xa5f   : > { %v7867_v22 = vsel %vm19518_vm7, %v7858_v58, %v7866_v6  ;;  %vm1976_vm10 = vweird.f32 %v19519_v55  ;;  %v17050_v10 = vadd.f32 %v8028_v51, %v8016_v8  ;;  %v7891_v27 = vsub.f32 %v7791_v30, %v7866_v6  ;;  %v19544_v55 = vld [vmem:[#allocation31_spill] sm:$0xff] }
 0xa60   : > { %v8017_v41 = vadd.f32 %v8005_v43, %v7981_v7  ;;  %v7887_v2 = vsub.f32 %v17007_v42, %v7867_v22  ;;  %vm1875_vm5 = vcmp.lt.s32.totalorder %v16927_v38, 2  ;;  %vm3525_vm11 = vcmp.eq.s32.totalorder %v16929_v23, 0  ;;  %v9623_v20 = vld [vmem:[%s17526_s1 + $0xb0] sm:$0xff]  }
 0xa61   : > { %19520 = vst [vmem:[#allocation182_spill] sm:$0xff] %v17050_v10  ;;  %v8006_v12 = vrot.slane %v7986_v54, 7  ;;  %v8007_v15 = vrot.slane %v7990_v44, 7  ;;  %v3326_v5 = vsel %vm1664_vm9, nan, %v16937_v48  ;;  %v1877_v58 = vxor.u32 2147483648, %v17041_v24  ;;  %vm19523_vm9 = vmmov %vm19514_vm0 }
 0xa62   : > { %vm3528_vm15 = vcmp.eq.s32.totalorder %v16929_v23, 2  ;;  %v7982_v46 = vadd.f32 %v7974_v39, %v7962_v0  ;;  %v17060_v17 = vadd.f32 %v8029_v50, %v8017_v41  ;;  %v7915_v60 = vmul.f32 2.0, %v7887_v2  ;;  %v10501_v41 = vld [vmem:[%s10655_s28] sm:$0x3f] }
 0xa63   : > { %vm3627_vm2 = vcmp.lt.s32.totalorder %v16807_v14, 2  ;;  %v1880_v42 = vxor.u32 2147483648, %v17032_v26  ;;  %v7907_v30 = vadd.f32 %v7899_v34, %v16955_v31  ;;  %v7933_v37 = vrot.slane %v7911_v36, 6  ;;  %v19533_v36 = vld [vmem:[#allocation150_spill] sm:$0xff] }
 0xa64   : > { %19521 = vst [vmem:[#allocation162_spill] sm:$0xff] %v17060_v17  ;;  %v7947_v3 = vmul.f32 4.0, %v7887_v2  ;;  %v8084_v1 = vsel %vm19523_vm9, %v8048_v28, %v19522_v47  ;;  %vm1872_vm6 = vweird.f32 %v19489_v45  ;;  %v8072_v48 = vrot.slane %v17050_v10, 2  ;;  %v19547_v45 = vld [vmem:[#allocation32_spill] sm:$0xff] }
 0xa65   : > { %v7934_v49 = vrot.slane %v7915_v60, 6  ;;  %v7987_v9 = vmul.f32 16.0, %v7887_v2  ;;  %v7991_v32 = vmul.f32 16.0, %v7891_v27  ;;  %v8008_v59 = vsel %vm19524_vm14, %v8006_v12, %v8007_v15  ;;  %vm19538_vm14 = vmmov %vm19526_vm4 }
 0xa66   : > { %v8022_v61 = vmul.f32 32.0, %v7890_v25  ;;  %v7967_v4 = vmul.f32 8.0, %v7887_v2  ;;  %v8073_v31 = vrot.slane %v17060_v17, 2  ;;  %v8018_v53 = vadd.f32 %v8008_v59, %v7982_v46  ;;  %v10502_v59 = vld [vmem:[%s10655_s28 + $0x18] sm:$0x3f] }
 0xa67   : > { %v7935_v11 = vsel %vm19525_vm12, %v7933_v37, %v7934_v49  ;;  %vm19527_vm8 = vmmov 1   ;;  %v1878_v57 = vsel %vm1876_vm1, %v17032_v26, %v1877_v58  ;;  %v1881_v25 = vsel %vm1879_vm3, %v1880_v42, %v17041_v24  ;;  %vm19534_vm1 = vmmov %vm19518_vm7 }
 0xa68   : > { %vm17076_vm0 = vmpackc.low %vm19527_vm8, %vm19526_vm4  ;;  %v7943_v63 = vadd.f32 %v7935_v11, %v7907_v30  ;;  %v7955_v8 = vrot.slane %v7947_v3, 1  ;;  %v19530_v16 = vmov 0.0   ;;  %v8089_v34 = vsel %vm19532_vm13, %v19531_v21, %v8073_v31  ;;  %v19541_v3 = vld [vmem:[#allocation22_spill] sm:$0xff]  ;;  %v9624_v21 = vld [vmem:[%s17526_s1 + $0xb8] sm:$0xff]  }
 0xa69   : > { %v9404_v33 = vpack.c.bf16 %v19530_v16, %v8073_v31  ;;  %v8009_v54 = vrot.slane %v7987_v9, 7  ;;  %v8010_v44 = vrot.slane %v7991_v32, 7  ;;  %v9407_v6 = vpack.c.bf16 %v19530_v16, %v8072_v48  ;;  %vm19535_vm7 = vmmov %vm19534_vm1 }
 0xa6a   : > { %v8101_v51 = vpack.c.bf16 %v8089_v34, %v19533_v36  ;;  %v7963_v0 = vadd.f32 %v7955_v8, %v7943_v63  ;;  %v7975_v7 = vrot.slane %v7967_v4, 4  ;;  %v8023_v39 = vmul.f32 32.0, %v7891_v27  ;;  %vm19553_vm8 = vmmov %vm19534_vm1  ;;  %v8206_v34 = vpop.f32.mrf.mxu0 }
 0xa6b   : > { %9405 = vmatprep.subr.msk.bf16.mxu0 %vm17076_vm0, %v9404_v33  ;;  %v8088_v43 = vsel %vm19534_vm1, %v3326_v5, %v8072_v48  ;;  %v8030_v50 = vrot.slane %v8022_v61, 2  ;;  %v1987_v22 = vsel %vm1976_vm10, nan, %v16917_v52  ;;  %vm3524_vm3 = vcmp.lt.s32.totalorder %v16929_v23, 2  ;;  %v9621_v23 = vld [vmem:[%s17526_s1 + $0xa0] sm:$0xff]  }
 0xa6c   : > { %9408 = vmatpush1.bf16.msk.msra.mxu0 %vm17076_vm0, %v9407_v6  ;;  %v8080_v2 = vsel %vm19535_vm7, %v10501_v41, %v8044_v35  ;;  %v7983_v27 = vadd.f32 %v7975_v7, %v7963_v0  ;;  %v1882_v12 = vsel %vm1875_vm5, %v1878_v57, %v1881_v25  ;;  %v3527_v15 = vsel %vm3525_vm11, %v17032_v26, %v1877_v58  ;;  %vm19542_vm5 = vmmov %vm19525_vm12  ;;  %v10503_v25 = vld [vmem:[%s10655_s28 + $0x10] sm:$0x3f]  ;;  %v17189_v6 = vpop.f32.mrf.mxu1  ;;  %s9055_s28 = sshll.u32 %s164_s4, 4  ;;  %s9056_s28 = int_to_ptr.vmem [resolvable:$true] %s9055_s28 }
 0xa6d   : > { %8362 = vmatprep.subr.bf16.mxu0 %v8101_v51  ;;  %vm19536_vm9 = vcmask 1043456   ;;  %v17114_v5 = vadd.f32 %v8030_v50, %v8018_v53  ;;  %v8011_v46 = vsel %vm19538_vm14, %v8009_v54, %v8010_v44  ;;  %v8100_v60 = vpack.c.bf16 %v8088_v43, %v8084_v1  ;;  %vm19543_vm11 = vmmov %vm19534_vm1  ;;  %v8208_v54 = vpop.f32.mrf.mxu0  ;;  %19561 = vst [vmem:[#allocation105_spill] sm:$0xff] %v17189_v6  ;;  %s10504_s9 = scalar_lea.vmem %s9056_s28, 512  ;;  %p10511_p0 = scmp.lt.s32.totalorder %s9056_s28, %s10509_s11 }
 0xa6e   : > { %v8049_v52 = vsel %vm19536_vm9, %v8044_v35, %v8048_v28  ;;  %v3530_v38 = vsel %vm3528_vm15, %v1880_v42, %v17041_v24  ;;  %v8019_v30 = vadd.f32 %v8011_v46, %v7983_v27  ;;  %v8031_v37 = vrot.slane %v8023_v39, 2  ;;  %vm19546_vm15 = vmmov %vm19534_vm1  ;;  %v17193_v51 = vpop.f32.mrf.mxu1  ;;  %p10505_p11 = scmp.ne.s32.totalorder %s9056_s28, %s10504_s9  ;;  %p10512_p1 = scmp.lt.s32.totalorder %s10510_s17, %s10504_s9 }
 0xa6f   : > { %19537 = vst [vmem:[#allocation153_spill] sm:$0xff] %v17114_v5  ;;  %v3634_v13 = vsel %vm3627_vm2, %v16901_v19, %v16884_v29  ;;  %v8054_v26 = vrot.slane %v1987_v22, 4  ;;  %v1883_v35 = vsel %vm1872_vm6, nan, %v1882_v12  ;;  %v8096_v62 = vpack.c.bf16 %v8049_v52, %v8080_v2  ;;  %v19540_v29 = vld [vmem:[#allocation21_spill] sm:$0xff]  ;;  %vm19548_vm2 = vmmov %vm19542_vm5  ;;  %v17187_v44 = vpop.f32.mrf.mxu0 }
 0xa70   : > { %8363 = vmatpush1.bf16.msra.mxu0 %v8100_v60  ;;  %v17126_v28 = vadd.f32 %v8031_v37, %v8019_v30  ;;  %v3531_v58 = vsel %vm3524_vm3, %v3527_v15, %v3530_v38  ;;  %v8074_v24 = vrot.slane %v17114_v5, 2  ;;  %v3635_v14 = vsel %vm1976_vm10, nan, %v3634_v13  ;;  %vm19545_vm10 = vmmov %vm19536_vm9  ;;  %19562 = vst [vmem:[#allocation176_spill] sm:$0xff] %v17193_v51  ;;  %v17197_v7 = vpop.f32.mrf.mxu1  ;;  %p10506_p12 = pnand %p10505_p11, %p10641_p5  ;;  %p10513_p2 = por %p10512_p1, %p10511_p0 }
 0xa71   : > { %8364 = vmatprep.subr.bf16.mxu0 %v8097_v18  ;;  %v8047_v19 = vrot.slane %v19540_v29, 4  ;;  %v8087_v47 = vsel %vm19542_vm5, %v8054_v26, %v19541_v3  ;;  %v8052_v1 = vrot.slane %v1883_v35, 4  ;;  %v3532_v40 = vsel %vm1872_vm6, nan, %v3531_v58  ;;  %vm19549_vm6 = vmmov %vm19534_vm1  ;;  %v17191_v36 = vpop.f32.mrf.mxu0  ;;  %19563 = vst [vmem:[#allocation48_spill] sm:$0xff] %v17197_v7 }
 0xa72   : > { %19539 = vst [vmem:[#allocation165_spill] sm:$0xff] %v17126_v28  ;;  %v8075_v42 = vrot.slane %v17126_v28, 2  ;;  %v8046_v48 = vrot.slane %v19544_v55, 4  ;;  %v9417_v49 = vpack.c.bf16 %v19530_v16, %v8074_v24  ;;  %v8090_v31 = vsel %vm19549_vm6, %v3532_v40, %v8074_v24  ;;  %vm19552_vm4 = vmmov %vm19536_vm9  ;;  %v17201_v43 = vpop.f32.mrf.mxu1  ;;  %p10507_p13 = pneg %p10506_p12 }
 0xa73   : > { %v8055_v32 = vsel %vm19545_vm10, %v8047_v19, %v8054_v26  ;;  %v8083_v61 = vsel %vm19546_vm15, %v10502_v59, %v8047_v19  ;;  %v8086_v4 = vsel %vm19548_vm2, %v8052_v1, %v19547_v45  ;;  %vm19550_vm12 = vcmask 523264   ;;  %v17195_v0 = vpop.f32.mrf.mxu0 }
 0xa74   : > { %8365 = vmatpush1.bf16.msra.mxu0 %v8096_v62  ;;  %v9414_v56 = vpack.c.bf16 %v19530_v16, %v8075_v42  ;;  %v8091_v18 = vsel %vm19543_vm11, %v3635_v14, %v8075_v42  ;;  %v19551_v53 = vmov 0   ;;  %v8099_v11 = vpack.c.bf16 %v8055_v32, %v8083_v61  ;;  %v9622_v16 = vld [vmem:[%s17526_s1 + $0xa8] sm:$0xff]   ;;  %vm19554_vm13 = vmmov %vm19550_vm12  ;;  %v17205_v22 = vpop.f32.mrf.mxu1  ;;  %p10514_p3 = pnand %p10513_p2, %p10507_p13 }
 0xa75   : > { %v8103_v9 = vpack.c.bf16 %v8091_v18, %v8087_v47  ;;  %v8053_v57 = vsel %vm19552_vm4, %v8046_v48, %v8052_v1  ;;  %v8082_v63 = vsel %vm19553_vm8, %v10503_v25, %v8046_v48  ;;  %v8102_v8 = vpack.c.bf16 %v8090_v31, %v8086_v4  ;;  %v17199_v39 = vpop.f32.mrf.mxu0  ;;  %19564 = vst [vmem:[#allocation143_spill] sm:$0xff] %v17205_v22  ;;  %v17231_v1 = vpop.permute.xlu1 %8525 }
 0xa76   : > { %9415 = vmatprep.subr.msk.bf16.mxu1 %vm17076_vm0, %v9414_v56  ;;  %v8098_v33 = vpack.c.bf16 %v8053_v57, %v8082_v63  ;;  %v17209_v2 = vpop.f32.mrf.mxu1  ;;  %v17235_v18 = vpop.permute.xlu0 %8521 }
 0xa77   : > { %9409 = vmatmul.mubr.msk.bf16.vlgmr.msra.gmra.mxu0 %vm19550_vm12, %v9621_v23  ;;  %9418 = vmatpush1.bf16.msk.msra.mxu1 %vm17076_vm0, %v9417_v49  ;;  %vm19555_vm0 = vmmov %vm19550_vm12  ;;  %v17203_v50 = vpop.f32.mrf.mxu0 }
 0xa78   : > { %8392 = vmatprep.mubr.bf16.mxu0 %v19551_v53  ;;  %8435 = vmatprep.subr.bf16.mxu1 %v8103_v9  ;;  %vm19556_vm1 = vmmov %vm19555_vm0  ;;  %v17213_v12 = vpop.f32.mrf.mxu1 }
 0xa79   : > { %vm19557_vm3 = vmmov %vm19555_vm0  ;;  %v17207_v41 = vpop.f32.mrf.mxu0  ;;  %19565 = vst [vmem:[#allocation64_spill] sm:$0xff] %v17213_v12  ;;  %v17239_v49 = vpop.permute.xlu1 %8513 }
 0xa7a   : > { %vm19558_vm7 = vmmov %vm19555_vm0  ;;  %v17215_v52 = vpop.f32.mrf.mxu1  ;;  %v17245_v45 = vpop.permute.xlu0 %8517 }
 0xa7b   : > { %8436 = vmatpush1.bf16.msra.mxu1 %v8102_v8  ;;  %vm19559_vm9 = vmmov %vm19555_vm0  ;;  %v17211_v27 = vpop.f32.mrf.mxu0 }
 0xa7c   : > { %8437 = vmatprep.subr.bf16.mxu1 %v8099_v11  ;;  %vm19560_vm14 = vmmov %vm19555_vm0  ;;  %v17217_v60 = vpop.f32.mrf.mxu1 }
 0xa7d   : > { %v8228_v15 = vpop.f32.mrf.mxu0  ;;  %v17249_v11 = vpop.permute.xlu1 %8505  ;;  %vm19583_vm5 = vmmov %vm19555_vm0 }
 0xa7e   : > { %v17219_v30 = vpop.f32.mrf.mxu1  ;;  %vm19585_vm11 = vmmov %vm19555_vm0 }
 0xa7f   : > { %9410 = vmatmul.mubr.msk.bf16.gmra.mxu0 %vm19554_vm13, %v9622_v16  ;;  %8438 = vmatpush1.bf16.msra.mxu1 %v8098_v33  ;;  %v8230_v46 = vpop.f32.mrf.mxu0  ;;  %v17255_v33 = vpop.permute.xlu0 %8509  ;;  %vm19586_vm10 = vmmov %vm19555_vm0 }
 0xa80   : > { %8402 = vmatprep.mubr.bf16.mxu0 %v19551_v53  ;;  %v17221_v13 = vpop.f32.mrf.mxu1  ;;  %vm19587_vm15 = vmmov %vm19555_vm0 }
 0xa81   : > { %v8232_v38 = vpop.f32.mrf.mxu0  ;;  %v17259_v28 = vpop.permute.xlu1 %8497  ;;  %vm19588_vm2 = vmmov %vm19555_vm0 }
 0xa82   : > { %9419 = vmatmul.mubr.msk.bf16.vlgmr.msra.gmra.mxu1 %vm19555_vm0, %v9621_v23  ;;  %v17223_v35 = vpop.f32.mrf.mxu1  ;;  %vm19589_vm6 = vmmov %vm19555_vm0 }
 0xa83   : > { %8465 = vmatprep.mubr.bf16.mxu1 %v19551_v53  ;;  %v8236_v37 = vpop.f32.mrf.mxu0  ;;  %vm19590_vm12 = vmmov %vm19555_vm0 }
 0xa84   : > { %v17225_v58 = vpop.f32.mrf.mxu1  ;;  %vm19591_vm4 = vmmov %vm19555_vm0 }
 0xa85   : > { %v8238_v26 = vpop.f32.mrf.mxu0  ;;  %vm19592_vm8 = vmmov %vm19555_vm0 }
 0xa86   : > { %v17227_v29 = vpop.f32.mrf.mxu1  ;;  %vm19593_vm13 = vmmov %vm19555_vm0  ;;  %vm19599_vm0 = vcmask 1040384  }
 0xa87   : > { %9411 = vmatmul.mubr.msk.bf16.gmra.mxu0 %vm19556_vm1, %v9623_v20  ;;  %v8240_v62 = vpop.f32.mrf.mxu0  ;;  %vm19601_vm1 = vcmask 1043456  }
 0xa88   : > { %8412 = vmatprep.mubr.bf16.mxu0 %v19551_v53  ;;  %v17229_v3 = vpop.f32.mrf.mxu1 }
 0xa89   : > { %v8242_v24 = vpop.f32.mrf.mxu0 }
 0xa8a   : > { %9420 = vmatmul.mubr.msk.bf16.gmra.mxu1 %vm19557_vm3, %v9622_v16  ;;  %v17233_v40 = vpop.f32.mrf.mxu1  ;;  %vm19602_vm3 = vmmov %vm19599_vm0 }
 0xa8b   : > { %8475 = vmatprep.mubr.bf16.mxu1 %v19551_v53 }
 0xa8f   : > { %9412 = vmatmul.mubr.msk.bf16.gmra.mxu0 %vm19558_vm7, %v9624_v21  ;;  %vm19603_vm7 = vcmask 1046528  }
 0xa90   : > { %8712 = vmatprep.mubr.bf16.mxu0 %v19551_v53 }
 0xa92   : > { %9421 = vmatmul.mubr.msk.bf16.gmra.mxu1 %vm19559_vm9, %v9623_v20  ;;  %vm19604_vm9 = vmmov %vm19601_vm1 }
 0xa93   : > { %8485 = vmatprep.mubr.bf16.mxu1 %v19551_v53 }
 0xa9a   : > { %9422 = vmatmul.mubr.msk.bf16.gmra.mxu1 %vm19560_vm14, %v9624_v21  ;;  %vm19605_vm14 = vmmov %vm19603_vm7 }
 0xa9b   : > { %8785 = vmatprep.mubr.bf16.mxu1 %v19551_v53 }
 0xb37   : > { %v8384_v14 = vpop.f32.mrf.mxu0 }
 0xb38   : > { %v8385_v16 = vadd.f32 %v8384_v14, %v8206_v34  ;;  %v17269_v14 = vpop.permute.xlu0 %8501 }
 0xb39   : > { %v8386_v19 = vpop.f32.mrf.mxu0 }
 0xb3a   : > { %v17264_v10 = vadd.f32 %v17259_v28, %v8385_v16  ;;  %v8387_v53 = vadd.f32 %v8386_v19, %v8208_v54 }
 0xb3b   : > { %v8388_v42 = vpop.f32.mrf.mxu0 }
 0xb3c   : > { %v8389_v34 = vadd.f32 %v8388_v42, %v17187_v44  ;;  %v17273_v16 = vadd.f32 %v17259_v28, %v8387_v53 }
 0xb3d   : > { %v8390_v47 = vpop.f32.mrf.mxu0 }
 0xb3f   : > { %v8394_v23 = vpop.f32.mrf.mxu0 }
 0xb41   : > { %v8396_v56 = vpop.f32.mrf.mxu0 }
 0xb42   : > { %v17237_v55 = vpop.f32.mrf.mxu1  ;;  %v8397_v53 = vadd.f32 %v8396_v56, %v17199_v39 }
 0xb43   : > { %19566 = vst [vmem:[#allocation167_spill] sm:$0xff] %v17237_v55  ;;  %v8398_v48 = vpop.f32.mrf.mxu0 }
 0xb44   : > { %v17241_v9 = vpop.f32.mrf.mxu1 }
 0xb45   : > { %19567 = vst [vmem:[#allocation158_spill] sm:$0xff] %v17241_v9  ;;  %v8400_v32 = vpop.f32.mrf.mxu0 }
 0xb46   : > { %v17243_v59 = vpop.f32.mrf.mxu1  ;;  %v8401_v54 = vadd.f32 %v8400_v32, %v17207_v41  ;;  %v8399_v41 = vadd.f32 %v8398_v48, %v17203_v50 }
 0xb47   : > { %19568 = vst [vmem:[#allocation68_spill] sm:$0xff] %v17243_v59  ;;  %v8404_v61 = vpop.f32.mrf.mxu0 }
 0xb48   : > { %v17247_v4 = vpop.f32.mrf.mxu1 }
 0xb49   : > { %v8406_v31 = vpop.f32.mrf.mxu0 }
 0xb4a   : > { %v17251_v57 = vpop.f32.mrf.mxu1 }
 0xb4b   : > { %19569 = vst [vmem:[#allocation164_spill] sm:$0xff] %v17251_v57  ;;  %v8408_v25 = vpop.f32.mrf.mxu0  ;;  %v8407_v57 = vadd.f32 %v8406_v31, %v8228_v15  ;;  %v8540_v31 = vadd.f32 %v17255_v33, %v8399_v41 }
 0xb4c   : > { %v17253_v63 = vpop.f32.mrf.mxu1 }
 0xb4d   : > { %19570 = vst [vmem:[#allocation15_spill] sm:$0xff] %v17253_v63  ;;  %v8410_v8 = vpop.f32.mrf.mxu0  ;;  %v8560_v63 = vmax.f32 %v17264_v10, 0.0  ;;  %v8572_v41 = vmax.f32 %v8540_v31, 0.0  ;;  %v19577_v31 = vld [vmem:[#allocation176_spill] sm:$0xff] }
 0xb4e   : > { %v17257_v20 = vpop.f32.mrf.mxu1  ;;  %v8411_v6 = vadd.f32 %v8410_v8, %v8232_v38 }
 0xb4f   : > { %19571 = vst [vmem:[#allocation169_spill] sm:$0xff] %v17257_v20  ;;  %v8414_v21 = vpop.f32.mrf.mxu0  ;;  %v8409_v20 = vadd.f32 %v8408_v25, %v8230_v46  ;;  %v17281_v46 = vadd.f32 %v17269_v14, %v8389_v34 }
 0xb50   : > { %v17261_v5 = vpop.f32.mrf.mxu1  ;;  %v8415_v9 = vadd.f32 %v8414_v21, %v8236_v37  ;;  %v8549_v44 = vadd.f32 %v17245_v45, %v8411_v6  ;;  %v8391_v37 = vadd.f32 %v8390_v47, %v17191_v36 }
 0xb51   : > { %v8416_v17 = vpop.f32.mrf.mxu0  ;;  %v8548_v6 = vadd.f32 %v17245_v45, %v8409_v20  ;;  %v8564_v48 = vmax.f32 %v17281_v46, 0.0 }
 0xb52   : > { %v17266_v55 = vpop.f32.mrf.mxu1  ;;  %v8417_v59 = vadd.f32 %v8416_v17, %v8238_v26  ;;  %v8405_v17 = vadd.f32 %v8404_v61, %v17211_v27  ;;  %v8545_v27 = vadd.f32 %v17239_v49, %v8407_v57  ;;  %v8581_v47 = vmax.f32 %v8549_v44, 0.0 }
 0xb53   : > { %v8418_v7 = vpop.f32.mrf.mxu0  ;;  %v8533_v32 = vadd.f32 %v17269_v14, %v8391_v37 }
 0xb54   : > { %v8419_v51 = vadd.f32 %v8418_v7, %v8240_v62  ;;  %v8479_v22 = vpop.f32.mrf.mxu1  ;;  %v8553_v26 = vadd.f32 %v17235_v18, %v8417_v59  ;;  %v8552_v62 = vadd.f32 %v17235_v18, %v8415_v9  ;;  %v8544_v39 = vadd.f32 %v17239_v49, %v8405_v17 }
 0xb55   : > { %v8420_v12 = vpop.f32.mrf.mxu0  ;;  %v8537_v59 = vadd.f32 %v17249_v11, %v8397_v53  ;;  %v8577_v57 = vmax.f32 %v8545_v27, 0.0  ;;  %v8480_v53 = vadd.f32 %v8479_v22, %v17219_v30 }
 0xb56   : > { %v8481_v38 = vpop.f32.mrf.mxu1  ;;  %v8556_v7 = vadd.f32 %v17231_v1, %v8419_v51  ;;  %v8421_v15 = vadd.f32 %v8420_v12, %v8242_v24  ;;  %v8561_v51 = vmax.f32 %v17273_v16, 0.0  ;;  %v8395_v12 = vadd.f32 %v8394_v23, %v17195_v0 }
 0xb57   : > { %v8541_v24 = vadd.f32 %v17255_v33, %v8401_v54  ;;  %v8585_v9 = vmax.f32 %v8553_v26, 0.0  ;;  %v8584_v61 = vmax.f32 %v8552_v62, 0.0  ;;  %v8580_v0 = vmax.f32 %v8548_v6, 0.0 }
 0xb58   : > { %v8483_v19 = vpop.f32.mrf.mxu1  ;;  %v8557_v42 = vadd.f32 %v17231_v1, %v8421_v15  ;;  %v8588_v36 = vmax.f32 %v8556_v7, 0.0  ;;  %v8536_v8 = vadd.f32 %v17249_v11, %v8395_v12  ;;  %v8576_v17 = vmax.f32 %v8544_v39, 0.0 }
 0xb59   : > { %v8484_v20 = vadd.f32 %v8483_v19, %v17223_v35  ;;  %v8573_v54 = vmax.f32 %v8541_v24, 0.0  ;;  %v8601_v7 = vpack.c.bf16 %v8581_v47, %v8577_v57  ;;  %v8565_v15 = vmax.f32 %v8533_v32, 0.0  ;;  %v19574_v47 = vld [vmem:[#allocation169_spill] sm:$0xff]  ;;  %v19578_v57 = vld [vmem:[#allocation158_spill] sm:$0xff] }
 0xb5a   : > { %v8487_v56 = vpop.f32.mrf.mxu1  ;;  %v8589_v50 = vmax.f32 %v8557_v42, 0.0  ;;  %v8604_v34 = vpack.c.bf16 %v8588_v36, %v8584_v61  ;;  %v8569_v37 = vmax.f32 %v8537_v59, 0.0  ;;  %v8474_v35 = vadd.f32 %v17261_v5, %v17215_v52 }
 0xb5b   : > { %v8488_v44 = vadd.f32 %v8487_v56, %v17225_v58  ;;  %v8482_v27 = vadd.f32 %v8481_v38, %v17221_v13  ;;  %v8551_v58 = vadd.f32 %v17245_v45, %v8484_v20  ;;  %v8568_v30 = vmax.f32 %v8536_v8, 0.0  ;;  %v19572_v13 = vld [vmem:[#allocation15_spill] sm:$0xff]  ;;  %v19579_v8 = vld [vmem:[#allocation48_spill] sm:$0xff] }
 0xb5c   : > { %v8489_v23 = vpop.f32.mrf.mxu1  ;;  %v8605_v25 = vpack.c.bf16 %v8589_v50, %v8585_v9  ;;  %v8597_v5 = vpack.c.bf16 %v8573_v54, %v8569_v37  ;;  %v8464_v52 = vadd.f32 %v17247_v4, %v17201_v43  ;;  %v8470_v38 = vadd.f32 %v19572_v13, %v17209_v2  ;;  %v19575_v50 = vld [vmem:[#allocation143_spill] sm:$0xff]  ;;  %v19576_v2 = vld [vmem:[#allocation164_spill] sm:$0xff] }
 0xb5d   : > { %v8490_v21 = vadd.f32 %v8489_v23, %v17227_v29  ;;  %v8600_v29 = vpack.c.bf16 %v8580_v0, %v8576_v17  ;;  %v8554_v12 = vadd.f32 %v17235_v18, %v8488_v44  ;;  %v8547_v24 = vadd.f32 %v17239_v49, %v8480_v53  ;;  %v19580_v20 = vld [vmem:[#allocation68_spill] sm:$0xff] }
 0xb5e   : > { %v8491_v26 = vpop.f32.mrf.mxu1  ;;  %8688 = vmatprep.subr.bf16.mxu0 %v8605_v25  ;;  %v8596_v39 = vpack.c.bf16 %v8572_v41, %v8568_v30  ;;  %v8583_v9 = vmax.f32 %v8551_v58, 0.0  ;;  %v8468_v32 = vadd.f32 %v19576_v2, %v19575_v50  ;;  %v8593_v61 = vpack.c.bf16 %v8565_v15, %v8561_v51 }
 0xb5f   : > { %v8492_v62 = vadd.f32 %v8491_v26, %v17229_v3  ;;  %8689 = vmatpush1.bf16.msra.mxu0 %v8604_v34  ;;  %v8555_v19 = vadd.f32 %v17235_v18, %v8490_v21  ;;  %v8478_v3 = vadd.f32 %v17266_v55, %v17217_v60  ;;  %v8550_v60 = vadd.f32 %v17245_v45, %v8482_v27  ;;  %v19581_v26 = vld [vmem:[#allocation105_spill] sm:$0xff] }
 0xb60   : > { %v8493_v6 = vpop.f32.mrf.mxu1  ;;  %8690 = vmatprep.subr.bf16.mxu0 %v8601_v7  ;;  %v8543_v18 = vadd.f32 %v17255_v33, %v8474_v35  ;;  %v8460_v0 = vadd.f32 %v19578_v57, %v19577_v31  ;;  %v8539_v45 = vadd.f32 %v17249_v11, %v8470_v38  ;;  %v8579_v23 = vmax.f32 %v8547_v24, 0.0  ;;  %v19582_v7 = vld [vmem:[#allocation167_spill] sm:$0xff]  ;;  %v8646_v57 = vpop.permute.xlu0 %8645 }
 0xb61   : > { %v8558_v42 = vadd.f32 %v17231_v1, %v8492_v62  ;;  %v8494_v22 = vadd.f32 %v8493_v6, %v17233_v40  ;;  %v19573_v40 = vld [vmem:[#allocation64_spill] sm:$0xff]  ;;  %v8587_v43 = vmax.f32 %v8555_v19, 0.0  ;;  %v8546_v59 = vadd.f32 %v17239_v49, %v8478_v3 }
 0xb62   : > { %v8472_v56 = vadd.f32 %v19574_v47, %v19573_v40  ;;  %v8462_v21 = vadd.f32 %v19580_v20, %v19579_v8  ;;  %v8582_v54 = vmax.f32 %v8550_v60, 0.0  ;;  %v8535_v49 = vadd.f32 %v17269_v14, %v8464_v52  ;;  %v9628_v3 = vld [vmem:[%s17526_s1 + $0xf8] sm:$0xff]   ;;  %v17383_v40 = vpop.permute.xlu1 %8641 }
 0xb63   : > { %v8559_v36 = vadd.f32 %v17231_v1, %v8494_v22  ;;  %8691 = vmatpush1.bf16.msra.mxu0 %v8600_v29  ;;  %v8590_v55 = vmax.f32 %v8558_v42, 0.0  ;;  %v8586_v1 = vmax.f32 %v8554_v12, 0.0  ;;  %v8575_v16 = vmax.f32 %v8543_v18, 0.0  ;;  %v8966_v12 = vld [vmem:[%s17527_s2] sm:$0x7] }
 0xb64   : > { %8692 = vmatprep.subr.bf16.mxu0 %v8597_v5  ;;  %v8542_v34 = vadd.f32 %v17255_v33, %v8472_v56  ;;  %v8603_v51 = vpack.c.bf16 %v8583_v9, %v8579_v23  ;;  %v8592_v44 = vpack.c.bf16 %v8564_v48, %v8560_v63  ;;  %v8458_v15 = vadd.f32 %v19582_v7, %v19581_v26  ;;  %v9625_v33 = vld [vmem:[%s17526_s1 + $0xe0] sm:$0xff]  }
 0xb65   : > { %v8591_v4 = vmax.f32 %v8559_v36, 0.0  ;;  %v8606_v17 = vpack.c.bf16 %v8590_v55, %v8586_v1  ;;  %v8538_v37 = vadd.f32 %v17249_v11, %v8468_v32  ;;  %v8578_v53 = vmax.f32 %v8546_v59, 0.0  ;;  %8969 = vperm.xlu0 %9577, %v8966_v12  }
 0xb66   : > { %v8531_v62 = vadd.f32 %v17259_v28, %v8460_v0  ;;  %v8571_v41 = vmax.f32 %v8539_v45, 0.0  ;;  %v8534_v10 = vadd.f32 %v17269_v14, %v8462_v21  ;;  %v8574_v46 = vmax.f32 %v8542_v34, 0.0  ;;  %v9626_v14 = vld [vmem:[%s17526_s1 + $0xe8] sm:$0xff]  }
 0xb67   : > { %v8607_v25 = vpack.c.bf16 %v8591_v4, %v8587_v43  ;;  %8693 = vmatpush1.bf16.msra.mxu0 %v8596_v39  ;;  %v8602_v63 = vpack.c.bf16 %v8582_v54, %v8578_v53  ;;  %v8567_v48 = vmax.f32 %v8535_v49, 0.0  ;;  %v8530_v29 = vadd.f32 %v17259_v28, %v8458_v15  ;;  %v9627_v28 = vld [vmem:[%s17526_s1 + $0xf0] sm:$0xff]   ;;  %v17391_v43 = vpop.permute.xlu1 %8633 }
 0xb68   : > { %8694 = vmatprep.subr.bf16.mxu0 %v8593_v61  ;;  %v8599_v35 = vpack.c.bf16 %v8575_v16, %v8571_v41  ;;  %v8570_v11 = vmax.f32 %v8538_v37, 0.0  ;;  %v8563_v27 = vmax.f32 %v8531_v62, 0.0  ;;  %v19584_v6 = vmov 0   ;;  %v17410_v16 = vpop.permute.xlu0 %8625 }
 0xb69   : > { %8761 = vmatprep.subr.bf16.mxu1 %v8607_v25  ;;  %v8566_v58 = vmax.f32 %v8534_v10, 0.0  ;;  %v8562_v22 = vmax.f32 %v8530_v29, 0.0 }
 0xb6a   : > { %8762 = vmatpush1.bf16.msra.mxu1 %v8606_v17  ;;  %v8598_v19 = vpack.c.bf16 %v8574_v46, %v8570_v11  ;;  %v8595_v42 = vpack.c.bf16 %v8567_v48, %v8563_v27 }
 0xb6b   : > { %8763 = vmatprep.subr.bf16.mxu1 %v8603_v51  ;;  %8695 = vmatpush1.bf16.msra.mxu0 %v8592_v44  ;;  %v8594_v30 = vpack.c.bf16 %v8566_v58, %v8562_v22  ;;  %v17399_v61 = vpop.permute.xlu1 %8637 }
 0xb6e   : > { %8764 = vmatpush1.bf16.msra.mxu1 %v8602_v63  ;;  %9427 = vmatmul.mubr.msk.bf16.vlgmr.msra.gmra.mxu0 %vm19583_vm5, %v9625_v33  ;;  %vm19607_vm5 = vmmov %vm19599_vm0 }
 0xb6f   : > { %8765 = vmatprep.subr.bf16.mxu1 %v8599_v35  ;;  %8722 = vmatprep.mubr.bf16.mxu0 %v19584_v6  ;;  %v17407_v54 = vpop.permute.xlu1 %8629 }
 0xb72   : > { %8766 = vmatpush1.bf16.msra.mxu1 %v8598_v19  ;;  %v17420_v19 = vpop.permute.xlu0 %8617 }
 0xb73   : > { %8767 = vmatprep.subr.bf16.mxu1 %v8595_v42  ;;  %v17418_v27 = vpop.permute.xlu1 %8621 }
 0xb76   : > { %8768 = vmatpush1.bf16.msra.mxu1 %v8594_v30  ;;  %9428 = vmatmul.mubr.msk.bf16.gmra.mxu0 %vm19585_vm11, %v9626_v14  ;;  %vm19609_vm11 = vmmov %vm19601_vm1 }
 0xb77   : > { %8732 = vmatprep.mubr.bf16.mxu0 %v19584_v6 }
 0xb79   : > { %9431 = vmatmul.mubr.msk.bf16.vlgmr.msra.gmra.mxu1 %vm19586_vm10, %v9625_v33  ;;  %vm19610_vm10 = vmmov %vm19599_vm0 }
 0xb7a   : > { %8795 = vmatprep.mubr.bf16.mxu1 %v19584_v6 }
 0xb7e   : > { %9429 = vmatmul.mubr.msk.bf16.gmra.mxu0 %vm19587_vm15, %v9627_v28  ;;  %vm19611_vm15 = vmmov %vm19603_vm7 }
 0xb7f   : > { %8742 = vmatprep.mubr.bf16.mxu0 %v19584_v6 }
 0xb81   : > { %9432 = vmatmul.mubr.msk.bf16.gmra.mxu1 %vm19588_vm2, %v9626_v14  ;;  %vm19612_vm2 = vmmov %vm19601_vm1 }
 0xb82   : > { %8805 = vmatprep.mubr.bf16.mxu1 %v19584_v6 }
 0xb86   : > { %9430 = vmatmul.mubr.msk.bf16.gmra.mxu0 %vm19589_vm6, %v9628_v3  ;;  %vm19613_vm6 = vmmov %vm19603_vm7 }
 0xb87   : > { %8916 = vmatprep.mubr.bf16.mxu0 %v19584_v6 }
 0xb89   : > { %9433 = vmatmul.mubr.msk.bf16.gmra.mxu1 %vm19590_vm12, %v9627_v28 }
 0xb8a   : > { %8815 = vmatprep.mubr.bf16.mxu1 %v19584_v6 }
 0xb91   : > { %9434 = vmatmul.mubr.msk.bf16.gmra.mxu1 %vm19591_vm4, %v9628_v3 }
 0xb92   : > { %8957 = vmatprep.mubr.bf16.mxu1 %v19584_v6 }
 0xc2e   : > { %v17377_v5 = vpop.f32.mrf.mxu0 }
 0xc30   : > { %v8716_v52 = vpop.f32.mrf.mxu0 }
 0xc31   : > { %v8717_v3 = vadd.f32 %v8716_v52, %v17420_v19 }
 0xc32   : > { %v17379_v13 = vpop.f32.mrf.mxu0 }
 0xc34   : > { %v8720_v38 = vpop.f32.mrf.mxu0 }
 0xc35   : > { %v8721_v42 = vadd.f32 %v8720_v38, %v17418_v27 }
 0xc36   : > { %v8724_v24 = vpop.f32.mrf.mxu0 }
 0xc37   : > { %v8725_v22 = vadd.f32 %v8724_v24, %v17410_v16 }
 0xc38   : > { %v8726_v36 = vpop.f32.mrf.mxu0 }
 0xc39   : > { %v17381_v39 = vpop.f32.mrf.mxu1  ;;  %v8727_v63 = vadd.f32 %v8726_v36, %v17410_v16  ;;  %v8719_v36 = vadd.f32 %v17379_v13, %v17418_v27  ;;  %v8827_v13 = vmax.f32 %v8717_v3, 0.0 }
 0xc3a   : > { %v8728_v47 = vpop.f32.mrf.mxu0 }
 0xc3b   : > { %v17385_v56 = vpop.f32.mrf.mxu1  ;;  %v8729_v48 = vadd.f32 %v8728_v47, %v17407_v54  ;;  %v8835_v47 = vmax.f32 %v8727_v63, 0.0 }
 0xc3c   : > { %v8730_v60 = vpop.f32.mrf.mxu0 }
 0xc3d   : > { %v17387_v55 = vpop.f32.mrf.mxu1  ;;  %v8731_v37 = vadd.f32 %v8730_v60, %v17407_v54  ;;  %v8838_v60 = vmax.f32 %v8729_v48, 0.0  ;;  %v9629_v48 = vld [vmem:[%s17526_s1 + $0x100] sm:$0xff]  }
 0xc3e   : > { %v8734_v18 = vpop.f32.mrf.mxu0 }
 0xc3f   : > { %v17389_v9 = vpop.f32.mrf.mxu1  ;;  %v8735_v10 = vadd.f32 %v8734_v18, %v17391_v43  ;;  %v8839_v14 = vmax.f32 %v8731_v37, 0.0 }
 0xc40   : > { %v8736_v4 = vpop.f32.mrf.mxu0 }
 0xc41   : > { %v17393_v50 = vpop.f32.mrf.mxu1  ;;  %v8737_v51 = vadd.f32 %v8736_v4, %v17391_v43  ;;  %v8842_v12 = vmax.f32 %v8735_v10, 0.0 }
 0xc42   : > { %v8738_v2 = vpop.f32.mrf.mxu0 }
 0xc43   : > { %v17395_v32 = vpop.f32.mrf.mxu1  ;;  %v8739_v7 = vadd.f32 %v8738_v2, %v17399_v61  ;;  %v8843_v35 = vmax.f32 %v8737_v51, 0.0 }
 0xc44   : > { %v8740_v59 = vpop.f32.mrf.mxu0 }
 0xc45   : > { %v17397_v1 = vpop.f32.mrf.mxu1  ;;  %v8741_v20 = vadd.f32 %v8740_v59, %v17399_v61  ;;  %v8846_v6 = vmax.f32 %v8739_v7, 0.0  ;;  %v8831_v59 = vmax.f32 %v8721_v42, 0.0 }
 0xc46   : > { %v8744_v31 = vpop.f32.mrf.mxu0 }
 0xc47   : > { %v17401_v0 = vpop.f32.mrf.mxu1  ;;  %v8745_v17 = vadd.f32 %v8744_v31, %v17383_v40  ;;  %v8847_v53 = vmax.f32 %v8741_v20, 0.0  ;;  %v8866_v4 = vpack.c.bf16 %v8846_v6, %v8842_v12  ;;  %v8834_v31 = vmax.f32 %v8725_v22, 0.0 }
 0xc48   : > { %v8746_v45 = vpop.f32.mrf.mxu0  ;;  %v8715_v20 = vadd.f32 %v17377_v5, %v17420_v19  ;;  %v8804_v7 = vadd.f32 %v17401_v0, %v17407_v54 }
 0xc49   : > { %v17403_v23 = vpop.f32.mrf.mxu1  ;;  %v8747_v21 = vadd.f32 %v8746_v45, %v17383_v40  ;;  %v8850_v46 = vmax.f32 %v8745_v17, 0.0  ;;  %v8867_v30 = vpack.c.bf16 %v8847_v53, %v8843_v35  ;;  %v8863_v45 = vpack.c.bf16 %v8839_v14, %v8835_v47 }
 0xc4a   : > { %v8748_v25 = vpop.f32.mrf.mxu0  ;;  %v8830_v17 = vmax.f32 %v8719_v36, 0.0  ;;  %v8859_v53 = vpack.c.bf16 %v8831_v59, %v8827_v13  ;;  %v8808_v5 = vadd.f32 %v17403_v23, %v17391_v43  ;;  %v8841_v63 = vmax.f32 %v8804_v7, 0.0 }
 0xc4b   : > { %v8809_v8 = vpop.f32.mrf.mxu1  ;;  %v8749_v34 = vadd.f32 %v8748_v25, %v8646_v57  ;;  %v8851_v62 = vmax.f32 %v8747_v21, 0.0  ;;  %v8798_v23 = vadd.f32 %v17393_v50, %v17410_v16  ;;  %v8788_v50 = vadd.f32 %v17381_v39, %v17420_v19 }
 0xc4c   : > { %v8750_v49 = vpop.f32.mrf.mxu0  ;;  %v8810_v21 = vadd.f32 %v8809_v8, %v17391_v43  ;;  %v8826_v8 = vmax.f32 %v8715_v20, 0.0 }
 0xc4d   : > { %v8811_v44 = vpop.f32.mrf.mxu1  ;;  %v8751_v26 = vadd.f32 %v8750_v49, %v8646_v57  ;;  %v8854_v15 = vmax.f32 %v8749_v34, 0.0  ;;  %v8862_v49 = vpack.c.bf16 %v8838_v60, %v8834_v31  ;;  %v8828_v14 = vmax.f32 %v8788_v50, 0.0 }
 0xc4e   : > { %v8812_v51 = vadd.f32 %v8811_v44, %v17399_v61  ;;  %v8858_v10 = vpack.c.bf16 %v8830_v17, %v8826_v8 }
 0xc4f   : > { %v8813_v33 = vpop.f32.mrf.mxu1  ;;  %v8855_v41 = vmax.f32 %v8751_v26, 0.0  ;;  %v8870_v58 = vpack.c.bf16 %v8854_v15, %v8850_v46  ;;  %v8794_v46 = vadd.f32 %v17389_v9, %v17418_v27  ;;  %v8792_v9 = vadd.f32 %v17387_v55, %v17418_v27  ;;  %v8970_v27 = vpop.permute.xlu0 %8969 }
 0xc50   : > { %v8814_v38 = vadd.f32 %v8813_v33, %v17399_v61  ;;  %v8802_v61 = vadd.f32 %v17397_v1, %v17407_v54  ;;  %v8848_v44 = vmax.f32 %v8812_v51, 0.0  ;;  %v8790_v1 = vadd.f32 %v17385_v56, %v17420_v19 }
 0xc51   : > { %v8817_v29 = vpop.f32.mrf.mxu1  ;;  %v8871_v11 = vpack.c.bf16 %v8855_v41, %v8851_v62  ;;  %v8845_v62 = vmax.f32 %v8810_v21, 0.0  ;;  %v8832_v56 = vmax.f32 %v8792_v9, 0.0 }
 0xc52   : > { %v8818_v52 = vadd.f32 %v8817_v29, %v17383_v40  ;;  %v8849_v15 = vmax.f32 %v8814_v38, 0.0  ;;  %v8840_v35 = vmax.f32 %v8802_v61, 0.0 }
 0xc53   : > { %v8819_v28 = vpop.f32.mrf.mxu1  ;;  %8892 = vmatprep.subr.bf16.mxu0 %v8871_v11  ;;  %v8833_v11 = vmax.f32 %v8794_v46, 0.0  ;;  %v8860_v55 = vpack.c.bf16 %v8832_v56, %v8828_v14  ;;  %v19598_v14 = vld [vmem:[#allocation182_spill] sm:$0xff] }
 0xc54   : > { %8893 = vmatpush1.bf16.msra.mxu0 %v8870_v58  ;;  %v8820_v24 = vadd.f32 %v8819_v28, %v17383_v40  ;;  %v8852_v33 = vmax.f32 %v8818_v52, 0.0  ;;  %v8869_v43 = vpack.c.bf16 %v8849_v15, %v8845_v62  ;;  %v8829_v58 = vmax.f32 %v8790_v1, 0.0  ;;  %v19594_v52 = vld [vmem:[#allocation168_spill] sm:$0xff]  ;;  %v19596_v62 = vld [vmem:[#allocation170_spill] sm:$0xff] }
 0xc55   : > { %v8821_v18 = vpop.f32.mrf.mxu1  ;;  %8894 = vmatprep.subr.bf16.mxu0 %v8867_v30 }
 0xc56   : > { %v8822_v2 = vadd.f32 %v8821_v18, %v8646_v57  ;;  %v8853_v40 = vmax.f32 %v8820_v24, 0.0  ;;  %v8861_v22 = vpack.c.bf16 %v8833_v11, %v8829_v58 }
 0xc57   : > { %v8823_v25 = vpop.f32.mrf.mxu1 }
 0xc58   : > { %v8824_v34 = vadd.f32 %v8823_v25, %v8646_v57  ;;  %8895 = vmatpush1.bf16.msra.mxu0 %v8866_v4  ;;  %v8856_v26 = vmax.f32 %v8822_v2, 0.0  ;;  %v8800_v57 = vadd.f32 %v17395_v32, %v17410_v16  ;;  %v8844_v32 = vmax.f32 %v8808_v5, 0.0 }
 0xc59   : > { %8896 = vmatprep.subr.bf16.mxu0 %v8863_v45  ;;  %v8836_v16 = vmax.f32 %v8798_v23, 0.0  ;;  %v6639_v25 = vrot.slane %v19594_v52, 4 }
 0xc5a   : > { %v8857_v37 = vmax.f32 %v8824_v34, 0.0  ;;  %v8872_v0 = vpack.c.bf16 %v8856_v26, %v8852_v33  ;;  %v8837_v54 = vmax.f32 %v8800_v57, 0.0  ;;  %v8868_v29 = vpack.c.bf16 %v8848_v44, %v8844_v32  ;;  %v19595_v34 = vld [vmem:[#allocation204_spill] sm:$0xff]  ;;  %v19597_v44 = vld [vmem:[#allocation186_spill] sm:$0xff] }
 0xc5b   : > { %v8864_v42 = vpack.c.bf16 %v8840_v35, %v8836_v16  ;;  %v6652_v17 = vrot.slane %v19595_v34, 4  ;;  %v6640_v7 = vadd.f32 %v6639_v25, %v19594_v52  ;;  %v6688_v35 = vpop.permute.xlu1 %6687  ;;  %v19606_v52 = vld [vmem:[#allocation153_spill] sm:$0xff] }
 0xc5c   : > { %v8873_v41 = vpack.c.bf16 %v8857_v37, %v8853_v40  ;;  %8897 = vmatpush1.bf16.msra.mxu0 %v8862_v49  ;;  %v8865_v6 = vpack.c.bf16 %v8841_v63, %v8837_v54  ;;  %v9018_v25 = vrot.slane %v19606_v52, 4 }
 0xc5d   : > { %8898 = vmatprep.subr.bf16.mxu0 %v8859_v53  ;;  %v6653_v40 = vadd.f32 %v6652_v17, %v19595_v34  ;;  %v6641_v53 = vrot.slane %v6640_v7, 2  ;;  %v19608_v34 = vld [vmem:[#allocation165_spill] sm:$0xff] }
 0xc5e   : > { %8933 = vmatprep.subr.bf16.mxu1 %v8873_v41  ;;  %v6665_v41 = vrot.slane %v19596_v62, 4  ;;  %v9019_v17 = vrot.slane %v19608_v34, 4 }
 0xc5f   : > { %8934 = vmatpush1.bf16.msra.mxu1 %v8872_v0  ;;  %v6654_v8 = vrot.slane %v6653_v40, 2  ;;  %v6642_v61 = vadd.f32 %v6641_v53, %v6640_v7  ;;  %v6678_v0 = vrot.slane %v19597_v44, 4 }
 0xc60   : > { %8935 = vmatprep.subr.bf16.mxu1 %v8869_v43  ;;  %8899 = vmatpush1.bf16.msra.mxu0 %v8858_v10  ;;  %v6666_v46 = vadd.f32 %v6665_v41, %v19596_v62 }
 0xc61   : > { %v6655_v10 = vadd.f32 %v6654_v8, %v6653_v40  ;;  %v6643_v63 = vrot.slane %v6642_v61, 1  ;;  %v6679_v43 = vadd.f32 %v6678_v0, %v19597_v44 }
 0xc63   : > { %8936 = vmatpush1.bf16.msra.mxu1 %v8868_v29  ;;  %9436 = vmatmul.mubr.msk.bf16.vlgmr.msra.gmra.mxu0 %vm19592_vm8, %v9629_v48  ;;  %v6656_v32 = vrot.slane %v6655_v10, 1  ;;  %v6644_v9 = vadd.f32 %v6643_v63, %v6642_v61  ;;  %v6680_v29 = vrot.slane %v6679_v43, 2 }
 0xc64   : > { %8937 = vmatprep.subr.bf16.mxu1 %v8865_v6 }
 0xc65   : > { %v6657_v6 = vadd.f32 %v6656_v32, %v6655_v10  ;;  %v6690_v58 = vadd.f32 %v6688_v35, %v6644_v9 }
 0xc67   : > { %8938 = vmatpush1.bf16.msra.mxu1 %v8864_v42 }
 0xc68   : > { %8939 = vmatprep.subr.bf16.mxu1 %v8861_v22  ;;  %v6681_v22 = vadd.f32 %v6680_v29, %v6679_v43 }
 0xc6b   : > { %8940 = vmatpush1.bf16.msra.mxu1 %v8860_v55  ;;  %v9016_v55 = vrot.slane %v19598_v14, 4 }
 0xc6e   : > { %9437 = vmatmul.mubr.msk.bf16.vlgmr.msra.gmra.mxu1 %vm19593_vm13, %v9629_v48  ;;  %v6667_v48 = vrot.slane %v6666_v46, 2 }
 0xc70   : > { %v6668_v16 = vadd.f32 %v6667_v48, %v6666_v46 }
 0xd23   : > { %v8918_v30 = vpop.f32.mrf.mxu0 }
 0xd24   : > { %v8972_v28 = vadd.f32 %v8970_v27, %v8918_v30 }
 0xd25   : > { %v8920_v39 = vpop.f32.mrf.mxu0 }
 0xd26   : > { %v8976_v19 = vsub.f32 0.0, %v8972_v28  ;;  %v8973_v3 = vadd.f32 %v8970_v27, %v8920_v39  ;;  %v6669_v39 = vrot.slane %v6668_v16, 1 }
 0xd27   : > { %v8922_v12 = vpop.f32.mrf.mxu0 }
 0xd28   : > { %v8980_v36 = vmin.f32 %v8976_v19, 60.0  ;;  %v8977_v47 = vsub.f32 0.0, %v8973_v3  ;;  %v19600_v19 = vld [vmem:[#allocation162_spill] sm:$0xff] }
 0xd29   : > { %v8923_v60 = vpop.f32.mrf.mxu0  ;;  %v9017_v3 = vrot.slane %v19600_v19, 4 }
 0xd2a   : > { %v8984_v18 = vmul.f32 1.442695, %v8980_v36  ;;  %v8981_v4 = vmin.f32 %v8977_v47, 60.0  ;;  %v6682_v60 = vrot.slane %v6681_v22, 1 }
 0xd2c   : > { %10462 = vpow2.f32 %v8984_v18  ;;  %v8986_v38 = vmul.f32 1.442695, %v8981_v4 }
 0xd2e   : > { %v8959_v24 = vpop.f32.mrf.mxu1  ;;  %10464 = vpow2.f32 %v8986_v38  ;;  %v6670_v38 = vadd.f32 %v6669_v39, %v6668_v16 }
 0xd2f   : > { %v8974_v2 = vadd.f32 %v8970_v27, %v8959_v24  ;;  %v6683_v24 = vadd.f32 %v6682_v60, %v6681_v22 }
 0xd30   : > { %v8961_v59 = vpop.f32.mrf.mxu1 }
 0xd31   : > { %v8978_v31 = vsub.f32 0.0, %v8974_v2  ;;  %v8975_v45 = vadd.f32 %v8970_v27, %v8961_v59  ;;  %v6691_v27 = vadd.f32 %v6688_v35, %v6657_v6  ;;  %v6692_v59 = vadd.f32 %v6688_v35, %v6670_v38 }
 0xd32   : > { %v8963_v20 = vpop.f32.mrf.mxu1 }
 0xd33   : > { %v8982_v13 = vmin.f32 %v8978_v31, 60.0  ;;  %v8979_v21 = vsub.f32 0.0, %v8975_v45  ;;  %v6693_v20 = vadd.f32 %v6688_v35, %v6683_v24 }
 0xd34   : > { %v8964_v49 = vpop.f32.mrf.mxu1 }
 0xd35   : > { %v8988_v51 = vmul.f32 1.442695, %v8982_v13  ;;  %v8983_v26 = vmin.f32 %v8979_v21, 60.0 }
 0xd37   : > { %10466 = vpow2.f32 %v8988_v51  ;;  %v8990_v15 = vmul.f32 1.442695, %v8983_v26 }
 0xd39   : > { %v10463_v37 = vpop.eup %10462  ;;  %10468 = vpow2.f32 %v8990_v15 }
 0xd3a   : > { %v8992_v5 = vadd.f32 1.0, %v10463_v37 }
 0xd3b   : > { %v10465_v33 = vpop.eup %10464 }
 0xd3c   : > { %10470 = vrcp.f32 %v8992_v5  ;;  %v8993_v57 = vadd.f32 1.0, %v10465_v33 }
 0xd3e   : > { %10472 = vrcp.f32 %v8993_v57 }
 0xd44   : > { %v10467_v23 = vpop.eup %10466 }
 0xd45   : > { %v8994_v1 = vadd.f32 1.0, %v10467_v23 }
 0xd46   : > { %v10469_v54 = vpop.eup %10468 }
 0xd47   : > { %10474 = vrcp.f32 %v8994_v1  ;;  %v8995_v11 = vadd.f32 1.0, %v10469_v54 }
 0xd49   : > { %v10471_v50 = vpop.eup %10470  ;;  %10476 = vrcp.f32 %v8995_v11 }
 0xd4a   : > { %v9008_v56 = vrot.slane %v10471_v50, 7 }
 0xd4b   : > { %v10473_v42 = vpop.eup %10472 }
 0xd4c   : > { %v9024_v30 = vsel %vm19599_vm0, %v6690_v58, %v9008_v56  ;;  %v9009_v28 = vrot.slane %v10473_v42, 7 }
 0xd4d   : > { %v9028_v12 = vsel %vm19601_vm1, %v9024_v30, %v9016_v55 }
 0xd4e   : > { %v9025_v36 = vsel %vm19602_vm3, %v6691_v27, %v9009_v28  ;;  %v9032_v47 = vsel %vm19603_vm7, %v9028_v12, 0.0 }
 0xd4f   : > { %v9029_v18 = vsel %vm19604_vm9, %v9025_v36, %v9017_v3  ;;  %9036 = vst [vmem:[%s164_s4] sm:$0xff] %v9032_v47 }
 0xd50   : > { %v9033_v4 = vsel %vm19605_vm14, %v9029_v18, 0.0 }
 0xd51   : > { %9037 = vst [vmem:[%s164_s4 + $0x8] sm:$0xff] %v9033_v4 }
 0xd54   : > { %v10475_v2 = vpop.eup %10474 }
 0xd55   : > { %v9010_v31 = vrot.slane %v10475_v2, 7 }
 0xd56   : > { %v10477_v45 = vpop.eup %10476 }
 0xd57   : > { %v9026_v13 = vsel %vm19607_vm5, %v6692_v59, %v9010_v31  ;;  %v9011_v21 = vrot.slane %v10477_v45, 7 }
 0xd58   : > { %v9030_v49 = vsel %vm19609_vm11, %v9026_v13, %v9018_v25 }
 0xd59   : > { %v9027_v51 = vsel %vm19610_vm10, %v6693_v20, %v9011_v21  ;;  %v9034_v26 = vsel %vm19611_vm15, %v9030_v49, 0.0 }
 0xd5a   : > { %v9031_v7 = vsel %vm19612_vm2, %v9027_v51, %v9019_v17  ;;  %9038 = vst [vmem:[%s164_s4 + $0x10] sm:$0xff] %v9034_v26 }
 0xd5b   : > { %v9035_v15 = vsel %vm19613_vm6, %v9031_v7, 0.0 }
 0xd5c   : > { %9039 = vst [vmem:[%s164_s4 + $0x18] sm:$0xff] %v9035_v15 }
 0xd5d   : > { %10517 = shalt.err (!%p10514_p3)
}
 0xd5e   : > { %s10518_s19 = scalar_lea.hbm %s17487_s8, 512  ;;  %s10522_s25 = scalar_lea.hbm %s17528_s3, 2048 }
 0xd5f   : > { %p10519_p4 = scmp.ne.s32.totalorder %s17487_s8, %s10518_s19  ;;  %p10523_p9 = scmp.lt.s32.totalorder %s17487_s8, %s17528_s3 }
 0xd60   : > { %p10524_p10 = scmp.lt.s32.totalorder %s10522_s25, %s10518_s19 }
 0xd61   : > { %p10520_p7 = pnand %p10519_p4, %p10641_p5 }
 0xd62   : > { %p10525_p11 = por %p10524_p10, %p10523_p9 }
 0xd63   : > { %p10521_p8 = pneg %p10520_p7 }
 0xd65   : > { %p10526_p12 = pnand %p10525_p11, %p10521_p8 }
 0xd67   : > { %10529 = shalt.err (!%p10526_p12)
}
 0xd68   : > { %9508 = dma.vmem_to_hbm [thread:$0]  (%p10641_p5), %s9056_s28, 512, %s17487_s8, %s9041_s16  }
 0xd69 PF: > { %p9514_p13 = scmp.ge.s32.totalorder %s10564_s15, 2  ;;  %s9067_s29 = sand.u32 1, %s10552_s12  }
 0xd6a   : > { %s9068_s30 = scalar_lea.sflag [#allocation3], %s9067_s29 }
 0xd6b   : > { %p9511_p0 = pnand %p9514_p13, %p10645_p6 }
 0xd6d   : > { %p9512_p1 = pneg %p9511_p0 }
 0xd6f   : > { %10547 = dma.done.wait (%p9512_p1), %s9068_s30, 512  }
 0xd70   : > { %10549 = vsyncadd (%p9512_p1), %s9068_s30, 4294966784  ;;  %p13_p2 = scmp.ge.s32.totalorder %s10628_s18, 6   ;;  %s19614_s12 = smov %s10556_s13 }
 0xd71   : > { %s19615_s13 = smov %s10560_s14  ;;  %s19616_s14 = smov %s10639_s21 }
 0xd72   : > { %s19617_s15 = smov %s10628_s18  ;;  %15 = sbr.rel (!%p13_p2) target bundleno = 3 (0x3), region = 67 }
 0xd77   :  { %9073 = vsyncpa [#allocation3], 1 }
 0xd78   :  { %9075 = vsyncpa [#allocation3 + $0x1], 1 }

</bundles_post_ra>
